<compile_context>
chip_gen: v7x
topology: tpu7x:2x2x1
jax: 0.10.0
libtpu: 0.0.40
codegen_flags: <defaults>
</compile_context>

<pallas_src>
import functools
import math

import jax
import jax.numpy as jnp
from jax import lax
from jax.experimental import pallas as pl
from jax.experimental.pallas import tpu as pltpu

# dtype used for the one-hot gather/scatter matmuls on the MXU.
# bfloat16 halves VMEM for the one-hot tiles and doubles MXU rate; accumulation
# stays f32.  Use jnp.float32 here for bit-exact parity with the f32 reference.
_MXU_DTYPE = jnp.bfloat16


# --------------------------------------------------------------------------
# small helpers
# --------------------------------------------------------------------------
def _round_up(x, m):
    return (x + m - 1) // m * m


def _pad_to(a, shape):
    pads = [(0, s - d) for d, s in zip(a.shape, shape)]
    return jnp.pad(a, pads)


def _pick_config():
    """(max_row_tile, vmem_limit_bytes) chosen per chip generation."""
    try:
        vmem = getattr(pltpu.get_tpu_info(), "vmem_capacity_bytes",
                       64 * 1024 * 1024)
    except Exception:  # pragma: no cover - conservative fallback
        vmem = 64 * 1024 * 1024
    if vmem >= 96 * 1024 * 1024:          # v5e / v6e: 128 MiB VMEM
        return 512, 96 * 1024 * 1024
    return 256, 48 * 1024 * 1024          # v7x: 64 MiB VMEM -> smaller tiles


def _row_tiling(rows, cap):
    """Return (tile, padded_rows, num_tiles).

    Single tile (= full padded extent) if it fits under `cap`, otherwise fixed
    tiles that are multiples of 128 (the row-index vector [1, E_tile] puts the
    edge axis on the lane dimension, so multi-tile blocks must be 128-aligned).
    """
    r8 = _round_up(rows, 8)
    if r8 <= cap:
        return r8, r8, 1
    tile = max(128, (cap // 128) * 128)
    padded = _round_up(rows, tile)
    return tile, padded, padded // tile


# --------------------------------------------------------------------------
# kernels
# --------------------------------------------------------------------------
def _node_linear_kernel(nf_ref, w_ref, b_ref, hg_ref, hsu_ref):
    """Fused node-side linears: one [N_tile, D] x [D, 4D] matmul.

    Column order of w/b: [src_gate | dst_gate | dst_update | src_update].
    Outputs: hg = first 3 blocks (gather side), hsu = src_update block.
    """
    d = hsu_ref.shape[1]
    h = jnp.dot(nf_ref[...], w_ref[...],
                preferred_element_type=jnp.float32) + b_ref[...]
    hg_ref[...] = h[:, :3 * d]
    hsu_ref[...] = h[:, 3 * d:]


def _gather_message_kernel(ii_ref, jj_ref, hg_ref, ef_ref, weg_ref, beg_ref,
                           y_ref, msig_ref, acc_ref):
    """grid = (E_tiles [parallel], N_tiles [arbitrary / reduction]).

    Gathers h_src[idx_i], (h_dst|h_du)[idx_j] via per-tile bf16 one-hot matmuls
    accumulated in f32 scratch; at the last node tile fuses the edge_gate
    linear, sigmoid and message, emitting y (pre-BN) and [m | sigma].
    """
    f32 = jnp.float32
    ni = pl.program_id(1)
    n_tile = hg_ref.shape[0]
    e_tile = ii_ref.shape[0]
    d = ef_ref.shape[1]

    @pl.when(ni == 0)
    def _():
        acc_ref[...] = jnp.zeros_like(acc_ref)

    col = lax.broadcasted_iota(jnp.int32, (e_tile, n_tile), 1) + ni * n_tile
    gi = (ii_ref[...] == col).astype(_MXU_DTYPE)          # [E_t, N_t] 0/1
    gj = (jj_ref[...] == col).astype(_MXU_DTYPE)

    hg = hg_ref[...].astype(_MXU_DTYPE)                    # [N_t, 3D]
    # e_src accumulation (width D) and fused (e_dst | bh) accumulation (width 2D)
    acc_ref[:, :d] += jnp.dot(gi, hg[:, :d], preferred_element_type=f32)
    acc_ref[:, d:] += jnp.dot(gj, hg[:, d:], preferred_element_type=f32)

    @pl.when(ni == pl.num_programs(1) - 1)
    def _():
        e_gate = jnp.dot(ef_ref[...], weg_ref[...],
                         preferred_element_type=f32) + beg_ref[...]
        acc = acc_ref[...]
        y = acc[:, :d] + acc[:, d:2 * d] + e_gate          # e_src + e_dst + gate
        sigma = jax.nn.sigmoid(y)
        m = acc[:, 2 * d:] * sigma                         # bh * sigma
        y_ref[...] = y
        msig_ref[...] = jnp.concatenate([m, sigma], axis=1).astype(msig_ref.dtype)


def _scatter_node_kernel(iirow_ref, msig_ref, hsu_ref, xpre_ref, acc_ref):
    """grid = (N_tiles [parallel], E_tiles [arbitrary / reduction]).

    Scatter-add of [m | sigma] over idx_i as a contraction-last bf16 matmul
    S[n, e] @ msig[e, 2D]; finalize with h = sum_sigma_h / (sum_sigma + 1e-6)
    (approx reciprocal on the EUP) and x_pre = src_update + h.
    """
    f32 = jnp.float32
    ni = pl.program_id(0)
    ei = pl.program_id(1)
    n_tile, d = hsu_ref.shape
    e_tile = msig_ref.shape[0]

    @pl.when(ei == 0)
    def _():
        acc_ref[...] = jnp.zeros_like(acc_ref)

    row = lax.broadcasted_iota(jnp.int32, (n_tile, e_tile), 0) + ni * n_tile
    s = (row == iirow_ref[...]).astype(_MXU_DTYPE)         # [N_t, E_t] 0/1
    acc_ref[...] += jnp.dot(s, msig_ref[...].astype(_MXU_DTYPE),
                            preferred_element_type=f32)

    @pl.when(ei == pl.num_programs(1) - 1)
    def _():
        acc = acc_ref[...]
        h = acc[:, :d] * pl.reciprocal(acc[:, d:] + 1e-6, approx=True)
        xpre_ref[...] = hsu_ref[...] + h


def _bn_stats_kernel(v_ref, stats_ref, *, rows_real):
    """Global (masked) per-column sum / sum-of-squares -> [mean; var] ([2, D])."""
    r = pl.program_id(0)
    r_tile = v_ref.shape[0]
    v = v_ref[...]
    rid = lax.broadcasted_iota(jnp.int32, v.shape, 0) + r * r_tile
    vm = jnp.where(rid < rows_real, v, 0.0)                # exclude padded rows
    part = jnp.concatenate(
        [jnp.sum(vm, axis=0, keepdims=True),
         jnp.sum(vm * vm, axis=0, keepdims=True)], axis=0)

    @pl.when(r == 0)
    def _():
        stats_ref[...] = jnp.zeros_like(stats_ref)

    stats_ref[...] += part

    @pl.when(r == pl.num_programs(0) - 1)
    def _():
        s = stats_ref[...]
        inv_n = 1.0 / float(rows_real)
        mean = s[0:1, :] * inv_n
        var = s[1:2, :] * inv_n - mean * mean              # biased (training BN)
        stats_ref[...] = jnp.concatenate([mean, var], axis=0)


def _bn_silu_res_kernel(v_ref, res_ref, stats_ref, g_ref, b_ref, o_ref):
    """BatchNorm (given mean/var) + SiLU + residual, tiled over rows."""
    mean = stats_ref[0:1, :]
    var = stats_ref[1:2, :]
    out = (v_ref[...] - mean) * lax.rsqrt(var + 1e-5) * g_ref[...] + b_ref[...]
    out = out * jax.nn.sigmoid(out)                        # SiLU
    o_ref[...] = res_ref[...] + out


# --------------------------------------------------------------------------
# wrappers
# --------------------------------------------------------------------------
def _bn_silu_residual(v, res, gamma, beta, rows_real, row_tile, vmem_limit):
    rp, dp = v.shape
    grid = (rp // row_tile,)
    cp = lambda sem: pltpu.CompilerParams(dimension_semantics=sem,
                                          vmem_limit_bytes=vmem_limit)
    stats = pl.pallas_call(
        functools.partial(_bn_stats_kernel, rows_real=rows_real),
        grid=grid,
        in_specs=[pl.BlockSpec((row_tile, dp), lambda r: (r, 0))],
        out_specs=pl.BlockSpec((2, dp), lambda r: (0, 0)),
        out_shape=jax.ShapeDtypeStruct((2, dp), jnp.float32),
        compiler_params=cp(("arbitrary",)),
    )(v)
    return pl.pallas_call(
        _bn_silu_res_kernel,
        grid=grid,
        in_specs=[pl.BlockSpec((row_tile, dp), lambda r: (r, 0)),
                  pl.BlockSpec((row_tile, dp), lambda r: (r, 0)),
                  pl.BlockSpec((2, dp), lambda r: (0, 0)),
                  pl.BlockSpec((1, dp), lambda r: (0, 0)),
                  pl.BlockSpec((1, dp), lambda r: (0, 0))],
        out_specs=pl.BlockSpec((row_tile, dp), lambda r: (r, 0)),
        out_shape=jax.ShapeDtypeStruct((rp, dp), jnp.float32),
        compiler_params=cp(("parallel",)),
    )(v, res, stats, gamma, beta)


def edge_gated_graph_conv(node_feats, edge_feats, edge_index, params,
                          row_tile_cap=None):
    """One EdgeGatedGraphConv forward (residual=True, training-mode BN)."""
    f32 = jnp.float32
    max_tile, vmem_limit = _pick_config()
    cap = int(row_tile_cap) if row_tile_cap is not None else max_tile

    n, d = node_feats.shape
    e = edge_feats.shape[0]
    dp = _round_up(d, 128)                    # lane-dense feature axis

    n_tile, n_pad, n_grid = _row_tiling(n, cap)
    e_tile, e_pad, e_grid = _row_tiling(e, cap)

    nf = _pad_to(node_feats.astype(f32), (n_pad, dp))
    ef = _pad_to(edge_feats.astype(f32), (e_pad, dp))

    # padded edges get index -1 -> never match any node -> inert in gather/scatter
    idx_i = edge_index[0].astype(jnp.int32)
    idx_j = edge_index[1].astype(jnp.int32)
    fill = jnp.full((e_pad - e,), -1, jnp.int32)
    idx_i = jnp.concatenate([idx_i, fill])
    idx_j = jnp.concatenate([idx_j, fill])
    ii_col = idx_i.reshape(e_pad, 1)
    jj_col = idx_j.reshape(e_pad, 1)
    ii_row = idx_i.reshape(1, e_pad)

    # fused node-side weights: [src_gate | dst_gate | dst_update | src_update]
    order = ("src_gate", "dst_gate", "dst_update", "src_update")
    w_cat = jnp.concatenate(
        [_pad_to(params[f"w_{k}"].astype(f32), (dp, dp)) for k in order], axis=1)
    b_cat = jnp.concatenate(
        [_pad_to(params[f"b_{k}"].astype(f32), (1, dp)) for k in order], axis=1)
    w_eg = _pad_to(params["w_edge_gate"].astype(f32), (dp, dp))
    b_eg = _pad_to(params["b_edge_gate"].astype(f32), (1, dp))
    g_n = _pad_to(params["bn_nodes_gamma"].astype(f32), (1, dp))
    bt_n = _pad_to(params["bn_nodes_beta"].astype(f32), (1, dp))
    g_e = _pad_to(params["bn_edges_gamma"].astype(f32), (1, dp))
    bt_e = _pad_to(params["bn_edges_beta"].astype(f32), (1, dp))

    cp = lambda sem: pltpu.CompilerParams(dimension_semantics=sem,
                                          vmem_limit_bytes=vmem_limit)

    # (1) fused node linears -> h_gather [N,3D], h_src_update [N,D]
    h_gather, h_su = pl.pallas_call(
        _node_linear_kernel,
        grid=(n_grid,),
        in_specs=[pl.BlockSpec((n_tile, dp), lambda i: (i, 0)),
                  pl.BlockSpec((dp, 4 * dp), lambda i: (0, 0)),
                  pl.BlockSpec((1, 4 * dp), lambda i: (0, 0))],
        out_specs=(pl.BlockSpec((n_tile, 3 * dp), lambda i: (i, 0)),
                   pl.BlockSpec((n_tile, dp), lambda i: (i, 0))),
        out_shape=(jax.ShapeDtypeStruct((n_pad, 3 * dp), f32),
                   jax.ShapeDtypeStruct((n_pad, dp), f32)),
        compiler_params=cp(("parallel",)),
    )(nf, w_cat, b_cat)

    # (2) gather + edge gate + message: y_pre [E,D], msig = [m|sigma] [E,2D]
    # TODO(synk): for very sparse graphs a scalar-prefetch / DMA row gather
    # would avoid the E*N one-hot FLOPs on the gather side.
    gm_cost = pl.CostEstimate(
        flops=int(2 * e_pad * n_pad * 3 * dp + 2 * e_pad * dp * dp),
        transcendentals=int(e_pad * dp),
        bytes_accessed=int(4 * e_grid * n_pad * 3 * dp + 8 * e_pad * dp
                           + 2 * e_pad * 2 * dp + 8 * e_pad + 4 * dp * dp))
    y_pre, msig = pl.pallas_call(
        _gather_message_kernel,
        grid=(e_grid, n_grid),
        in_specs=[pl.BlockSpec((e_tile, 1), lambda ei, ni: (ei, 0)),
                  pl.BlockSpec((e_tile, 1), lambda ei, ni: (ei, 0)),
                  pl.BlockSpec((n_tile, 3 * dp), lambda ei, ni: (ni, 0)),
                  pl.BlockSpec((e_tile, dp), lambda ei, ni: (ei, 0)),
                  pl.BlockSpec((dp, dp), lambda ei, ni: (0, 0)),
                  pl.BlockSpec((1, dp), lambda ei, ni: (0, 0))],
        out_specs=(pl.BlockSpec((e_tile, dp), lambda ei, ni: (ei, 0)),
                   pl.BlockSpec((e_tile, 2 * dp), lambda ei, ni: (ei, 0))),
        out_shape=(jax.ShapeDtypeStruct((e_pad, dp), f32),
                   jax.ShapeDtypeStruct((e_pad, 2 * dp), _MXU_DTYPE)),
        scratch_shapes=[pltpu.VMEM((e_tile, 3 * dp), f32)],
        compiler_params=cp(("parallel", "arbitrary")),
        cost_estimate=gm_cost,
    )(ii_col, jj_col, h_gather, ef, w_eg, b_eg)

    # (3) scatter-add + node update: x_pre [N,D]
    sc_cost = pl.CostEstimate(
        flops=int(2 * n_pad * e_pad * 2 * dp),
        transcendentals=int(n_pad * dp),
        bytes_accessed=int(2 * n_grid * e_pad * 2 * dp + 8 * n_pad * dp
                           + 4 * n_grid * e_pad))
    x_pre = pl.pallas_call(
        _scatter_node_kernel,
        grid=(n_grid, e_grid),
        in_specs=[pl.BlockSpec((1, e_tile), lambda ni, ei: (0, ei)),
                  pl.BlockSpec((e_tile, 2 * dp), lambda ni, ei: (ei, 0)),
                  pl.BlockSpec((n_tile, dp), lambda ni, ei: (ni, 0))],
        out_specs=pl.BlockSpec((n_tile, dp), lambda ni, ei: (ni, 0)),
        out_shape=jax.ShapeDtypeStruct((n_pad, dp), f32),
        scratch_shapes=[pltpu.VMEM((n_tile, 2 * dp), f32)],
        compiler_params=cp(("parallel", "arbitrary")),
        cost_estimate=sc_cost,
    )(ii_row, msig, h_su)

    # (4) BatchNorm (global batch stats, padded rows masked) + SiLU + residual
    x_out = _bn_silu_residual(x_pre, nf, g_n, bt_n, n, n_tile, vmem_limit)
    y_out = _bn_silu_residual(y_pre, ef, g_e, bt_e, e, e_tile, vmem_limit)
    return x_out[:n, :d], y_out[:e, :d]


def alignn_conv(x, y, z, edge_index, edge_index_triplets,
                node_params, edge_params, row_tile_cap=None):
    # Matches the PyTorch forward: edge_update first, then node_update.
    # TODO(synk): fuse both EdgeGatedGraphConv layers into a single pallas_call
    # so the intermediate `m` does not round-trip HBM between them.
    m, z_out = edge_gated_graph_conv(y, z, edge_index_triplets, edge_params,
                                     row_tile_cap=row_tile_cap)
    x_out, y_out = edge_gated_graph_conv(x, m, edge_index, node_params,
                                         row_tile_cap=row_tile_cap)
    return x_out, y_out, z_out


def init_egc_params(key, din, dout):
    """Deterministic PyTorch-Linear-style init (uniform +/- 1/sqrt(fan_in))."""
    names = ["src_gate", "dst_gate", "edge_gate", "src_update", "dst_update"]
    keys = jax.random.split(key, 2 * len(names))
    bound = 1.0 / math.sqrt(din)
    p = {}
    for i, nm in enumerate(names):
        # stored pre-transposed as [din, dout] so kernels do x @ W
        p[f"w_{nm}"] = jax.random.uniform(keys[2 * i], (din, dout),
                                          jnp.float32, -bound, bound)
        p[f"b_{nm}"] = jax.random.uniform(keys[2 * i + 1], (1, dout),
                                          jnp.float32, -bound, bound)
    p["bn_nodes_gamma"] = jnp.ones((1, dout), jnp.float32)
    p["bn_nodes_beta"] = jnp.zeros((1, dout), jnp.float32)
    p["bn_edges_gamma"] = jnp.ones((1, dout), jnp.float32)
    p["bn_edges_beta"] = jnp.zeros((1, dout), jnp.float32)
    return p
    # TODO(synk): BatchNorm1d running_mean/running_var updates (training-time
    # side effect only) are not reproduced; the normalization itself matches.


# --------------------------------------------------------------------------
# pure-JAX reference (for a loose self-check in __main__)
# --------------------------------------------------------------------------
def _egc_reference(nf, ef, edge_index, p):
    lin = lambda x, w, b: x @ w + b
    idx_i, idx_j = edge_index
    h_src = lin(nf, p["w_src_gate"], p["b_src_gate"])
    h_dst = lin(nf, p["w_dst_gate"], p["b_dst_gate"])
    h_du = lin(nf, p["w_dst_update"], p["b_dst_update"])
    h_su = lin(nf, p["w_src_update"], p["b_src_update"])
    e_gate = lin(ef, p["w_edge_gate"], p["b_edge_gate"])
    y = h_src[idx_i] + h_dst[idx_j] + e_gate
    sigma = jax.nn.sigmoid(y)
    m = h_du[idx_j] * sigma
    zeros = jnp.zeros_like(nf)
    sum_sigma_h = zeros.at[idx_i].add(m)
    sum_sigma = zeros.at[idx_i].add(sigma)
    x = h_su + sum_sigma_h / (sum_sigma + 1e-6)

    def bn_silu(v, g, b):
        mean = v.mean(0, keepdims=True)
        var = ((v - mean) ** 2).mean(0, keepdims=True)
        o = (v - mean) * lax.rsqrt(var + 1e-5) * g + b
        return o * jax.nn.sigmoid(o)

    x = nf + bn_silu(x, p["bn_nodes_gamma"], p["bn_nodes_beta"])
    y = ef + bn_silu(y, p["bn_edges_gamma"], p["bn_edges_beta"])
    return x, y


def _alignn_reference(x, y, z, ei, eit, node_params, edge_params):
    m, z2 = _egc_reference(y, z, eit, edge_params)
    x2, y2 = _egc_reference(x, m, ei, node_params)
    return x2, y2, z2


if __name__ == "__main__":
    # Small graph, lane-dense features (D multiple of 128 per perf guidance).
    # Sizes chosen slightly above the 128-row tile cap so the run exercises the
    # multi-tile gather/scatter reductions, row padding and masked BN stats.
    N, E, T, D = 136, 272, 400, 128

    key = jax.random.PRNGKey(0)
    kx, ky, kz, kei, ket, kpn, kpe = jax.random.split(key, 7)

    x = jax.random.normal(kx, (N, D), jnp.float32)   # node features
    y = jax.random.normal(ky, (E, D), jnp.float32)   # edge features
    z = jax.random.normal(kz, (T, D), jnp.float32)   # triplet features
    edge_index = jax.random.randint(kei, (2, E), 0, N, jnp.int32)
    edge_index_triplets = jax.random.randint(ket, (2, T), 0, E, jnp.int32)

    node_params = init_egc_params(kpn, D, D)
    edge_params = init_egc_params(kpe, D, D)

    fn = jax.jit(functools.partial(alignn_conv, row_tile_cap=128))
    x_out, y_out, z_out = fn(x, y, z, edge_index, edge_index_triplets,
                             node_params, edge_params)
    jax.block_until_ready((x_out, y_out, z_out))

    assert x_out.shape == (N, D) and y_out.shape == (E, D) and z_out.shape == (T, D)

    xr, yr, zr = _alignn_reference(x, y, z, edge_index, edge_index_triplets,
                                   node_params, edge_params)
    err = max(float(jnp.max(jnp.abs(x_out - xr))),
              float(jnp.max(jnp.abs(y_out - yr))),
              float(jnp.max(jnp.abs(z_out - zr))))
    # loose tolerance: the gather/scatter MXU operands run in bfloat16
    assert err < 0.5, f"deviation vs pure-JAX reference too large: {err}"
    print("KERNEL_OK")
</pallas_src>

<mosaic_0001>
module attributes {stable_mosaic.version = 11 : i64} {
  func.func @_node_linear_kernel(%arg0: i32, %arg1: memref<128x128xf32, #tpu.memory_space<vmem>>, %arg2: memref<128x512xf32, #tpu.memory_space<vmem>>, %arg3: memref<1x512xf32, #tpu.memory_space<vmem>>, %arg4: memref<128x384xf32, #tpu.memory_space<vmem>>, %arg5: memref<128x128xf32, #tpu.memory_space<vmem>>) attributes {dimension_semantics = [#tpu.dimension_semantics<parallel>], iteration_bounds = array<i64: 3>, scalar_prefetch = 0 : i64, scratch_operands = 0 : i64, tpu.core_type = #tpu.core_type<tc>, window_params = [{transform_indices = @transform_0, window_bounds = array<i64: 128, 128>}, {pipeline_mode = #tpu.pipeline_mode<synchronous>, transform_indices = @transform_1, window_bounds = array<i64: 128, 512>}, {pipeline_mode = #tpu.pipeline_mode<synchronous>, transform_indices = @transform_2, window_bounds = array<i64: 1, 512>}, {transform_indices = @transform_3, window_bounds = array<i64: 128, 384>}, {transform_indices = @transform_4, window_bounds = array<i64: 128, 128>}]} {
    %c0 = arith.constant 0 : index
    %c0_0 = arith.constant 0 : index
    %0 = vector.load %arg1[%c0, %c0_0] : memref<128x128xf32, #tpu.memory_space<vmem>>, vector<128x128xf32>
    %c0_1 = arith.constant 0 : index
    %c0_2 = arith.constant 0 : index
    %1 = vector.load %arg2[%c0_1, %c0_2] : memref<128x512xf32, #tpu.memory_space<vmem>>, vector<128x512xf32>
    %cst = arith.constant dense<0.000000e+00> : vector<128x512xf32>
    %2 = tpu.matmul %0, %1, %cst {dimension_numbers = #tpu.dot_dimension_numbers<[1], [0], [0], [1], [0, 0, 1, 1], [], []>} : vector<128x128xf32>, vector<128x512xf32>, vector<128x512xf32> -> vector<128x512xf32>
    %c0_3 = arith.constant 0 : index
    %c0_4 = arith.constant 0 : index
    %3 = vector.load %arg3[%c0_3, %c0_4] : memref<1x512xf32, #tpu.memory_space<vmem>>, vector<1x512xf32>
    %4 = vector.broadcast %3 : vector<1x512xf32> to vector<128x512xf32>
    %5 = arith.addf %2, %4 : vector<128x512xf32>
    %6 = vector.extract_strided_slice %5 {offsets = [0, 0], sizes = [128, 384], strides = [1, 1]} : vector<128x512xf32> to vector<128x384xf32>
    %c0_5 = arith.constant 0 : index
    %c0_6 = arith.constant 0 : index
    %7 = vector.load %arg4[%c0_5, %c0_6] : memref<128x384xf32, #tpu.memory_space<vmem>>, vector<128x384xf32>
    tpu.vector_store %arg4[%c0_5, %c0_6], %6 {strides = array<i32>} : memref<128x384xf32, #tpu.memory_space<vmem>>, vector<128x384xf32>,
    %8 = vector.extract_strided_slice %5 {offsets = [0, 384], sizes = [128, 128], strides = [1, 1]} : vector<128x512xf32> to vector<128x128xf32>
    %c0_7 = arith.constant 0 : index
    %c0_8 = arith.constant 0 : index
    %9 = vector.load %arg5[%c0_7, %c0_8] : memref<128x128xf32, #tpu.memory_space<vmem>>, vector<128x128xf32>
    tpu.vector_store %arg5[%c0_7, %c0_8], %8 {strides = array<i32>} : memref<128x128xf32, #tpu.memory_space<vmem>>, vector<128x128xf32>,
    return
  }
  func.func @transform_0(%arg0: i32) -> (i32, i32) {
    %c0_i32 = arith.constant 0 : i32
    %c0_i32_0 = arith.constant 0 : i32
    return %arg0, %c0_i32 : i32, i32
  }
  func.func @transform_1(%arg0: i32) -> (i32, i32) {
    %c0_i32 = arith.constant 0 : i32
    %c0_i32_0 = arith.constant 0 : i32
    %c0_i32_1 = arith.constant 0 : i32
    return %c0_i32, %c0_i32_0 : i32, i32
  }
  func.func @transform_2(%arg0: i32) -> (i32, i32) {
    %c0_i32 = arith.constant 0 : i32
    %c0_i32_0 = arith.constant 0 : i32
    %c0_i32_1 = arith.constant 0 : i32
    return %c0_i32, %c0_i32_0 : i32, i32
  }
  func.func @transform_3(%arg0: i32) -> (i32, i32) {
    %c0_i32 = arith.constant 0 : i32
    %c0_i32_0 = arith.constant 0 : i32
    return %arg0, %c0_i32 : i32, i32
  }
  func.func @transform_4(%arg0: i32) -> (i32, i32) {
    %c0_i32 = arith.constant 0 : i32
    %c0_i32_0 = arith.constant 0 : i32
    return %arg0, %c0_i32 : i32, i32
  }
}

module attributes {stable_mosaic.version = 11 : i64} {
  func.func @_gather_message_kernel(%arg0: i32, %arg1: i32, %arg2: memref<128x1xi32, #tpu.memory_space<vmem>>, %arg3: memref<128x1xi32, #tpu.memory_space<vmem>>, %arg4: memref<128x384xf32, #tpu.memory_space<vmem>>, %arg5: memref<128x128xf32, #tpu.memory_space<vmem>>, %arg6: memref<128x128xf32, #tpu.memory_space<vmem>>, %arg7: memref<1x128xf32, #tpu.memory_space<vmem>>, %arg8: memref<128x128xf32, #tpu.memory_space<vmem>>, %arg9: memref<128x256xbf16, #tpu.memory_space<vmem>>, %arg10: memref<128x384xf32, #tpu.memory_space<vmem>>) attributes {dimension_semantics = [#tpu.dimension_semantics<parallel>, #tpu.dimension_semantics<arbitrary>], iteration_bounds = array<i64: 4, 3>, scalar_prefetch = 0 : i64, scratch_operands = 1 : i64, tpu.core_type = #tpu.core_type<tc>, window_params = [{transform_indices = @transform_0, window_bounds = array<i64: 128, 1>}, {transform_indices = @transform_1, window_bounds = array<i64: 128, 1>}, {transform_indices = @transform_2, window_bounds = array<i64: 128, 384>}, {transform_indices = @transform_3, window_bounds = array<i64: 128, 128>}, {pipeline_mode = #tpu.pipeline_mode<synchronous>, transform_indices = @transform_4, window_bounds = array<i64: 128, 128>}, {pipeline_mode = #tpu.pipeline_mode<synchronous>, transform_indices = @transform_5, window_bounds = array<i64: 1, 128>}, {transform_indices = @transform_6, window_bounds = array<i64: 128, 128>}, {transform_indices = @transform_7, window_bounds = array<i64: 128, 256>}]} {
    %c0_i32 = arith.constant 0 : i32
    %0 = arith.cmpi eq, %arg1, %c0_i32 : i32
    %1 = arith.extui %0 : i1 to i32
    %c0_i32_0 = arith.constant 0 : i32
    %2 = arith.cmpi ne, %1, %c0_i32_0 : i32
    scf.if %2 {
      %cst_15 = arith.constant 0.000000e+00 : f32
      %34 = vector.broadcast %cst_15 : f32 to vector<128x384xf32>
      %c0_16 = arith.constant 0 : index
      %c0_17 = arith.constant 0 : index
      %35 = vector.load %arg10[%c0_16, %c0_17] : memref<128x384xf32, #tpu.memory_space<vmem>>, vector<128x384xf32>
      tpu.vector_store %arg10[%c0_16, %c0_17], %34 {strides = array<i32>} : memref<128x384xf32, #tpu.memory_space<vmem>>, vector<128x384xf32>,
    } else {
    }
    %3 = tpu.iota {dimensions = array<i32: 1>} : vector<128x128xi32>
    %c128_i32 = arith.constant 128 : i32
    %4 = arith.muli %arg1, %c128_i32 : i32
    %5 = vector.broadcast %4 : i32 to vector<128x128xi32>
    %6 = arith.addi %3, %5 : vector<128x128xi32>
    %c0 = arith.constant 0 : index
    %c0_1 = arith.constant 0 : index
    %7 = vector.load %arg2[%c0, %c0_1] : memref<128x1xi32, #tpu.memory_space<vmem>>, vector<128x1xi32>
    %8 = vector.broadcast %7 : vector<128x1xi32> to vector<128x128xi32>
    %9 = arith.cmpi eq, %8, %6 : vector<128x128xi32>
    %10 = arith.extui %9 : vector<128x128xi1> to vector<128x128xi32>
    %11 = arith.sitofp %10 : vector<128x128xi32> to vector<128x128xf32>
    %12 = arith.truncf %11 : vector<128x128xf32> to vector<128x128xbf16>
    %c0_2 = arith.constant 0 : index
    %c0_3 = arith.constant 0 : index
    %13 = vector.load %arg3[%c0_2, %c0_3] : memref<128x1xi32, #tpu.memory_space<vmem>>, vector<128x1xi32>
    %14 = vector.broadcast %13 : vector<128x1xi32> to vector<128x128xi32>
    %15 = arith.cmpi eq, %14, %6 : vector<128x128xi32>
    %16 = arith.extui %15 : vector<128x128xi1> to vector<128x128xi32>
    %17 = arith.sitofp %16 : vector<128x128xi32> to vector<128x128xf32>
    %18 = arith.truncf %17 : vector<128x128xf32> to vector<128x128xbf16>
    %c0_4 = arith.constant 0 : index
    %c0_5 = arith.constant 0 : index
    %19 = vector.load %arg4[%c0_4, %c0_5] : memref<128x384xf32, #tpu.memory_space<vmem>>, vector<128x384xf32>
    %20 = arith.truncf %19 : vector<128x384xf32> to vector<128x384xbf16>
    %c0_6 = arith.constant 0 : index
    %c0_7 = arith.constant 0 : index
    %21 = vector.load %arg10[%c0_6, %c0_7] : memref<128x384xf32, #tpu.memory_space<vmem>>, vector<128x128xf32>
    %22 = vector.extract_strided_slice %20 {offsets = [0, 0], sizes = [128, 128], strides = [1, 1]} : vector<128x384xbf16> to vector<128x128xbf16>
    %cst = arith.constant dense<0.000000e+00> : vector<128x128xf32>
    %23 = tpu.matmul %12, %22, %cst {dimension_numbers = #tpu.dot_dimension_numbers<[1], [0], [0], [1], [0, 0, 1, 1], [], []>} : vector<128x128xbf16>, vector<128x128xbf16>, vector<128x128xf32> -> vector<128x128xf32>
    %24 = arith.addf %21, %23 : vector<128x128xf32>
    %c0_8 = arith.constant 0 : index
    %c0_9 = arith.constant 0 : index
    %25 = vector.load %arg10[%c0_8, %c0_9] : memref<128x384xf32, #tpu.memory_space<vmem>>, vector<128x128xf32>
    tpu.vector_store %arg10[%c0_8, %c0_9], %24 {strides = array<i32>} : memref<128x384xf32, #tpu.memory_space<vmem>>, vector<128x128xf32>,
    %c0_10 = arith.constant 0 : index
    %c128 = arith.constant 128 : index
    %26 = vector.load %arg10[%c0_10, %c128] : memref<128x384xf32, #tpu.memory_space<vmem>>, vector<128x256xf32>
    %27 = vector.extract_strided_slice %20 {offsets = [0, 128], sizes = [128, 256], strides = [1, 1]} : vector<128x384xbf16> to vector<128x256xbf16>
    %cst_11 = arith.constant dense<0.000000e+00> : vector<128x256xf32>
    %28 = tpu.matmul %18, %27, %cst_11 {dimension_numbers = #tpu.dot_dimension_numbers<[1], [0], [0], [1], [0, 0, 1, 1], [], []>} : vector<128x128xbf16>, vector<128x256xbf16>, vector<128x256xf32> -> vector<128x256xf32>
    %29 = arith.addf %26, %28 : vector<128x256xf32>
    %c0_12 = arith.constant 0 : index
    %c128_13 = arith.constant 128 : index
    %30 = vector.load %arg10[%c0_12, %c128_13] : memref<128x384xf32, #tpu.memory_space<vmem>>, vector<128x256xf32>
    tpu.vector_store %arg10[%c0_12, %c128_13], %29 {strides = array<i32>} : memref<128x384xf32, #tpu.memory_space<vmem>>, vector<128x256xf32>,
    %c2_i32 = arith.constant 2 : i32
    %31 = arith.cmpi eq, %arg1, %c2_i32 : i32
    %32 = arith.extui %31 : i1 to i32
    %c0_i32_14 = arith.constant 0 : i32
    %33 = arith.cmpi ne, %32, %c0_i32_14 : i32
    scf.if %33 {
      %c0_15 = arith.constant 0 : index
      %c0_16 = arith.constant 0 : index
      %34 = vector.load %arg5[%c0_15, %c0_16] : memref<128x128xf32, #tpu.memory_space<vmem>>, vector<128x128xf32>
      %c0_17 = arith.constant 0 : index
      %c0_18 = arith.constant 0 : index
      %35 = vector.load %arg6[%c0_17, %c0_18] : memref<128x128xf32, #tpu.memory_space<vmem>>, vector<128x128xf32>
      %cst_19 = arith.constant dense<0.000000e+00> : vector<128x128xf32>
      %36 = tpu.matmul %34, %35, %cst_19 {dimension_numbers = #tpu.dot_dimension_numbers<[1], [0], [0], [1], [0, 0, 1, 1], [], []>} : vector<128x128xf32>, vector<128x128xf32>, vector<128x128xf32> -> vector<128x128xf32>
      %c0_20 = arith.constant 0 : index
      %c0_21 = arith.constant 0 : index
      %37 = vector.load %arg7[%c0_20, %c0_21] : memref<1x128xf32, #tpu.memory_space<vmem>>, vector<1x128xf32>
      %38 = vector.broadcast %37 : vector<1x128xf32> to vector<128x128xf32>
      %39 = arith.addf %36, %38 : vector<128x128xf32>
      %c0_22 = arith.constant 0 : index
      %c0_23 = arith.constant 0 : index
      %40 = vector.load %arg10[%c0_22, %c0_23] : memref<128x384xf32, #tpu.memory_space<vmem>>, vector<128x384xf32>
      %41 = vector.extract_strided_slice %40 {offsets = [0, 0], sizes = [128, 128], strides = [1, 1]} : vector<128x384xf32> to vector<128x128xf32>
      %42 = vector.extract_strided_slice %40 {offsets = [0, 128], sizes = [128, 128], strides = [1, 1]} : vector<128x384xf32> to vector<128x128xf32>
      %43 = arith.addf %41, %42 : vector<128x128xf32>
      %44 = arith.addf %43, %39 : vector<128x128xf32>
      %45 = arith.negf %44 : vector<128x128xf32>
      %46 = math.exp %45 : vector<128x128xf32>
      %cst_24 = arith.constant 1.000000e+00 : f32
      %47 = vector.broadcast %cst_24 : f32 to vector<128x128xf32>
      %48 = arith.addf %47, %46 : vector<128x128xf32>
      %49 = arith.divf %47, %48 : vector<128x128xf32>
      %50 = vector.extract_strided_slice %40 {offsets = [0, 256], sizes = [128, 128], strides = [1, 1]} : vector<128x384xf32> to vector<128x128xf32>
      %51 = arith.mulf %50, %49 : vector<128x128xf32>
      %c0_25 = arith.constant 0 : index
      %c0_26 = arith.constant 0 : index
      %52 = vector.load %arg8[%c0_25, %c0_26] : memref<128x128xf32, #tpu.memory_space<vmem>>, vector<128x128xf32>
      tpu.vector_store %arg8[%c0_25, %c0_26], %44 {strides = array<i32>} : memref<128x128xf32, #tpu.memory_space<vmem>>, vector<128x128xf32>,
      %53 = tpu.concatenate %51, %49 in 1 : vector<128x128xf32>, vector<128x128xf32> -> vector<128x256xf32>
      %54 = arith.truncf %53 : vector<128x256xf32> to vector<128x256xbf16>
      %c0_27 = arith.constant 0 : index
      %c0_28 = arith.constant 0 : index
      %55 = vector.load %arg9[%c0_27, %c0_28] : memref<128x256xbf16, #tpu.memory_space<vmem>>, vector<128x256xbf16>
      tpu.vector_store %arg9[%c0_27, %c0_28], %54 {strides = array<i32>} : memref<128x256xbf16, #tpu.memory_space<vmem>>, vector<128x256xbf16>,
    } else {
    }
    return
  }
  func.func @transform_0(%arg0: i32, %arg1: i32) -> (i32, i32) {
    %c0_i32 = arith.constant 0 : i32
    %c0_i32_0 = arith.constant 0 : i32
    return %arg0, %c0_i32 : i32, i32
  }
  func.func @transform_1(%arg0: i32, %arg1: i32) -> (i32, i32) {
    %c0_i32 = arith.constant 0 : i32
    %c0_i32_0 = arith.constant 0 : i32
    return %arg0, %c0_i32 : i32, i32
  }
  func.func @transform_2(%arg0: i32, %arg1: i32) -> (i32, i32) {
    %c0_i32 = arith.constant 0 : i32
    %c0_i32_0 = arith.constant 0 : i32
    return %arg1, %c0_i32 : i32, i32
  }
  func.func @transform_3(%arg0: i32, %arg1: i32) -> (i32, i32) {
    %c0_i32 = arith.constant 0 : i32
    %c0_i32_0 = arith.constant 0 : i32
    return %arg0, %c0_i32 : i32, i32
  }
  func.func @transform_4(%arg0: i32, %arg1: i32) -> (i32, i32) {
    %c0_i32 = arith.constant 0 : i32
    %c0_i32_0 = arith.constant 0 : i32
    %c0_i32_1 = arith.constant 0 : i32
    return %c0_i32, %c0_i32_0 : i32, i32
  }
  func.func @transform_5(%arg0: i32, %arg1: i32) -> (i32, i32) {
    %c0_i32 = arith.constant 0 : i32
    %c0_i32_0 = arith.constant 0 : i32
    %c0_i32_1 = arith.constant 0 : i32
    return %c0_i32, %c0_i32_0 : i32, i32
  }
  func.func @transform_6(%arg0: i32, %arg1: i32) -> (i32, i32) {
    %c0_i32 = arith.constant 0 : i32
    %c0_i32_0 = arith.constant 0 : i32
    return %arg0, %c0_i32 : i32, i32
  }
  func.func @transform_7(%arg0: i32, %arg1: i32) -> (i32, i32) {
    %c0_i32 = arith.constant 0 : i32
    %c0_i32_0 = arith.constant 0 : i32
    return %arg0, %c0_i32 : i32, i32
  }
}

module attributes {stable_mosaic.version = 11 : i64} {
  func.func @_bn_stats_kernel(%arg0: i32, %arg1: memref<128x128xf32, #tpu.memory_space<vmem>>, %arg2: memref<2x128xf32, #tpu.memory_space<vmem>>) attributes {dimension_semantics = [#tpu.dimension_semantics<arbitrary>], iteration_bounds = array<i64: 3>, scalar_prefetch = 0 : i64, scratch_operands = 0 : i64, tpu.core_type = #tpu.core_type<tc>, window_params = [{transform_indices = @transform_0, window_bounds = array<i64: 128, 128>}, {pipeline_mode = #tpu.pipeline_mode<synchronous>, transform_indices = @transform_1, window_bounds = array<i64: 2, 128>}]} {
    %c0 = arith.constant 0 : index
    %c0_0 = arith.constant 0 : index
    %0 = vector.load %arg1[%c0, %c0_0] : memref<128x128xf32, #tpu.memory_space<vmem>>, vector<128x128xf32>
    %1 = tpu.iota {dimensions = array<i32: 0>} : vector<128x128xi32>
    %c128_i32 = arith.constant 128 : i32
    %2 = arith.muli %arg0, %c128_i32 : i32
    %3 = vector.broadcast %2 : i32 to vector<128x128xi32>
    %4 = arith.addi %1, %3 : vector<128x128xi32>
    %c272_i32 = arith.constant 272 : i32
    %5 = vector.broadcast %c272_i32 : i32 to vector<128x128xi32>
    %6 = arith.cmpi slt, %4, %5 : vector<128x128xi32>
    %cst = arith.constant 0.000000e+00 : f32
    %7 = vector.broadcast %cst : f32 to vector<128x128xf32>
    %8 = arith.select %6, %0, %7 : vector<128x128xi1>, vector<128x128xf32>
    %cst_1 = arith.constant dense<0.000000e+00> : vector<128xf32>
    %9 = vector.multi_reduction <add>, %8, %cst_1 [0] : vector<128x128xf32> to vector<128xf32>
    %10 = vector.shape_cast %9 : vector<128xf32> to vector<1x128xf32>
    %11 = arith.mulf %8, %8 : vector<128x128xf32>
    %cst_2 = arith.constant dense<0.000000e+00> : vector<128xf32>
    %12 = vector.multi_reduction <add>, %11, %cst_2 [0] : vector<128x128xf32> to vector<128xf32>
    %13 = vector.shape_cast %12 : vector<128xf32> to vector<1x128xf32>
    %14 = tpu.concatenate %10, %13 in 0 : vector<1x128xf32>, vector<1x128xf32> -> vector<2x128xf32>
    %c0_i32 = arith.constant 0 : i32
    %15 = arith.cmpi eq, %arg0, %c0_i32 : i32
    %16 = arith.extui %15 : i1 to i32
    %c0_i32_3 = arith.constant 0 : i32
    %17 = arith.cmpi ne, %16, %c0_i32_3 : i32
    scf.if %17 {
      %cst_9 = arith.constant 0.000000e+00 : f32
      %24 = vector.broadcast %cst_9 : f32 to vector<2x128xf32>
      %c0_10 = arith.constant 0 : index
      %c0_11 = arith.constant 0 : index
      %25 = vector.load %arg2[%c0_10, %c0_11] : memref<2x128xf32, #tpu.memory_space<vmem>>, vector<2x128xf32>
      tpu.vector_store %arg2[%c0_10, %c0_11], %24 {strides = array<i32>} : memref<2x128xf32, #tpu.memory_space<vmem>>, vector<2x128xf32>,
    } else {
    }
    %c0_4 = arith.constant 0 : index
    %c0_5 = arith.constant 0 : index
    %18 = vector.load %arg2[%c0_4, %c0_5] : memref<2x128xf32, #tpu.memory_space<vmem>>, vector<2x128xf32>
    %19 = arith.addf %18, %14 : vector<2x128xf32>
    %c0_6 = arith.constant 0 : index
    %c0_7 = arith.constant 0 : index
    %20 = vector.load %arg2[%c0_6, %c0_7] : memref<2x128xf32, #tpu.memory_space<vmem>>, vector<2x128xf32>
    tpu.vector_store %arg2[%c0_6, %c0_7], %19 {strides = array<i32>} : memref<2x128xf32, #tpu.memory_space<vmem>>, vector<2x128xf32>,
    %c2_i32 = arith.constant 2 : i32
    %21 = arith.cmpi eq, %arg0, %c2_i32 : i32
    %22 = arith.extui %21 : i1 to i32
    %c0_i32_8 = arith.constant 0 : i32
    %23 = arith.cmpi ne, %22, %c0_i32_8 : i32
    scf.if %23 {
      %c0_9 = arith.constant 0 : index
      %c0_10 = arith.constant 0 : index
      %24 = vector.load %arg2[%c0_9, %c0_10] : memref<2x128xf32, #tpu.memory_space<vmem>>, vector<2x128xf32>
      %25 = vector.extract_strided_slice %24 {offsets = [0, 0], sizes = [1, 128], strides = [1, 1]} : vector<2x128xf32> to vector<1x128xf32>
      %cst_11 = arith.constant 0.0036764706 : f32
      %26 = vector.broadcast %cst_11 : f32 to vector<1x128xf32>
      %27 = arith.mulf %25, %26 : vector<1x128xf32>
      %28 = vector.extract_strided_slice %24 {offsets = [1, 0], sizes = [1, 128], strides = [1, 1]} : vector<2x128xf32> to vector<1x128xf32>
      %cst_12 = arith.constant 0.0036764706 : f32
      %29 = vector.broadcast %cst_12 : f32 to vector<1x128xf32>
      %30 = arith.mulf %28, %29 : vector<1x128xf32>
      %31 = arith.mulf %27, %27 : vector<1x128xf32>
      %32 = arith.subf %30, %31 : vector<1x128xf32>
      %33 = tpu.concatenate %27, %32 in 0 : vector<1x128xf32>, vector<1x128xf32> -> vector<2x128xf32>
      %c0_13 = arith.constant 0 : index
      %c0_14 = arith.constant 0 : index
      %34 = vector.load %arg2[%c0_13, %c0_14] : memref<2x128xf32, #tpu.memory_space<vmem>>, vector<2x128xf32>
      tpu.vector_store %arg2[%c0_13, %c0_14], %33 {strides = array<i32>} : memref<2x128xf32, #tpu.memory_space<vmem>>, vector<2x128xf32>,
    } else {
    }
    return
  }
  func.func @transform_0(%arg0: i32) -> (i32, i32) {
    %c0_i32 = arith.constant 0 : i32
    %c0_i32_0 = arith.constant 0 : i32
    return %arg0, %c0_i32 : i32, i32
  }
  func.func @transform_1(%arg0: i32) -> (i32, i32) {
    %c0_i32 = arith.constant 0 : i32
    %c0_i32_0 = arith.constant 0 : i32
    %c0_i32_1 = arith.constant 0 : i32
    return %c0_i32, %c0_i32_0 : i32, i32
  }
}

module attributes {stable_mosaic.version = 11 : i64} {
  func.func @_scatter_node_kernel(%arg0: i32, %arg1: i32, %arg2: memref<1x128xi32, #tpu.memory_space<vmem>>, %arg3: memref<128x256xbf16, #tpu.memory_space<vmem>>, %arg4: memref<128x128xf32, #tpu.memory_space<vmem>>, %arg5: memref<128x128xf32, #tpu.memory_space<vmem>>, %arg6: memref<128x256xf32, #tpu.memory_space<vmem>>) attributes {dimension_semantics = [#tpu.dimension_semantics<parallel>, #tpu.dimension_semantics<arbitrary>], iteration_bounds = array<i64: 3, 4>, scalar_prefetch = 0 : i64, scratch_operands = 1 : i64, tpu.core_type = #tpu.core_type<tc>, window_params = [{transform_indices = @transform_0, window_bounds = array<i64: 1, 128>}, {transform_indices = @transform_1, window_bounds = array<i64: 128, 256>}, {transform_indices = @transform_2, window_bounds = array<i64: 128, 128>}, {transform_indices = @transform_3, window_bounds = array<i64: 128, 128>}]} {
    %c0_i32 = arith.constant 0 : i32
    %0 = arith.cmpi eq, %arg1, %c0_i32 : i32
    %1 = arith.extui %0 : i1 to i32
    %c0_i32_0 = arith.constant 0 : i32
    %2 = arith.cmpi ne, %1, %c0_i32_0 : i32
    scf.if %2 {
      %cst_9 = arith.constant 0.000000e+00 : f32
      %21 = vector.broadcast %cst_9 : f32 to vector<128x256xf32>
      %c0_10 = arith.constant 0 : index
      %c0_11 = arith.constant 0 : index
      %22 = vector.load %arg6[%c0_10, %c0_11] : memref<128x256xf32, #tpu.memory_space<vmem>>, vector<128x256xf32>
      tpu.vector_store %arg6[%c0_10, %c0_11], %21 {strides = array<i32>} : memref<128x256xf32, #tpu.memory_space<vmem>>, vector<128x256xf32>,
    } else {
    }
    %3 = tpu.iota {dimensions = array<i32: 0>} : vector<128x128xi32>
    %c128_i32 = arith.constant 128 : i32
    %4 = arith.muli %arg0, %c128_i32 : i32
    %5 = vector.broadcast %4 : i32 to vector<128x128xi32>
    %6 = arith.addi %3, %5 : vector<128x128xi32>
    %c0 = arith.constant 0 : index
    %c0_1 = arith.constant 0 : index
    %7 = vector.load %arg2[%c0, %c0_1] : memref<1x128xi32, #tpu.memory_space<vmem>>, vector<1x128xi32>
    %8 = vector.broadcast %7 : vector<1x128xi32> to vector<128x128xi32>
    %9 = arith.cmpi eq, %6, %8 : vector<128x128xi32>
    %10 = arith.extui %9 : vector<128x128xi1> to vector<128x128xi32>
    %11 = arith.sitofp %10 : vector<128x128xi32> to vector<128x128xf32>
    %12 = arith.truncf %11 : vector<128x128xf32> to vector<128x128xbf16>
    %c0_2 = arith.constant 0 : index
    %c0_3 = arith.constant 0 : index
    %13 = vector.load %arg6[%c0_2, %c0_3] : memref<128x256xf32, #tpu.memory_space<vmem>>, vector<128x256xf32>
    %c0_4 = arith.constant 0 : index
    %c0_5 = arith.constant 0 : index
    %14 = vector.load %arg3[%c0_4, %c0_5] : memref<128x256xbf16, #tpu.memory_space<vmem>>, vector<128x256xbf16>
    %cst = arith.constant dense<0.000000e+00> : vector<128x256xf32>
    %15 = tpu.matmul %12, %14, %cst {dimension_numbers = #tpu.dot_dimension_numbers<[1], [0], [0], [1], [0, 0, 1, 1], [], []>} : vector<128x128xbf16>, vector<128x256xbf16>, vector<128x256xf32> -> vector<128x256xf32>
    %16 = arith.addf %13, %15 : vector<128x256xf32>
    %c0_6 = arith.constant 0 : index
    %c0_7 = arith.constant 0 : index
    %17 = vector.load %arg6[%c0_6, %c0_7] : memref<128x256xf32, #tpu.memory_space<vmem>>, vector<128x256xf32>
    tpu.vector_store %arg6[%c0_6, %c0_7], %16 {strides = array<i32>} : memref<128x256xf32, #tpu.memory_space<vmem>>, vector<128x256xf32>,
    %c3_i32 = arith.constant 3 : i32
    %18 = arith.cmpi eq, %arg1, %c3_i32 : i32
    %19 = arith.extui %18 : i1 to i32
    %c0_i32_8 = arith.constant 0 : i32
    %20 = arith.cmpi ne, %19, %c0_i32_8 : i32
    scf.if %20 {
      %c0_9 = arith.constant 0 : index
      %c0_10 = arith.constant 0 : index
      %21 = vector.load %arg6[%c0_9, %c0_10] : memref<128x256xf32, #tpu.memory_space<vmem>>, vector<128x256xf32>
      %22 = vector.extract_strided_slice %21 {offsets = [0, 0], sizes = [128, 128], strides = [1, 1]} : vector<128x256xf32> to vector<128x128xf32>
      %23 = vector.extract_strided_slice %21 {offsets = [0, 128], sizes = [128, 128], strides = [1, 1]} : vector<128x256xf32> to vector<128x128xf32>
      %cst_11 = arith.constant 9.99999997E-7 : f32
      %24 = vector.broadcast %cst_11 : f32 to vector<128x128xf32>
      %25 = arith.addf %23, %24 : vector<128x128xf32>
      %26 = tpu.reciprocal %25 {approx = true} : vector<128x128xf32> -> vector<128x128xf32>
      %27 = arith.mulf %22, %26 : vector<128x128xf32>
      %c0_12 = arith.constant 0 : index
      %c0_13 = arith.constant 0 : index
      %28 = vector.load %arg4[%c0_12, %c0_13] : memref<128x128xf32, #tpu.memory_space<vmem>>, vector<128x128xf32>
      %29 = arith.addf %28, %27 : vector<128x128xf32>
      %c0_14 = arith.constant 0 : index
      %c0_15 = arith.constant 0 : index
      %30 = vector.load %arg5[%c0_14, %c0_15] : memref<128x128xf32, #tpu.memory_space<vmem>>, vector<128x128xf32>
      tpu.vector_store %arg5[%c0_14, %c0_15], %29 {strides = array<i32>} : memref<128x128xf32, #tpu.memory_space<vmem>>, vector<128x128xf32>,
    } else {
    }
    return
  }
  func.func @transform_0(%arg0: i32, %arg1: i32) -> (i32, i32) {
    %c0_i32 = arith.constant 0 : i32
    %c0_i32_0 = arith.constant 0 : i32
    return %c0_i32, %arg1 : i32, i32
  }
  func.func @transform_1(%arg0: i32, %arg1: i32) -> (i32, i32) {
    %c0_i32 = arith.constant 0 : i32
    %c0_i32_0 = arith.constant 0 : i32
    return %arg1, %c0_i32 : i32, i32
  }
  func.func @transform_2(%arg0: i32, %arg1: i32) -> (i32, i32) {
    %c0_i32 = arith.constant 0 : i32
    %c0_i32_0 = arith.constant 0 : i32
    return %arg0, %c0_i32 : i32, i32
  }
  func.func @transform_3(%arg0: i32, %arg1: i32) -> (i32, i32) {
    %c0_i32 = arith.constant 0 : i32
    %c0_i32_0 = arith.constant 0 : i32
    return %arg0, %c0_i32 : i32, i32
  }
}

module attributes {stable_mosaic.version = 11 : i64} {
  func.func @_bn_silu_res_kernel(%arg0: i32, %arg1: memref<128x128xf32, #tpu.memory_space<vmem>>, %arg2: memref<128x128xf32, #tpu.memory_space<vmem>>, %arg3: memref<2x128xf32, #tpu.memory_space<vmem>>, %arg4: memref<1x128xf32, #tpu.memory_space<vmem>>, %arg5: memref<1x128xf32, #tpu.memory_space<vmem>>, %arg6: memref<128x128xf32, #tpu.memory_space<vmem>>) attributes {dimension_semantics = [#tpu.dimension_semantics<parallel>], iteration_bounds = array<i64: 3>, scalar_prefetch = 0 : i64, scratch_operands = 0 : i64, tpu.core_type = #tpu.core_type<tc>, window_params = [{transform_indices = @transform_0, window_bounds = array<i64: 128, 128>}, {transform_indices = @transform_1, window_bounds = array<i64: 128, 128>}, {pipeline_mode = #tpu.pipeline_mode<synchronous>, transform_indices = @transform_2, window_bounds = array<i64: 2, 128>}, {pipeline_mode = #tpu.pipeline_mode<synchronous>, transform_indices = @transform_3, window_bounds = array<i64: 1, 128>}, {pipeline_mode = #tpu.pipeline_mode<synchronous>, transform_indices = @transform_4, window_bounds = array<i64: 1, 128>}, {transform_indices = @transform_5, window_bounds = array<i64: 128, 128>}]} {
    %c0 = arith.constant 0 : index
    %c0_0 = arith.constant 0 : index
    %0 = vector.load %arg3[%c0, %c0_0] : memref<2x128xf32, #tpu.memory_space<vmem>>, vector<1x128xf32>
    %c1 = arith.constant 1 : index
    %c0_1 = arith.constant 0 : index
    %1 = vector.load %arg3[%c1, %c0_1] : memref<2x128xf32, #tpu.memory_space<vmem>>, vector<1x128xf32>
    %c0_2 = arith.constant 0 : index
    %c0_3 = arith.constant 0 : index
    %2 = vector.load %arg1[%c0_2, %c0_3] : memref<128x128xf32, #tpu.memory_space<vmem>>, vector<128x128xf32>
    %3 = vector.broadcast %0 : vector<1x128xf32> to vector<128x128xf32>
    %4 = arith.subf %2, %3 : vector<128x128xf32>
    %cst = arith.constant 9.99999974E-6 : f32
    %5 = vector.broadcast %cst : f32 to vector<1x128xf32>
    %6 = arith.addf %1, %5 : vector<1x128xf32>
    %7 = math.rsqrt %6 : vector<1x128xf32>
    %8 = vector.broadcast %7 : vector<1x128xf32> to vector<128x128xf32>
    %9 = arith.mulf %4, %8 : vector<128x128xf32>
    %c0_4 = arith.constant 0 : index
    %c0_5 = arith.constant 0 : index
    %10 = vector.load %arg4[%c0_4, %c0_5] : memref<1x128xf32, #tpu.memory_space<vmem>>, vector<1x128xf32>
    %11 = vector.broadcast %10 : vector<1x128xf32> to vector<128x128xf32>
    %12 = arith.mulf %9, %11 : vector<128x128xf32>
    %c0_6 = arith.constant 0 : index
    %c0_7 = arith.constant 0 : index
    %13 = vector.load %arg5[%c0_6, %c0_7] : memref<1x128xf32, #tpu.memory_space<vmem>>, vector<1x128xf32>
    %14 = vector.broadcast %13 : vector<1x128xf32> to vector<128x128xf32>
    %15 = arith.addf %12, %14 : vector<128x128xf32>
    %16 = arith.negf %15 : vector<128x128xf32>
    %17 = math.exp %16 : vector<128x128xf32>
    %cst_8 = arith.constant 1.000000e+00 : f32
    %18 = vector.broadcast %cst_8 : f32 to vector<128x128xf32>
    %19 = arith.addf %18, %17 : vector<128x128xf32>
    %20 = arith.divf %18, %19 : vector<128x128xf32>
    %21 = arith.mulf %15, %20 : vector<128x128xf32>
    %c0_9 = arith.constant 0 : index
    %c0_10 = arith.constant 0 : index
    %22 = vector.load %arg2[%c0_9, %c0_10] : memref<128x128xf32, #tpu.memory_space<vmem>>, vector<128x128xf32>
    %23 = arith.addf %22, %21 : vector<128x128xf32>
    %c0_11 = arith.constant 0 : index
    %c0_12 = arith.constant 0 : index
    %24 = vector.load %arg6[%c0_11, %c0_12] : memref<128x128xf32, #tpu.memory_space<vmem>>, vector<128x128xf32>
    tpu.vector_store %arg6[%c0_11, %c0_12], %23 {strides = array<i32>} : memref<128x128xf32, #tpu.memory_space<vmem>>, vector<128x128xf32>,
    return
  }
  func.func @transform_0(%arg0: i32) -> (i32, i32) {
    %c0_i32 = arith.constant 0 : i32
    %c0_i32_0 = arith.constant 0 : i32
    return %arg0, %c0_i32 : i32, i32
  }
  func.func @transform_1(%arg0: i32) -> (i32, i32) {
    %c0_i32 = arith.constant 0 : i32
    %c0_i32_0 = arith.constant 0 : i32
    return %arg0, %c0_i32 : i32, i32
  }
  func.func @transform_2(%arg0: i32) -> (i32, i32) {
    %c0_i32 = arith.constant 0 : i32
    %c0_i32_0 = arith.constant 0 : i32
    %c0_i32_1 = arith.constant 0 : i32
    return %c0_i32, %c0_i32_0 : i32, i32
  }
  func.func @transform_3(%arg0: i32) -> (i32, i32) {
    %c0_i32 = arith.constant 0 : i32
    %c0_i32_0 = arith.constant 0 : i32
    %c0_i32_1 = arith.constant 0 : i32
    return %c0_i32, %c0_i32_0 : i32, i32
  }
  func.func @transform_4(%arg0: i32) -> (i32, i32) {
    %c0_i32 = arith.constant 0 : i32
    %c0_i32_0 = arith.constant 0 : i32
    %c0_i32_1 = arith.constant 0 : i32
    return %c0_i32, %c0_i32_0 : i32, i32
  }
  func.func @transform_5(%arg0: i32) -> (i32, i32) {
    %c0_i32 = arith.constant 0 : i32
    %c0_i32_0 = arith.constant 0 : i32
    return %arg0, %c0_i32 : i32, i32
  }
}

module attributes {stable_mosaic.version = 11 : i64} {
  func.func @_node_linear_kernel(%arg0: i32, %arg1: memref<128x128xf32, #tpu.memory_space<vmem>>, %arg2: memref<128x512xf32, #tpu.memory_space<vmem>>, %arg3: memref<1x512xf32, #tpu.memory_space<vmem>>, %arg4: memref<128x384xf32, #tpu.memory_space<vmem>>, %arg5: memref<128x128xf32, #tpu.memory_space<vmem>>) attributes {dimension_semantics = [#tpu.dimension_semantics<parallel>], iteration_bounds = array<i64: 2>, scalar_prefetch = 0 : i64, scratch_operands = 0 : i64, tpu.core_type = #tpu.core_type<tc>, window_params = [{transform_indices = @transform_0, window_bounds = array<i64: 128, 128>}, {pipeline_mode = #tpu.pipeline_mode<synchronous>, transform_indices = @transform_1, window_bounds = array<i64: 128, 512>}, {pipeline_mode = #tpu.pipeline_mode<synchronous>, transform_indices = @transform_2, window_bounds = array<i64: 1, 512>}, {transform_indices = @transform_3, window_bounds = array<i64: 128, 384>}, {transform_indices = @transform_4, window_bounds = array<i64: 128, 128>}]} {
    %c0 = arith.constant 0 : index
    %c0_0 = arith.constant 0 : index
    %0 = vector.load %arg1[%c0, %c0_0] : memref<128x128xf32, #tpu.memory_space<vmem>>, vector<128x128xf32>
    %c0_1 = arith.constant 0 : index
    %c0_2 = arith.constant 0 : index
    %1 = vector.load %arg2[%c0_1, %c0_2] : memref<128x512xf32, #tpu.memory_space<vmem>>, vector<128x512xf32>
    %cst = arith.constant dense<0.000000e+00> : vector<128x512xf32>
    %2 = tpu.matmul %0, %1, %cst {dimension_numbers = #tpu.dot_dimension_numbers<[1], [0], [0], [1], [0, 0, 1, 1], [], []>} : vector<128x128xf32>, vector<128x512xf32>, vector<128x512xf32> -> vector<128x512xf32>
    %c0_3 = arith.constant 0 : index
    %c0_4 = arith.constant 0 : index
    %3 = vector.load %arg3[%c0_3, %c0_4] : memref<1x512xf32, #tpu.memory_space<vmem>>, vector<1x512xf32>
    %4 = vector.broadcast %3 : vector<1x512xf32> to vector<128x512xf32>
    %5 = arith.addf %2, %4 : vector<128x512xf32>
    %6 = vector.extract_strided_slice %5 {offsets = [0, 0], sizes = [128, 384], strides = [1, 1]} : vector<128x512xf32> to vector<128x384xf32>
    %c0_5 = arith.constant 0 : index
    %c0_6 = arith.constant 0 : index
    %7 = vector.load %arg4[%c0_5, %c0_6] : memref<128x384xf32, #tpu.memory_space<vmem>>, vector<128x384xf32>
    tpu.vector_store %arg4[%c0_5, %c0_6], %6 {strides = array<i32>} : memref<128x384xf32, #tpu.memory_space<vmem>>, vector<128x384xf32>,
    %8 = vector.extract_strided_slice %5 {offsets = [0, 384], sizes = [128, 128], strides = [1, 1]} : vector<128x512xf32> to vector<128x128xf32>
    %c0_7 = arith.constant 0 : index
    %c0_8 = arith.constant 0 : index
    %9 = vector.load %arg5[%c0_7, %c0_8] : memref<128x128xf32, #tpu.memory_space<vmem>>, vector<128x128xf32>
    tpu.vector_store %arg5[%c0_7, %c0_8], %8 {strides = array<i32>} : memref<128x128xf32, #tpu.memory_space<vmem>>, vector<128x128xf32>,
    return
  }
  func.func @transform_0(%arg0: i32) -> (i32, i32) {
    %c0_i32 = arith.constant 0 : i32
    %c0_i32_0 = arith.constant 0 : i32
    return %arg0, %c0_i32 : i32, i32
  }
  func.func @transform_1(%arg0: i32) -> (i32, i32) {
    %c0_i32 = arith.constant 0 : i32
    %c0_i32_0 = arith.constant 0 : i32
    %c0_i32_1 = arith.constant 0 : i32
    return %c0_i32, %c0_i32_0 : i32, i32
  }
  func.func @transform_2(%arg0: i32) -> (i32, i32) {
    %c0_i32 = arith.constant 0 : i32
    %c0_i32_0 = arith.constant 0 : i32
    %c0_i32_1 = arith.constant 0 : i32
    return %c0_i32, %c0_i32_0 : i32, i32
  }
  func.func @transform_3(%arg0: i32) -> (i32, i32) {
    %c0_i32 = arith.constant 0 : i32
    %c0_i32_0 = arith.constant 0 : i32
    return %arg0, %c0_i32 : i32, i32
  }
  func.func @transform_4(%arg0: i32) -> (i32, i32) {
    %c0_i32 = arith.constant 0 : i32
    %c0_i32_0 = arith.constant 0 : i32
    return %arg0, %c0_i32 : i32, i32
  }
}

module attributes {stable_mosaic.version = 11 : i64} {
  func.func @_gather_message_kernel(%arg0: i32, %arg1: i32, %arg2: memref<128x1xi32, #tpu.memory_space<vmem>>, %arg3: memref<128x1xi32, #tpu.memory_space<vmem>>, %arg4: memref<128x384xf32, #tpu.memory_space<vmem>>, %arg5: memref<128x128xf32, #tpu.memory_space<vmem>>, %arg6: memref<128x128xf32, #tpu.memory_space<vmem>>, %arg7: memref<1x128xf32, #tpu.memory_space<vmem>>, %arg8: memref<128x128xf32, #tpu.memory_space<vmem>>, %arg9: memref<128x256xbf16, #tpu.memory_space<vmem>>, %arg10: memref<128x384xf32, #tpu.memory_space<vmem>>) attributes {dimension_semantics = [#tpu.dimension_semantics<parallel>, #tpu.dimension_semantics<arbitrary>], iteration_bounds = array<i64: 3, 2>, scalar_prefetch = 0 : i64, scratch_operands = 1 : i64, tpu.core_type = #tpu.core_type<tc>, window_params = [{transform_indices = @transform_0, window_bounds = array<i64: 128, 1>}, {transform_indices = @transform_1, window_bounds = array<i64: 128, 1>}, {transform_indices = @transform_2, window_bounds = array<i64: 128, 384>}, {transform_indices = @transform_3, window_bounds = array<i64: 128, 128>}, {pipeline_mode = #tpu.pipeline_mode<synchronous>, transform_indices = @transform_4, window_bounds = array<i64: 128, 128>}, {pipeline_mode = #tpu.pipeline_mode<synchronous>, transform_indices = @transform_5, window_bounds = array<i64: 1, 128>}, {transform_indices = @transform_6, window_bounds = array<i64: 128, 128>}, {transform_indices = @transform_7, window_bounds = array<i64: 128, 256>}]} {
    %c0_i32 = arith.constant 0 : i32
    %0 = arith.cmpi eq, %arg1, %c0_i32 : i32
    %1 = arith.extui %0 : i1 to i32
    %c0_i32_0 = arith.constant 0 : i32
    %2 = arith.cmpi ne, %1, %c0_i32_0 : i32
    scf.if %2 {
      %cst_15 = arith.constant 0.000000e+00 : f32
      %34 = vector.broadcast %cst_15 : f32 to vector<128x384xf32>
      %c0_16 = arith.constant 0 : index
      %c0_17 = arith.constant 0 : index
      %35 = vector.load %arg10[%c0_16, %c0_17] : memref<128x384xf32, #tpu.memory_space<vmem>>, vector<128x384xf32>
      tpu.vector_store %arg10[%c0_16, %c0_17], %34 {strides = array<i32>} : memref<128x384xf32, #tpu.memory_space<vmem>>, vector<128x384xf32>,
    } else {
    }
    %3 = tpu.iota {dimensions = array<i32: 1>} : vector<128x128xi32>
    %c128_i32 = arith.constant 128 : i32
    %4 = arith.muli %arg1, %c128_i32 : i32
    %5 = vector.broadcast %4 : i32 to vector<128x128xi32>
    %6 = arith.addi %3, %5 : vector<128x128xi32>
    %c0 = arith.constant 0 : index
    %c0_1 = arith.constant 0 : index
    %7 = vector.load %arg2[%c0, %c0_1] : memref<128x1xi32, #tpu.memory_space<vmem>>, vector<128x1xi32>
    %8 = vector.broadcast %7 : vector<128x1xi32> to vector<128x128xi32>
    %9 = arith.cmpi eq, %8, %6 : vector<128x128xi32>
    %10 = arith.extui %9 : vector<128x128xi1> to vector<128x128xi32>
    %11 = arith.sitofp %10 : vector<128x128xi32> to vector<128x128xf32>
    %12 = arith.truncf %11 : vector<128x128xf32> to vector<128x128xbf16>
    %c0_2 = arith.constant 0 : index
    %c0_3 = arith.constant 0 : index
    %13 = vector.load %arg3[%c0_2, %c0_3] : memref<128x1xi32, #tpu.memory_space<vmem>>, vector<128x1xi32>
    %14 = vector.broadcast %13 : vector<128x1xi32> to vector<128x128xi32>
    %15 = arith.cmpi eq, %14, %6 : vector<128x128xi32>
    %16 = arith.extui %15 : vector<128x128xi1> to vector<128x128xi32>
    %17 = arith.sitofp %16 : vector<128x128xi32> to vector<128x128xf32>
    %18 = arith.truncf %17 : vector<128x128xf32> to vector<128x128xbf16>
    %c0_4 = arith.constant 0 : index
    %c0_5 = arith.constant 0 : index
    %19 = vector.load %arg4[%c0_4, %c0_5] : memref<128x384xf32, #tpu.memory_space<vmem>>, vector<128x384xf32>
    %20 = arith.truncf %19 : vector<128x384xf32> to vector<128x384xbf16>
    %c0_6 = arith.constant 0 : index
    %c0_7 = arith.constant 0 : index
    %21 = vector.load %arg10[%c0_6, %c0_7] : memref<128x384xf32, #tpu.memory_space<vmem>>, vector<128x128xf32>
    %22 = vector.extract_strided_slice %20 {offsets = [0, 0], sizes = [128, 128], strides = [1, 1]} : vector<128x384xbf16> to vector<128x128xbf16>
    %cst = arith.constant dense<0.000000e+00> : vector<128x128xf32>
    %23 = tpu.matmul %12, %22, %cst {dimension_numbers = #tpu.dot_dimension_numbers<[1], [0], [0], [1], [0, 0, 1, 1], [], []>} : vector<128x128xbf16>, vector<128x128xbf16>, vector<128x128xf32> -> vector<128x128xf32>
    %24 = arith.addf %21, %23 : vector<128x128xf32>
    %c0_8 = arith.constant 0 : index
    %c0_9 = arith.constant 0 : index
    %25 = vector.load %arg10[%c0_8, %c0_9] : memref<128x384xf32, #tpu.memory_space<vmem>>, vector<128x128xf32>
    tpu.vector_store %arg10[%c0_8, %c0_9], %24 {strides = array<i32>} : memref<128x384xf32, #tpu.memory_space<vmem>>, vector<128x128xf32>,
    %c0_10 = arith.constant 0 : index
    %c128 = arith.constant 128 : index
    %26 = vector.load %arg10[%c0_10, %c128] : memref<128x384xf32, #tpu.memory_space<vmem>>, vector<128x256xf32>
    %27 = vector.extract_strided_slice %20 {offsets = [0, 128], sizes = [128, 256], strides = [1, 1]} : vector<128x384xbf16> to vector<128x256xbf16>
    %cst_11 = arith.constant dense<0.000000e+00> : vector<128x256xf32>
    %28 = tpu.matmul %18, %27, %cst_11 {dimension_numbers = #tpu.dot_dimension_numbers<[1], [0], [0], [1], [0, 0, 1, 1], [], []>} : vector<128x128xbf16>, vector<128x256xbf16>, vector<128x256xf32> -> vector<128x256xf32>
    %29 = arith.addf %26, %28 : vector<128x256xf32>
    %c0_12 = arith.constant 0 : index
    %c128_13 = arith.constant 128 : index
    %30 = vector.load %arg10[%c0_12, %c128_13] : memref<128x384xf32, #tpu.memory_space<vmem>>, vector<128x256xf32>
    tpu.vector_store %arg10[%c0_12, %c128_13], %29 {strides = array<i32>} : memref<128x384xf32, #tpu.memory_space<vmem>>, vector<128x256xf32>,
    %c1_i32 = arith.constant 1 : i32
    %31 = arith.cmpi eq, %arg1, %c1_i32 : i32
    %32 = arith.extui %31 : i1 to i32
    %c0_i32_14 = arith.constant 0 : i32
    %33 = arith.cmpi ne, %32, %c0_i32_14 : i32
    scf.if %33 {
      %c0_15 = arith.constant 0 : index
      %c0_16 = arith.constant 0 : index
      %34 = vector.load %arg5[%c0_15, %c0_16] : memref<128x128xf32, #tpu.memory_space<vmem>>, vector<128x128xf32>
      %c0_17 = arith.constant 0 : index
      %c0_18 = arith.constant 0 : index
      %35 = vector.load %arg6[%c0_17, %c0_18] : memref<128x128xf32, #tpu.memory_space<vmem>>, vector<128x128xf32>
      %cst_19 = arith.constant dense<0.000000e+00> : vector<128x128xf32>
      %36 = tpu.matmul %34, %35, %cst_19 {dimension_numbers = #tpu.dot_dimension_numbers<[1], [0], [0], [1], [0, 0, 1, 1], [], []>} : vector<128x128xf32>, vector<128x128xf32>, vector<128x128xf32> -> vector<128x128xf32>
      %c0_20 = arith.constant 0 : index
      %c0_21 = arith.constant 0 : index
      %37 = vector.load %arg7[%c0_20, %c0_21] : memref<1x128xf32, #tpu.memory_space<vmem>>, vector<1x128xf32>
      %38 = vector.broadcast %37 : vector<1x128xf32> to vector<128x128xf32>
      %39 = arith.addf %36, %38 : vector<128x128xf32>
      %c0_22 = arith.constant 0 : index
      %c0_23 = arith.constant 0 : index
      %40 = vector.load %arg10[%c0_22, %c0_23] : memref<128x384xf32, #tpu.memory_space<vmem>>, vector<128x384xf32>
      %41 = vector.extract_strided_slice %40 {offsets = [0, 0], sizes = [128, 128], strides = [1, 1]} : vector<128x384xf32> to vector<128x128xf32>
      %42 = vector.extract_strided_slice %40 {offsets = [0, 128], sizes = [128, 128], strides = [1, 1]} : vector<128x384xf32> to vector<128x128xf32>
      %43 = arith.addf %41, %42 : vector<128x128xf32>
      %44 = arith.addf %43, %39 : vector<128x128xf32>
      %45 = arith.negf %44 : vector<128x128xf32>
      %46 = math.exp %45 : vector<128x128xf32>
      %cst_24 = arith.constant 1.000000e+00 : f32
      %47 = vector.broadcast %cst_24 : f32 to vector<128x128xf32>
      %48 = arith.addf %47, %46 : vector<128x128xf32>
      %49 = arith.divf %47, %48 : vector<128x128xf32>
      %50 = vector.extract_strided_slice %40 {offsets = [0, 256], sizes = [128, 128], strides = [1, 1]} : vector<128x384xf32> to vector<128x128xf32>
      %51 = arith.mulf %50, %49 : vector<128x128xf32>
      %c0_25 = arith.constant 0 : index
      %c0_26 = arith.constant 0 : index
      %52 = vector.load %arg8[%c0_25, %c0_26] : memref<128x128xf32, #tpu.memory_space<vmem>>, vector<128x128xf32>
      tpu.vector_store %arg8[%c0_25, %c0_26], %44 {strides = array<i32>} : memref<128x128xf32, #tpu.memory_space<vmem>>, vector<128x128xf32>,
      %53 = tpu.concatenate %51, %49 in 1 : vector<128x128xf32>, vector<128x128xf32> -> vector<128x256xf32>
      %54 = arith.truncf %53 : vector<128x256xf32> to vector<128x256xbf16>
      %c0_27 = arith.constant 0 : index
      %c0_28 = arith.constant 0 : index
      %55 = vector.load %arg9[%c0_27, %c0_28] : memref<128x256xbf16, #tpu.memory_space<vmem>>, vector<128x256xbf16>
      tpu.vector_store %arg9[%c0_27, %c0_28], %54 {strides = array<i32>} : memref<128x256xbf16, #tpu.memory_space<vmem>>, vector<128x256xbf16>,
    } else {
    }
    return
  }
  func.func @transform_0(%arg0: i32, %arg1: i32) -> (i32, i32) {
    %c0_i32 = arith.constant 0 : i32
    %c0_i32_0 = arith.constant 0 : i32
    return %arg0, %c0_i32 : i32, i32
  }
  func.func @transform_1(%arg0: i32, %arg1: i32) -> (i32, i32) {
    %c0_i32 = arith.constant 0 : i32
    %c0_i32_0 = arith.constant 0 : i32
    return %arg0, %c0_i32 : i32, i32
  }
  func.func @transform_2(%arg0: i32, %arg1: i32) -> (i32, i32) {
    %c0_i32 = arith.constant 0 : i32
    %c0_i32_0 = arith.constant 0 : i32
    return %arg1, %c0_i32 : i32, i32
  }
  func.func @transform_3(%arg0: i32, %arg1: i32) -> (i32, i32) {
    %c0_i32 = arith.constant 0 : i32
    %c0_i32_0 = arith.constant 0 : i32
    return %arg0, %c0_i32 : i32, i32
  }
  func.func @transform_4(%arg0: i32, %arg1: i32) -> (i32, i32) {
    %c0_i32 = arith.constant 0 : i32
    %c0_i32_0 = arith.constant 0 : i32
    %c0_i32_1 = arith.constant 0 : i32
    return %c0_i32, %c0_i32_0 : i32, i32
  }
  func.func @transform_5(%arg0: i32, %arg1: i32) -> (i32, i32) {
    %c0_i32 = arith.constant 0 : i32
    %c0_i32_0 = arith.constant 0 : i32
    %c0_i32_1 = arith.constant 0 : i32
    return %c0_i32, %c0_i32_0 : i32, i32
  }
  func.func @transform_6(%arg0: i32, %arg1: i32) -> (i32, i32) {
    %c0_i32 = arith.constant 0 : i32
    %c0_i32_0 = arith.constant 0 : i32
    return %arg0, %c0_i32 : i32, i32
  }
  func.func @transform_7(%arg0: i32, %arg1: i32) -> (i32, i32) {
    %c0_i32 = arith.constant 0 : i32
    %c0_i32_0 = arith.constant 0 : i32
    return %arg0, %c0_i32 : i32, i32
  }
}

module attributes {stable_mosaic.version = 11 : i64} {
  func.func @_bn_stats_kernel(%arg0: i32, %arg1: memref<128x128xf32, #tpu.memory_space<vmem>>, %arg2: memref<2x128xf32, #tpu.memory_space<vmem>>) attributes {dimension_semantics = [#tpu.dimension_semantics<arbitrary>], iteration_bounds = array<i64: 2>, scalar_prefetch = 0 : i64, scratch_operands = 0 : i64, tpu.core_type = #tpu.core_type<tc>, window_params = [{transform_indices = @transform_0, window_bounds = array<i64: 128, 128>}, {pipeline_mode = #tpu.pipeline_mode<synchronous>, transform_indices = @transform_1, window_bounds = array<i64: 2, 128>}]} {
    %c0 = arith.constant 0 : index
    %c0_0 = arith.constant 0 : index
    %0 = vector.load %arg1[%c0, %c0_0] : memref<128x128xf32, #tpu.memory_space<vmem>>, vector<128x128xf32>
    %1 = tpu.iota {dimensions = array<i32: 0>} : vector<128x128xi32>
    %c128_i32 = arith.constant 128 : i32
    %2 = arith.muli %arg0, %c128_i32 : i32
    %3 = vector.broadcast %2 : i32 to vector<128x128xi32>
    %4 = arith.addi %1, %3 : vector<128x128xi32>
    %c136_i32 = arith.constant 136 : i32
    %5 = vector.broadcast %c136_i32 : i32 to vector<128x128xi32>
    %6 = arith.cmpi slt, %4, %5 : vector<128x128xi32>
    %cst = arith.constant 0.000000e+00 : f32
    %7 = vector.broadcast %cst : f32 to vector<128x128xf32>
    %8 = arith.select %6, %0, %7 : vector<128x128xi1>, vector<128x128xf32>
    %cst_1 = arith.constant dense<0.000000e+00> : vector<128xf32>
    %9 = vector.multi_reduction <add>, %8, %cst_1 [0] : vector<128x128xf32> to vector<128xf32>
    %10 = vector.shape_cast %9 : vector<128xf32> to vector<1x128xf32>
    %11 = arith.mulf %8, %8 : vector<128x128xf32>
    %cst_2 = arith.constant dense<0.000000e+00> : vector<128xf32>
    %12 = vector.multi_reduction <add>, %11, %cst_2 [0] : vector<128x128xf32> to vector<128xf32>
    %13 = vector.shape_cast %12 : vector<128xf32> to vector<1x128xf32>
    %14 = tpu.concatenate %10, %13 in 0 : vector<1x128xf32>, vector<1x128xf32> -> vector<2x128xf32>
    %c0_i32 = arith.constant 0 : i32
    %15 = arith.cmpi eq, %arg0, %c0_i32 : i32
    %16 = arith.extui %15 : i1 to i32
    %c0_i32_3 = arith.constant 0 : i32
    %17 = arith.cmpi ne, %16, %c0_i32_3 : i32
    scf.if %17 {
      %cst_9 = arith.constant 0.000000e+00 : f32
      %24 = vector.broadcast %cst_9 : f32 to vector<2x128xf32>
      %c0_10 = arith.constant 0 : index
      %c0_11 = arith.constant 0 : index
      %25 = vector.load %arg2[%c0_10, %c0_11] : memref<2x128xf32, #tpu.memory_space<vmem>>, vector<2x128xf32>
      tpu.vector_store %arg2[%c0_10, %c0_11], %24 {strides = array<i32>} : memref<2x128xf32, #tpu.memory_space<vmem>>, vector<2x128xf32>,
    } else {
    }
    %c0_4 = arith.constant 0 : index
    %c0_5 = arith.constant 0 : index
    %18 = vector.load %arg2[%c0_4, %c0_5] : memref<2x128xf32, #tpu.memory_space<vmem>>, vector<2x128xf32>
    %19 = arith.addf %18, %14 : vector<2x128xf32>
    %c0_6 = arith.constant 0 : index
    %c0_7 = arith.constant 0 : index
    %20 = vector.load %arg2[%c0_6, %c0_7] : memref<2x128xf32, #tpu.memory_space<vmem>>, vector<2x128xf32>
    tpu.vector_store %arg2[%c0_6, %c0_7], %19 {strides = array<i32>} : memref<2x128xf32, #tpu.memory_space<vmem>>, vector<2x128xf32>,
    %c1_i32 = arith.constant 1 : i32
    %21 = arith.cmpi eq, %arg0, %c1_i32 : i32
    %22 = arith.extui %21 : i1 to i32
    %c0_i32_8 = arith.constant 0 : i32
    %23 = arith.cmpi ne, %22, %c0_i32_8 : i32
    scf.if %23 {
      %c0_9 = arith.constant 0 : index
      %c0_10 = arith.constant 0 : index
      %24 = vector.load %arg2[%c0_9, %c0_10] : memref<2x128xf32, #tpu.memory_space<vmem>>, vector<2x128xf32>
      %25 = vector.extract_strided_slice %24 {offsets = [0, 0], sizes = [1, 128], strides = [1, 1]} : vector<2x128xf32> to vector<1x128xf32>
      %cst_11 = arith.constant 0.0073529412 : f32
      %26 = vector.broadcast %cst_11 : f32 to vector<1x128xf32>
      %27 = arith.mulf %25, %26 : vector<1x128xf32>
      %28 = vector.extract_strided_slice %24 {offsets = [1, 0], sizes = [1, 128], strides = [1, 1]} : vector<2x128xf32> to vector<1x128xf32>
      %cst_12 = arith.constant 0.0073529412 : f32
      %29 = vector.broadcast %cst_12 : f32 to vector<1x128xf32>
      %30 = arith.mulf %28, %29 : vector<1x128xf32>
      %31 = arith.mulf %27, %27 : vector<1x128xf32>
      %32 = arith.subf %30, %31 : vector<1x128xf32>
      %33 = tpu.concatenate %27, %32 in 0 : vector<1x128xf32>, vector<1x128xf32> -> vector<2x128xf32>
      %c0_13 = arith.constant 0 : index
      %c0_14 = arith.constant 0 : index
      %34 = vector.load %arg2[%c0_13, %c0_14] : memref<2x128xf32, #tpu.memory_space<vmem>>, vector<2x128xf32>
      tpu.vector_store %arg2[%c0_13, %c0_14], %33 {strides = array<i32>} : memref<2x128xf32, #tpu.memory_space<vmem>>, vector<2x128xf32>,
    } else {
    }
    return
  }
  func.func @transform_0(%arg0: i32) -> (i32, i32) {
    %c0_i32 = arith.constant 0 : i32
    %c0_i32_0 = arith.constant 0 : i32
    return %arg0, %c0_i32 : i32, i32
  }
  func.func @transform_1(%arg0: i32) -> (i32, i32) {
    %c0_i32 = arith.constant 0 : i32
    %c0_i32_0 = arith.constant 0 : i32
    %c0_i32_1 = arith.constant 0 : i32
    return %c0_i32, %c0_i32_0 : i32, i32
  }
}

module attributes {stable_mosaic.version = 11 : i64} {
  func.func @_scatter_node_kernel(%arg0: i32, %arg1: i32, %arg2: memref<1x128xi32, #tpu.memory_space<vmem>>, %arg3: memref<128x256xbf16, #tpu.memory_space<vmem>>, %arg4: memref<128x128xf32, #tpu.memory_space<vmem>>, %arg5: memref<128x128xf32, #tpu.memory_space<vmem>>, %arg6: memref<128x256xf32, #tpu.memory_space<vmem>>) attributes {dimension_semantics = [#tpu.dimension_semantics<parallel>, #tpu.dimension_semantics<arbitrary>], iteration_bounds = array<i64: 2, 3>, scalar_prefetch = 0 : i64, scratch_operands = 1 : i64, tpu.core_type = #tpu.core_type<tc>, window_params = [{transform_indices = @transform_0, window_bounds = array<i64: 1, 128>}, {transform_indices = @transform_1, window_bounds = array<i64: 128, 256>}, {transform_indices = @transform_2, window_bounds = array<i64: 128, 128>}, {transform_indices = @transform_3, window_bounds = array<i64: 128, 128>}]} {
    %c0_i32 = arith.constant 0 : i32
    %0 = arith.cmpi eq, %arg1, %c0_i32 : i32
    %1 = arith.extui %0 : i1 to i32
    %c0_i32_0 = arith.constant 0 : i32
    %2 = arith.cmpi ne, %1, %c0_i32_0 : i32
    scf.if %2 {
      %cst_9 = arith.constant 0.000000e+00 : f32
      %21 = vector.broadcast %cst_9 : f32 to vector<128x256xf32>
      %c0_10 = arith.constant 0 : index
      %c0_11 = arith.constant 0 : index
      %22 = vector.load %arg6[%c0_10, %c0_11] : memref<128x256xf32, #tpu.memory_space<vmem>>, vector<128x256xf32>
      tpu.vector_store %arg6[%c0_10, %c0_11], %21 {strides = array<i32>} : memref<128x256xf32, #tpu.memory_space<vmem>>, vector<128x256xf32>,
    } else {
    }
    %3 = tpu.iota {dimensions = array<i32: 0>} : vector<128x128xi32>
    %c128_i32 = arith.constant 128 : i32
    %4 = arith.muli %arg0, %c128_i32 : i32
    %5 = vector.broadcast %4 : i32 to vector<128x128xi32>
    %6 = arith.addi %3, %5 : vector<128x128xi32>
    %c0 = arith.constant 0 : index
    %c0_1 = arith.constant 0 : index
    %7 = vector.load %arg2[%c0, %c0_1] : memref<1x128xi32, #tpu.memory_space<vmem>>, vector<1x128xi32>
    %8 = vector.broadcast %7 : vector<1x128xi32> to vector<128x128xi32>
    %9 = arith.cmpi eq, %6, %8 : vector<128x128xi32>
    %10 = arith.extui %9 : vector<128x128xi1> to vector<128x128xi32>
    %11 = arith.sitofp %10 : vector<128x128xi32> to vector<128x128xf32>
    %12 = arith.truncf %11 : vector<128x128xf32> to vector<128x128xbf16>
    %c0_2 = arith.constant 0 : index
    %c0_3 = arith.constant 0 : index
    %13 = vector.load %arg6[%c0_2, %c0_3] : memref<128x256xf32, #tpu.memory_space<vmem>>, vector<128x256xf32>
    %c0_4 = arith.constant 0 : index
    %c0_5 = arith.constant 0 : index
    %14 = vector.load %arg3[%c0_4, %c0_5] : memref<128x256xbf16, #tpu.memory_space<vmem>>, vector<128x256xbf16>
    %cst = arith.constant dense<0.000000e+00> : vector<128x256xf32>
    %15 = tpu.matmul %12, %14, %cst {dimension_numbers = #tpu.dot_dimension_numbers<[1], [0], [0], [1], [0, 0, 1, 1], [], []>} : vector<128x128xbf16>, vector<128x256xbf16>, vector<128x256xf32> -> vector<128x256xf32>
    %16 = arith.addf %13, %15 : vector<128x256xf32>
    %c0_6 = arith.constant 0 : index
    %c0_7 = arith.constant 0 : index
    %17 = vector.load %arg6[%c0_6, %c0_7] : memref<128x256xf32, #tpu.memory_space<vmem>>, vector<128x256xf32>
    tpu.vector_store %arg6[%c0_6, %c0_7], %16 {strides = array<i32>} : memref<128x256xf32, #tpu.memory_space<vmem>>, vector<128x256xf32>,
    %c2_i32 = arith.constant 2 : i32
    %18 = arith.cmpi eq, %arg1, %c2_i32 : i32
    %19 = arith.extui %18 : i1 to i32
    %c0_i32_8 = arith.constant 0 : i32
    %20 = arith.cmpi ne, %19, %c0_i32_8 : i32
    scf.if %20 {
      %c0_9 = arith.constant 0 : index
      %c0_10 = arith.constant 0 : index
      %21 = vector.load %arg6[%c0_9, %c0_10] : memref<128x256xf32, #tpu.memory_space<vmem>>, vector<128x256xf32>
      %22 = vector.extract_strided_slice %21 {offsets = [0, 0], sizes = [128, 128], strides = [1, 1]} : vector<128x256xf32> to vector<128x128xf32>
      %23 = vector.extract_strided_slice %21 {offsets = [0, 128], sizes = [128, 128], strides = [1, 1]} : vector<128x256xf32> to vector<128x128xf32>
      %cst_11 = arith.constant 9.99999997E-7 : f32
      %24 = vector.broadcast %cst_11 : f32 to vector<128x128xf32>
      %25 = arith.addf %23, %24 : vector<128x128xf32>
      %26 = tpu.reciprocal %25 {approx = true} : vector<128x128xf32> -> vector<128x128xf32>
      %27 = arith.mulf %22, %26 : vector<128x128xf32>
      %c0_12 = arith.constant 0 : index
      %c0_13 = arith.constant 0 : index
      %28 = vector.load %arg4[%c0_12, %c0_13] : memref<128x128xf32, #tpu.memory_space<vmem>>, vector<128x128xf32>
      %29 = arith.addf %28, %27 : vector<128x128xf32>
      %c0_14 = arith.constant 0 : index
      %c0_15 = arith.constant 0 : index
      %30 = vector.load %arg5[%c0_14, %c0_15] : memref<128x128xf32, #tpu.memory_space<vmem>>, vector<128x128xf32>
      tpu.vector_store %arg5[%c0_14, %c0_15], %29 {strides = array<i32>} : memref<128x128xf32, #tpu.memory_space<vmem>>, vector<128x128xf32>,
    } else {
    }
    return
  }
  func.func @transform_0(%arg0: i32, %arg1: i32) -> (i32, i32) {
    %c0_i32 = arith.constant 0 : i32
    %c0_i32_0 = arith.constant 0 : i32
    return %c0_i32, %arg1 : i32, i32
  }
  func.func @transform_1(%arg0: i32, %arg1: i32) -> (i32, i32) {
    %c0_i32 = arith.constant 0 : i32
    %c0_i32_0 = arith.constant 0 : i32
    return %arg1, %c0_i32 : i32, i32
  }
  func.func @transform_2(%arg0: i32, %arg1: i32) -> (i32, i32) {
    %c0_i32 = arith.constant 0 : i32
    %c0_i32_0 = arith.constant 0 : i32
    return %arg0, %c0_i32 : i32, i32
  }
  func.func @transform_3(%arg0: i32, %arg1: i32) -> (i32, i32) {
    %c0_i32 = arith.constant 0 : i32
    %c0_i32_0 = arith.constant 0 : i32
    return %arg0, %c0_i32 : i32, i32
  }
}

module attributes {stable_mosaic.version = 11 : i64} {
  func.func @_bn_silu_res_kernel(%arg0: i32, %arg1: memref<128x128xf32, #tpu.memory_space<vmem>>, %arg2: memref<128x128xf32, #tpu.memory_space<vmem>>, %arg3: memref<2x128xf32, #tpu.memory_space<vmem>>, %arg4: memref<1x128xf32, #tpu.memory_space<vmem>>, %arg5: memref<1x128xf32, #tpu.memory_space<vmem>>, %arg6: memref<128x128xf32, #tpu.memory_space<vmem>>) attributes {dimension_semantics = [#tpu.dimension_semantics<parallel>], iteration_bounds = array<i64: 2>, scalar_prefetch = 0 : i64, scratch_operands = 0 : i64, tpu.core_type = #tpu.core_type<tc>, window_params = [{transform_indices = @transform_0, window_bounds = array<i64: 128, 128>}, {transform_indices = @transform_1, window_bounds = array<i64: 128, 128>}, {pipeline_mode = #tpu.pipeline_mode<synchronous>, transform_indices = @transform_2, window_bounds = array<i64: 2, 128>}, {pipeline_mode = #tpu.pipeline_mode<synchronous>, transform_indices = @transform_3, window_bounds = array<i64: 1, 128>}, {pipeline_mode = #tpu.pipeline_mode<synchronous>, transform_indices = @transform_4, window_bounds = array<i64: 1, 128>}, {transform_indices = @transform_5, window_bounds = array<i64: 128, 128>}]} {
    %c0 = arith.constant 0 : index
    %c0_0 = arith.constant 0 : index
    %0 = vector.load %arg3[%c0, %c0_0] : memref<2x128xf32, #tpu.memory_space<vmem>>, vector<1x128xf32>
    %c1 = arith.constant 1 : index
    %c0_1 = arith.constant 0 : index
    %1 = vector.load %arg3[%c1, %c0_1] : memref<2x128xf32, #tpu.memory_space<vmem>>, vector<1x128xf32>
    %c0_2 = arith.constant 0 : index
    %c0_3 = arith.constant 0 : index
    %2 = vector.load %arg1[%c0_2, %c0_3] : memref<128x128xf32, #tpu.memory_space<vmem>>, vector<128x128xf32>
    %3 = vector.broadcast %0 : vector<1x128xf32> to vector<128x128xf32>
    %4 = arith.subf %2, %3 : vector<128x128xf32>
    %cst = arith.constant 9.99999974E-6 : f32
    %5 = vector.broadcast %cst : f32 to vector<1x128xf32>
    %6 = arith.addf %1, %5 : vector<1x128xf32>
    %7 = math.rsqrt %6 : vector<1x128xf32>
    %8 = vector.broadcast %7 : vector<1x128xf32> to vector<128x128xf32>
    %9 = arith.mulf %4, %8 : vector<128x128xf32>
    %c0_4 = arith.constant 0 : index
    %c0_5 = arith.constant 0 : index
    %10 = vector.load %arg4[%c0_4, %c0_5] : memref<1x128xf32, #tpu.memory_space<vmem>>, vector<1x128xf32>
    %11 = vector.broadcast %10 : vector<1x128xf32> to vector<128x128xf32>
    %12 = arith.mulf %9, %11 : vector<128x128xf32>
    %c0_6 = arith.constant 0 : index
    %c0_7 = arith.constant 0 : index
    %13 = vector.load %arg5[%c0_6, %c0_7] : memref<1x128xf32, #tpu.memory_space<vmem>>, vector<1x128xf32>
    %14 = vector.broadcast %13 : vector<1x128xf32> to vector<128x128xf32>
    %15 = arith.addf %12, %14 : vector<128x128xf32>
    %16 = arith.negf %15 : vector<128x128xf32>
    %17 = math.exp %16 : vector<128x128xf32>
    %cst_8 = arith.constant 1.000000e+00 : f32
    %18 = vector.broadcast %cst_8 : f32 to vector<128x128xf32>
    %19 = arith.addf %18, %17 : vector<128x128xf32>
    %20 = arith.divf %18, %19 : vector<128x128xf32>
    %21 = arith.mulf %15, %20 : vector<128x128xf32>
    %c0_9 = arith.constant 0 : index
    %c0_10 = arith.constant 0 : index
    %22 = vector.load %arg2[%c0_9, %c0_10] : memref<128x128xf32, #tpu.memory_space<vmem>>, vector<128x128xf32>
    %23 = arith.addf %22, %21 : vector<128x128xf32>
    %c0_11 = arith.constant 0 : index
    %c0_12 = arith.constant 0 : index
    %24 = vector.load %arg6[%c0_11, %c0_12] : memref<128x128xf32, #tpu.memory_space<vmem>>, vector<128x128xf32>
    tpu.vector_store %arg6[%c0_11, %c0_12], %23 {strides = array<i32>} : memref<128x128xf32, #tpu.memory_space<vmem>>, vector<128x128xf32>,
    return
  }
  func.func @transform_0(%arg0: i32) -> (i32, i32) {
    %c0_i32 = arith.constant 0 : i32
    %c0_i32_0 = arith.constant 0 : i32
    return %arg0, %c0_i32 : i32, i32
  }
  func.func @transform_1(%arg0: i32) -> (i32, i32) {
    %c0_i32 = arith.constant 0 : i32
    %c0_i32_0 = arith.constant 0 : i32
    return %arg0, %c0_i32 : i32, i32
  }
  func.func @transform_2(%arg0: i32) -> (i32, i32) {
    %c0_i32 = arith.constant 0 : i32
    %c0_i32_0 = arith.constant 0 : i32
    %c0_i32_1 = arith.constant 0 : i32
    return %c0_i32, %c0_i32_0 : i32, i32
  }
  func.func @transform_3(%arg0: i32) -> (i32, i32) {
    %c0_i32 = arith.constant 0 : i32
    %c0_i32_0 = arith.constant 0 : i32
    %c0_i32_1 = arith.constant 0 : i32
    return %c0_i32, %c0_i32_0 : i32, i32
  }
  func.func @transform_4(%arg0: i32) -> (i32, i32) {
    %c0_i32 = arith.constant 0 : i32
    %c0_i32_0 = arith.constant 0 : i32
    %c0_i32_1 = arith.constant 0 : i32
    return %c0_i32, %c0_i32_0 : i32, i32
  }
  func.func @transform_5(%arg0: i32) -> (i32, i32) {
    %c0_i32 = arith.constant 0 : i32
    %c0_i32_0 = arith.constant 0 : i32
    return %arg0, %c0_i32 : i32, i32
  }
}

module attributes {stable_mosaic.version = 11 : i64} {
  func.func @_bn_stats_kernel(%arg0: i32, %arg1: memref<128x128xf32, #tpu.memory_space<vmem>>, %arg2: memref<2x128xf32, #tpu.memory_space<vmem>>) attributes {dimension_semantics = [#tpu.dimension_semantics<arbitrary>], iteration_bounds = array<i64: 4>, scalar_prefetch = 0 : i64, scratch_operands = 0 : i64, tpu.core_type = #tpu.core_type<tc>, window_params = [{transform_indices = @transform_0, window_bounds = array<i64: 128, 128>}, {pipeline_mode = #tpu.pipeline_mode<synchronous>, transform_indices = @transform_1, window_bounds = array<i64: 2, 128>}]} {
    %c0 = arith.constant 0 : index
    %c0_0 = arith.constant 0 : index
    %0 = vector.load %arg1[%c0, %c0_0] : memref<128x128xf32, #tpu.memory_space<vmem>>, vector<128x128xf32>
    %1 = tpu.iota {dimensions = array<i32: 0>} : vector<128x128xi32>
    %c128_i32 = arith.constant 128 : i32
    %2 = arith.muli %arg0, %c128_i32 : i32
    %3 = vector.broadcast %2 : i32 to vector<128x128xi32>
    %4 = arith.addi %1, %3 : vector<128x128xi32>
    %c400_i32 = arith.constant 400 : i32
    %5 = vector.broadcast %c400_i32 : i32 to vector<128x128xi32>
    %6 = arith.cmpi slt, %4, %5 : vector<128x128xi32>
    %cst = arith.constant 0.000000e+00 : f32
    %7 = vector.broadcast %cst : f32 to vector<128x128xf32>
    %8 = arith.select %6, %0, %7 : vector<128x128xi1>, vector<128x128xf32>
    %cst_1 = arith.constant dense<0.000000e+00> : vector<128xf32>
    %9 = vector.multi_reduction <add>, %8, %cst_1 [0] : vector<128x128xf32> to vector<128xf32>
    %10 = vector.shape_cast %9 : vector<128xf32> to vector<1x128xf32>
    %11 = arith.mulf %8, %8 : vector<128x128xf32>
    %cst_2 = arith.constant dense<0.000000e+00> : vector<128xf32>
    %12 = vector.multi_reduction <add>, %11, %cst_2 [0] : vector<128x128xf32> to vector<128xf32>
    %13 = vector.shape_cast %12 : vector<128xf32> to vector<1x128xf32>
    %14 = tpu.concatenate %10, %13 in 0 : vector<1x128xf32>, vector<1x128xf32> -> vector<2x128xf32>
    %c0_i32 = arith.constant 0 : i32
    %15 = arith.cmpi eq, %arg0, %c0_i32 : i32
    %16 = arith.extui %15 : i1 to i32
    %c0_i32_3 = arith.constant 0 : i32
    %17 = arith.cmpi ne, %16, %c0_i32_3 : i32
    scf.if %17 {
      %cst_9 = arith.constant 0.000000e+00 : f32
      %24 = vector.broadcast %cst_9 : f32 to vector<2x128xf32>
      %c0_10 = arith.constant 0 : index
      %c0_11 = arith.constant 0 : index
      %25 = vector.load %arg2[%c0_10, %c0_11] : memref<2x128xf32, #tpu.memory_space<vmem>>, vector<2x128xf32>
      tpu.vector_store %arg2[%c0_10, %c0_11], %24 {strides = array<i32>} : memref<2x128xf32, #tpu.memory_space<vmem>>, vector<2x128xf32>,
    } else {
    }
    %c0_4 = arith.constant 0 : index
    %c0_5 = arith.constant 0 : index
    %18 = vector.load %arg2[%c0_4, %c0_5] : memref<2x128xf32, #tpu.memory_space<vmem>>, vector<2x128xf32>
    %19 = arith.addf %18, %14 : vector<2x128xf32>
    %c0_6 = arith.constant 0 : index
    %c0_7 = arith.constant 0 : index
    %20 = vector.load %arg2[%c0_6, %c0_7] : memref<2x128xf32, #tpu.memory_space<vmem>>, vector<2x128xf32>
    tpu.vector_store %arg2[%c0_6, %c0_7], %19 {strides = array<i32>} : memref<2x128xf32, #tpu.memory_space<vmem>>, vector<2x128xf32>,
    %c3_i32 = arith.constant 3 : i32
    %21 = arith.cmpi eq, %arg0, %c3_i32 : i32
    %22 = arith.extui %21 : i1 to i32
    %c0_i32_8 = arith.constant 0 : i32
    %23 = arith.cmpi ne, %22, %c0_i32_8 : i32
    scf.if %23 {
      %c0_9 = arith.constant 0 : index
      %c0_10 = arith.constant 0 : index
      %24 = vector.load %arg2[%c0_9, %c0_10] : memref<2x128xf32, #tpu.memory_space<vmem>>, vector<2x128xf32>
      %25 = vector.extract_strided_slice %24 {offsets = [0, 0], sizes = [1, 128], strides = [1, 1]} : vector<2x128xf32> to vector<1x128xf32>
      %cst_11 = arith.constant 2.500000e-03 : f32
      %26 = vector.broadcast %cst_11 : f32 to vector<1x128xf32>
      %27 = arith.mulf %25, %26 : vector<1x128xf32>
      %28 = vector.extract_strided_slice %24 {offsets = [1, 0], sizes = [1, 128], strides = [1, 1]} : vector<2x128xf32> to vector<1x128xf32>
      %cst_12 = arith.constant 2.500000e-03 : f32
      %29 = vector.broadcast %cst_12 : f32 to vector<1x128xf32>
      %30 = arith.mulf %28, %29 : vector<1x128xf32>
      %31 = arith.mulf %27, %27 : vector<1x128xf32>
      %32 = arith.subf %30, %31 : vector<1x128xf32>
      %33 = tpu.concatenate %27, %32 in 0 : vector<1x128xf32>, vector<1x128xf32> -> vector<2x128xf32>
      %c0_13 = arith.constant 0 : index
      %c0_14 = arith.constant 0 : index
      %34 = vector.load %arg2[%c0_13, %c0_14] : memref<2x128xf32, #tpu.memory_space<vmem>>, vector<2x128xf32>
      tpu.vector_store %arg2[%c0_13, %c0_14], %33 {strides = array<i32>} : memref<2x128xf32, #tpu.memory_space<vmem>>, vector<2x128xf32>,
    } else {
    }
    return
  }
  func.func @transform_0(%arg0: i32) -> (i32, i32) {
    %c0_i32 = arith.constant 0 : i32
    %c0_i32_0 = arith.constant 0 : i32
    return %arg0, %c0_i32 : i32, i32
  }
  func.func @transform_1(%arg0: i32) -> (i32, i32) {
    %c0_i32 = arith.constant 0 : i32
    %c0_i32_0 = arith.constant 0 : i32
    %c0_i32_1 = arith.constant 0 : i32
    return %c0_i32, %c0_i32_0 : i32, i32
  }
}

module attributes {stable_mosaic.version = 11 : i64} {
  func.func @_bn_silu_res_kernel(%arg0: i32, %arg1: memref<128x128xf32, #tpu.memory_space<vmem>>, %arg2: memref<128x128xf32, #tpu.memory_space<vmem>>, %arg3: memref<2x128xf32, #tpu.memory_space<vmem>>, %arg4: memref<1x128xf32, #tpu.memory_space<vmem>>, %arg5: memref<1x128xf32, #tpu.memory_space<vmem>>, %arg6: memref<128x128xf32, #tpu.memory_space<vmem>>) attributes {dimension_semantics = [#tpu.dimension_semantics<parallel>], iteration_bounds = array<i64: 4>, scalar_prefetch = 0 : i64, scratch_operands = 0 : i64, tpu.core_type = #tpu.core_type<tc>, window_params = [{transform_indices = @transform_0, window_bounds = array<i64: 128, 128>}, {transform_indices = @transform_1, window_bounds = array<i64: 128, 128>}, {pipeline_mode = #tpu.pipeline_mode<synchronous>, transform_indices = @transform_2, window_bounds = array<i64: 2, 128>}, {pipeline_mode = #tpu.pipeline_mode<synchronous>, transform_indices = @transform_3, window_bounds = array<i64: 1, 128>}, {pipeline_mode = #tpu.pipeline_mode<synchronous>, transform_indices = @transform_4, window_bounds = array<i64: 1, 128>}, {transform_indices = @transform_5, window_bounds = array<i64: 128, 128>}]} {
    %c0 = arith.constant 0 : index
    %c0_0 = arith.constant 0 : index
    %0 = vector.load %arg3[%c0, %c0_0] : memref<2x128xf32, #tpu.memory_space<vmem>>, vector<1x128xf32>
    %c1 = arith.constant 1 : index
    %c0_1 = arith.constant 0 : index
    %1 = vector.load %arg3[%c1, %c0_1] : memref<2x128xf32, #tpu.memory_space<vmem>>, vector<1x128xf32>
    %c0_2 = arith.constant 0 : index
    %c0_3 = arith.constant 0 : index
    %2 = vector.load %arg1[%c0_2, %c0_3] : memref<128x128xf32, #tpu.memory_space<vmem>>, vector<128x128xf32>
    %3 = vector.broadcast %0 : vector<1x128xf32> to vector<128x128xf32>
    %4 = arith.subf %2, %3 : vector<128x128xf32>
    %cst = arith.constant 9.99999974E-6 : f32
    %5 = vector.broadcast %cst : f32 to vector<1x128xf32>
    %6 = arith.addf %1, %5 : vector<1x128xf32>
    %7 = math.rsqrt %6 : vector<1x128xf32>
    %8 = vector.broadcast %7 : vector<1x128xf32> to vector<128x128xf32>
    %9 = arith.mulf %4, %8 : vector<128x128xf32>
    %c0_4 = arith.constant 0 : index
    %c0_5 = arith.constant 0 : index
    %10 = vector.load %arg4[%c0_4, %c0_5] : memref<1x128xf32, #tpu.memory_space<vmem>>, vector<1x128xf32>
    %11 = vector.broadcast %10 : vector<1x128xf32> to vector<128x128xf32>
    %12 = arith.mulf %9, %11 : vector<128x128xf32>
    %c0_6 = arith.constant 0 : index
    %c0_7 = arith.constant 0 : index
    %13 = vector.load %arg5[%c0_6, %c0_7] : memref<1x128xf32, #tpu.memory_space<vmem>>, vector<1x128xf32>
    %14 = vector.broadcast %13 : vector<1x128xf32> to vector<128x128xf32>
    %15 = arith.addf %12, %14 : vector<128x128xf32>
    %16 = arith.negf %15 : vector<128x128xf32>
    %17 = math.exp %16 : vector<128x128xf32>
    %cst_8 = arith.constant 1.000000e+00 : f32
    %18 = vector.broadcast %cst_8 : f32 to vector<128x128xf32>
    %19 = arith.addf %18, %17 : vector<128x128xf32>
    %20 = arith.divf %18, %19 : vector<128x128xf32>
    %21 = arith.mulf %15, %20 : vector<128x128xf32>
    %c0_9 = arith.constant 0 : index
    %c0_10 = arith.constant 0 : index
    %22 = vector.load %arg2[%c0_9, %c0_10] : memref<128x128xf32, #tpu.memory_space<vmem>>, vector<128x128xf32>
    %23 = arith.addf %22, %21 : vector<128x128xf32>
    %c0_11 = arith.constant 0 : index
    %c0_12 = arith.constant 0 : index
    %24 = vector.load %arg6[%c0_11, %c0_12] : memref<128x128xf32, #tpu.memory_space<vmem>>, vector<128x128xf32>
    tpu.vector_store %arg6[%c0_11, %c0_12], %23 {strides = array<i32>} : memref<128x128xf32, #tpu.memory_space<vmem>>, vector<128x128xf32>,
    return
  }
  func.func @transform_0(%arg0: i32) -> (i32, i32) {
    %c0_i32 = arith.constant 0 : i32
    %c0_i32_0 = arith.constant 0 : i32
    return %arg0, %c0_i32 : i32, i32
  }
  func.func @transform_1(%arg0: i32) -> (i32, i32) {
    %c0_i32 = arith.constant 0 : i32
    %c0_i32_0 = arith.constant 0 : i32
    return %arg0, %c0_i32 : i32, i32
  }
  func.func @transform_2(%arg0: i32) -> (i32, i32) {
    %c0_i32 = arith.constant 0 : i32
    %c0_i32_0 = arith.constant 0 : i32
    %c0_i32_1 = arith.constant 0 : i32
    return %c0_i32, %c0_i32_0 : i32, i32
  }
  func.func @transform_3(%arg0: i32) -> (i32, i32) {
    %c0_i32 = arith.constant 0 : i32
    %c0_i32_0 = arith.constant 0 : i32
    %c0_i32_1 = arith.constant 0 : i32
    return %c0_i32, %c0_i32_0 : i32, i32
  }
  func.func @transform_4(%arg0: i32) -> (i32, i32) {
    %c0_i32 = arith.constant 0 : i32
    %c0_i32_0 = arith.constant 0 : i32
    %c0_i32_1 = arith.constant 0 : i32
    return %c0_i32, %c0_i32_0 : i32, i32
  }
  func.func @transform_5(%arg0: i32) -> (i32, i32) {
    %c0_i32 = arith.constant 0 : i32
    %c0_i32_0 = arith.constant 0 : i32
    return %arg0, %c0_i32 : i32, i32
  }
}

</mosaic_0001>

<bundles_post_ra>
// kernel: alignn_conv.14
= control target key start
LH: loop header
LB: loop body
LE: loop exit
PB: predicated region body
PF: predicated region fallthrough
CT: control target
= control target key end

     0   :  { %s918_s15 = smov 0   ;;  %s1339_s0 = inlined_call_operand.vmem [shape: f32[384,128], index: 0, kind: input, shape index: {}]   ;;  %s1340_s1 = inlined_call_operand.vmem [shape: f32[128,512], index: 1, kind: input, shape index: {}]   ;;  %s1341_s2 = inlined_call_operand.vmem [shape: f32[1,512], index: 2, kind: input, shape index: {}]   ;;  %s1342_s3 = inlined_call_operand.vmem [shape: f32[384,384], index: 3, kind: output, shape index: {0}]   ;;  %s1343_s4 = inlined_call_operand.vmem [shape: f32[384,128], index: 4, kind: output, shape index: {1}]  }
   0x1 LB: > { %s797_s16 = sadd.s32 4294967295, %s890_s15   ;;  %p801_p0 = scmp.ge.s32.totalorder %s890_s15, 1  ;;  %s890_s15 = sphi %s918_s15, %s15_s15  }
   0x2   : > { %p166_p1 = scmp.lt.s32.totalorder %s890_s15, 4 }
   0x4   : > { %p167_p2 = pnand %p801_p0, %p166_p1 }
   0x5   : > { %v234_v0 = vld [vmem:[%s1340_s1 + $0x8] sm:$0xff] (!%p167_p2)  ;;  %v236_v2 = vld [vmem:[%s1340_s1 + $0x18] sm:$0xff] (!%p167_p2)  ;;  %v233_v5 = vld [vmem:[%s1340_s1] sm:$0xff] (!%p167_p2)  ;;  %v892_v7 = vmov (!%p167_p2), 0.0   ;;  %s1062_s7 = sshll.u32 (!%p167_p2), %s797_s16, 4 }
   0x6   : > { %170 = sbr.rel (%p167_p2) target bundleno = 318 (0x13e), region = 32  ;;  %v238_v1 = vld [vmem:[%s1340_s1 + $0x28] sm:$0xff] (!%p167_p2)  ;;  %v240_v4 = vld [vmem:[%s1340_s1 + $0x38] sm:$0xff] (!%p167_p2)  ;;  %v237_v6 = vld [vmem:[%s1340_s1 + $0x20] sm:$0xff] (!%p167_p2)  ;;  %383 = vmatprep.mubr.f32.mxu0 (!%p167_p2), %v892_v7  ;;  %544 = vmatprep.mubr.f32.mxu1 (!%p167_p2), %v892_v7  ;;  %p199_p3 = scmp.lt.s32.totalorder (!%p167_p2), %s1062_s7, 47 }
   0x7   : > { %v810_v3 = vpack.c.bf16 (!%p167_p2), %v238_v1, %v234_v0  ;;  %v842_v8 = vpack.c.bf16 (!%p167_p2), %v240_v4, %v236_v2  ;;  %v812_v9 = vpack.c.bf16 (!%p167_p2), %v237_v6, %v233_v5  ;;  %v235_v10 = vld [vmem:[%s1340_s1 + $0x10] sm:$0xff] (!%p167_p2)  ;;  %v242_v12 = vld [vmem:[%s1340_s1 + $0x48] sm:$0xff] (!%p167_p2)  ;;  %v244_v15 = vld [vmem:[%s1340_s1 + $0x58] sm:$0xff] (!%p167_p2) }
   0x8   : > { %v239_v11 = vld [vmem:[%s1340_s1 + $0x30] sm:$0xff] (!%p167_p2)  ;;  %v246_v14 = vld [vmem:[%s1340_s1 + $0x68] sm:$0xff] (!%p167_p2)  ;;  %v248_v16 = vld [vmem:[%s1340_s1 + $0x78] sm:$0xff] (!%p167_p2) }
   0x9   : > { %811 = vmatprep.subr.bf16.mxu0 (!%p167_p2), %v810_v3  ;;  %v844_v13 = vpack.c.bf16 (!%p167_p2), %v239_v11, %v235_v10  ;;  %843 = vmatprep.subr.bf16.mxu1 (!%p167_p2), %v842_v8  ;;  %v814_v17 = vpack.c.bf16 (!%p167_p2), %v246_v14, %v242_v12  ;;  %v846_v18 = vpack.c.bf16 (!%p167_p2), %v248_v16, %v244_v15  ;;  %v241_v19 = vld [vmem:[%s1340_s1 + $0x40] sm:$0xff] (!%p167_p2)  ;;  %v243_v21 = vld [vmem:[%s1340_s1 + $0x50] sm:$0xff] (!%p167_p2)  ;;  %v250_v24 = vld [vmem:[%s1340_s1 + $0x88] sm:$0xff] (!%p167_p2) }
   0xa   : > { %813 = vmatpush1.bf16.msra.mxu0 (!%p167_p2), %v812_v9  ;;  %v245_v20 = vld [vmem:[%s1340_s1 + $0x60] sm:$0xff] (!%p167_p2)  ;;  %v247_v23 = vld [vmem:[%s1340_s1 + $0x70] sm:$0xff] (!%p167_p2)  ;;  %v254_v25 = vld [vmem:[%s1340_s1 + $0xa8] sm:$0xff] (!%p167_p2) }
   0xb   : > { %845 = vmatpush1.bf16.msra.mxu1 (!%p167_p2), %v844_v13  ;;  %v816_v22 = vpack.c.bf16 (!%p167_p2), %v245_v20, %v241_v19  ;;  %815 = vmatprep.subr.bf16.mxu0 (!%p167_p2), %v814_v17  ;;  %v848_v26 = vpack.c.bf16 (!%p167_p2), %v247_v23, %v243_v21  ;;  %v818_v27 = vpack.c.bf16 (!%p167_p2), %v254_v25, %v250_v24  ;;  %v252_v28 = vld [vmem:[%s1340_s1 + $0x98] sm:$0xff] (!%p167_p2)  ;;  %v249_v30 = vld [vmem:[%s1340_s1 + $0x80] sm:$0xff] (!%p167_p2)  ;;  %v251_v33 = vld [vmem:[%s1340_s1 + $0x90] sm:$0xff] (!%p167_p2) }
   0xc   : > { %847 = vmatprep.subr.bf16.mxu1 (!%p167_p2), %v846_v18  ;;  %v256_v29 = vld [vmem:[%s1340_s1 + $0xb8] sm:$0xff] (!%p167_p2)  ;;  %v253_v32 = vld [vmem:[%s1340_s1 + $0xa0] sm:$0xff] (!%p167_p2)  ;;  %v255_v34 = vld [vmem:[%s1340_s1 + $0xb0] sm:$0xff] (!%p167_p2) }
   0xd   : > { %v850_v31 = vpack.c.bf16 %v256_v29, %v252_v28  ;;  %v820_v35 = vpack.c.bf16 %v253_v32, %v249_v30  ;;  %v258_v36 = vld [vmem:[%s1340_s1 + $0xc8] sm:$0xff]  ;;  %v260_v38 = vld [vmem:[%s1340_s1 + $0xd8] sm:$0xff]  ;;  %v852_v39 = vpack.c.bf16 %v255_v34, %v251_v33  ;;  %v257_v42 = vld [vmem:[%s1340_s1 + $0xc0] sm:$0xff]  ;;  %s1345_s7 = smov (!%p199_p3, %s1062_s7), 47 }
   0xe   : > { %817 = vmatpush1.bf16.msra.mxu0 %v816_v22  ;;  %v262_v37 = vld [vmem:[%s1340_s1 + $0xe8] sm:$0xff]  ;;  %v264_v41 = vld [vmem:[%s1340_s1 + $0xf8] sm:$0xff]  ;;  %v261_v43 = vld [vmem:[%s1340_s1 + $0xe0] sm:$0xff]  ;;  %s803_s25 = sshll.u32 %s1345_s7, 3  ;;  %s874_s5 = smul.u32 24, %s1345_s7 }
   0xf   : > { %849 = vmatpush1.bf16.msra.mxu1 %v848_v26  ;;  %819 = vmatprep.subr.bf16.mxu0 %v818_v27  ;;  %v822_v40 = vpack.c.bf16 %v262_v37, %v258_v36  ;;  %v854_v44 = vpack.c.bf16 %v264_v41, %v260_v38  ;;  %v259_v45 = vld [vmem:[%s1340_s1 + $0xd0] sm:$0xff]  ;;  %v266_v47 = vld [vmem:[%s1340_s1 + $0x108] sm:$0xff]  ;;  %v268_v49 = vld [vmem:[%s1340_s1 + $0x118] sm:$0xff]  ;;  %v824_v51 = vpack.c.bf16 %v261_v43, %v257_v42  ;;  %s1136_s28 = scalar_lea.vmem %s1339_s0, %s803_s25  ;;  %s1209_s12 = scalar_lea.vmem %s1343_s4, %s803_s25 }
  0x10   : > { %851 = vmatprep.subr.bf16.mxu1 %v850_v31  ;;  %v263_v46 = vld [vmem:[%s1340_s1 + $0xf0] sm:$0xff]  ;;  %v270_v48 = vld [vmem:[%s1340_s1 + $0x128] sm:$0xff]  ;;  %v272_v50 = vld [vmem:[%s1340_s1 + $0x138] sm:$0xff]  ;;  %s1199_s9 = scalar_lea.vmem %s1342_s3, %s874_s5 }
  0x11   : > { %v856_v52 = vpack.c.bf16 %v263_v46, %v259_v45  ;;  %v826_v53 = vpack.c.bf16 %v270_v48, %v266_v47  ;;  %v265_v54 = vld [vmem:[%s1340_s1 + $0x100] sm:$0xff]  ;;  %v267_v56 = vld [vmem:[%s1340_s1 + $0x110] sm:$0xff]  ;;  %v858_v57 = vpack.c.bf16 %v272_v50, %v268_v49  ;;  %v274_v59 = vld [vmem:[%s1340_s1 + $0x148] sm:$0xff]  ;;  %v299_v50 = vlaneseq }
  0x12   : > { %821 = vmatpush1.bf16.msra.mxu0 %v820_v35  ;;  %v269_v55 = vld [vmem:[%s1340_s1 + $0x120] sm:$0xff]  ;;  %v271_v58 = vld [vmem:[%s1340_s1 + $0x130] sm:$0xff]  ;;  %v278_v60 = vld [vmem:[%s1340_s1 + $0x168] sm:$0xff] }
  0x13   : > { %853 = vmatpush1.bf16.msra.mxu1 %v852_v39  ;;  %823 = vmatprep.subr.bf16.mxu0 %v822_v40  ;;  %v276_v61 = vld [vmem:[%s1340_s1 + $0x158] sm:$0xff]  ;;  %v828_v63 = vpack.c.bf16 %v269_v55, %v265_v54  ;;  %v860_v0 = vpack.c.bf16 %v271_v58, %v267_v56  ;;  %v830_v1 = vpack.c.bf16 %v278_v60, %v274_v59  ;;  %v273_v2 = vld [vmem:[%s1340_s1 + $0x140] sm:$0xff]  ;;  %v275_v4 = vld [vmem:[%s1340_s1 + $0x150] sm:$0xff] }
  0x14   : > { %855 = vmatprep.subr.bf16.mxu1 %v854_v44  ;;  %v280_v62 = vld [vmem:[%s1340_s1 + $0x178] sm:$0xff]  ;;  %v277_v3 = vld [vmem:[%s1340_s1 + $0x160] sm:$0xff]  ;;  %v279_v6 = vld [vmem:[%s1340_s1 + $0x170] sm:$0xff] }
  0x15   : > { %v862_v5 = vpack.c.bf16 %v280_v62, %v276_v61  ;;  %v282_v8 = vld [vmem:[%s1340_s1 + $0x188] sm:$0xff]  ;;  %v284_v10 = vld [vmem:[%s1340_s1 + $0x198] sm:$0xff]  ;;  %v832_v12 = vpack.c.bf16 %v277_v3, %v273_v2  ;;  %v864_v13 = vpack.c.bf16 %v279_v6, %v275_v4  ;;  %v281_v15 = vld [vmem:[%s1340_s1 + $0x180] sm:$0xff] }
  0x16   : > { %825 = vmatpush1.bf16.msra.mxu0 %v824_v51  ;;  %v286_v9 = vld [vmem:[%s1340_s1 + $0x1a8] sm:$0xff]  ;;  %v288_v11 = vld [vmem:[%s1340_s1 + $0x1b8] sm:$0xff]  ;;  %v285_v16 = vld [vmem:[%s1340_s1 + $0x1a0] sm:$0xff]  ;;  %v300_v51 = vshrl.u32 %v299_v50, 7 }
  0x17   : > { %857 = vmatpush1.bf16.msra.mxu1 %v856_v52  ;;  %827 = vmatprep.subr.bf16.mxu0 %v826_v53  ;;  %v834_v14 = vpack.c.bf16 %v286_v9, %v282_v8  ;;  %v283_v17 = vld [vmem:[%s1340_s1 + $0x190] sm:$0xff]  ;;  %v866_v18 = vpack.c.bf16 %v288_v11, %v284_v10  ;;  %v290_v20 = vld [vmem:[%s1340_s1 + $0x1c8] sm:$0xff]  ;;  %v292_v22 = vld [vmem:[%s1340_s1 + $0x1d8] sm:$0xff]  ;;  %v836_v24 = vpack.c.bf16 %v285_v16, %v281_v15 }
  0x18   : > { %859 = vmatprep.subr.bf16.mxu1 %v858_v57  ;;  %v287_v19 = vld [vmem:[%s1340_s1 + $0x1b0] sm:$0xff]  ;;  %v294_v21 = vld [vmem:[%s1340_s1 + $0x1e8] sm:$0xff]  ;;  %v296_v23 = vld [vmem:[%s1340_s1 + $0x1f8] sm:$0xff]  ;;  %v301_v52 = vsub.s32 0, %v300_v51  ;;  %v309_v54 = vsub.s32 2, %v300_v51  ;;  %v305_v55 = vsub.s32 1, %v300_v51 }
  0x19   : > { %v868_v25 = vpack.c.bf16 %v287_v19, %v283_v17  ;;  %v838_v26 = vpack.c.bf16 %v294_v21, %v290_v20  ;;  %v289_v27 = vld [vmem:[%s1340_s1 + $0x1c0] sm:$0xff]  ;;  %v870_v29 = vpack.c.bf16 %v296_v23, %v292_v22  ;;  %v291_v30 = vld [vmem:[%s1340_s1 + $0x1d0] sm:$0xff]  ;;  %v218_v35 = vld [vmem:[%s1136_s28 + $0x8] sm:$0xff]  ;;  %v313_v56 = vsub.s32 3, %v300_v51 }
  0x1a   : > { %829 = vmatpush1.bf16.msra.mxu0 %v828_v63  ;;  %v293_v28 = vld [vmem:[%s1340_s1 + $0x1e0] sm:$0xff]  ;;  %v295_v31 = vld [vmem:[%s1340_s1 + $0x1f0] sm:$0xff]  ;;  %v220_v37 = vld [vmem:[%s1136_s28 + $0x18] sm:$0xff] }
  0x1b   : > { %861 = vmatpush1.bf16.msra.mxu1 %v860_v0  ;;  %831 = vmatprep.subr.bf16.mxu0 %v830_v1  ;;  %v840_v32 = vpack.c.bf16 %v293_v28, %v289_v27  ;;  %v872_v33 = vpack.c.bf16 %v295_v31, %v291_v30  ;;  %v217_v34 = vld [vmem:[%s1136_s28] sm:$0xff]  ;;  %v219_v36 = vld [vmem:[%s1136_s28 + $0x10] sm:$0xff]  ;;  %v222_v39 = vld [vmem:[%s1136_s28 + $0x28] sm:$0xff] }
  0x1c   : > { %863 = vmatprep.subr.bf16.mxu1 %v862_v5  ;;  %v221_v38 = vld [vmem:[%s1136_s28 + $0x20] sm:$0xff]  ;;  %v223_v40 = vld [vmem:[%s1136_s28 + $0x30] sm:$0xff]  ;;  %v224_v41 = vld [vmem:[%s1136_s28 + $0x38] sm:$0xff] }
  0x1d   : > { %v225_v42 = vld [vmem:[%s1136_s28 + $0x40] sm:$0xff]  ;;  %v226_v43 = vld [vmem:[%s1136_s28 + $0x48] sm:$0xff]  ;;  %v227_v44 = vld [vmem:[%s1136_s28 + $0x50] sm:$0xff] }
  0x1e   : > { %833 = vmatpush1.bf16.msra.mxu0 %v832_v12  ;;  %v228_v45 = vld [vmem:[%s1136_s28 + $0x58] sm:$0xff]  ;;  %v229_v46 = vld [vmem:[%s1136_s28 + $0x60] sm:$0xff]  ;;  %v230_v47 = vld [vmem:[%s1136_s28 + $0x68] sm:$0xff] }
  0x1f   : > { %865 = vmatpush1.bf16.msra.mxu1 %v864_v13  ;;  %835 = vmatprep.subr.bf16.mxu0 %v834_v14  ;;  %v231_v48 = vld [vmem:[%s1136_s28 + $0x70] sm:$0xff]  ;;  %v232_v49 = vld [vmem:[%s1136_s28 + $0x78] sm:$0xff]  ;;  %v297_v53 = vld [vmem:[%s1341_s2] sm:$0xf] }
  0x20   : > { %867 = vmatprep.subr.bf16.mxu1 %v866_v18  ;;  %v1188_v57 = vrot.slane %v297_v53, %v301_v52  ;;  %v1190_v58 = vrot.slane %v297_v53, %v309_v54  ;;  %v1192_v59 = vrot.slane %v297_v53, %v305_v55 }
  0x22   : > { %837 = vmatpush1.bf16.msra.mxu0 %v836_v24 }
  0x23   : > { %869 = vmatpush1.bf16.msra.mxu1 %v868_v25  ;;  %839 = vmatprep.subr.bf16.mxu0 %v838_v26 }
  0x24   : > { %871 = vmatprep.subr.bf16.mxu1 %v870_v29 }
  0x26   : > { %841 = vmatpush1.bf16.msra.mxu0 %v840_v32 }
  0x27   : > { %873 = vmatpush1.bf16.msra.mxu1 %v872_v33 }
  0x29   : > { %384 = vmatmul.mubr.f32.vlgmr.msra.gmra.mrb[0].mxu0 %v217_v34 }
  0x2a   : > { %545 = vmatmul.mubr.f32.vlgmr.msra.gmra.mrb[0].mxu1 %v217_v34  ;;  %389 = vmatprep.mubr.f32.mxu0 %v892_v7 }
  0x2b   : > { %550 = vmatprep.mubr.f32.mxu1 %v892_v7 }
  0x2d   : > { %390 = vmatmul.mubr.f32.gmra.mrb[2].mxu0 %v218_v35 }
  0x2e   : > { %551 = vmatmul.mubr.f32.gmra.mrb[2].mxu1 %v218_v35  ;;  %395 = vmatprep.mubr.f32.mxu0 %v892_v7 }
  0x2f   : > { %556 = vmatprep.mubr.f32.mxu1 %v892_v7 }
  0x31   : > { %396 = vmatmul.mubr.f32.gmra.mrb[4].mxu0 %v219_v36 }
  0x32   : > { %557 = vmatmul.mubr.f32.gmra.mrb[4].mxu1 %v219_v36  ;;  %401 = vmatprep.mubr.f32.mxu0 %v892_v7 }
  0x33   : > { %562 = vmatprep.mubr.f32.mxu1 %v892_v7 }
  0x35   : > { %402 = vmatmul.mubr.f32.gmra.mrb[6].mxu0 %v220_v37 }
  0x36   : > { %563 = vmatmul.mubr.f32.gmra.mrb[6].mxu1 %v220_v37  ;;  %407 = vmatprep.mubr.f32.mxu0 %v892_v7 }
  0x37   : > { %568 = vmatprep.mubr.f32.mxu1 %v892_v7 }
  0x39   : > { %408 = vmatmul.mubr.f32.gmra.mrb[8].mxu0 %v221_v38 }
  0x3a   : > { %569 = vmatmul.mubr.f32.gmra.mrb[8].mxu1 %v221_v38  ;;  %413 = vmatprep.mubr.f32.mxu0 %v892_v7 }
  0x3b   : > { %574 = vmatprep.mubr.f32.mxu1 %v892_v7 }
  0x3d   : > { %414 = vmatmul.mubr.f32.gmra.mrb[10].mxu0 %v222_v39 }
  0x3e   : > { %575 = vmatmul.mubr.f32.gmra.mrb[10].mxu1 %v222_v39  ;;  %419 = vmatprep.mubr.f32.mxu0 %v892_v7 }
  0x3f   : > { %580 = vmatprep.mubr.f32.mxu1 %v892_v7 }
  0x41   : > { %420 = vmatmul.mubr.f32.gmra.mrb[12].mxu0 %v223_v40 }
  0x42   : > { %581 = vmatmul.mubr.f32.gmra.mrb[12].mxu1 %v223_v40  ;;  %425 = vmatprep.mubr.f32.mxu0 %v892_v7 }
  0x43   : > { %586 = vmatprep.mubr.f32.mxu1 %v892_v7 }
  0x45   : > { %426 = vmatmul.mubr.f32.gmra.mrb[14].mxu0 %v224_v41 }
  0x46   : > { %587 = vmatmul.mubr.f32.gmra.mrb[14].mxu1 %v224_v41  ;;  %431 = vmatprep.mubr.f32.mxu0 %v892_v7 }
  0x47   : > { %592 = vmatprep.mubr.f32.mxu1 %v892_v7 }
  0x49   : > { %432 = vmatmul.mubr.f32.gmra.mrb[16].mxu0 %v225_v42 }
  0x4a   : > { %593 = vmatmul.mubr.f32.gmra.mrb[16].mxu1 %v225_v42  ;;  %437 = vmatprep.mubr.f32.mxu0 %v892_v7 }
  0x4b   : > { %598 = vmatprep.mubr.f32.mxu1 %v892_v7 }
  0x4d   : > { %438 = vmatmul.mubr.f32.gmra.mrb[18].mxu0 %v226_v43 }
  0x4e   : > { %599 = vmatmul.mubr.f32.gmra.mrb[18].mxu1 %v226_v43  ;;  %443 = vmatprep.mubr.f32.mxu0 %v892_v7 }
  0x4f   : > { %604 = vmatprep.mubr.f32.mxu1 %v892_v7 }
  0x51   : > { %444 = vmatmul.mubr.f32.gmra.mrb[20].mxu0 %v227_v44 }
  0x52   : > { %605 = vmatmul.mubr.f32.gmra.mrb[20].mxu1 %v227_v44  ;;  %449 = vmatprep.mubr.f32.mxu0 %v892_v7 }
  0x53   : > { %610 = vmatprep.mubr.f32.mxu1 %v892_v7 }
  0x55   : > { %450 = vmatmul.mubr.f32.gmra.mrb[22].mxu0 %v228_v45 }
  0x56   : > { %611 = vmatmul.mubr.f32.gmra.mrb[22].mxu1 %v228_v45  ;;  %455 = vmatprep.mubr.f32.mxu0 %v892_v7 }
  0x57   : > { %616 = vmatprep.mubr.f32.mxu1 %v892_v7 }
  0x59   : > { %456 = vmatmul.mubr.f32.gmra.mrb[24].mxu0 %v229_v46 }
  0x5a   : > { %617 = vmatmul.mubr.f32.gmra.mrb[24].mxu1 %v229_v46  ;;  %461 = vmatprep.mubr.f32.mxu0 %v892_v7 }
  0x5b   : > { %622 = vmatprep.mubr.f32.mxu1 %v892_v7 }
  0x5d   : > { %462 = vmatmul.mubr.f32.gmra.mrb[26].mxu0 %v230_v47 }
  0x5e   : > { %623 = vmatmul.mubr.f32.gmra.mrb[26].mxu1 %v230_v47  ;;  %467 = vmatprep.mubr.f32.mxu0 %v892_v7 }
  0x5f   : > { %628 = vmatprep.mubr.f32.mxu1 %v892_v7 }
  0x61   : > { %468 = vmatmul.mubr.f32.gmra.mrb[28].mxu0 %v231_v48 }
  0x62   : > { %629 = vmatmul.mubr.f32.gmra.mrb[28].mxu1 %v231_v48  ;;  %473 = vmatprep.mubr.f32.mxu0 %v892_v7 }
  0x63   : > { %634 = vmatprep.mubr.f32.mxu1 %v892_v7  ;;  %v1194_v7 = vrot.slane %v297_v53, %v313_v56 }
  0x65   : > { %474 = vmatmul.mubr.f32.gmra.mrb[30].mxu0 %v232_v49 }
  0x66   : > { %635 = vmatmul.mubr.f32.gmra.mrb[30].mxu1 %v232_v49 }
  0xfc   : > { %v385_v60 = vpop.f32.mrb[0].mxu0 }
  0xfd   : > { %v386_v61 = vadd.f32 %v385_v60, %v1188_v57  ;;  %v546_v62 = vpop.f32.mrb[0].mxu1  ;;  %v387_v63 = vpop.f32.mrb[1].mxu0 }
  0xfe   : > { %v547_v0 = vadd.f32 %v546_v62, %v1190_v58  ;;  %v388_v1 = vadd.f32 %v387_v63, %v1192_v59  ;;  %v548_v2 = vpop.f32.mrb[1].mxu1 }
  0xff   : > { %641 = vst [vmem:[%s1199_s9] sm:$0xff] %v386_v61  ;;  %v549_v3 = vadd.f32 %v548_v2, %v1194_v7 }
 0x100   : > { %643 = vst [vmem:[%s1199_s9 + $0x10] sm:$0xff] %v547_v0  ;;  %642 = vst [vmem:[%s1199_s9 + $0x8] sm:$0xff] %v388_v1  ;;  %v391_v4 = vpop.f32.mrb[2].mxu0 }
 0x101   : > { %689 = vst [vmem:[%s1209_s12] sm:$0xff] %v549_v3  ;;  %v392_v5 = vadd.f32 %v391_v4, %v1188_v57  ;;  %v552_v6 = vpop.f32.mrb[2].mxu1  ;;  %v393_v8 = vpop.f32.mrb[3].mxu0 }
 0x102   : > { %v553_v9 = vadd.f32 %v552_v6, %v1190_v58  ;;  %v394_v10 = vadd.f32 %v393_v8, %v1192_v59  ;;  %v554_v11 = vpop.f32.mrb[3].mxu1 }
 0x103   : > { %644 = vst [vmem:[%s1199_s9 + $0x18] sm:$0xff] %v392_v5  ;;  %v555_v12 = vadd.f32 %v554_v11, %v1194_v7 }
 0x104   : > { %646 = vst [vmem:[%s1199_s9 + $0x28] sm:$0xff] %v553_v9  ;;  %645 = vst [vmem:[%s1199_s9 + $0x20] sm:$0xff] %v394_v10  ;;  %v397_v13 = vpop.f32.mrb[4].mxu0 }
 0x105   : > { %690 = vst [vmem:[%s1209_s12 + $0x8] sm:$0xff] %v555_v12  ;;  %v398_v14 = vadd.f32 %v397_v13, %v1188_v57  ;;  %v558_v15 = vpop.f32.mrb[4].mxu1  ;;  %v399_v16 = vpop.f32.mrb[5].mxu0 }
 0x106   : > { %v559_v17 = vadd.f32 %v558_v15, %v1190_v58  ;;  %v400_v18 = vadd.f32 %v399_v16, %v1192_v59  ;;  %v560_v19 = vpop.f32.mrb[5].mxu1 }
 0x107   : > { %647 = vst [vmem:[%s1199_s9 + $0x30] sm:$0xff] %v398_v14  ;;  %v561_v20 = vadd.f32 %v560_v19, %v1194_v7 }
 0x108   : > { %649 = vst [vmem:[%s1199_s9 + $0x40] sm:$0xff] %v559_v17  ;;  %648 = vst [vmem:[%s1199_s9 + $0x38] sm:$0xff] %v400_v18  ;;  %v403_v21 = vpop.f32.mrb[6].mxu0 }
 0x109   : > { %691 = vst [vmem:[%s1209_s12 + $0x10] sm:$0xff] %v561_v20  ;;  %v404_v22 = vadd.f32 %v403_v21, %v1188_v57  ;;  %v564_v23 = vpop.f32.mrb[6].mxu1  ;;  %v405_v24 = vpop.f32.mrb[7].mxu0 }
 0x10a   : > { %v565_v25 = vadd.f32 %v564_v23, %v1190_v58  ;;  %v406_v26 = vadd.f32 %v405_v24, %v1192_v59  ;;  %v566_v27 = vpop.f32.mrb[7].mxu1 }
 0x10b   : > { %650 = vst [vmem:[%s1199_s9 + $0x48] sm:$0xff] %v404_v22  ;;  %v567_v28 = vadd.f32 %v566_v27, %v1194_v7 }
 0x10c   : > { %652 = vst [vmem:[%s1199_s9 + $0x58] sm:$0xff] %v565_v25  ;;  %651 = vst [vmem:[%s1199_s9 + $0x50] sm:$0xff] %v406_v26  ;;  %v409_v29 = vpop.f32.mrb[8].mxu0 }
 0x10d   : > { %692 = vst [vmem:[%s1209_s12 + $0x18] sm:$0xff] %v567_v28  ;;  %v410_v30 = vadd.f32 %v409_v29, %v1188_v57  ;;  %v570_v31 = vpop.f32.mrb[8].mxu1  ;;  %v411_v32 = vpop.f32.mrb[9].mxu0 }
 0x10e   : > { %v571_v33 = vadd.f32 %v570_v31, %v1190_v58  ;;  %v412_v34 = vadd.f32 %v411_v32, %v1192_v59  ;;  %v572_v35 = vpop.f32.mrb[9].mxu1 }
 0x10f   : > { %653 = vst [vmem:[%s1199_s9 + $0x60] sm:$0xff] %v410_v30  ;;  %v573_v36 = vadd.f32 %v572_v35, %v1194_v7 }
 0x110   : > { %655 = vst [vmem:[%s1199_s9 + $0x70] sm:$0xff] %v571_v33  ;;  %654 = vst [vmem:[%s1199_s9 + $0x68] sm:$0xff] %v412_v34  ;;  %v415_v37 = vpop.f32.mrb[10].mxu0 }
 0x111   : > { %693 = vst [vmem:[%s1209_s12 + $0x20] sm:$0xff] %v573_v36  ;;  %v416_v38 = vadd.f32 %v415_v37, %v1188_v57  ;;  %v576_v39 = vpop.f32.mrb[10].mxu1  ;;  %v417_v40 = vpop.f32.mrb[11].mxu0 }
 0x112   : > { %v577_v41 = vadd.f32 %v576_v39, %v1190_v58  ;;  %v418_v42 = vadd.f32 %v417_v40, %v1192_v59  ;;  %v578_v43 = vpop.f32.mrb[11].mxu1 }
 0x113   : > { %656 = vst [vmem:[%s1199_s9 + $0x78] sm:$0xff] %v416_v38  ;;  %v579_v44 = vadd.f32 %v578_v43, %v1194_v7 }
 0x114   : > { %658 = vst [vmem:[%s1199_s9 + $0x88] sm:$0xff] %v577_v41  ;;  %657 = vst [vmem:[%s1199_s9 + $0x80] sm:$0xff] %v418_v42  ;;  %v421_v45 = vpop.f32.mrb[12].mxu0 }
 0x115   : > { %694 = vst [vmem:[%s1209_s12 + $0x28] sm:$0xff] %v579_v44  ;;  %v422_v46 = vadd.f32 %v421_v45, %v1188_v57  ;;  %v582_v47 = vpop.f32.mrb[12].mxu1  ;;  %v423_v48 = vpop.f32.mrb[13].mxu0 }
 0x116   : > { %v583_v49 = vadd.f32 %v582_v47, %v1190_v58  ;;  %v424_v50 = vadd.f32 %v423_v48, %v1192_v59  ;;  %v584_v51 = vpop.f32.mrb[13].mxu1 }
 0x117   : > { %659 = vst [vmem:[%s1199_s9 + $0x90] sm:$0xff] %v422_v46  ;;  %v585_v52 = vadd.f32 %v584_v51, %v1194_v7 }
 0x118   : > { %661 = vst [vmem:[%s1199_s9 + $0xa0] sm:$0xff] %v583_v49  ;;  %660 = vst [vmem:[%s1199_s9 + $0x98] sm:$0xff] %v424_v50  ;;  %v427_v53 = vpop.f32.mrb[14].mxu0 }
 0x119   : > { %695 = vst [vmem:[%s1209_s12 + $0x30] sm:$0xff] %v585_v52  ;;  %v428_v54 = vadd.f32 %v427_v53, %v1188_v57  ;;  %v588_v55 = vpop.f32.mrb[14].mxu1  ;;  %v429_v56 = vpop.f32.mrb[15].mxu0 }
 0x11a   : > { %v589_v60 = vadd.f32 %v588_v55, %v1190_v58  ;;  %v430_v61 = vadd.f32 %v429_v56, %v1192_v59  ;;  %v590_v62 = vpop.f32.mrb[15].mxu1 }
 0x11b   : > { %662 = vst [vmem:[%s1199_s9 + $0xa8] sm:$0xff] %v428_v54  ;;  %v591_v63 = vadd.f32 %v590_v62, %v1194_v7 }
 0x11c   : > { %664 = vst [vmem:[%s1199_s9 + $0xb8] sm:$0xff] %v589_v60  ;;  %663 = vst [vmem:[%s1199_s9 + $0xb0] sm:$0xff] %v430_v61  ;;  %v433_v0 = vpop.f32.mrb[16].mxu0 }
 0x11d   : > { %696 = vst [vmem:[%s1209_s12 + $0x38] sm:$0xff] %v591_v63  ;;  %v434_v1 = vadd.f32 %v433_v0, %v1188_v57  ;;  %v594_v2 = vpop.f32.mrb[16].mxu1  ;;  %v435_v3 = vpop.f32.mrb[17].mxu0 }
 0x11e   : > { %v595_v4 = vadd.f32 %v594_v2, %v1190_v58  ;;  %v436_v5 = vadd.f32 %v435_v3, %v1192_v59  ;;  %v596_v6 = vpop.f32.mrb[17].mxu1 }
 0x11f   : > { %665 = vst [vmem:[%s1199_s9 + $0xc0] sm:$0xff] %v434_v1  ;;  %v597_v8 = vadd.f32 %v596_v6, %v1194_v7 }
 0x120   : > { %667 = vst [vmem:[%s1199_s9 + $0xd0] sm:$0xff] %v595_v4  ;;  %666 = vst [vmem:[%s1199_s9 + $0xc8] sm:$0xff] %v436_v5  ;;  %v439_v9 = vpop.f32.mrb[18].mxu0 }
 0x121   : > { %697 = vst [vmem:[%s1209_s12 + $0x40] sm:$0xff] %v597_v8  ;;  %v440_v10 = vadd.f32 %v439_v9, %v1188_v57  ;;  %v600_v11 = vpop.f32.mrb[18].mxu1  ;;  %v441_v12 = vpop.f32.mrb[19].mxu0 }
 0x122   : > { %v601_v13 = vadd.f32 %v600_v11, %v1190_v58  ;;  %v442_v14 = vadd.f32 %v441_v12, %v1192_v59  ;;  %v602_v15 = vpop.f32.mrb[19].mxu1 }
 0x123   : > { %668 = vst [vmem:[%s1199_s9 + $0xd8] sm:$0xff] %v440_v10  ;;  %v603_v16 = vadd.f32 %v602_v15, %v1194_v7 }
 0x124   : > { %670 = vst [vmem:[%s1199_s9 + $0xe8] sm:$0xff] %v601_v13  ;;  %669 = vst [vmem:[%s1199_s9 + $0xe0] sm:$0xff] %v442_v14  ;;  %v445_v17 = vpop.f32.mrb[20].mxu0 }
 0x125   : > { %698 = vst [vmem:[%s1209_s12 + $0x48] sm:$0xff] %v603_v16  ;;  %v446_v18 = vadd.f32 %v445_v17, %v1188_v57  ;;  %v606_v19 = vpop.f32.mrb[20].mxu1  ;;  %v447_v20 = vpop.f32.mrb[21].mxu0 }
 0x126   : > { %v607_v21 = vadd.f32 %v606_v19, %v1190_v58  ;;  %v448_v22 = vadd.f32 %v447_v20, %v1192_v59  ;;  %v608_v23 = vpop.f32.mrb[21].mxu1 }
 0x127   : > { %671 = vst [vmem:[%s1199_s9 + $0xf0] sm:$0xff] %v446_v18  ;;  %v609_v24 = vadd.f32 %v608_v23, %v1194_v7 }
 0x128   : > { %673 = vst [vmem:[%s1199_s9 + $0x100] sm:$0xff] %v607_v21  ;;  %672 = vst [vmem:[%s1199_s9 + $0xf8] sm:$0xff] %v448_v22  ;;  %v451_v25 = vpop.f32.mrb[22].mxu0 }
 0x129   : > { %699 = vst [vmem:[%s1209_s12 + $0x50] sm:$0xff] %v609_v24  ;;  %v452_v26 = vadd.f32 %v451_v25, %v1188_v57  ;;  %v612_v27 = vpop.f32.mrb[22].mxu1  ;;  %v453_v28 = vpop.f32.mrb[23].mxu0 }
 0x12a   : > { %v613_v29 = vadd.f32 %v612_v27, %v1190_v58  ;;  %v454_v30 = vadd.f32 %v453_v28, %v1192_v59  ;;  %v614_v31 = vpop.f32.mrb[23].mxu1 }
 0x12b   : > { %674 = vst [vmem:[%s1199_s9 + $0x108] sm:$0xff] %v452_v26  ;;  %v615_v32 = vadd.f32 %v614_v31, %v1194_v7 }
 0x12c   : > { %676 = vst [vmem:[%s1199_s9 + $0x118] sm:$0xff] %v613_v29  ;;  %675 = vst [vmem:[%s1199_s9 + $0x110] sm:$0xff] %v454_v30  ;;  %v457_v33 = vpop.f32.mrb[24].mxu0 }
 0x12d   : > { %700 = vst [vmem:[%s1209_s12 + $0x58] sm:$0xff] %v615_v32  ;;  %v458_v34 = vadd.f32 %v457_v33, %v1188_v57  ;;  %v618_v35 = vpop.f32.mrb[24].mxu1  ;;  %v459_v36 = vpop.f32.mrb[25].mxu0 }
 0x12e   : > { %v619_v37 = vadd.f32 %v618_v35, %v1190_v58  ;;  %v460_v38 = vadd.f32 %v459_v36, %v1192_v59  ;;  %v620_v39 = vpop.f32.mrb[25].mxu1 }
 0x12f   : > { %677 = vst [vmem:[%s1199_s9 + $0x120] sm:$0xff] %v458_v34  ;;  %v621_v40 = vadd.f32 %v620_v39, %v1194_v7 }
 0x130   : > { %679 = vst [vmem:[%s1199_s9 + $0x130] sm:$0xff] %v619_v37  ;;  %678 = vst [vmem:[%s1199_s9 + $0x128] sm:$0xff] %v460_v38  ;;  %v463_v41 = vpop.f32.mrb[26].mxu0 }
 0x131   : > { %701 = vst [vmem:[%s1209_s12 + $0x60] sm:$0xff] %v621_v40  ;;  %v464_v42 = vadd.f32 %v463_v41, %v1188_v57  ;;  %v624_v43 = vpop.f32.mrb[26].mxu1  ;;  %v465_v44 = vpop.f32.mrb[27].mxu0 }
 0x132   : > { %v625_v45 = vadd.f32 %v624_v43, %v1190_v58  ;;  %v466_v46 = vadd.f32 %v465_v44, %v1192_v59  ;;  %v626_v47 = vpop.f32.mrb[27].mxu1 }
 0x133   : > { %680 = vst [vmem:[%s1199_s9 + $0x138] sm:$0xff] %v464_v42  ;;  %v627_v48 = vadd.f32 %v626_v47, %v1194_v7 }
 0x134   : > { %682 = vst [vmem:[%s1199_s9 + $0x148] sm:$0xff] %v625_v45  ;;  %681 = vst [vmem:[%s1199_s9 + $0x140] sm:$0xff] %v466_v46  ;;  %v469_v49 = vpop.f32.mrb[28].mxu0 }
 0x135   : > { %702 = vst [vmem:[%s1209_s12 + $0x68] sm:$0xff] %v627_v48  ;;  %v470_v50 = vadd.f32 %v469_v49, %v1188_v57  ;;  %v630_v51 = vpop.f32.mrb[28].mxu1  ;;  %v471_v52 = vpop.f32.mrb[29].mxu0 }
 0x136   : > { %v631_v53 = vadd.f32 %v630_v51, %v1190_v58  ;;  %v472_v54 = vadd.f32 %v471_v52, %v1192_v59  ;;  %v632_v55 = vpop.f32.mrb[29].mxu1 }
 0x137   : > { %683 = vst [vmem:[%s1199_s9 + $0x150] sm:$0xff] %v470_v50  ;;  %v633_v56 = vadd.f32 %v632_v55, %v1194_v7 }
 0x138   : > { %685 = vst [vmem:[%s1199_s9 + $0x160] sm:$0xff] %v631_v53  ;;  %684 = vst [vmem:[%s1199_s9 + $0x158] sm:$0xff] %v472_v54  ;;  %v475_v60 = vpop.f32.mrb[30].mxu0 }
 0x139   : > { %703 = vst [vmem:[%s1209_s12 + $0x70] sm:$0xff] %v633_v56  ;;  %v476_v61 = vadd.f32 %v475_v60, %v1188_v57  ;;  %v636_v62 = vpop.f32.mrb[30].mxu1  ;;  %v477_v63 = vpop.f32.mrb[31].mxu0 }
 0x13a   : > { %v637_v0 = vadd.f32 %v636_v62, %v1190_v58  ;;  %v478_v1 = vadd.f32 %v477_v63, %v1192_v59  ;;  %v638_v2 = vpop.f32.mrb[31].mxu1 }
 0x13b   : > { %686 = vst [vmem:[%s1199_s9 + $0x168] sm:$0xff] %v476_v61  ;;  %v639_v3 = vadd.f32 %v638_v2, %v1194_v7 }
 0x13c   : > { %688 = vst [vmem:[%s1199_s9 + $0x178] sm:$0xff] %v637_v0  ;;  %687 = vst [vmem:[%s1199_s9 + $0x170] sm:$0xff] %v478_v1 }
 0x13d   : > { %704 = vst [vmem:[%s1209_s12 + $0x78] sm:$0xff] %v639_v3 }
 0x13e PF: > { %s15_s15 = sadd.s32 1, %s890_s15  }
 0x13f   : > { %p12_p4 = scmp.ge.s32.totalorder %s15_s15, 5  }
 0x141   :  { %14 = sbr.rel (!%p12_p4) target bundleno = 1 (0x1), region = 74 }

// kernel: alignn_conv.17
= control target key start
LH: loop header
LB: loop body
LE: loop exit
PB: predicated region body
PF: predicated region fallthrough
CT: control target
= control target key end

     0   :  { %s335_s6 = smov 0   ;;  %s426_s0 = inlined_call_operand.vmem [shape: f32[384,128], index: 0, kind: input, shape index: {}]   ;;  %s427_s1 = inlined_call_operand.vmem [shape: f32[2,128], index: 1, kind: output, shape index: {}]  }
   0x1 LB: > { %s341_s7 = sadd.s32 4294967295, %s322_s6   ;;  %p299_p0 = scmp.ge.s32.totalorder %s322_s6, 1  ;;  %s322_s6 = sphi %s335_s6, %s11_s6  }
   0x2   : > { %p83_p1 = scmp.lt.s32.totalorder %s322_s6, 4 }
   0x4   : > { %p84_p2 = pnand %p299_p0, %p83_p1 }
   0x5   : > { %s300_s8 = sshll.u32 (!%p84_p2), %s341_s7, 4  ;;  %v120_v0 = vlaneseq (!%p84_p2)  ;;  %s302_s9 = sshll.u32 (!%p84_p2), %s341_s7, 7 }
   0x6   : > { %87 = sbr.rel (%p84_p2) target bundleno = 84 (0x54), region = 24  ;;  %p99_p3 = scmp.lt.s32.totalorder (!%p84_p2), %s300_s8, 47  ;;  %v350_v3 = vstv (!%p84_p2), %s302_s9 }
   0x7   : > { %v346_v1 = vshrl.u32 (!%p84_p2), %v120_v0, 7  ;;  %p303_p4 = scmp.ne.s32.totalorder (!%p84_p2), %s341_s7, 0 }
   0x9   : > { %v122_v2 = vadd.s32 (!%p84_p2), 8, %v346_v1  ;;  %v123_v4 = vadd.s32 (!%p84_p2), 16, %v346_v1  ;;  %v124_v5 = vadd.s32 (!%p84_p2), 24, %v346_v1  ;;  %v139_v6 = vadd.s32 (!%p84_p2), %v350_v3, %v346_v1 }
   0xa   : > { %v125_v8 = vadd.s32 (!%p84_p2), 32, %v346_v1  ;;  %v126_v12 = vadd.s32 (!%p84_p2), 40, %v346_v1  ;;  %v127_v15 = vadd.s32 (!%p84_p2), 48, %v346_v1  ;;  %v128_v20 = vadd.s32 (!%p84_p2), 56, %v346_v1 }
   0xb   : > { %v140_v7 = vadd.s32 (!%p84_p2), %v350_v3, %v122_v2  ;;  %v141_v9 = vadd.s32 (!%p84_p2), %v350_v3, %v123_v4  ;;  %v142_v13 = vadd.s32 (!%p84_p2), %v350_v3, %v124_v5  ;;  %vm155_vm0 = vcmp.lt.s32.totalorder (!%p84_p2), %v139_v6, 272 }
   0xc   : > { %v143_v16 = vadd.s32 (!%p84_p2), %v350_v3, %v125_v8  ;;  %v144_v21 = vadd.s32 (!%p84_p2), %v350_v3, %v126_v12  ;;  %v129_v22 = vadd.s32 (!%p84_p2), 64, %v346_v1  ;;  %v145_v26 = vadd.s32 (!%p84_p2), %v350_v3, %v127_v15 }
   0xd   : > { %s429_s8 = smov (!%p99_p3, %s300_s8), 47  ;;  %vm156_vm1 = vcmp.lt.s32.totalorder %v140_v7, 272  ;;  %vm157_vm2 = vcmp.lt.s32.totalorder %v141_v9, 272  ;;  %vm158_vm3 = vcmp.lt.s32.totalorder %v142_v13, 272  ;;  %v130_v32 = vadd.s32 72, %v346_v1 }
   0xe   : > { %s301_s10 = sshll.u32 %s429_s8, 3  ;;  %vm159_vm4 = vcmp.lt.s32.totalorder %v143_v16, 272  ;;  %v146_v33 = vadd.s32 %v350_v3, %v128_v20  ;;  %vm160_vm5 = vcmp.lt.s32.totalorder %v144_v21, 272  ;;  %v131_v35 = vadd.s32 80, %v346_v1 }
   0xf   : > { %s360_s13 = scalar_lea.vmem %s426_s0, %s301_s10  ;;  %v147_v39 = vadd.s32 %v350_v3, %v129_v22  ;;  %vm161_vm6 = vcmp.lt.s32.totalorder %v145_v26, 272  ;;  %v132_v42 = vadd.s32 88, %v346_v1  ;;  %v148_v46 = vadd.s32 %v350_v3, %v130_v32 }
  0x10   : > { %v104_v10 = vld [vmem:[%s360_s13] sm:$0xff]  ;;  %v105_v11 = vld [vmem:[%s360_s13 + $0x8] sm:$0xff]  ;;  %v106_v14 = vld [vmem:[%s360_s13 + $0x10] sm:$0xff]  ;;  %vm162_vm7 = vcmp.lt.s32.totalorder %v146_v33, 272  ;;  %v133_v49 = vadd.s32 96, %v346_v1  ;;  %v149_v53 = vadd.s32 %v350_v3, %v131_v35  ;;  %v134_v56 = vadd.s32 104, %v346_v1 }
  0x11   : > { %v171_v17 = vsel %vm155_vm0, %v104_v10, 0.0  ;;  %v172_v18 = vsel %vm156_vm1, %v105_v11, 0.0  ;;  %v107_v19 = vld [vmem:[%s360_s13 + $0x18] sm:$0xff]  ;;  %v173_v23 = vsel %vm157_vm2, %v106_v14, 0.0  ;;  %v108_v25 = vld [vmem:[%s360_s13 + $0x20] sm:$0xff]  ;;  %v109_v31 = vld [vmem:[%s360_s13 + $0x28] sm:$0xff]  ;;  %v150_v60 = vadd.s32 %v350_v3, %v132_v42 }
  0x12   : > { %v187_v24 = vadd.f32 %v172_v18, %v171_v17  ;;  %v208_v27 = vmul.f32 %v171_v17, %v171_v17  ;;  %v209_v28 = vmul.f32 %v172_v18, %v172_v18  ;;  %v174_v29 = vsel %vm158_vm3, %v107_v19, 0.0  ;;  %v110_v38 = vld [vmem:[%s360_s13 + $0x30] sm:$0xff]  ;;  %v111_v45 = vld [vmem:[%s360_s13 + $0x38] sm:$0xff]  ;;  %v112_v52 = vld [vmem:[%s360_s13 + $0x40] sm:$0xff] }
  0x13   : > { %v210_v34 = vmul.f32 %v173_v23, %v173_v23  ;;  %v175_v36 = vsel %vm159_vm4, %v108_v25, 0.0  ;;  %v211_v40 = vmul.f32 %v174_v29, %v174_v29  ;;  %v176_v43 = vsel %vm160_vm5, %v109_v31, 0.0  ;;  %v113_v59 = vld [vmem:[%s360_s13 + $0x48] sm:$0xff]  ;;  %v114_v4 = vld [vmem:[%s360_s13 + $0x50] sm:$0xff]  ;;  %v115_v11 = vld [vmem:[%s360_s13 + $0x58] sm:$0xff] }
  0x14   : > { %v188_v30 = vadd.f32 %v187_v24, %v173_v23  ;;  %v224_v41 = vadd.f32 %v209_v28, %v208_v27  ;;  %v212_v47 = vmul.f32 %v175_v36, %v175_v36  ;;  %v177_v50 = vsel %vm161_vm6, %v110_v38, 0.0  ;;  %v116_v17 = vld [vmem:[%s360_s13 + $0x60] sm:$0xff]  ;;  %v117_v22 = vld [vmem:[%s360_s13 + $0x68] sm:$0xff]  ;;  %v118_v28 = vld [vmem:[%s360_s13 + $0x70] sm:$0xff] }
  0x15   : > { %vm163_vm8 = vcmp.lt.s32.totalorder %v147_v39, 272  ;;  %v213_v54 = vmul.f32 %v176_v43, %v176_v43  ;;  %v178_v57 = vsel %vm162_vm7, %v111_v45, 0.0  ;;  %vm164_vm9 = vcmp.lt.s32.totalorder %v148_v46, 272  ;;  %v119_v33 = vld [vmem:[%s360_s13 + $0x78] sm:$0xff] }
  0x16   : > { %v189_v37 = vadd.f32 %v188_v30, %v174_v29  ;;  %v225_v48 = vadd.f32 %v224_v41, %v210_v34  ;;  %v214_v61 = vmul.f32 %v177_v50, %v177_v50  ;;  %v135_v63 = vadd.s32 112, %v346_v1 }
  0x17   : > { %v179_v0 = vsel %vm163_vm8, %v112_v52, 0.0  ;;  %v151_v5 = vadd.s32 %v350_v3, %v133_v49  ;;  %vm165_vm10 = vcmp.lt.s32.totalorder %v149_v53, 272  ;;  %v215_v6 = vmul.f32 %v178_v57, %v178_v57 }
  0x18   : > { %v190_v44 = vadd.f32 %v189_v37, %v175_v36  ;;  %v226_v55 = vadd.f32 %v225_v48, %v211_v40  ;;  %v136_v8 = vadd.s32 120, %v346_v1  ;;  %v180_v9 = vsel %vm164_vm9, %v113_v59, 0.0 }
  0x19   : > { %v152_v12 = vadd.s32 %v350_v3, %v134_v56  ;;  %vm166_vm11 = vcmp.lt.s32.totalorder %v150_v60, 272  ;;  %v216_v13 = vmul.f32 %v179_v0, %v179_v0  ;;  %v181_v15 = vsel %vm165_vm10, %v114_v4, 0.0 }
  0x1a   : > { %v191_v51 = vadd.f32 %v190_v44, %v176_v43  ;;  %v227_v62 = vadd.f32 %v226_v55, %v212_v47  ;;  %v153_v18 = vadd.s32 %v350_v3, %v135_v63  ;;  %vm167_vm12 = vcmp.lt.s32.totalorder %v151_v5, 272 }
  0x1b   : > { %v217_v19 = vmul.f32 %v180_v9, %v180_v9  ;;  %v182_v1 = vsel %vm166_vm11, %v115_v11, 0.0  ;;  %v154_v23 = vadd.s32 %v350_v3, %v136_v8  ;;  %vm168_vm13 = vcmp.lt.s32.totalorder %v152_v12, 272 }
  0x1c   : > { %v192_v58 = vadd.f32 %v191_v51, %v177_v50  ;;  %v228_v7 = vadd.f32 %v227_v62, %v213_v54  ;;  %v218_v24 = vmul.f32 %v181_v15, %v181_v15  ;;  %v183_v26 = vsel %vm167_vm12, %v116_v17, 0.0 }
  0x1d   : > { %vm169_vm14 = vcmp.lt.s32.totalorder %v153_v18, 272  ;;  %v219_v29 = vmul.f32 %v182_v1, %v182_v1  ;;  %v184_v31 = vsel %vm168_vm13, %v117_v22, 0.0  ;;  %vm170_vm15 = vcmp.lt.s32.totalorder %v154_v23, 272 }
  0x1e   : > { %v193_v2 = vadd.f32 %v192_v58, %v178_v57  ;;  %v229_v14 = vadd.f32 %v228_v7, %v214_v61  ;;  %v220_v34 = vmul.f32 %v183_v26, %v183_v26  ;;  %v185_v36 = vsel %vm169_vm14, %v118_v28, 0.0 }
  0x1f   : > { %v221_v38 = vmul.f32 %v184_v31, %v184_v31  ;;  %v186_v3 = vsel %vm170_vm15, %v119_v33, 0.0  ;;  %v222_v41 = vmul.f32 %v185_v36, %v185_v36  ;;  %vm245_vm0 = vcmask 1040384  }
  0x20   : > { %v194_v10 = vadd.f32 %v193_v2, %v179_v0  ;;  %v230_v20 = vadd.f32 %v229_v14, %v215_v6  ;;  %v223_v44 = vmul.f32 %v186_v3, %v186_v3  ;;  %v324_v61 = vmov (!%p303_p4), 0.0  }
  0x21   : > { %251 = vst [vmem:[%s427_s1] sm:$0x3] (!%p303_p4), %v324_v61 }
  0x22   : > { %v195_v16 = vadd.f32 %v194_v10, %v180_v9  ;;  %v231_v25 = vadd.f32 %v230_v20, %v216_v13 }
  0x24   : > { %v196_v21 = vadd.f32 %v195_v16, %v181_v15  ;;  %v232_v30 = vadd.f32 %v231_v25, %v217_v19 }
  0x26   : > { %v197_v27 = vadd.f32 %v196_v21, %v182_v1  ;;  %v233_v35 = vadd.f32 %v232_v30, %v218_v24 }
  0x28   : > { %v198_v32 = vadd.f32 %v197_v27, %v183_v26  ;;  %v234_v39 = vadd.f32 %v233_v35, %v219_v29 }
  0x2a   : > { %v199_v37 = vadd.f32 %v198_v32, %v184_v31  ;;  %v235_v42 = vadd.f32 %v234_v39, %v220_v34 }
  0x2c   : > { %v200_v40 = vadd.f32 %v199_v37, %v185_v36  ;;  %v236_v45 = vadd.f32 %v235_v42, %v221_v38 }
  0x2e   : > { %v201_v43 = vadd.f32 %v200_v40, %v186_v3  ;;  %v237_v47 = vadd.f32 %v236_v45, %v222_v41 }
  0x30   : > { %v202_v46 = vrot.slane %v201_v43, 4  ;;  %v238_v49 = vadd.f32 %v237_v47, %v223_v44 }
  0x32   : > { %v203_v48 = vadd.f32 %v202_v46, %v201_v43  ;;  %v239_v51 = vrot.slane %v238_v49, 4 }
  0x34   : > { %v204_v50 = vrot.slane %v203_v48, 2  ;;  %v240_v53 = vadd.f32 %v239_v51, %v238_v49 }
  0x36   : > { %v205_v52 = vadd.f32 %v204_v50, %v203_v48  ;;  %v241_v55 = vrot.slane %v240_v53, 2 }
  0x38   : > { %v206_v54 = vrot.slane %v205_v52, 1  ;;  %v242_v56 = vadd.f32 %v241_v55, %v240_v53  ;;  %250 = sbr.rel (%p303_p4) target bundleno = 63 (0x3f), region = 28 }
  0x3a   : > { %v207_v57 = vadd.f32 %v206_v54, %v205_v52  ;;  %v243_v58 = vrot.slane %v242_v56, 1 }
  0x3c   : > { %v244_v59 = vadd.f32 %v243_v58, %v242_v56 }
  0x3e   : > { %v246_v60 = vsel %vm245_vm0, %v207_v57, %v244_v59 }
  0x3f PF: > { %v252_v62 = vld [vmem:[%s427_s1] sm:$0x3]  ;;  %p304_p5 = scmp.ne.s32.totalorder %s341_s7, 2 }
  0x40   : > { %v253_v63 = vadd.f32 %v252_v62, %v246_v60 }
  0x41   : > { %258 = sbr.rel (%p304_p5) target bundleno = 84 (0x54), region = 32 }
  0x42   : > { %254 = vst [vmem:[%s427_s1] sm:$0x3] %v253_v63 }
  0x49   : > { %v259_v0 = vld [vmem:[%s427_s1] sm:$0x3] }
  0x4a   : > { %v260_v2 = vmul.f32 0.0036764706, %v259_v0 }
  0x4c   : > { %v261_v4 = vmul.f32 %v260_v2, %v260_v2 }
  0x4e   : > { %v263_v5 = vrot.slane %v261_v4, 7 }
  0x50   : > { %v265_v6 = vsub.f32 %v260_v2, %v263_v5 }
  0x52   : > { %v266_v7 = vsel %vm245_vm0, %v260_v2, %v265_v6 }
  0x53   : > { %267 = vst [vmem:[%s427_s1] sm:$0x3] %v266_v7 }
  0x54 PF: > { %s11_s6 = sadd.s32 1, %s322_s6  }
  0x55   : > { %p8_p6 = scmp.ge.s32.totalorder %s11_s6, 5  }
  0x57   :  { %10 = sbr.rel (!%p8_p6) target bundleno = 1 (0x1), region = 58 }

// kernel: alignn_conv.16
= control target key start
LH: loop header
LB: loop body
LE: loop exit
PB: predicated region body
PF: predicated region fallthrough
CT: control target
= control target key end

     0   :  { %s1129_s12 = smov 0   ;;  %s1131_s13 = smov 0   ;;  %s1321_s0 = inlined_call_operand.vmem [shape: s32[1,512], index: 0, kind: input, shape index: {}]   ;;  %s1322_s1 = inlined_call_operand.vmem [shape: bf16[512,256], index: 1, kind: input, shape index: {}]   ;;  %s1323_s2 = inlined_call_operand.vmem [shape: f32[384,128], index: 2, kind: input, shape index: {}]   ;;  %s1324_s3 = inlined_call_operand.vmem [shape: f32[384,128], index: 3, kind: output, shape index: {}]  }
   0x1   :  { %s1133_s14 = smov 0   ;;  %s1135_s15 = smov 0  }
   0x2   :  { %s1137_s16 = smov 0  }
   0x3 LB: > { %s22_s17 = sadd.s32 1, %s1096_s14  ;;  %s25_s18 = sadd.s32 1, %s1100_s15  ;;  %s1104_s16 = sphi %s1137_s16, %s13_s16   ;;  %s1100_s15 = sphi %s1135_s15, %s1328_s15   ;;  %s1096_s14 = sphi %s1133_s14, %s1327_s14   ;;  %s1092_s13 = sphi %s1131_s13, %s1326_s13   ;;  %s1088_s12 = sphi %s1129_s12, %s1325_s12  }
   0x4   : > { %p23_p0 = scmp.ge.s32.totalorder %s22_s17, 4  ;;  %p888_p1 = scmp.ge.s32.totalorder %s1104_s16, 1 }
   0x5   : > { %p170_p2 = scmp.lt.s32.totalorder %s1104_s16, 13 }
   0x6   : > { %s1330_s17 = smov (%p23_p0, %s22_s17), 0  ;;  %s1332_s18 = smov (!%p23_p0, %s25_s18), %s1100_s15 }
   0x7   : > { %p171_p3 = pnand %p888_p1, %p170_p2  ;;  %p27_p4 = scmp.ge.s32.totalorder %s1332_s18, 3 }
   0x8   : > { %p203_p5 = scmp.lt.s32.totalorder (!%p171_p3), %s1088_s12, 3  ;;  %s889_s19 = sshll.u32 (!%p171_p3), %s1088_s12, 4 }
   0x9   : > { %s1334_s18 = smov (%p27_p4, %s1332_s18), 0  ;;  %174 = sbr.rel (%p171_p3) target bundleno = 344 (0x158), region = 32 }
   0xa   : > { %p207_p6 = scmp.lt.s32.totalorder (!%p171_p3), %s889_s19, 63  ;;  %s892_s20 = sshll.u32 (!%p171_p3), %s1092_s13, 4 }
   0xb   : > { %p214_p7 = scmp.lt.s32.totalorder (!%p171_p3), %s892_s20, 47  ;;  %p896_p8 = scmp.ne.s32.totalorder (!%p171_p3), %s1088_s12, 0 }
  0x10   : > { %s1167_s21 = scalar_select %p203_p5, %s1088_s12, 3 }
  0x11   : > { %s1336_s19 = smov (!%p207_p6, %s889_s19), 63  ;;  %s1338_s20 = smov (!%p214_p7, %s892_s20), 47 }
  0x12   : > { %s205_s24 = scalar_lea.vmem %s1321_s0, %s1167_s21  ;;  %s950_s25 = sshll.u32 %s1336_s19, 3  ;;  %v1106_v0 = vmov (!%p896_p8), 0.0  }
  0x13   : > { %s1176_s28 = scalar_lea.vmem %s1322_s1, %s950_s25  ;;  %s893_s29 = sshll.u32 %s1338_s20, 3  ;;  %230 = vst [vmem:[#allocation2] sm:$0xff] (!%p896_p8), %v1106_v0  ;;  %231 = vst [vmem:[#allocation2 + $0x8] sm:$0xff] (!%p896_p8), %v1106_v0 }
  0x14   : > { %s1181_s5 = scalar_lea.vmem %s1323_s2, %s893_s29  ;;  %s1186_s8 = scalar_lea.vmem %s1324_s3, %s893_s29  ;;  %232 = vst [vmem:[#allocation2 + $0x10] sm:$0xff] (!%p896_p8), %v1106_v0  ;;  %233 = vst [vmem:[#allocation2 + $0x18] sm:$0xff] (!%p896_p8), %v1106_v0 }
  0x15   : > { %229 = sbr.rel (%p896_p8) target bundleno = 35 (0x23), region = 36  ;;  %234 = vst [vmem:[#allocation2 + $0x20] sm:$0xff] (!%p896_p8), %v1106_v0  ;;  %235 = vst [vmem:[#allocation2 + $0x28] sm:$0xff] (!%p896_p8), %v1106_v0 }
  0x16   : > { %236 = vst [vmem:[#allocation2 + $0x30] sm:$0xff] (!%p896_p8), %v1106_v0  ;;  %237 = vst [vmem:[#allocation2 + $0x38] sm:$0xff] (!%p896_p8), %v1106_v0 }
  0x17   : > { %238 = vst [vmem:[#allocation2 + $0x40] sm:$0xff] (!%p896_p8), %v1106_v0  ;;  %239 = vst [vmem:[#allocation2 + $0x48] sm:$0xff] (!%p896_p8), %v1106_v0 }
  0x18   : > { %240 = vst [vmem:[#allocation2 + $0x50] sm:$0xff] (!%p896_p8), %v1106_v0  ;;  %241 = vst [vmem:[#allocation2 + $0x58] sm:$0xff] (!%p896_p8), %v1106_v0 }
  0x19   : > { %242 = vst [vmem:[#allocation2 + $0x60] sm:$0xff] (!%p896_p8), %v1106_v0  ;;  %243 = vst [vmem:[#allocation2 + $0x68] sm:$0xff] (!%p896_p8), %v1106_v0 }
  0x1a   : > { %244 = vst [vmem:[#allocation2 + $0x70] sm:$0xff] (!%p896_p8), %v1106_v0  ;;  %245 = vst [vmem:[#allocation2 + $0x78] sm:$0xff] (!%p896_p8), %v1106_v0 }
  0x1b   : > { %246 = vst [vmem:[#allocation2 + $0x80] sm:$0xff] (!%p896_p8), %v1106_v0  ;;  %247 = vst [vmem:[#allocation2 + $0x88] sm:$0xff] (!%p896_p8), %v1106_v0 }
  0x1c   : > { %248 = vst [vmem:[#allocation2 + $0x90] sm:$0xff] %v1106_v0  ;;  %249 = vst [vmem:[#allocation2 + $0x98] sm:$0xff] %v1106_v0 }
  0x1d   : > { %250 = vst [vmem:[#allocation2 + $0xa0] sm:$0xff] %v1106_v0  ;;  %251 = vst [vmem:[#allocation2 + $0xa8] sm:$0xff] %v1106_v0 }
  0x1e   : > { %252 = vst [vmem:[#allocation2 + $0xb0] sm:$0xff] %v1106_v0  ;;  %253 = vst [vmem:[#allocation2 + $0xb8] sm:$0xff] %v1106_v0 }
  0x1f   : > { %254 = vst [vmem:[#allocation2 + $0xc0] sm:$0xff] %v1106_v0  ;;  %255 = vst [vmem:[#allocation2 + $0xc8] sm:$0xff] %v1106_v0 }
  0x20   : > { %256 = vst [vmem:[#allocation2 + $0xd0] sm:$0xff] %v1106_v0  ;;  %257 = vst [vmem:[#allocation2 + $0xd8] sm:$0xff] %v1106_v0 }
  0x21   : > { %258 = vst [vmem:[#allocation2 + $0xe0] sm:$0xff] %v1106_v0  ;;  %259 = vst [vmem:[#allocation2 + $0xe8] sm:$0xff] %v1106_v0 }
  0x22   : > { %260 = vst [vmem:[#allocation2 + $0xf0] sm:$0xff] %v1106_v0  ;;  %261 = vst [vmem:[#allocation2 + $0xf8] sm:$0xff] %v1106_v0 }
  0x23 PF: > { %v1010_v1 = vld [vmem:[%s1176_s28 + $0x4] ss:$8 sps:$4 sm:$0xff]   ;;  %v1012_v2 = vld [vmem:[%s1176_s28] ss:$8 sps:$4 sm:$0xff]   ;;  %v1107_v3 = vmov 0   ;;  %v262_v10 = vlaneseq  ;;  %s897_s9 = sshll.u32 %s1092_s13, 7 }
  0x24   : > { %518 = vmatprep.mubr.bf16.mxu0 %v1107_v3  ;;  %558 = vmatprep.mubr.bf16.mxu1 %v1107_v3  ;;  %v1013_v4 = vld [vmem:[%s1176_s28 + $0x14] ss:$8 sps:$4 sm:$0xff]   ;;  %v1015_v5 = vld [vmem:[%s1176_s28 + $0x10] ss:$8 sps:$4 sm:$0xff]   ;;  %v1016_v6 = vld [vmem:[%s1176_s28 + $0x24] ss:$8 sps:$4 sm:$0xff]   ;;  %v1208_v18 = vstv %s897_s9 }
  0x25   : > { %486 = vmatprep.subr.bf16.mxu0 %v1010_v1  ;;  %951 = vmatprep.subr.bf16.mxu1 %v1010_v1  ;;  %v1018_v7 = vld [vmem:[%s1176_s28 + $0x20] ss:$8 sps:$4 sm:$0xff]   ;;  %v1019_v8 = vld [vmem:[%s1176_s28 + $0x34] ss:$8 sps:$4 sm:$0xff]   ;;  %v1021_v9 = vld [vmem:[%s1176_s28 + $0x30] ss:$8 sps:$4 sm:$0xff]  }
  0x26   : > { %487 = vmatpush1.bf16.msra.mxu0 %v1012_v2  ;;  %959 = vmatpush1.bf16.msra.mxu1 %v1012_v2  ;;  %v1022_v11 = vld [vmem:[%s1176_s28 + $0x44] ss:$8 sps:$4 sm:$0xff]   ;;  %v1024_v12 = vld [vmem:[%s1176_s28 + $0x40] ss:$8 sps:$4 sm:$0xff]   ;;  %v1201_v13 = vshrl.u32 %v262_v10, 7  ;;  %v360_v60 = vld [vmem:[#allocation2 + $0x10] sm:$0xff] }
  0x27   : > { %488 = vmatprep.subr.bf16.mxu0 %v1013_v4  ;;  %952 = vmatprep.subr.bf16.mxu1 %v1013_v4  ;;  %v1025_v14 = vld [vmem:[%s1176_s28 + $0x54] ss:$8 sps:$4 sm:$0xff]   ;;  %v1027_v15 = vld [vmem:[%s1176_s28 + $0x50] ss:$8 sps:$4 sm:$0xff]   ;;  %v1028_v17 = vld [vmem:[%s1176_s28 + $0x64] ss:$8 sps:$4 sm:$0xff]  }
  0x28   : > { %v264_v16 = vadd.s32 8, %v1201_v13  ;;  %v271_v19 = vadd.s32 64, %v1201_v13  ;;  %v272_v20 = vadd.s32 72, %v1201_v13  ;;  %v1030_v21 = vld [vmem:[%s1176_s28 + $0x60] ss:$8 sps:$4 sm:$0xff]   ;;  %v281_v22 = vadd.s32 %v1208_v18, %v1201_v13  ;;  %v361_v2 = vld [vmem:[#allocation2 + $0x18] sm:$0xff] }
  0x29   : > { %v1031_v24 = vld [vmem:[%s1176_s28 + $0x74] ss:$8 sps:$4 sm:$0xff]   ;;  %v1222_v25 = vld [vmem:[%s205_s24] ss:$0 sm:$0xff]  ;;  %v1033_v28 = vld [vmem:[%s1176_s28 + $0x70] ss:$8 sps:$4 sm:$0xff]  }
  0x2a   : > { %489 = vmatpush1.bf16.msra.mxu0 %v1015_v5  ;;  %960 = vmatpush1.bf16.msra.mxu1 %v1015_v5  ;;  %v282_v23 = vadd.s32 %v1208_v18, %v264_v16  ;;  %v289_v26 = vadd.s32 %v1208_v18, %v271_v19  ;;  %v290_v27 = vadd.s32 %v1208_v18, %v272_v20  ;;  %v265_v29 = vadd.s32 16, %v1201_v13  ;;  %v358_v54 = vld [vmem:[#allocation2] sm:$0xff]  ;;  %v359_v56 = vld [vmem:[#allocation2 + $0x8] sm:$0xff]  ;;  %v376_v61 = vld [vmem:[#allocation2 + $0x90] sm:$0xff]  ;;  %p947_p9 = scmp.ne.s32.totalorder %s1088_s12, 3 }
  0x2b   : > { %490 = vmatprep.subr.bf16.mxu0 %v1016_v6  ;;  %953 = vmatprep.subr.bf16.mxu1 %v1016_v6  ;;  %vm302_vm0 = vcmp.eq.s32.totalorder %v281_v22, %v1222_v25  ;;  %v266_v30 = vadd.s32 24, %v1201_v13  ;;  %v273_v31 = vadd.s32 80, %v1201_v13  ;;  %v274_v32 = vadd.s32 88, %v1201_v13  ;;  %v374_v55 = vld [vmem:[#allocation2 + $0x80] sm:$0xff]  ;;  %v375_v57 = vld [vmem:[#allocation2 + $0x88] sm:$0xff]  ;;  %v364_v20 = vld [vmem:[#allocation2 + $0x30] sm:$0xff] }
  0x2c   : > { %vm303_vm1 = vcmp.eq.s32.totalorder %v282_v23, %v1222_v25  ;;  %vm310_vm2 = vcmp.eq.s32.totalorder %v289_v26, %v1222_v25  ;;  %vm311_vm3 = vcmp.eq.s32.totalorder %v290_v27, %v1222_v25  ;;  %v283_v33 = vadd.s32 %v1208_v18, %v265_v29  ;;  %v363_v16 = vld [vmem:[#allocation2 + $0x28] sm:$0xff]  ;;  %v365_v26 = vld [vmem:[#allocation2 + $0x38] sm:$0xff] }
  0x2d   : > { %vm931_vm4 = vmpackc.low %vm303_vm1, %vm302_vm0  ;;  %v284_v34 = vadd.s32 %v1208_v18, %v266_v30  ;;  %v291_v35 = vadd.s32 %v1208_v18, %v273_v31  ;;  %v292_v36 = vadd.s32 %v1208_v18, %v274_v32  ;;  %v1108_v37 = vmov 1.0|1.0   ;;  %v381_v27 = vld [vmem:[#allocation2 + $0xb8] sm:$0xff] }
  0x2e   : > { %491 = vmatpush1.bf16.msra.mxu0 %v1018_v7  ;;  %961 = vmatpush1.bf16.msra.mxu1 %v1018_v7  ;;  %vm939_vm5 = vmpackc.low %vm311_vm3, %vm310_vm2  ;;  %vm304_vm6 = vcmp.eq.s32.totalorder %v283_v33, %v1222_v25  ;;  %v267_v38 = vadd.s32 32, %v1201_v13  ;;  %v268_v39 = vadd.s32 40, %v1201_v13  ;;  %v275_v40 = vadd.s32 96, %v1201_v13 }
  0x2f   : > { %492 = vmatprep.subr.bf16.mxu0 %v1019_v8  ;;  %954 = vmatprep.subr.bf16.mxu1 %v1019_v8  ;;  %vm305_vm7 = vcmp.eq.s32.totalorder %v284_v34, %v1222_v25  ;;  %vm312_vm8 = vcmp.eq.s32.totalorder %v291_v35, %v1222_v25  ;;  %vm313_vm9 = vcmp.eq.s32.totalorder %v292_v36, %v1222_v25  ;;  %v276_v41 = vadd.s32 104, %v1201_v13 }
  0x30   : > { %vm933_vm10 = vmpackc.low %vm305_vm7, %vm304_vm6  ;;  %v285_v42 = vadd.s32 %v1208_v18, %v267_v38  ;;  %v286_v43 = vadd.s32 %v1208_v18, %v268_v39  ;;  %v293_v44 = vadd.s32 %v1208_v18, %v275_v40  ;;  %v269_v46 = vadd.s32 48, %v1201_v13  ;;  %v366_v38 = vld [vmem:[#allocation2 + $0x40] sm:$0xff]  ;;  %v367_v40 = vld [vmem:[#allocation2 + $0x48] sm:$0xff] }
  0x31   : > { %vm941_vm11 = vmpackc.low %vm313_vm9, %vm312_vm8  ;;  %v294_v45 = vadd.s32 %v1208_v18, %v276_v41  ;;  %v270_v47 = vadd.s32 56, %v1201_v13  ;;  %v277_v48 = vadd.s32 112, %v1201_v13  ;;  %v278_v49 = vadd.s32 120, %v1201_v13  ;;  %v382_v39 = vld [vmem:[#allocation2 + $0xc0] sm:$0xff]  ;;  %v383_v41 = vld [vmem:[#allocation2 + $0xc8] sm:$0xff] }
  0x32   : > { %493 = vmatpush1.bf16.msra.mxu0 %v1021_v9  ;;  %962 = vmatpush1.bf16.msra.mxu1 %v1021_v9  ;;  %vm306_vm12 = vcmp.eq.s32.totalorder %v285_v42, %v1222_v25  ;;  %vm307_vm13 = vcmp.eq.s32.totalorder %v286_v43, %v1222_v25  ;;  %vm314_vm14 = vcmp.eq.s32.totalorder %v293_v44, %v1222_v25  ;;  %v368_v44 = vld [vmem:[#allocation2 + $0x50] sm:$0xff] }
  0x33   : > { %494 = vmatprep.subr.bf16.mxu0 %v1022_v11  ;;  %955 = vmatprep.subr.bf16.mxu1 %v1022_v11  ;;  %vm315_vm15 = vcmp.eq.s32.totalorder %v294_v45, %v1222_v25  ;;  %vm935_vm0 = vmpackc.low %vm307_vm13, %vm306_vm12  ;;  %v287_v50 = vadd.s32 %v1208_v18, %v269_v46  ;;  %v288_v51 = vadd.s32 %v1208_v18, %v270_v47  ;;  %v384_v45 = vld [vmem:[#allocation2 + $0xd0] sm:$0xff] }
  0x34   : > { %vm943_vm1 = vmpackc.low %vm315_vm15, %vm314_vm14  ;;  %v295_v52 = vadd.s32 %v1208_v18, %v277_v48  ;;  %v296_v53 = vadd.s32 %v1208_v18, %v278_v49 }
  0x35   : > { %vm308_vm2 = vcmp.eq.s32.totalorder %v287_v50, %v1222_v25  ;;  %vm309_vm3 = vcmp.eq.s32.totalorder %v288_v51, %v1222_v25  ;;  %v369_v50 = vld [vmem:[#allocation2 + $0x58] sm:$0xff] }
  0x36   : > { %495 = vmatpush1.bf16.msra.mxu0 %v1024_v12  ;;  %963 = vmatpush1.bf16.msra.mxu1 %v1024_v12  ;;  %vm937_vm6 = vmpackc.low %vm309_vm3, %vm308_vm2  ;;  %v385_v51 = vld [vmem:[#allocation2 + $0xd8] sm:$0xff] }
  0x37   : > { %496 = vmatprep.subr.bf16.mxu0 %v1025_v14  ;;  %956 = vmatprep.subr.bf16.mxu1 %v1025_v14  ;;  %v362_v14 = vld [vmem:[#allocation2 + $0x20] sm:$0xff] }
  0x3a   : > { %497 = vmatpush1.bf16.msra.mxu0 %v1027_v15  ;;  %964 = vmatpush1.bf16.msra.mxu1 %v1027_v15  ;;  %v378_v15 = vld [vmem:[#allocation2 + $0xa0] sm:$0xff] }
  0x3b   : > { %498 = vmatprep.subr.bf16.mxu0 %v1028_v17  ;;  %957 = vmatprep.subr.bf16.mxu1 %v1028_v17  ;;  %v379_v17 = vld [vmem:[#allocation2 + $0xa8] sm:$0xff] }
  0x3e   : > { %499 = vmatpush1.bf16.msra.mxu0 %v1030_v21  ;;  %965 = vmatpush1.bf16.msra.mxu1 %v1030_v21  ;;  %v380_v21 = vld [vmem:[#allocation2 + $0xb0] sm:$0xff] }
  0x3f   : > { %500 = vmatprep.subr.bf16.mxu0 %v1031_v24  ;;  %958 = vmatprep.subr.bf16.mxu1 %v1031_v24 }
  0x42   : > { %501 = vmatpush1.bf16.msra.mxu0 %v1033_v28  ;;  %966 = vmatpush1.bf16.msra.mxu1 %v1033_v28 }
  0x45   : > { %932 = vmatmul.mubr.msk.bf16.vlgmr.msra.gmra.mrb[0].mxu0 %vm931_vm4, %v1108_v37  ;;  %940 = vmatmul.mubr.msk.bf16.vlgmr.msra.gmra.mrb[0].mxu1 %vm939_vm5, %v1108_v37  ;;  %vm316_vm4 = vcmp.eq.s32.totalorder %v295_v52, %v1222_v25  ;;  %vm317_vm5 = vcmp.eq.s32.totalorder %v296_v53, %v1222_v25 }
  0x46   : > { %528 = vmatprep.mubr.bf16.mxu0 %v1107_v3  ;;  %568 = vmatprep.mubr.bf16.mxu1 %v1107_v3  ;;  %vm945_vm7 = vmpackc.low %vm317_vm5, %vm316_vm4 }
  0x4d   : > { %934 = vmatmul.mubr.msk.bf16.gmra.mrb[4].mxu0 %vm933_vm10, %v1108_v37  ;;  %942 = vmatmul.mubr.msk.bf16.gmra.mrb[4].mxu1 %vm941_vm11, %v1108_v37 }
  0x4e   : > { %538 = vmatprep.mubr.bf16.mxu0 %v1107_v3  ;;  %578 = vmatprep.mubr.bf16.mxu1 %v1107_v3 }
  0x55   : > { %936 = vmatmul.mubr.msk.bf16.gmra.mrb[8].mxu0 %vm935_vm0, %v1108_v37  ;;  %944 = vmatmul.mubr.msk.bf16.gmra.mrb[8].mxu1 %vm943_vm1, %v1108_v37 }
  0x56   : > { %548 = vmatprep.mubr.bf16.mxu0 %v1107_v3  ;;  %588 = vmatprep.mubr.bf16.mxu1 %v1107_v3  ;;  %v377_v3 = vld [vmem:[#allocation2 + $0x98] sm:$0xff] }
  0x5d   : > { %938 = vmatmul.mubr.msk.bf16.gmra.mrb[12].mxu0 %vm937_vm6, %v1108_v37  ;;  %946 = vmatmul.mubr.msk.bf16.gmra.mrb[12].mxu1 %vm945_vm7, %v1108_v37 }
 0x118   : > { %v520_v58 = vpop.f32.mrb[0].mxu0  ;;  %v560_v59 = vpop.f32.mrb[0].mxu1 }
 0x119   : > { %v599_v62 = vadd.f32 %v520_v58, %v358_v54  ;;  %v615_v63 = vadd.f32 %v560_v59, %v374_v55  ;;  %v522_v0 = vpop.f32.mrb[1].mxu0  ;;  %v562_v1 = vpop.f32.mrb[1].mxu1 }
 0x11a   : > { %v600_v4 = vadd.f32 %v522_v0, %v359_v56  ;;  %v616_v5 = vadd.f32 %v562_v1, %v375_v57  ;;  %v524_v6 = vpop.f32.mrb[2].mxu0  ;;  %v564_v7 = vpop.f32.mrb[2].mxu1  ;;  %v371_v0 = vld [vmem:[#allocation2 + $0x68] sm:$0xff] }
 0x11b   : > { %631 = vst [vmem:[#allocation2] sm:$0xff] %v599_v62  ;;  %647 = vst [vmem:[#allocation2 + $0x80] sm:$0xff] %v615_v63  ;;  %v601_v8 = vadd.f32 %v524_v6, %v360_v60  ;;  %v617_v9 = vadd.f32 %v564_v7, %v376_v61  ;;  %v526_v10 = vpop.f32.mrb[3].mxu0  ;;  %v566_v11 = vpop.f32.mrb[3].mxu1  ;;  %v370_v62 = vld [vmem:[#allocation2 + $0x60] sm:$0xff]  ;;  %v387_v1 = vld [vmem:[#allocation2 + $0xe8] sm:$0xff] }
 0x11c   : > { %632 = vst [vmem:[#allocation2 + $0x8] sm:$0xff] %v600_v4  ;;  %648 = vst [vmem:[#allocation2 + $0x88] sm:$0xff] %v616_v5  ;;  %v602_v12 = vadd.f32 %v526_v10, %v361_v2  ;;  %v618_v13 = vadd.f32 %v566_v11, %v377_v3  ;;  %v386_v63 = vld [vmem:[#allocation2 + $0xe0] sm:$0xff]  ;;  %v372_v4 = vld [vmem:[#allocation2 + $0x70] sm:$0xff] }
 0x11d   : > { %633 = vst [vmem:[#allocation2 + $0x10] sm:$0xff] %v601_v8  ;;  %649 = vst [vmem:[#allocation2 + $0x90] sm:$0xff] %v617_v9  ;;  %v388_v5 = vld [vmem:[#allocation2 + $0xf0] sm:$0xff]  ;;  %v373_v10 = vld [vmem:[#allocation2 + $0x78] sm:$0xff] }
 0x11e   : > { %634 = vst [vmem:[#allocation2 + $0x18] sm:$0xff] %v602_v12  ;;  %650 = vst [vmem:[#allocation2 + $0x98] sm:$0xff] %v618_v13  ;;  %v389_v11 = vld [vmem:[#allocation2 + $0xf8] sm:$0xff] }
 0x120   : > { %v530_v18 = vpop.f32.mrb[4].mxu0  ;;  %v570_v19 = vpop.f32.mrb[4].mxu1 }
 0x121   : > { %v603_v22 = vadd.f32 %v530_v18, %v362_v14  ;;  %v619_v23 = vadd.f32 %v570_v19, %v378_v15  ;;  %v532_v24 = vpop.f32.mrb[5].mxu0  ;;  %v572_v25 = vpop.f32.mrb[5].mxu1 }
 0x122   : > { %v604_v28 = vadd.f32 %v532_v24, %v363_v16  ;;  %v620_v29 = vadd.f32 %v572_v25, %v379_v17  ;;  %v534_v30 = vpop.f32.mrb[6].mxu0  ;;  %v574_v31 = vpop.f32.mrb[6].mxu1 }
 0x123   : > { %635 = vst [vmem:[#allocation2 + $0x20] sm:$0xff] %v603_v22  ;;  %651 = vst [vmem:[#allocation2 + $0xa0] sm:$0xff] %v619_v23  ;;  %v605_v32 = vadd.f32 %v534_v30, %v364_v20  ;;  %v621_v33 = vadd.f32 %v574_v31, %v380_v21  ;;  %v536_v34 = vpop.f32.mrb[7].mxu0  ;;  %v576_v35 = vpop.f32.mrb[7].mxu1  ;;  %v668_v22 = vld [vmem:[#allocation2 + $0x8] sm:$0xff] (!%p947_p9) }
 0x124   : > { %636 = vst [vmem:[#allocation2 + $0x28] sm:$0xff] %v604_v28  ;;  %652 = vst [vmem:[#allocation2 + $0xa8] sm:$0xff] %v620_v29  ;;  %v606_v36 = vadd.f32 %v536_v34, %v365_v26  ;;  %v622_v37 = vadd.f32 %v576_v35, %v381_v27  ;;  %v699_v23 = vadd.f32 (!%p947_p9), 1e-06, %v668_v22  ;;  %v683_v22 = vld [vmem:[#allocation2 + $0x80] sm:$0xff] (!%p947_p9) }
 0x125   : > { %637 = vst [vmem:[#allocation2 + $0x30] sm:$0xff] %v605_v32  ;;  %653 = vst [vmem:[#allocation2 + $0xb0] sm:$0xff] %v621_v33  ;;  %v670_v24 = vld [vmem:[#allocation2 + $0x18] sm:$0xff] (!%p947_p9) }
 0x126   : > { %638 = vst [vmem:[#allocation2 + $0x38] sm:$0xff] %v606_v36  ;;  %654 = vst [vmem:[#allocation2 + $0xb8] sm:$0xff] %v622_v37  ;;  %v700_v25 = vadd.f32 (!%p947_p9), 1e-06, %v670_v24  ;;  %1034 = vrcp.f32 (!%p947_p9), %v699_v23 }
 0x128   : > { %v540_v42 = vpop.f32.mrb[8].mxu0  ;;  %v580_v43 = vpop.f32.mrb[8].mxu1  ;;  %1036 = vrcp.f32 (!%p947_p9), %v700_v25 }
 0x129   : > { %v607_v46 = vadd.f32 %v540_v42, %v366_v38  ;;  %v623_v47 = vadd.f32 %v580_v43, %v382_v39  ;;  %v542_v48 = vpop.f32.mrb[9].mxu0  ;;  %v582_v49 = vpop.f32.mrb[9].mxu1  ;;  %v684_v38 = vld [vmem:[#allocation2 + $0x88] sm:$0xff] (!%p947_p9)  ;;  %v667_v43 = vld [vmem:[#allocation2] sm:$0xff] (!%p947_p9) }
 0x12a   : > { %v608_v52 = vadd.f32 %v542_v48, %v367_v40  ;;  %v624_v53 = vadd.f32 %v582_v49, %v383_v41  ;;  %v544_v54 = vpop.f32.mrb[10].mxu0  ;;  %v584_v55 = vpop.f32.mrb[10].mxu1  ;;  %v707_v39 = vadd.f32 (!%p947_p9), 1e-06, %v684_v38  ;;  %v686_v40 = vld [vmem:[#allocation2 + $0x98] sm:$0xff] (!%p947_p9) }
 0x12b   : > { %639 = vst [vmem:[#allocation2 + $0x40] sm:$0xff] %v607_v46  ;;  %655 = vst [vmem:[#allocation2 + $0xc0] sm:$0xff] %v623_v47  ;;  %v609_v56 = vadd.f32 %v544_v54, %v368_v44  ;;  %v625_v57 = vadd.f32 %v584_v55, %v384_v45  ;;  %v546_v58 = vpop.f32.mrb[11].mxu0  ;;  %v586_v59 = vpop.f32.mrb[11].mxu1  ;;  %v672_v26 = vld [vmem:[#allocation2 + $0x28] sm:$0xff] (!%p947_p9)  ;;  %v669_v46 = vld [vmem:[#allocation2 + $0x10] sm:$0xff] (!%p947_p9) }
 0x12c   : > { %640 = vst [vmem:[#allocation2 + $0x48] sm:$0xff] %v608_v52  ;;  %656 = vst [vmem:[#allocation2 + $0xc8] sm:$0xff] %v624_v53  ;;  %v610_v60 = vadd.f32 %v546_v58, %v369_v50  ;;  %v626_v61 = vadd.f32 %v586_v59, %v385_v51  ;;  %v701_v27 = vadd.f32 (!%p947_p9), 1e-06, %v672_v26  ;;  %v708_v41 = vadd.f32 (!%p947_p9), 1e-06, %v686_v40 }
 0x12d   : > { %641 = vst [vmem:[#allocation2 + $0x50] sm:$0xff] %v609_v56  ;;  %657 = vst [vmem:[#allocation2 + $0xd0] sm:$0xff] %v625_v57  ;;  %v674_v28 = vld [vmem:[#allocation2 + $0x38] sm:$0xff] (!%p947_p9)  ;;  %v688_v42 = vld [vmem:[#allocation2 + $0xa8] sm:$0xff] (!%p947_p9) }
 0x12e   : > { %642 = vst [vmem:[#allocation2 + $0x58] sm:$0xff] %v610_v60  ;;  %658 = vst [vmem:[#allocation2 + $0xd8] sm:$0xff] %v626_v61  ;;  %v702_v29 = vadd.f32 (!%p947_p9), 1e-06, %v674_v28  ;;  %1038 = vrcp.f32 (!%p947_p9), %v701_v27  ;;  %v709_v44 = vadd.f32 (!%p947_p9), 1e-06, %v688_v42 }
 0x12f   : > { %v690_v45 = vld [vmem:[#allocation2 + $0xb8] sm:$0xff] (!%p947_p9)  ;;  %v747_v50 = vld [vmem:[%s1181_s5] sm:$0xff] (!%p947_p9)  ;;  %v748_v56 = vld [vmem:[%s1181_s5 + $0x8] sm:$0xff] (!%p947_p9) }
 0x130   : > { %v550_v2 = vpop.f32.mrb[12].mxu0  ;;  %v590_v3 = vpop.f32.mrb[12].mxu1  ;;  %666 = sbr.rel (%p947_p9) target bundleno = 344 (0x158), region = 40  ;;  %1040 = vrcp.f32 (!%p947_p9), %v702_v29  ;;  %v710_v47 = vadd.f32 (!%p947_p9), 1e-06, %v690_v45  ;;  %v671_v51 = vld [vmem:[#allocation2 + $0x20] sm:$0xff] (!%p947_p9) }
 0x131   : > { %v611_v6 = vadd.f32 %v550_v2, %v370_v62  ;;  %v627_v7 = vadd.f32 %v590_v3, %v386_v63  ;;  %v552_v8 = vpop.f32.mrb[13].mxu0  ;;  %v592_v9 = vpop.f32.mrb[13].mxu1  ;;  %v673_v57 = vld [vmem:[#allocation2 + $0x30] sm:$0xff] (!%p947_p9)  ;;  %v754_v26 = vld [vmem:[%s1181_s5 + $0x38] sm:$0xff] (!%p947_p9) }
 0x132   : > { %v612_v12 = vadd.f32 %v552_v8, %v371_v0  ;;  %v628_v13 = vadd.f32 %v592_v9, %v387_v1  ;;  %v554_v14 = vpop.f32.mrb[14].mxu0  ;;  %v594_v15 = vpop.f32.mrb[14].mxu1  ;;  %v749_v62 = vld [vmem:[%s1181_s5 + $0x10] sm:$0xff] (!%p947_p9)  ;;  %v675_v63 = vld [vmem:[#allocation2 + $0x40] sm:$0xff] (!%p947_p9) }
 0x133   : > { %643 = vst [vmem:[#allocation2 + $0x60] sm:$0xff] %v611_v6  ;;  %659 = vst [vmem:[#allocation2 + $0xe0] sm:$0xff] %v627_v7  ;;  %v613_v16 = vadd.f32 %v554_v14, %v372_v4  ;;  %v629_v17 = vadd.f32 %v594_v15, %v388_v5  ;;  %v556_v18 = vpop.f32.mrb[15].mxu0  ;;  %v596_v19 = vpop.f32.mrb[15].mxu1  ;;  %v676_v30 = vld [vmem:[#allocation2 + $0x48] sm:$0xff] (!%p947_p9)  ;;  %v750_v5 = vld [vmem:[%s1181_s5 + $0x18] sm:$0xff] (!%p947_p9) }
 0x134   : > { %644 = vst [vmem:[#allocation2 + $0x68] sm:$0xff] %v612_v12  ;;  %660 = vst [vmem:[#allocation2 + $0xe8] sm:$0xff] %v628_v13  ;;  %v614_v20 = vadd.f32 %v556_v18, %v373_v10  ;;  %v630_v21 = vadd.f32 %v596_v19, %v389_v11  ;;  %v703_v31 = vadd.f32 (!%p947_p9), 1e-06, %v676_v30  ;;  %v692_v48 = vld [vmem:[#allocation2 + $0xc8] sm:$0xff] (!%p947_p9)  ;;  %v1035_v49 = vpop.eup (!%p947_p9), %1034  ;;  %v677_v6 = vld [vmem:[#allocation2 + $0x50] sm:$0xff] (!%p947_p9) }
 0x135   : > { %645 = vst [vmem:[#allocation2 + $0x70] sm:$0xff] %v613_v16  ;;  %661 = vst [vmem:[#allocation2 + $0xf0] sm:$0xff] %v629_v17  ;;  %v678_v32 = vld [vmem:[#allocation2 + $0x58] sm:$0xff] (!%p947_p9)  ;;  %v711_v52 = vadd.f32 (!%p947_p9), 1e-06, %v692_v48  ;;  %v1037_v54 = vpop.eup (!%p947_p9), %1036  ;;  %v731_v55 = vmul.f32 (!%p947_p9), %v1035_v49, %v667_v43  ;;  %v751_v11 = vld [vmem:[%s1181_s5 + $0x20] sm:$0xff] (!%p947_p9) }
 0x136   : > { %646 = vst [vmem:[#allocation2 + $0x78] sm:$0xff] %v614_v20  ;;  %662 = vst [vmem:[#allocation2 + $0xf8] sm:$0xff] %v630_v21  ;;  %v704_v33 = vadd.f32 (!%p947_p9), 1e-06, %v678_v32  ;;  %1042 = vrcp.f32 (!%p947_p9), %v703_v31  ;;  %v694_v53 = vld [vmem:[#allocation2 + $0xd8] sm:$0xff] (!%p947_p9)  ;;  %v732_v61 = vmul.f32 (!%p947_p9), %v1037_v54, %v669_v46  ;;  %v752_v16 = vld [vmem:[%s1181_s5 + $0x28] sm:$0xff] (!%p947_p9) }
 0x137   : > { %v712_v58 = vadd.f32 1e-06, %v694_v53  ;;  %v763_v3 = vadd.f32 %v747_v50, %v731_v55  ;;  %v753_v21 = vld [vmem:[%s1181_s5 + $0x30] sm:$0xff]  ;;  %v755_v31 = vld [vmem:[%s1181_s5 + $0x40] sm:$0xff]  ;;  %v758_v46 = vld [vmem:[%s1181_s5 + $0x58] sm:$0xff] }
 0x138   : > { %1044 = vrcp.f32 %v704_v33  ;;  %v1039_v60 = vpop.eup %1038  ;;  %v764_v9 = vadd.f32 %v748_v56, %v732_v61  ;;  %v685_v27 = vld [vmem:[#allocation2 + $0x90] sm:$0xff]  ;;  %v687_v32 = vld [vmem:[#allocation2 + $0xa0] sm:$0xff]  ;;  %v760_v56 = vld [vmem:[%s1181_s5 + $0x68] sm:$0xff] }
 0x139   : > { %v733_v4 = vmul.f32 %v1039_v60, %v671_v51  ;;  %779 = vst [vmem:[%s1186_s8] sm:$0xff] %v763_v3  ;;  %v691_v42 = vld [vmem:[#allocation2 + $0xc0] sm:$0xff]  ;;  %v761_v61 = vld [vmem:[%s1181_s5 + $0x70] sm:$0xff] }
 0x13a   : > { %v1041_v2 = vpop.eup %1040  ;;  %v679_v12 = vld [vmem:[#allocation2 + $0x60] sm:$0xff]  ;;  %780 = vst [vmem:[%s1186_s8 + $0x8] sm:$0xff] %v764_v9 }
 0x13b   : > { %v680_v34 = vld [vmem:[#allocation2 + $0x68] sm:$0xff]  ;;  %v734_v10 = vmul.f32 %v1041_v2, %v673_v57  ;;  %v765_v14 = vadd.f32 %v749_v62, %v733_v4  ;;  %v759_v51 = vld [vmem:[%s1181_s5 + $0x60] sm:$0xff] }
 0x13c   : > { %v705_v35 = vadd.f32 1e-06, %v680_v34  ;;  %v696_v59 = vld [vmem:[#allocation2 + $0xe8] sm:$0xff]  ;;  %v681_v17 = vld [vmem:[#allocation2 + $0x70] sm:$0xff] }
 0x13d   : > { %v682_v36 = vld [vmem:[#allocation2 + $0x78] sm:$0xff]  ;;  %v713_v0 = vadd.f32 1e-06, %v696_v59  ;;  %v766_v19 = vadd.f32 %v750_v5, %v734_v10  ;;  %781 = vst [vmem:[%s1186_s8 + $0x10] sm:$0xff] %v765_v14  ;;  %v697_v57 = vld [vmem:[#allocation2 + $0xf0] sm:$0xff] }
 0x13e   : > { %v706_v37 = vadd.f32 1e-06, %v682_v36  ;;  %1046 = vrcp.f32 %v705_v35  ;;  %v698_v1 = vld [vmem:[#allocation2 + $0xf8] sm:$0xff]  ;;  %v756_v36 = vld [vmem:[%s1181_s5 + $0x48] sm:$0xff] }
 0x13f   : > { %v714_v7 = vadd.f32 1e-06, %v698_v1  ;;  %782 = vst [vmem:[%s1186_s8 + $0x18] sm:$0xff] %v766_v19  ;;  %v762_v1 = vld [vmem:[%s1181_s5 + $0x78] sm:$0xff] }
 0x140   : > { %1048 = vrcp.f32 %v706_v37  ;;  %v1043_v8 = vpop.eup %1042  ;;  %v689_v37 = vld [vmem:[#allocation2 + $0xb0] sm:$0xff] }
 0x141   : > { %1050 = vrcp.f32 %v707_v39  ;;  %v735_v15 = vmul.f32 %v1043_v8, %v675_v63 }
 0x142   : > { %1052 = vrcp.f32 %v708_v41  ;;  %v1045_v13 = vpop.eup %1044  ;;  %v757_v41 = vld [vmem:[%s1181_s5 + $0x50] sm:$0xff] }
 0x143   : > { %1054 = vrcp.f32 %v709_v44  ;;  %v736_v20 = vmul.f32 %v1045_v13, %v677_v6  ;;  %v767_v24 = vadd.f32 %v751_v11, %v735_v15 }
 0x144   : > { %1056 = vrcp.f32 %v710_v47  ;;  %v693_v47 = vld [vmem:[#allocation2 + $0xd0] sm:$0xff] }
 0x145   : > { %1058 = vrcp.f32 %v711_v52  ;;  %v768_v29 = vadd.f32 %v752_v16, %v736_v20  ;;  %783 = vst [vmem:[%s1186_s8 + $0x20] sm:$0xff] %v767_v24  ;;  %v695_v52 = vld [vmem:[#allocation2 + $0xe0] sm:$0xff] }
 0x146   : > { %1060 = vrcp.f32 %v712_v58 }
 0x147   : > { %1062 = vrcp.f32 %v713_v0  ;;  %784 = vst [vmem:[%s1186_s8 + $0x28] sm:$0xff] %v768_v29 }
 0x148   : > { %1064 = vrcp.f32 %v714_v7  ;;  %v1047_v18 = vpop.eup %1046 }
 0x149   : > { %v737_v25 = vmul.f32 %v1047_v18, %v679_v12 }
 0x14a   : > { %v1049_v23 = vpop.eup %1048 }
 0x14b   : > { %v1051_v28 = vpop.eup %1050  ;;  %v738_v30 = vmul.f32 %v1049_v23, %v681_v17  ;;  %v769_v34 = vadd.f32 %v753_v21, %v737_v25 }
 0x14c   : > { %v1053_v33 = vpop.eup %1052  ;;  %v739_v35 = vmul.f32 %v1051_v28, %v683_v22 }
 0x14d   : > { %v1055_v38 = vpop.eup %1054  ;;  %v770_v39 = vadd.f32 %v754_v26, %v738_v30  ;;  %v740_v40 = vmul.f32 %v1053_v33, %v685_v27  ;;  %785 = vst [vmem:[%s1186_s8 + $0x30] sm:$0xff] %v769_v34 }
 0x14e   : > { %v1057_v43 = vpop.eup %1056  ;;  %v771_v44 = vadd.f32 %v755_v31, %v739_v35  ;;  %v741_v45 = vmul.f32 %v1055_v38, %v687_v32 }
 0x14f   : > { %v1059_v48 = vpop.eup %1058  ;;  %786 = vst [vmem:[%s1186_s8 + $0x38] sm:$0xff] %v770_v39  ;;  %v772_v49 = vadd.f32 %v756_v36, %v740_v40  ;;  %v742_v50 = vmul.f32 %v1057_v43, %v689_v37 }
 0x150   : > { %v1061_v53 = vpop.eup %1060  ;;  %787 = vst [vmem:[%s1186_s8 + $0x40] sm:$0xff] %v771_v44  ;;  %v773_v54 = vadd.f32 %v757_v41, %v741_v45  ;;  %v743_v55 = vmul.f32 %v1059_v48, %v691_v42 }
 0x151   : > { %v1063_v58 = vpop.eup %1062  ;;  %788 = vst [vmem:[%s1186_s8 + $0x48] sm:$0xff] %v772_v49  ;;  %v774_v59 = vadd.f32 %v758_v46, %v742_v50  ;;  %v744_v60 = vmul.f32 %v1061_v53, %v693_v47 }
 0x152   : > { %v1065_v62 = vpop.eup %1064  ;;  %789 = vst [vmem:[%s1186_s8 + $0x50] sm:$0xff] %v773_v54  ;;  %v775_v63 = vadd.f32 %v759_v51, %v743_v55  ;;  %v745_v0 = vmul.f32 %v1063_v58, %v695_v52 }
 0x153   : > { %790 = vst [vmem:[%s1186_s8 + $0x58] sm:$0xff] %v774_v59  ;;  %v776_v2 = vadd.f32 %v760_v56, %v744_v60  ;;  %v746_v3 = vmul.f32 %v1065_v62, %v697_v57 }
 0x154   : > { %791 = vst [vmem:[%s1186_s8 + $0x60] sm:$0xff] %v775_v63  ;;  %v777_v4 = vadd.f32 %v761_v61, %v745_v0 }
 0x155   : > { %792 = vst [vmem:[%s1186_s8 + $0x68] sm:$0xff] %v776_v2  ;;  %v778_v5 = vadd.f32 %v762_v1, %v746_v3 }
 0x156   : > { %793 = vst [vmem:[%s1186_s8 + $0x70] sm:$0xff] %v777_v4 }
 0x157   : > { %794 = vst [vmem:[%s1186_s8 + $0x78] sm:$0xff] %v778_v5 }
 0x158 PF: > { %s13_s16 = sadd.s32 1, %s1104_s16   ;;  %s1325_s12 = smov %s1096_s14 }
 0x159   : > { %p10_p10 = scmp.ge.s32.totalorder %s13_s16, 14   ;;  %s1326_s13 = smov %s1100_s15 }
 0x15a   : > { %s1327_s14 = smov %s1330_s17  ;;  %s1328_s15 = smov %s1334_s18 }
 0x15b   :  { %12 = sbr.rel (!%p10_p10) target bundleno = 3 (0x3), region = 76 }

// kernel: alignn_conv.15
= control target key start
LH: loop header
LB: loop body
LE: loop exit
PB: predicated region body
PF: predicated region fallthrough
CT: control target
= control target key end

     0   :  { %s2281_s24 = smov 0   ;;  %s2283_s25 = smov 0   ;;  %s2683_s0 = inlined_call_operand.vmem [shape: s32[512,1], index: 0, kind: input, shape index: {}]   ;;  %s2684_s1 = inlined_call_operand.vmem [shape: s32[512,1], index: 1, kind: input, shape index: {}]   ;;  %s2685_s2 = inlined_call_operand.vmem [shape: f32[384,384], index: 2, kind: input, shape index: {}]   ;;  %s2686_s3 = inlined_call_operand.vmem [shape: f32[512,128], index: 3, kind: input, shape index: {}]   ;;  %s2687_s4 = inlined_call_operand.vmem [shape: f32[128,128], index: 4, kind: input, shape index: {}]   ;;  %s2688_s5 = inlined_call_operand.vmem [shape: f32[1,128], index: 5, kind: input, shape index: {}]   ;;  %s2689_s6 = inlined_call_operand.vmem [shape: f32[512,128], index: 6, kind: output, shape index: {0}]   ;;  %s2690_s7 = inlined_call_operand.vmem [shape: bf16[512,256], index: 7, kind: output, shape index: {1}]  }
   0x1   :  { %s2285_s26 = smov 0   ;;  %s2287_s27 = smov 0  }
   0x2   :  { %s2289_s28 = smov 0  }
   0x3 LB: > { %s27_s29 = sadd.s32 1, %s2228_s26  ;;  %s30_s30 = sadd.s32 1, %s2232_s27  ;;  %s2236_s28 = sphi %s2289_s28, %s18_s28   ;;  %s2232_s27 = sphi %s2287_s27, %s2694_s27   ;;  %s2228_s26 = sphi %s2285_s26, %s2693_s26   ;;  %s2224_s25 = sphi %s2283_s25, %s2692_s25   ;;  %s2220_s24 = sphi %s2281_s24, %s2691_s24  }
   0x4   : > { %p28_p0 = scmp.ge.s32.totalorder %s27_s29, 3  ;;  %p1755_p1 = scmp.ge.s32.totalorder %s2236_s28, 1 }
   0x5   : > { %p287_p2 = scmp.lt.s32.totalorder %s2236_s28, 13 }
   0x6   : > { %s2696_s29 = smov (%p28_p0, %s27_s29), 0  ;;  %s2698_s30 = smov (!%p28_p0, %s30_s30), %s2232_s27 }
   0x7   : > { %p288_p3 = pnand %p1755_p1, %p287_p2  ;;  %p32_p4 = scmp.ge.s32.totalorder %s2698_s30, 4 }
   0x8   : > { %s1756_s8 = sshll.u32 (!%p288_p3), %s2224_s25, 4  ;;  %s1760_s9 = sshll.u32 (!%p288_p3), %s2220_s24, 4 }
   0x9   : > { %s2700_s30 = smov (%p32_p4, %s2698_s30), 0  ;;  %291 = sbr.rel (%p288_p3) target bundleno = 741 (0x2e5), region = 44 }
   0xa   : > { %p342_p5 = scmp.lt.s32.totalorder (!%p288_p3), %s1756_s8, 63  ;;  %p354_p6 = scmp.lt.s32.totalorder (!%p288_p3), %s1760_s9, 47 }
   0xb   : > { %p1769_p7 = scmp.ne.s32.totalorder (!%p288_p3), %s2220_s24, 0 }
  0x10   : > { %s2702_s8 = smov (!%p342_p5, %s1756_s8), 63  ;;  %s2704_s9 = smov (!%p354_p6, %s1760_s9), 47 }
  0x11   : > { %s1757_s10 = sshll.u32 %s2702_s8, 3  ;;  %s2088_s17 = smul.u32 24, %s2704_s9  ;;  %v2238_v0 = vmov (!%p1769_p7), 0.0  }
  0x12   : > { %s2317_s13 = scalar_lea.vmem %s2683_s0, %s1757_s10  ;;  %s2322_s16 = scalar_lea.vmem %s2684_s1, %s1757_s10  ;;  %384 = vst [vmem:[#allocation2] sm:$0xff] (!%p1769_p7), %v2238_v0  ;;  %385 = vst [vmem:[#allocation2 + $0x8] sm:$0xff] (!%p1769_p7), %v2238_v0 }
  0x13   : > { %s2327_s20 = scalar_lea.vmem %s2686_s3, %s1757_s10  ;;  %s2332_s23 = scalar_lea.vmem %s2689_s6, %s1757_s10  ;;  %386 = vst [vmem:[#allocation2 + $0x10] sm:$0xff] (!%p1769_p7), %v2238_v0  ;;  %387 = vst [vmem:[#allocation2 + $0x18] sm:$0xff] (!%p1769_p7), %v2238_v0 }
  0x14   : > { %s2337_s11 = scalar_lea.vmem %s2690_s7, %s1757_s10  ;;  %s2342_s15 = scalar_lea.vmem %s2685_s2, %s2088_s17  ;;  %388 = vst [vmem:[#allocation2 + $0x20] sm:$0xff] (!%p1769_p7), %v2238_v0  ;;  %389 = vst [vmem:[#allocation2 + $0x28] sm:$0xff] (!%p1769_p7), %v2238_v0 }
  0x15   : > { %383 = sbr.rel (%p1769_p7) target bundleno = 42 (0x2a), region = 48  ;;  %390 = vst [vmem:[#allocation2 + $0x30] sm:$0xff] (!%p1769_p7), %v2238_v0  ;;  %391 = vst [vmem:[#allocation2 + $0x38] sm:$0xff] (!%p1769_p7), %v2238_v0 }
  0x16   : > { %392 = vst [vmem:[#allocation2 + $0x40] sm:$0xff] (!%p1769_p7), %v2238_v0  ;;  %393 = vst [vmem:[#allocation2 + $0x48] sm:$0xff] (!%p1769_p7), %v2238_v0 }
  0x17   : > { %394 = vst [vmem:[#allocation2 + $0x50] sm:$0xff] (!%p1769_p7), %v2238_v0  ;;  %395 = vst [vmem:[#allocation2 + $0x58] sm:$0xff] (!%p1769_p7), %v2238_v0 }
  0x18   : > { %396 = vst [vmem:[#allocation2 + $0x60] sm:$0xff] (!%p1769_p7), %v2238_v0  ;;  %397 = vst [vmem:[#allocation2 + $0x68] sm:$0xff] (!%p1769_p7), %v2238_v0 }
  0x19   : > { %398 = vst [vmem:[#allocation2 + $0x70] sm:$0xff] (!%p1769_p7), %v2238_v0  ;;  %399 = vst [vmem:[#allocation2 + $0x78] sm:$0xff] (!%p1769_p7), %v2238_v0 }
  0x1a   : > { %400 = vst [vmem:[#allocation2 + $0x80] sm:$0xff] (!%p1769_p7), %v2238_v0  ;;  %401 = vst [vmem:[#allocation2 + $0x88] sm:$0xff] (!%p1769_p7), %v2238_v0 }
  0x1b   : > { %402 = vst [vmem:[#allocation2 + $0x90] sm:$0xff] (!%p1769_p7), %v2238_v0  ;;  %403 = vst [vmem:[#allocation2 + $0x98] sm:$0xff] (!%p1769_p7), %v2238_v0 }
  0x1c   : > { %404 = vst [vmem:[#allocation2 + $0xa0] sm:$0xff] %v2238_v0  ;;  %405 = vst [vmem:[#allocation2 + $0xa8] sm:$0xff] %v2238_v0 }
  0x1d   : > { %406 = vst [vmem:[#allocation2 + $0xb0] sm:$0xff] %v2238_v0  ;;  %407 = vst [vmem:[#allocation2 + $0xb8] sm:$0xff] %v2238_v0 }
  0x1e   : > { %408 = vst [vmem:[#allocation2 + $0xc0] sm:$0xff] %v2238_v0  ;;  %409 = vst [vmem:[#allocation2 + $0xc8] sm:$0xff] %v2238_v0 }
  0x1f   : > { %410 = vst [vmem:[#allocation2 + $0xd0] sm:$0xff] %v2238_v0  ;;  %411 = vst [vmem:[#allocation2 + $0xd8] sm:$0xff] %v2238_v0 }
  0x20   : > { %412 = vst [vmem:[#allocation2 + $0xe0] sm:$0xff] %v2238_v0  ;;  %413 = vst [vmem:[#allocation2 + $0xe8] sm:$0xff] %v2238_v0 }
  0x21   : > { %414 = vst [vmem:[#allocation2 + $0xf0] sm:$0xff] %v2238_v0  ;;  %415 = vst [vmem:[#allocation2 + $0xf8] sm:$0xff] %v2238_v0 }
  0x22   : > { %416 = vst [vmem:[#allocation2 + $0x100] sm:$0xff] %v2238_v0  ;;  %417 = vst [vmem:[#allocation2 + $0x108] sm:$0xff] %v2238_v0 }
  0x23   : > { %418 = vst [vmem:[#allocation2 + $0x110] sm:$0xff] %v2238_v0  ;;  %419 = vst [vmem:[#allocation2 + $0x118] sm:$0xff] %v2238_v0 }
  0x24   : > { %420 = vst [vmem:[#allocation2 + $0x120] sm:$0xff] %v2238_v0  ;;  %421 = vst [vmem:[#allocation2 + $0x128] sm:$0xff] %v2238_v0 }
  0x25   : > { %422 = vst [vmem:[#allocation2 + $0x130] sm:$0xff] %v2238_v0  ;;  %423 = vst [vmem:[#allocation2 + $0x138] sm:$0xff] %v2238_v0 }
  0x26   : > { %424 = vst [vmem:[#allocation2 + $0x140] sm:$0xff] %v2238_v0  ;;  %425 = vst [vmem:[#allocation2 + $0x148] sm:$0xff] %v2238_v0 }
  0x27   : > { %426 = vst [vmem:[#allocation2 + $0x150] sm:$0xff] %v2238_v0  ;;  %427 = vst [vmem:[#allocation2 + $0x158] sm:$0xff] %v2238_v0 }
  0x28   : > { %428 = vst [vmem:[#allocation2 + $0x160] sm:$0xff] %v2238_v0  ;;  %429 = vst [vmem:[#allocation2 + $0x168] sm:$0xff] %v2238_v0 }
  0x29   : > { %430 = vst [vmem:[#allocation2 + $0x170] sm:$0xff] %v2238_v0  ;;  %431 = vst [vmem:[#allocation2 + $0x178] sm:$0xff] %v2238_v0 }
  0x2a PF: > { %v439_v1 = vld [vmem:[%s2317_s13 + $0x10] sm:$0xff]  ;;  %v437_v2 = vld [vmem:[%s2317_s13] sm:$0xff]  ;;  %v2239_v3 = vmov 0   ;;  %v440_v4 = vld [vmem:[%s2317_s13 + $0x18] sm:$0xff]  ;;  %s1770_s9 = sshll.u32 %s2220_s24, 7  ;;  %p1835_p8 = scmp.ne.s32.totalorder %s2220_s24, 2 }
  0x2b   : > { %2133 = vset.pattern.permute.xlu1 %v2239_v3  ;;  %2132 = vset.pattern.permute.xlu0 %v2239_v3  ;;  %v438_v5 = vld [vmem:[%s2317_s13 + $0x8] sm:$0xff]  ;;  %v561_v7 = vld [vmem:[%s2322_s16 + $0x20] sm:$0xff]  ;;  %v680_v11 = vld [vmem:[%s2342_s15 + $0x18] sm:$0xff] }
  0x2c   : > { %460 = vperm.xlu1 %2133, %v439_v1   ;;  %454 = vperm.xlu0 %2132, %v437_v2   ;;  %v562_v6 = vld [vmem:[%s2322_s16 + $0x28] sm:$0xff]  ;;  %v441_v9 = vld [vmem:[%s2317_s13 + $0x20] sm:$0xff]  ;;  %v679_v12 = vld [vmem:[%s2342_s15 + $0x10] sm:$0xff] }
  0x2d   : > { %978 = vmatprep.mubr.bf16.mxu1 %v2239_v3  ;;  %v442_v8 = vld [vmem:[%s2317_s13 + $0x28] sm:$0xff]  ;;  %v677_v10 = vld [vmem:[%s2342_s15] sm:$0xff]  ;;  %v683_v16 = vld [vmem:[%s2342_s15 + $0x30] sm:$0xff] }
  0x2e   : > { %v682_v13 = vld [vmem:[%s2342_s15 + $0x28] sm:$0xff]  ;;  %v725_v14 = vpack.c.bf16 %v680_v11, %v677_v10  ;;  %v444_v19 = vld [vmem:[%s2317_s13 + $0x38] sm:$0xff]  ;;  %v443_v20 = vld [vmem:[%s2317_s13 + $0x30] sm:$0xff] }
  0x2f   : > { %v2360_v15 = vpack.c.bf16 %v682_v13, %v679_v12  ;;  %v686_v17 = vld [vmem:[%s2342_s15 + $0x48] sm:$0xff]  ;;  %v681_v22 = vld [vmem:[%s2342_s15 + $0x20] sm:$0xff]  ;;  %v688_v24 = vld [vmem:[%s2342_s15 + $0x58] sm:$0xff] }
  0x30   : > { %463 = vperm.xlu1 %2133, %v440_v4   ;;  %457 = vperm.xlu0 %2132, %v438_v5   ;;  %v678_v18 = vld [vmem:[%s2342_s15 + $0x8] sm:$0xff]  ;;  %v728_v21 = vpack.c.bf16 %v686_v17, %v683_v16  ;;  %v685_v23 = vld [vmem:[%s2342_s15 + $0x40] sm:$0xff]  ;;  %v692_v28 = vld [vmem:[%s2342_s15 + $0x78] sm:$0xff] }
  0x31   : > { %v2370_v25 = vpack.c.bf16 %v681_v22, %v678_v18  ;;  %v2372_v26 = vpack.c.bf16 %v688_v24, %v685_v23  ;;  %v689_v27 = vld [vmem:[%s2342_s15 + $0x60] sm:$0xff]  ;;  %v684_v29 = vld [vmem:[%s2342_s15 + $0x38] sm:$0xff]  ;;  %1936 = vmatprep.subr.bf16.mxu0 %v725_v14  ;;  %2056 = vmatprep.subr.bf16.mxu1 %v2360_v15  ;;  %v687_v30 = vld [vmem:[%s2342_s15 + $0x50] sm:$0xff] }
  0x32   : > { %v691_v31 = vld [vmem:[%s2342_s15 + $0x70] sm:$0xff]  ;;  %v694_v32 = vld [vmem:[%s2342_s15 + $0x88] sm:$0xff]  ;;  %1937 = vmatpush3.bf16.msra.mxu0 %v725_v14  ;;  %v2382_v33 = vpack.c.bf16 %v687_v30, %v684_v29  ;;  %v731_v34 = vpack.c.bf16 %v692_v28, %v689_v27  ;;  %v693_v38 = vld [vmem:[%s2342_s15 + $0x80] sm:$0xff] }
  0x33   : > { %2064 = vmatpush1.bf16.msra.mxu1 %v2370_v25  ;;  %1938 = vmatprep.subr.bf16.mxu0 %v728_v21  ;;  %v2385_v35 = vpack.c.bf16 %v694_v32, %v691_v31  ;;  %v695_v36 = vld [vmem:[%s2342_s15 + $0x90] sm:$0xff]  ;;  %v690_v37 = vld [vmem:[%s2342_s15 + $0x68] sm:$0xff]  ;;  %v697_v40 = vld [vmem:[%s2342_s15 + $0xa0] sm:$0xff] }
  0x34   : > { %589 = vperm.xlu1 %2133, %v562_v6   ;;  %586 = vperm.xlu0 %2132, %v561_v7   ;;  %v698_v39 = vld [vmem:[%s2342_s15 + $0xa8] sm:$0xff]  ;;  %v700_v41 = vld [vmem:[%s2342_s15 + $0xb8] sm:$0xff]  ;;  %v563_v43 = vld [vmem:[%s2322_s16 + $0x30] sm:$0xff]  ;;  %v2396_v44 = vpack.c.bf16 %v693_v38, %v690_v37 }
  0x35   : > { %2057 = vmatprep.subr.bf16.mxu1 %v2372_v26  ;;  %v564_v42 = vld [vmem:[%s2322_s16 + $0x38] sm:$0xff]  ;;  %v734_v45 = vpack.c.bf16 %v698_v39, %v695_v36  ;;  %v2399_v46 = vpack.c.bf16 %v700_v41, %v697_v40  ;;  %v701_v47 = vld [vmem:[%s2342_s15 + $0xc0] sm:$0xff]  ;;  %v699_v49 = vld [vmem:[%s2342_s15 + $0xb0] sm:$0xff] }
  0x36   : > { %1939 = vmatpush3.bf16.msra.mxu0 %v728_v21  ;;  %v696_v48 = vld [vmem:[%s2342_s15 + $0x98] sm:$0xff]  ;;  %v703_v51 = vld [vmem:[%s2342_s15 + $0xd0] sm:$0xff]  ;;  %v706_v52 = vld [vmem:[%s2342_s15 + $0xe8] sm:$0xff] }
  0x37   : > { %2065 = vmatpush1.bf16.msra.mxu1 %v2382_v33  ;;  %1940 = vmatprep.subr.bf16.mxu0 %v731_v34  ;;  %v704_v50 = vld [vmem:[%s2342_s15 + $0xd8] sm:$0xff]  ;;  %v446_v53 = vld [vmem:[%s2317_s13 + $0x48] sm:$0xff]  ;;  %v445_v54 = vld [vmem:[%s2317_s13 + $0x40] sm:$0xff]  ;;  %v2410_v55 = vpack.c.bf16 %v699_v49, %v696_v48  ;;  %v2413_v57 = vpack.c.bf16 %v706_v52, %v703_v51  ;;  %v435_v51 = vstv %s1770_s9 }
  0x38   : > { %469 = vperm.xlu1 %2133, %v442_v8   ;;  %466 = vperm.xlu0 %2132, %v441_v9   ;;  %v737_v56 = vpack.c.bf16 %v704_v50, %v701_v47  ;;  %v707_v58 = vld [vmem:[%s2342_s15 + $0xf0] sm:$0xff]  ;;  %v702_v59 = vld [vmem:[%s2342_s15 + $0xc8] sm:$0xff]  ;;  %v705_v60 = vld [vmem:[%s2342_s15 + $0xe0] sm:$0xff] }
  0x39   : > { %2058 = vmatprep.subr.bf16.mxu1 %v2385_v35  ;;  %v710_v61 = vld [vmem:[%s2342_s15 + $0x108] sm:$0xff]  ;;  %v709_v62 = vld [vmem:[%s2342_s15 + $0x100] sm:$0xff]  ;;  %v712_v63 = vld [vmem:[%s2342_s15 + $0x118] sm:$0xff]  ;;  %v2424_v2 = vpack.c.bf16 %v705_v60, %v702_v59  ;;  %v2240_v59 = vmov 1.0|1.0  }
  0x3a   : > { %1941 = vmatpush3.bf16.msra.mxu0 %v731_v34  ;;  %v448_v0 = vld [vmem:[%s2317_s13 + $0x58] sm:$0xff]  ;;  %v447_v1 = vld [vmem:[%s2317_s13 + $0x50] sm:$0xff]  ;;  %v740_v4 = vpack.c.bf16 %v710_v61, %v707_v58  ;;  %v2427_v5 = vpack.c.bf16 %v712_v63, %v709_v62  ;;  %v713_v6 = vld [vmem:[%s2342_s15 + $0x120] sm:$0xff] }
  0x3b   : > { %2066 = vmatpush1.bf16.msra.mxu1 %v2396_v44  ;;  %1942 = vmatprep.subr.bf16.mxu0 %v734_v45  ;;  %v708_v7 = vld [vmem:[%s2342_s15 + $0xf8] sm:$0xff]  ;;  %v711_v8 = vld [vmem:[%s2342_s15 + $0x110] sm:$0xff]  ;;  %v718_v11 = vld [vmem:[%s2342_s15 + $0x148] sm:$0xff] }
  0x3c   : > { %475 = vperm.xlu1 %2133, %v444_v19   ;;  %472 = vperm.xlu0 %2132, %v443_v20   ;;  %v716_v9 = vld [vmem:[%s2342_s15 + $0x138] sm:$0xff]  ;;  %v715_v10 = vld [vmem:[%s2342_s15 + $0x130] sm:$0xff]  ;;  %v566_v12 = vld [vmem:[%s2322_s16 + $0x48] sm:$0xff]  ;;  %v2438_v14 = vpack.c.bf16 %v711_v8, %v708_v7 }
  0x3d   : > { %2059 = vmatprep.subr.bf16.mxu1 %v2399_v46  ;;  %v565_v13 = vld [vmem:[%s2322_s16 + $0x40] sm:$0xff]  ;;  %v743_v16 = vpack.c.bf16 %v716_v9, %v713_v6  ;;  %v2441_v17 = vpack.c.bf16 %v718_v11, %v715_v10  ;;  %v719_v18 = vld [vmem:[%s2342_s15 + $0x150] sm:$0xff]  ;;  %v714_v19 = vld [vmem:[%s2342_s15 + $0x128] sm:$0xff] }
  0x3e   : > { %1943 = vmatpush3.bf16.msra.mxu0 %v734_v45  ;;  %v717_v20 = vld [vmem:[%s2342_s15 + $0x140] sm:$0xff]  ;;  %v722_v21 = vld [vmem:[%s2342_s15 + $0x168] sm:$0xff]  ;;  %v724_v23 = vld [vmem:[%s2342_s15 + $0x178] sm:$0xff] }
  0x3f   : > { %2067 = vmatpush1.bf16.msra.mxu1 %v2410_v55  ;;  %1944 = vmatprep.subr.bf16.mxu0 %v737_v56  ;;  %v721_v22 = vld [vmem:[%s2342_s15 + $0x160] sm:$0xff]  ;;  %v450_v24 = vld [vmem:[%s2317_s13 + $0x68] sm:$0xff]  ;;  %v2452_v28 = vpack.c.bf16 %v717_v20, %v714_v19  ;;  %v746_v29 = vpack.c.bf16 %v722_v21, %v719_v18  ;;  %v720_v31 = vld [vmem:[%s2342_s15 + $0x158] sm:$0xff] }
  0x40   : > { %595 = vperm.xlu1 %2133, %v564_v42   ;;  %592 = vperm.xlu0 %2132, %v563_v43   ;;  %v449_v27 = vld [vmem:[%s2317_s13 + $0x60] sm:$0xff]  ;;  %v2455_v30 = vpack.c.bf16 %v724_v23, %v721_v22  ;;  %v723_v32 = vld [vmem:[%s2342_s15 + $0x170] sm:$0xff]  ;;  %v452_v34 = vld [vmem:[%s2317_s13 + $0x78] sm:$0xff] }
  0x41   : > { %2060 = vmatprep.subr.bf16.mxu1 %v2413_v57  ;;  %v451_v36 = vld [vmem:[%s2317_s13 + $0x70] sm:$0xff]  ;;  %v2462_v37 = vpack.c.bf16 %v723_v32, %v720_v31  ;;  %v568_v38 = vld [vmem:[%s2322_s16 + $0x58] sm:$0xff]  ;;  %v558_v40 = vld [vmem:[%s2322_s16 + $0x8] sm:$0xff] }
  0x42   : > { %1945 = vmatpush3.bf16.msra.mxu0 %v737_v56  ;;  %v567_v39 = vld [vmem:[%s2322_s16 + $0x50] sm:$0xff]  ;;  %v557_v41 = vld [vmem:[%s2322_s16] sm:$0xff]  ;;  %v570_v42 = vld [vmem:[%s2322_s16 + $0x68] sm:$0xff] }
  0x43   : > { %2068 = vmatpush1.bf16.msra.mxu1 %v2424_v2  ;;  %1946 = vmatprep.subr.bf16.mxu0 %v740_v4  ;;  %v569_v43 = vld [vmem:[%s2322_s16 + $0x60] sm:$0xff]  ;;  %v560_v45 = vld [vmem:[%s2322_s16 + $0x18] sm:$0xff]  ;;  %v559_v47 = vld [vmem:[%s2322_s16 + $0x10] sm:$0xff] }
  0x44   : > { %481 = vperm.xlu1 %2133, %v446_v53   ;;  %478 = vperm.xlu0 %2132, %v445_v54   ;;  %v572_v48 = vld [vmem:[%s2322_s16 + $0x78] sm:$0xff]  ;;  %v571_v49 = vld [vmem:[%s2322_s16 + $0x70] sm:$0xff]  ;;  %v749_v19 = vld [vmem:[#allocation2] sm:$0xff] }
  0x45   : > { %2061 = vmatprep.subr.bf16.mxu1 %v2427_v5  ;;  %v751_v18 = vld [vmem:[#allocation2 + $0x30] sm:$0xff]  ;;  %v902_v21 = vld [vmem:[#allocation2 + $0x68] sm:$0xff]  ;;  %v904_v31 = vld [vmem:[#allocation2 + $0x80] sm:$0xff] }
  0x46   : > { %1947 = vmatpush3.bf16.msra.mxu0 %v740_v4 }
  0x47   : > { %2069 = vmatpush1.bf16.msra.mxu1 %v2438_v14  ;;  %1948 = vmatprep.subr.bf16.mxu0 %v743_v16 }
  0x48   : > { %487 = vperm.xlu1 %2133, %v448_v0   ;;  %484 = vperm.xlu0 %2132, %v447_v1  }
  0x49   : > { %2062 = vmatprep.subr.bf16.mxu1 %v2441_v17 }
  0x4a   : > { %1949 = vmatpush3.bf16.msra.mxu0 %v743_v16 }
  0x4b   : > { %2070 = vmatpush1.bf16.msra.mxu1 %v2452_v28  ;;  %1950 = vmatprep.subr.bf16.mxu0 %v746_v29 }
  0x4c   : > { %601 = vperm.xlu1 %2133, %v566_v12   ;;  %598 = vperm.xlu0 %2132, %v565_v13  }
  0x4d   : > { %2063 = vmatprep.subr.bf16.mxu1 %v2455_v30 }
  0x4e   : > { %1951 = vmatpush3.bf16.msra.mxu0 %v746_v29 }
  0x4f   : > { %2071 = vmatpush1.bf16.msra.mxu1 %v2462_v37  ;;  %926 = vmatprep.subr.bf16.mxu0 %v2360_v15  ;;  %v432_v15 = vlaneseq }
  0x50   : > { %493 = vperm.xlu1 %2133, %v450_v24   ;;  %490 = vperm.xlu0 %2132, %v449_v27   ;;  %v750_v24 = vld [vmem:[#allocation2 + $0x18] sm:$0xff]  ;;  %v903_v27 = vld [vmem:[#allocation2 + $0x70] sm:$0xff] }
  0x51   : > { %v433_v50 = vand.u32 127, %v432_v15  ;;  %v756_v15 = vld [vmem:[#allocation2 + $0xa8] sm:$0xff] }
  0x53   : > { %v2478_v54 = vadd.s32 %v435_v51, %v433_v50 }
  0x54   : > { %499 = vperm.xlu1 %2133, %v452_v34   ;;  %496 = vperm.xlu0 %2132, %v451_v36  }
  0x58   : > { %607 = vperm.xlu1 %2133, %v568_v38   ;;  %604 = vperm.xlu0 %2132, %v567_v39   ;;  %v905_v38 = vld [vmem:[#allocation2 + $0x88] sm:$0xff] }
  0x5c   : > { %577 = vperm.xlu1 %2133, %v558_v40   ;;  %574 = vperm.xlu0 %2132, %v557_v41  }
  0x60   : > { %613 = vperm.xlu1 %2133, %v570_v42   ;;  %610 = vperm.xlu0 %2132, %v569_v43  }
  0x64   : > { %583 = vperm.xlu1 %2133, %v560_v45   ;;  %580 = vperm.xlu0 %2132, %v559_v47   ;;  %v755_v47 = vld [vmem:[#allocation2 + $0x90] sm:$0xff] }
  0x68   : > { %619 = vperm.xlu1 %2133, %v572_v48   ;;  %616 = vperm.xlu0 %2132, %v571_v49   ;;  %v753_v48 = vld [vmem:[#allocation2 + $0x60] sm:$0xff] }
  0xab   : > { %v461_v52 = vpop.permute.xlu1 %460  ;;  %v455_v53 = vpop.permute.xlu0 %454 }
  0xac   : > { %vm503_vm0 = vcmp.eq.s32.totalorder %v461_v52, %v2478_v54  ;;  %vm501_vm3 = vcmp.eq.s32.totalorder %v455_v53, %v2478_v54  ;;  %v754_v52 = vld [vmem:[#allocation2 + $0x78] sm:$0xff] }
  0xaf   : > { %v464_v56 = vpop.permute.xlu1 %463  ;;  %v458_v58 = vpop.permute.xlu0 %457 }
  0xb0   : > { %vm504_vm1 = vcmp.eq.s32.totalorder %v464_v56, %v2478_v54  ;;  %vm502_vm2 = vcmp.eq.s32.totalorder %v458_v58, %v2478_v54  ;;  %v906_v56 = vld [vmem:[#allocation2 + $0x98] sm:$0xff] }
  0xb1   : > { %vm1805_vm4 = vmpackc.low %vm504_vm1, %vm503_vm0 }
  0xb2   : > { %vm1803_vm5 = vmpackc.low %vm502_vm2, %vm501_vm3 }
  0xb3   : > { %1952 = vmatprep.mubr.msk.bf16.mxu0 %vm1803_vm5, %v2240_v59  ;;  %v590_v60 = vpop.permute.xlu1 %589  ;;  %v587_v61 = vpop.permute.xlu0 %586 }
  0xb4   : > { %vm626_vm6 = vcmp.eq.s32.totalorder %v590_v60, %v2478_v54  ;;  %vm625_vm7 = vcmp.eq.s32.totalorder %v587_v61, %v2478_v54  ;;  %1953 = vmatmul.mubr.msk.bf16.vlgmr.msra.gmra.mrb[0].mxu0 %vm1805_vm4, %v2240_v59  ;;  %v907_v60 = vld [vmem:[#allocation2 + $0xa0] sm:$0xff] }
  0xb5   : > { %vm1823_vm8 = vmpackc.low %vm626_vm6, %vm625_vm7  ;;  %927 = vmatpush1.bf16.msra.mxu0 %v2370_v25 }
  0xb6   : > { %1824 = vmatmul.mubr.msk.bf16.vlgmr.msra.gmra.mrb[0].mxu1 %vm1823_vm8, %v2240_v59  ;;  %928 = vmatprep.subr.bf16.mxu0 %v2372_v26 }
  0xb7   : > { %v470_v62 = vpop.permute.xlu1 %469  ;;  %v467_v63 = vpop.permute.xlu0 %466  ;;  %988 = vmatprep.mubr.bf16.mxu1 %v2239_v3 }
  0xb8   : > { %vm506_vm9 = vcmp.eq.s32.totalorder %v470_v62, %v2478_v54  ;;  %vm505_vm10 = vcmp.eq.s32.totalorder %v467_v63, %v2478_v54  ;;  %v908_v63 = vld [vmem:[#allocation2 + $0xb0] sm:$0xff] }
  0xb9   : > { %vm1807_vm11 = vmpackc.low %vm506_vm9, %vm505_vm10  ;;  %929 = vmatpush1.bf16.msra.mxu0 %v2382_v33 }
  0xba   : > { %1956 = vmatprep.mubr.msk.bf16.mxu0 %vm1807_vm11, %v2240_v59  ;;  %930 = vmatprep.subr.bf16.mxu0 %v2385_v35 }
  0xbb   : > { %v476_v25 = vpop.permute.xlu1 %475  ;;  %v473_v0 = vpop.permute.xlu0 %472 }
  0xbc   : > { %vm508_vm12 = vcmp.eq.s32.totalorder %v476_v25, %v2478_v54  ;;  %vm507_vm13 = vcmp.eq.s32.totalorder %v473_v0, %v2478_v54 }
  0xbd   : > { %vm1809_vm14 = vmpackc.low %vm508_vm12, %vm507_vm13  ;;  %931 = vmatpush1.bf16.msra.mxu0 %v2396_v44 }
  0xbe   : > { %1957 = vmatmul.mubr.msk.bf16.gmra.mrb[4].mxu0 %vm1809_vm14, %v2240_v59  ;;  %932 = vmatprep.subr.bf16.mxu0 %v2399_v46 }
  0xbf   : > { %v596_v26 = vpop.permute.xlu1 %595  ;;  %v593_v1 = vpop.permute.xlu0 %592 }
  0xc0   : > { %vm628_vm15 = vcmp.eq.s32.totalorder %v596_v26, %v2478_v54  ;;  %vm627_vm0 = vcmp.eq.s32.totalorder %v593_v1, %v2478_v54  ;;  %v909_v26 = vld [vmem:[#allocation2 + $0xb8] sm:$0xff] }
  0xc1   : > { %vm1825_vm1 = vmpackc.low %vm628_vm15, %vm627_vm0  ;;  %933 = vmatpush1.bf16.msra.mxu0 %v2410_v55 }
  0xc2   : > { %1826 = vmatmul.mubr.msk.bf16.gmra.mrb[4].mxu1 %vm1825_vm1, %v2240_v59  ;;  %934 = vmatprep.subr.bf16.mxu0 %v2413_v57 }
  0xc3   : > { %v482_v33 = vpop.permute.xlu1 %481  ;;  %v479_v35 = vpop.permute.xlu0 %478  ;;  %998 = vmatprep.mubr.bf16.mxu1 %v2239_v3 }
  0xc4   : > { %vm510_vm2 = vcmp.eq.s32.totalorder %v482_v33, %v2478_v54  ;;  %vm509_vm3 = vcmp.eq.s32.totalorder %v479_v35, %v2478_v54 }
  0xc5   : > { %vm1811_vm4 = vmpackc.low %vm510_vm2, %vm509_vm3  ;;  %935 = vmatpush1.bf16.msra.mxu0 %v2424_v2 }
  0xc6   : > { %1960 = vmatprep.mubr.msk.bf16.mxu0 %vm1811_vm4, %v2240_v59  ;;  %936 = vmatprep.subr.bf16.mxu0 %v2427_v5 }
  0xc7   : > { %v488_v44 = vpop.permute.xlu1 %487  ;;  %v485_v46 = vpop.permute.xlu0 %484 }
  0xc8   : > { %vm512_vm5 = vcmp.eq.s32.totalorder %v488_v44, %v2478_v54  ;;  %vm511_vm6 = vcmp.eq.s32.totalorder %v485_v46, %v2478_v54 }
  0xc9   : > { %vm1813_vm7 = vmpackc.low %vm512_vm5, %vm511_vm6  ;;  %937 = vmatpush1.bf16.msra.mxu0 %v2438_v14 }
  0xca   : > { %1961 = vmatmul.mubr.msk.bf16.gmra.mrb[8].mxu0 %vm1813_vm7, %v2240_v59  ;;  %938 = vmatprep.subr.bf16.mxu0 %v2441_v17 }
  0xcb   : > { %v602_v55 = vpop.permute.xlu1 %601  ;;  %v599_v57 = vpop.permute.xlu0 %598 }
  0xcc   : > { %vm630_vm8 = vcmp.eq.s32.totalorder %v602_v55, %v2478_v54  ;;  %vm629_vm9 = vcmp.eq.s32.totalorder %v599_v57, %v2478_v54  ;;  %v759_v55 = vld [vmem:[#allocation2 + $0xf0] sm:$0xff]  ;;  %v757_v57 = vld [vmem:[#allocation2 + $0xc0] sm:$0xff] }
  0xcd   : > { %vm1827_vm10 = vmpackc.low %vm630_vm8, %vm629_vm9  ;;  %939 = vmatpush1.bf16.msra.mxu0 %v2452_v28 }
  0xce   : > { %1828 = vmatmul.mubr.msk.bf16.gmra.mrb[8].mxu1 %vm1827_vm10, %v2240_v59  ;;  %940 = vmatprep.subr.bf16.mxu0 %v2455_v30 }
  0xcf   : > { %v494_v2 = vpop.permute.xlu1 %493  ;;  %v491_v4 = vpop.permute.xlu0 %490  ;;  %1008 = vmatprep.mubr.bf16.mxu1 %v2239_v3 }
  0xd0   : > { %vm514_vm11 = vcmp.eq.s32.totalorder %v494_v2, %v2478_v54  ;;  %vm513_vm12 = vcmp.eq.s32.totalorder %v491_v4, %v2478_v54  ;;  %v760_v4 = vld [vmem:[#allocation2 + $0x108] sm:$0xff] }
  0xd1   : > { %vm1815_vm13 = vmpackc.low %vm514_vm11, %vm513_vm12  ;;  %941 = vmatpush1.bf16.msra.mxu0 %v2462_v37 }
  0xd2   : > { %1964 = vmatprep.mubr.msk.bf16.mxu0 %vm1815_vm13, %v2240_v59 }
  0xd3   : > { %v500_v5 = vpop.permute.xlu1 %499  ;;  %v497_v6 = vpop.permute.xlu0 %496 }
  0xd4   : > { %vm516_vm14 = vcmp.eq.s32.totalorder %v500_v5, %v2478_v54  ;;  %vm515_vm15 = vcmp.eq.s32.totalorder %v497_v6, %v2478_v54 }
  0xd5   : > { %vm1817_vm0 = vmpackc.low %vm516_vm14, %vm515_vm15 }
  0xd6   : > { %1965 = vmatmul.mubr.msk.bf16.gmra.mrb[12].mxu0 %vm1817_vm0, %v2240_v59 }
  0xd7   : > { %v608_v7 = vpop.permute.xlu1 %607  ;;  %v605_v8 = vpop.permute.xlu0 %604  ;;  %958 = vmatprep.mubr.bf16.mxu0 %v2239_v3 }
  0xd8   : > { %vm632_vm1 = vcmp.eq.s32.totalorder %v608_v7, %v2478_v54  ;;  %vm631_vm2 = vcmp.eq.s32.totalorder %v605_v8, %v2478_v54  ;;  %v758_v7 = vld [vmem:[#allocation2 + $0xd8] sm:$0xff] }
  0xd9   : > { %vm1829_vm3 = vmpackc.low %vm632_vm1, %vm631_vm2 }
  0xda   : > { %1830 = vmatmul.mubr.msk.bf16.gmra.mrb[12].mxu1 %vm1829_vm3, %v2240_v59 }
  0xdb   : > { %v578_v9 = vpop.permute.xlu1 %577  ;;  %v575_v10 = vpop.permute.xlu0 %574  ;;  %1018 = vmatprep.mubr.bf16.mxu1 %v2239_v3 }
  0xdc   : > { %vm622_vm4 = vcmp.eq.s32.totalorder %v578_v9, %v2478_v54  ;;  %vm621_vm5 = vcmp.eq.s32.totalorder %v575_v10, %v2478_v54  ;;  %v910_v10 = vld [vmem:[#allocation2 + $0xc8] sm:$0xff] }
  0xdd   : > { %vm1819_vm6 = vmpackc.low %vm622_vm4, %vm621_vm5 }
  0xde   : > { %1820 = vmatmul.mubr.msk.bf16.vlgmr.msra.gmra.mrb[16].mxu0 %vm1819_vm6, %v2240_v59 }
  0xdf   : > { %v614_v11 = vpop.permute.xlu1 %613  ;;  %v611_v12 = vpop.permute.xlu0 %610  ;;  %968 = vmatprep.mubr.bf16.mxu0 %v2239_v3 }
  0xe0   : > { %vm634_vm7 = vcmp.eq.s32.totalorder %v614_v11, %v2478_v54  ;;  %vm633_vm8 = vcmp.eq.s32.totalorder %v611_v12, %v2478_v54 }
  0xe1   : > { %vm1831_vm9 = vmpackc.low %vm634_vm7, %vm633_vm8 }
  0xe2   : > { %1832 = vmatmul.mubr.msk.bf16.gmra.mrb[16].mxu1 %vm1831_vm9, %v2240_v59 }
  0xe3   : > { %v584_v13 = vpop.permute.xlu1 %583  ;;  %v581_v14 = vpop.permute.xlu0 %580  ;;  %1028 = vmatprep.mubr.bf16.mxu1 %v2239_v3  ;;  %v752_v3 = vld [vmem:[#allocation2 + $0x48] sm:$0xff] }
  0xe4   : > { %vm624_vm10 = vcmp.eq.s32.totalorder %v584_v13, %v2478_v54  ;;  %vm623_vm11 = vcmp.eq.s32.totalorder %v581_v14, %v2478_v54  ;;  %v911_v13 = vld [vmem:[#allocation2 + $0xd0] sm:$0xff] }
  0xe5   : > { %vm1821_vm12 = vmpackc.low %vm624_vm10, %vm623_vm11 }
  0xe6   : > { %1822 = vmatmul.mubr.msk.bf16.gmra.mrb[20].mxu0 %vm1821_vm12, %v2240_v59 }
  0xe7   : > { %v620_v16 = vpop.permute.xlu1 %619  ;;  %v617_v17 = vpop.permute.xlu0 %616 }
  0xe8   : > { %vm636_vm13 = vcmp.eq.s32.totalorder %v620_v16, %v2478_v54  ;;  %vm635_vm14 = vcmp.eq.s32.totalorder %v617_v17, %v2478_v54  ;;  %v912_v17 = vld [vmem:[#allocation2 + $0xe0] sm:$0xff] }
  0xe9   : > { %vm1833_vm15 = vmpackc.low %vm636_vm13, %vm635_vm14 }
  0xea   : > { %1834 = vmatmul.mubr.msk.bf16.gmra.mrb[20].mxu1 %vm1833_vm15, %v2240_v59 }
 0x187   : > { %v1954_v20 = vpop.f32.mrb[0].mxu0 }
 0x188   : > { %v864_v22 = vadd.f32 %v1954_v20, %v751_v18  ;;  %v799_v23 = vpop.f32.mrb[1].mxu0  ;;  %v913_v20 = vld [vmem:[#allocation2 + $0xe8] sm:$0xff] }
 0x189   : > { %v862_v28 = vadd.f32 %v799_v23, %v749_v19  ;;  %v1955_v29 = vpop.f32.mrb[2].mxu0  ;;  %v980_v30 = vpop.f32.mrb[0].mxu1 }
 0x18a   : > { %880 = vst [vmem:[#allocation2 + $0x30] sm:$0xff] %v864_v22  ;;  %v865_v32 = vadd.f32 %v1955_v29, %v752_v3  ;;  %v802_v34 = vpop.f32.mrb[3].mxu0  ;;  %v1047_v36 = vadd.f32 %v980_v30, %v902_v21  ;;  %v982_v37 = vpop.f32.mrb[1].mxu1  ;;  %v764_v30 = vld [vmem:[#allocation2 + $0x168] sm:$0xff] }
 0x18b   : > { %878 = vst [vmem:[#allocation2] sm:$0xff] %v862_v28  ;;  %v863_v39 = vadd.f32 %v802_v34, %v750_v24  ;;  %v1048_v40 = vadd.f32 %v982_v37, %v903_v27  ;;  %v984_v41 = vpop.f32.mrb[2].mxu1  ;;  %v763_v27 = vld [vmem:[#allocation2 + $0x150] sm:$0xff]  ;;  %v761_v28 = vld [vmem:[#allocation2 + $0x120] sm:$0xff]  ;;  %v762_v34 = vld [vmem:[#allocation2 + $0x138] sm:$0xff] }
 0x18c   : > { %881 = vst [vmem:[#allocation2 + $0x48] sm:$0xff] %v865_v32  ;;  %1079 = vst [vmem:[#allocation2 + $0x68] sm:$0xff] %v1047_v36  ;;  %v1049_v42 = vadd.f32 %v984_v41, %v904_v31  ;;  %v986_v43 = vpop.f32.mrb[3].mxu1  ;;  %v915_v41 = vld [vmem:[#allocation2 + $0x100] sm:$0xff] }
 0x18d   : > { %879 = vst [vmem:[#allocation2 + $0x18] sm:$0xff] %v863_v39  ;;  %1080 = vst [vmem:[#allocation2 + $0x70] sm:$0xff] %v1048_v40  ;;  %v1050_v45 = vadd.f32 %v986_v43, %v905_v38  ;;  %v914_v38 = vld [vmem:[#allocation2 + $0xf8] sm:$0xff] }
 0x18e   : > { %1081 = vst [vmem:[#allocation2 + $0x80] sm:$0xff] %v1049_v42 }
 0x18f   : > { %1082 = vst [vmem:[#allocation2 + $0x88] sm:$0xff] %v1050_v45  ;;  %v916_v45 = vld [vmem:[#allocation2 + $0x110] sm:$0xff] }
 0x191   : > { %v1958_v49 = vpop.f32.mrb[4].mxu0 }
 0x192   : > { %v868_v50 = vadd.f32 %v1958_v49, %v755_v47  ;;  %v815_v51 = vpop.f32.mrb[5].mxu0  ;;  %v917_v49 = vld [vmem:[#allocation2 + $0x118] sm:$0xff] }
 0x193   : > { %v866_v53 = vadd.f32 %v815_v51, %v753_v48  ;;  %v1959_v54 = vpop.f32.mrb[6].mxu0  ;;  %v894_v51 = vld [vmem:[#allocation2 + $0x8] sm:$0xff] }
 0x194   : > { %884 = vst [vmem:[#allocation2 + $0x90] sm:$0xff] %v868_v50  ;;  %v869_v58 = vadd.f32 %v1959_v54, %v756_v15  ;;  %v818_v59 = vpop.f32.mrb[7].mxu0  ;;  %v895_v54 = vld [vmem:[#allocation2 + $0x10] sm:$0xff] }
 0x195   : > { %882 = vst [vmem:[#allocation2 + $0x60] sm:$0xff] %v866_v53  ;;  %v867_v61 = vadd.f32 %v818_v59, %v754_v52  ;;  %v990_v62 = vpop.f32.mrb[4].mxu1  ;;  %v896_v59 = vld [vmem:[#allocation2 + $0x20] sm:$0xff] }
 0x196   : > { %885 = vst [vmem:[#allocation2 + $0xa8] sm:$0xff] %v869_v58  ;;  %v1051_v25 = vadd.f32 %v990_v62, %v906_v56  ;;  %v992_v0 = vpop.f32.mrb[5].mxu1  ;;  %v897_v62 = vld [vmem:[#allocation2 + $0x28] sm:$0xff] }
 0x197   : > { %883 = vst [vmem:[#allocation2 + $0x78] sm:$0xff] %v867_v61  ;;  %v1052_v1 = vadd.f32 %v992_v0, %v907_v60  ;;  %v994_v33 = vpop.f32.mrb[6].mxu1  ;;  %v918_v0 = vld [vmem:[#allocation2 + $0x128] sm:$0xff] }
 0x198   : > { %1083 = vst [vmem:[#allocation2 + $0x98] sm:$0xff] %v1051_v25  ;;  %v1053_v35 = vadd.f32 %v994_v33, %v908_v63  ;;  %v996_v44 = vpop.f32.mrb[7].mxu1  ;;  %v919_v33 = vld [vmem:[#allocation2 + $0x130] sm:$0xff] }
 0x199   : > { %1084 = vst [vmem:[#allocation2 + $0xa0] sm:$0xff] %v1052_v1  ;;  %v1054_v46 = vadd.f32 %v996_v44, %v909_v26 }
 0x19a   : > { %1085 = vst [vmem:[#allocation2 + $0xb0] sm:$0xff] %v1053_v35 }
 0x19b   : > { %1086 = vst [vmem:[#allocation2 + $0xb8] sm:$0xff] %v1054_v46  ;;  %v920_v46 = vld [vmem:[#allocation2 + $0x140] sm:$0xff] }
 0x19d   : > { %v1962_v2 = vpop.f32.mrb[8].mxu0 }
 0x19e   : > { %v872_v5 = vadd.f32 %v1962_v2, %v759_v55  ;;  %v831_v6 = vpop.f32.mrb[9].mxu0  ;;  %v921_v2 = vld [vmem:[#allocation2 + $0x148] sm:$0xff] }
 0x19f   : > { %v870_v8 = vadd.f32 %v831_v6, %v757_v57  ;;  %v1963_v9 = vpop.f32.mrb[10].mxu0  ;;  %v898_v6 = vld [vmem:[#allocation2 + $0x38] sm:$0xff] }
 0x1a0   : > { %888 = vst [vmem:[#allocation2 + $0xf0] sm:$0xff] %v872_v5  ;;  %v873_v11 = vadd.f32 %v1963_v9, %v760_v4  ;;  %v834_v12 = vpop.f32.mrb[11].mxu0  ;;  %v899_v9 = vld [vmem:[#allocation2 + $0x40] sm:$0xff] }
 0x1a1   : > { %886 = vst [vmem:[#allocation2 + $0xc0] sm:$0xff] %v870_v8  ;;  %v871_v14 = vadd.f32 %v834_v12, %v758_v7  ;;  %v1000_v16 = vpop.f32.mrb[8].mxu1  ;;  %v900_v12 = vld [vmem:[#allocation2 + $0x50] sm:$0xff] }
 0x1a2   : > { %889 = vst [vmem:[#allocation2 + $0x108] sm:$0xff] %v873_v11  ;;  %v1055_v18 = vadd.f32 %v1000_v16, %v910_v10  ;;  %v1002_v19 = vpop.f32.mrb[9].mxu1  ;;  %v901_v16 = vld [vmem:[#allocation2 + $0x58] sm:$0xff] }
 0x1a3   : > { %887 = vst [vmem:[#allocation2 + $0xd8] sm:$0xff] %v871_v14  ;;  %v1056_v3 = vadd.f32 %v1002_v19, %v911_v13  ;;  %v1004_v21 = vpop.f32.mrb[10].mxu1  ;;  %v922_v19 = vld [vmem:[#allocation2 + $0x158] sm:$0xff] }
 0x1a4   : > { %1087 = vst [vmem:[#allocation2 + $0xc8] sm:$0xff] %v1055_v18  ;;  %v1057_v22 = vadd.f32 %v1004_v21, %v912_v17  ;;  %v1006_v23 = vpop.f32.mrb[11].mxu1  ;;  %v923_v21 = vld [vmem:[#allocation2 + $0x160] sm:$0xff] }
 0x1a5   : > { %1088 = vst [vmem:[#allocation2 + $0xd0] sm:$0xff] %v1056_v3  ;;  %v1058_v24 = vadd.f32 %v1006_v23, %v913_v20 }
 0x1a6   : > { %1089 = vst [vmem:[#allocation2 + $0xe0] sm:$0xff] %v1057_v22 }
 0x1a7   : > { %1090 = vst [vmem:[#allocation2 + $0xe8] sm:$0xff] %v1058_v24  ;;  %v924_v24 = vld [vmem:[#allocation2 + $0x170] sm:$0xff] }
 0x1a9   : > { %v1966_v29 = vpop.f32.mrb[12].mxu0 }
 0x1aa   : > { %v876_v31 = vadd.f32 %v1966_v29, %v763_v27  ;;  %v847_v32 = vpop.f32.mrb[13].mxu0  ;;  %v925_v29 = vld [vmem:[#allocation2 + $0x178] sm:$0xff] }
 0x1ab   : > { %v874_v36 = vadd.f32 %v847_v32, %v761_v28  ;;  %v1967_v37 = vpop.f32.mrb[14].mxu0 }
 0x1ac   : > { %892 = vst [vmem:[#allocation2 + $0x150] sm:$0xff] %v876_v31  ;;  %v877_v39 = vadd.f32 %v1967_v37, %v764_v30  ;;  %v850_v40 = vpop.f32.mrb[15].mxu0  ;;  %v1123_v37 = vld [vmem:[%s2687_s4] sm:$0xff] (!%p1835_p8) }
 0x1ad   : > { %890 = vst [vmem:[#allocation2 + $0x120] sm:$0xff] %v874_v36  ;;  %v875_v42 = vadd.f32 %v850_v40, %v762_v34  ;;  %v1010_v43 = vpop.f32.mrb[12].mxu1 }
 0x1ae   : > { %893 = vst [vmem:[#allocation2 + $0x168] sm:$0xff] %v877_v39  ;;  %v1059_v47 = vadd.f32 %v1010_v43, %v914_v38  ;;  %v1012_v48 = vpop.f32.mrb[13].mxu1  ;;  %v1124_v38 = vld [vmem:[%s2687_s4 + $0x8] sm:$0xff] (!%p1835_p8)  ;;  %v1125_v39 = vld [vmem:[%s2687_s4 + $0x10] sm:$0xff] (!%p1835_p8)  ;;  %v1127_v43 = vld [vmem:[%s2687_s4 + $0x20] sm:$0xff] (!%p1835_p8) }
 0x1af   : > { %891 = vst [vmem:[#allocation2 + $0x138] sm:$0xff] %v875_v42  ;;  %v1060_v15 = vadd.f32 %v1012_v48, %v915_v41  ;;  %v1014_v50 = vpop.f32.mrb[14].mxu1  ;;  %v2024_v40 = vpack.c.bf16 (!%p1835_p8), %v1124_v38, %v1123_v37  ;;  %v1126_v41 = vld [vmem:[%s2687_s4 + $0x18] sm:$0xff] (!%p1835_p8)  ;;  %v1107_v48 = vld [vmem:[%s2327_s20] sm:$0xff] (!%p1835_p8) }
 0x1b0   : > { %1091 = vst [vmem:[#allocation2 + $0xf8] sm:$0xff] %v1059_v47  ;;  %v1061_v52 = vadd.f32 %v1014_v50, %v916_v45  ;;  %v1016_v53 = vpop.f32.mrb[15].mxu1  ;;  %v2028_v42 = vpack.c.bf16 (!%p1835_p8), %v1126_v41, %v1125_v39  ;;  %v1128_v45 = vld [vmem:[%s2687_s4 + $0x28] sm:$0xff] (!%p1835_p8)  ;;  %v1130_v50 = vld [vmem:[%s2687_s4 + $0x38] sm:$0xff] (!%p1835_p8)  ;;  %2000 = vmatprep.mubr.f32.mxu0 (!%p1835_p8), %v1107_v48 }
 0x1b1   : > { %1092 = vst [vmem:[#allocation2 + $0x100] sm:$0xff] %v1060_v15  ;;  %v1062_v56 = vadd.f32 %v1016_v53, %v917_v49  ;;  %v960_v58 = vpop.f32.mrb[16].mxu0  ;;  %2025 = vmatprep.subr.bf16.mxu0 (!%p1835_p8), %v2024_v40  ;;  %2072 = vmatprep.subr.bf16.mxu1 (!%p1835_p8), %v2024_v40  ;;  %v2032_v47 = vpack.c.bf16 (!%p1835_p8), %v1128_v45, %v1127_v43  ;;  %v1115_v49 = vld [vmem:[%s2327_s20 + $0x40] sm:$0xff] (!%p1835_p8)  ;;  %v1129_v15 = vld [vmem:[%s2687_s4 + $0x30] sm:$0xff] (!%p1835_p8)  ;;  %v1132_v53 = vld [vmem:[%s2687_s4 + $0x48] sm:$0xff] (!%p1835_p8) }
 0x1b2   : > { %1093 = vst [vmem:[#allocation2 + $0x110] sm:$0xff] %v1061_v52  ;;  %v1039_v60 = vadd.f32 %v960_v58, %v894_v51  ;;  %v962_v61 = vpop.f32.mrb[17].mxu0  ;;  %2027 = vmatpush3.bf16.msra.mxu0 (!%p1835_p8), %v2024_v40  ;;  %2080 = vmatpush3.bf16.msra.mxu1 (!%p1835_p8), %v2024_v40  ;;  %v2036_v51 = vpack.c.bf16 (!%p1835_p8), %v1130_v50, %v1129_v15  ;;  %v1131_v52 = vld [vmem:[%s2687_s4 + $0x40] sm:$0xff] (!%p1835_p8)  ;;  %v1134_v58 = vld [vmem:[%s2687_s4 + $0x58] sm:$0xff] (!%p1835_p8) }
 0x1b3   : > { %1094 = vst [vmem:[#allocation2 + $0x118] sm:$0xff] %v1062_v56  ;;  %v1040_v63 = vadd.f32 %v962_v61, %v895_v54  ;;  %v964_v25 = vpop.f32.mrb[18].mxu0  ;;  %2029 = vmatprep.subr.bf16.mxu0 (!%p1835_p8), %v2028_v42  ;;  %2073 = vmatprep.subr.bf16.mxu1 (!%p1835_p8), %v2028_v42  ;;  %v2040_v54 = vpack.c.bf16 (!%p1835_p8), %v1132_v53, %v1131_v52  ;;  %v1133_v56 = vld [vmem:[%s2687_s4 + $0x50] sm:$0xff] (!%p1835_p8)  ;;  %v1136_v61 = vld [vmem:[%s2687_s4 + $0x68] sm:$0xff] (!%p1835_p8)  ;;  %v1303_v40 = vld [vmem:[#allocation2 + $0x60] sm:$0xff] (!%p1835_p8) }
 0x1b4   : > { %1071 = vst [vmem:[#allocation2 + $0x8] sm:$0xff] %v1039_v60  ;;  %v1041_v26 = vadd.f32 %v964_v25, %v896_v59  ;;  %v966_v1 = vpop.f32.mrb[19].mxu0  ;;  %2012 = vmatprep.mubr.f32.mxu1 (!%p1835_p8), %v1115_v49  ;;  %v2044_v59 = vpack.c.bf16 (!%p1835_p8), %v1134_v58, %v1133_v56  ;;  %v1135_v60 = vld [vmem:[%s2687_s4 + $0x60] sm:$0xff] (!%p1835_p8)  ;;  %v1138_v25 = vld [vmem:[%s2687_s4 + $0x78] sm:$0xff] (!%p1835_p8)  ;;  %v1304_v49 = vld [vmem:[#allocation2 + $0x68] sm:$0xff] (!%p1835_p8) }
 0x1b5   : > { %1072 = vst [vmem:[#allocation2 + $0x10] sm:$0xff] %v1040_v63  ;;  %v1042_v35 = vadd.f32 %v966_v1, %v897_v62  ;;  %v1020_v44 = vpop.f32.mrb[16].mxu1  ;;  %v2048_v62 = vpack.c.bf16 (!%p1835_p8), %v1136_v61, %v1135_v60  ;;  %v1137_v63 = vld [vmem:[%s2687_s4 + $0x70] sm:$0xff] (!%p1835_p8)  ;;  %v1116_v1 = vld [vmem:[%s2327_s20 + $0x48] sm:$0xff] (!%p1835_p8)  ;;  %v1327_v15 = vld [vmem:[#allocation2 + $0x120] sm:$0xff] (!%p1835_p8) }
 0x1b6   : > { %1073 = vst [vmem:[#allocation2 + $0x20] sm:$0xff] %v1041_v26  ;;  %v1063_v55 = vadd.f32 %v1020_v44, %v918_v0  ;;  %v1022_v57 = vpop.f32.mrb[17].mxu1  ;;  %2031 = vmatpush3.bf16.msra.mxu0 (!%p1835_p8), %v2028_v42  ;;  %2081 = vmatpush3.bf16.msra.mxu1 (!%p1835_p8), %v2028_v42  ;;  %v2052_v0 = vpack.c.bf16 (!%p1835_p8), %v1138_v25, %v1137_v63  ;;  %v1108_v26 = vld [vmem:[%s2327_s20 + $0x8] sm:$0xff] (!%p1835_p8)  ;;  %v1110_v44 = vld [vmem:[%s2327_s20 + $0x18] sm:$0xff] (!%p1835_p8) }
 0x1b7   : > { %1074 = vst [vmem:[#allocation2 + $0x28] sm:$0xff] %v1042_v35  ;;  %v1064_v4 = vadd.f32 %v1022_v57, %v919_v33  ;;  %v1024_v5 = vpop.f32.mrb[18].mxu1  ;;  %2033 = vmatprep.subr.bf16.mxu0 (!%p1835_p8), %v2032_v47  ;;  %2074 = vmatprep.subr.bf16.mxu1 (!%p1835_p8), %v2032_v47  ;;  %v1109_v33 = vld [vmem:[%s2327_s20 + $0x10] sm:$0xff] (!%p1835_p8)  ;;  %v1119_v57 = vld [vmem:[%s2327_s20 + $0x60] sm:$0xff] (!%p1835_p8)  ;;  %v1330_v38 = vld [vmem:[#allocation2 + $0x138] sm:$0xff] (!%p1835_p8) }
 0x1b8   : > { %1095 = vst [vmem:[#allocation2 + $0x128] sm:$0xff] %v1063_v55  ;;  %v1065_v7 = vadd.f32 %v1024_v5, %v920_v46  ;;  %v1026_v8 = vpop.f32.mrb[19].mxu1  ;;  %v1117_v35 = vld [vmem:[%s2327_s20 + $0x50] sm:$0xff] (!%p1835_p8)  ;;  %v1118_v46 = vld [vmem:[%s2327_s20 + $0x58] sm:$0xff] (!%p1835_p8)  ;;  %v1111_v55 = vld [vmem:[%s2327_s20 + $0x20] sm:$0xff] (!%p1835_p8) }
 0x1b9   : > { %1096 = vst [vmem:[#allocation2 + $0x130] sm:$0xff] %v1064_v4  ;;  %v1066_v10 = vadd.f32 %v1026_v8, %v921_v2  ;;  %v970_v11 = vpop.f32.mrb[20].mxu0  ;;  %v1112_v2 = vld [vmem:[%s2327_s20 + $0x28] sm:$0xff] (!%p1835_p8)  ;;  %v1113_v5 = vld [vmem:[%s2327_s20 + $0x30] sm:$0xff] (!%p1835_p8)  ;;  %v1122_v8 = vld [vmem:[%s2327_s20 + $0x78] sm:$0xff] (!%p1835_p8) }
 0x1ba   : > { %1097 = vst [vmem:[#allocation2 + $0x140] sm:$0xff] %v1065_v7  ;;  %v1043_v13 = vadd.f32 %v970_v11, %v898_v6  ;;  %v972_v14 = vpop.f32.mrb[21].mxu0  ;;  %2035 = vmatpush3.bf16.msra.mxu0 (!%p1835_p8), %v2032_v47  ;;  %2082 = vmatpush3.bf16.msra.mxu1 (!%p1835_p8), %v2032_v47  ;;  %v1120_v4 = vld [vmem:[%s2327_s20 + $0x68] sm:$0xff] (!%p1835_p8)  ;;  %v1121_v6 = vld [vmem:[%s2327_s20 + $0x70] sm:$0xff] (!%p1835_p8)  ;;  %v1114_v7 = vld [vmem:[%s2327_s20 + $0x38] sm:$0xff] (!%p1835_p8) }
 0x1bb   : > { %1098 = vst [vmem:[#allocation2 + $0x148] sm:$0xff] %v1066_v10  ;;  %v1044_v17 = vadd.f32 %v972_v14, %v899_v9  ;;  %v974_v18 = vpop.f32.mrb[22].mxu0  ;;  %2037 = vmatprep.subr.bf16.mxu0 (!%p1835_p8), %v2036_v51  ;;  %2075 = vmatprep.subr.bf16.mxu1 (!%p1835_p8), %v2036_v51  ;;  %v1294_v9 = vld [vmem:[#allocation2 + $0x18] sm:$0xff] (!%p1835_p8)  ;;  %v1292_v14 = vld [vmem:[#allocation2 + $0x8] sm:$0xff] (!%p1835_p8) }
 0x1bc   : > { %1075 = vst [vmem:[#allocation2 + $0x38] sm:$0xff] %v1043_v13  ;;  %v1045_v20 = vadd.f32 %v974_v18, %v900_v12  ;;  %v976_v3 = vpop.f32.mrb[23].mxu0  ;;  %v1318_v11 = vld [vmem:[#allocation2 + $0xd8] sm:$0xff] (!%p1835_p8)  ;;  %v1319_v12 = vld [vmem:[#allocation2 + $0xe0] sm:$0xff] (!%p1835_p8)  ;;  %v1316_v18 = vld [vmem:[#allocation2 + $0xc8] sm:$0xff] (!%p1835_p8) }
 0x1bd   : > { %1076 = vst [vmem:[#allocation2 + $0x40] sm:$0xff] %v1044_v17  ;;  %v1046_v22 = vadd.f32 %v976_v3, %v901_v16  ;;  %v1030_v23 = vpop.f32.mrb[20].mxu1  ;;  %1106 = sbr.rel (%p1835_p8) target bundleno = 741 (0x2e5), region = 52  ;;  %v1295_v10 = vld [vmem:[#allocation2 + $0x20] sm:$0xff] (!%p1835_p8)  ;;  %v1324_v3 = vld [vmem:[#allocation2 + $0x108] sm:$0xff] (!%p1835_p8) }
 0x1be   : > { %1077 = vst [vmem:[#allocation2 + $0x50] sm:$0xff] %v1045_v20  ;;  %v1067_v27 = vadd.f32 %v1030_v23, %v922_v19  ;;  %v1032_v28 = vpop.f32.mrb[21].mxu1  ;;  %2039 = vmatpush3.bf16.msra.mxu0 (!%p1835_p8), %v2036_v51  ;;  %2083 = vmatpush3.bf16.msra.mxu1 (!%p1835_p8), %v2036_v51  ;;  %v1291_v13 = vld [vmem:[#allocation2] sm:$0xff] (!%p1835_p8)  ;;  %v1300_v19 = vld [vmem:[#allocation2 + $0x48] sm:$0xff] (!%p1835_p8) }
 0x1bf   : > { %1078 = vst [vmem:[#allocation2 + $0x58] sm:$0xff] %v1046_v22  ;;  %v1068_v30 = vadd.f32 %v1032_v28, %v923_v21  ;;  %v1034_v31 = vpop.f32.mrb[22].mxu1  ;;  %2041 = vmatprep.subr.bf16.mxu0 (!%p1835_p8), %v2040_v54  ;;  %2076 = vmatprep.subr.bf16.mxu1 (!%p1835_p8), %v2040_v54  ;;  %v2618_v16 = vld [vmem:[%s2688_s5] ss:$0 sm:$0xff] (!%p1835_p8)  ;;  %v1325_v21 = vld [vmem:[#allocation2 + $0x110] sm:$0xff] (!%p1835_p8)  ;;  %v1348_v28 = vadd.f32 (!%p1835_p8), %v1319_v12, %v1318_v11  ;;  %v1328_v50 = vld [vmem:[#allocation2 + $0x128] sm:$0xff] (!%p1835_p8) }
 0x1c0   : > { %1099 = vst [vmem:[#allocation2 + $0x158] sm:$0xff] %v1067_v27  ;;  %v1069_v32 = vadd.f32 %v1034_v31, %v924_v24  ;;  %v1036_v34 = vpop.f32.mrb[23].mxu1  ;;  %v1315_v17 = vld [vmem:[#allocation2 + $0xc0] sm:$0xff] (!%p1835_p8)  ;;  %v1297_v22 = vld [vmem:[#allocation2 + $0x30] sm:$0xff] (!%p1835_p8)  ;;  %v1340_v27 = vadd.f32 (!%p1835_p8), %v1295_v10, %v1294_v9  ;;  %v1350_v48 = vadd.f32 (!%p1835_p8), %v1325_v21, %v1324_v3  ;;  %v1312_v61 = vld [vmem:[#allocation2 + $0xa8] sm:$0xff] (!%p1835_p8) }
 0x1c1   : > { %1100 = vst [vmem:[#allocation2 + $0x160] sm:$0xff] %v1068_v30  ;;  %v1070_v36 = vadd.f32 %v1036_v34, %v925_v29  ;;  %v1321_v24 = vld [vmem:[#allocation2 + $0xf0] sm:$0xff] (!%p1835_p8)  ;;  %v1322_v29 = vld [vmem:[#allocation2 + $0xf8] sm:$0xff] (!%p1835_p8)  ;;  %v1307_v31 = vld [vmem:[#allocation2 + $0x80] sm:$0xff] (!%p1835_p8)  ;;  %v1347_v37 = vadd.f32 (!%p1835_p8), %v1316_v18, %v1315_v17 }
 0x1c2   : > { %1101 = vst [vmem:[#allocation2 + $0x170] sm:$0xff] %v1069_v32  ;;  %2043 = vmatpush3.bf16.msra.mxu0 (!%p1835_p8), %v2040_v54  ;;  %2084 = vmatpush3.bf16.msra.mxu1 (!%p1835_p8), %v2040_v54  ;;  %v1306_v30 = vld [vmem:[#allocation2 + $0x78] sm:$0xff] (!%p1835_p8)  ;;  %v1331_v39 = vld [vmem:[#allocation2 + $0x140] sm:$0xff] (!%p1835_p8)  ;;  %v1349_v54 = vadd.f32 (!%p1835_p8), %v1322_v29, %v1321_v24  ;;  %v1333_v21 = vld [vmem:[#allocation2 + $0x150] sm:$0xff] (!%p1835_p8) }
 0x1c3   : > { %1102 = vst [vmem:[#allocation2 + $0x178] sm:$0xff] %v1070_v36  ;;  %2045 = vmatprep.subr.bf16.mxu0 (!%p1835_p8), %v2044_v59  ;;  %2077 = vmatprep.subr.bf16.mxu1 (!%p1835_p8), %v2044_v59  ;;  %v1298_v23 = vld [vmem:[#allocation2 + $0x38] sm:$0xff] (!%p1835_p8)  ;;  %v1339_v36 = vadd.f32 (!%p1835_p8), %v1292_v14, %v1291_v13  ;;  %v1352_v60 = vadd.f32 (!%p1835_p8), %v1331_v39, %v1330_v38  ;;  %v1309_v13 = vld [vmem:[#allocation2 + $0x90] sm:$0xff] (!%p1835_p8) }
 0x1c4   : > { %v1341_v53 = vadd.f32 %v1298_v23, %v1297_v22  ;;  %v1310_v3 = vld [vmem:[#allocation2 + $0x98] sm:$0xff] }
 0x1c5   : > { %v1301_v20 = vld [vmem:[#allocation2 + $0x50] sm:$0xff] }
 0x1c6   : > { %2047 = vmatpush3.bf16.msra.mxu0 %v2044_v59  ;;  %2085 = vmatpush3.bf16.msra.mxu1 %v2044_v59  ;;  %v1342_v47 = vadd.f32 %v1301_v20, %v1300_v19  ;;  %v1344_v59 = vadd.f32 %v1307_v31, %v1306_v30 }
 0x1c7   : > { %2049 = vmatprep.subr.bf16.mxu0 %v2048_v62  ;;  %2078 = vmatprep.subr.bf16.mxu1 %v2048_v62  ;;  %v1334_v22 = vld [vmem:[#allocation2 + $0x158] sm:$0xff] }
 0x1ca   : > { %2051 = vmatpush3.bf16.msra.mxu0 %v2048_v62  ;;  %2086 = vmatpush3.bf16.msra.mxu1 %v2048_v62 }
 0x1cb   : > { %2053 = vmatprep.subr.bf16.mxu0 %v2052_v0  ;;  %2079 = vmatprep.subr.bf16.mxu1 %v2052_v0 }
 0x1ce   : > { %2055 = vmatpush3.bf16.msra.mxu0 %v2052_v0  ;;  %2087 = vmatpush3.bf16.msra.mxu1 %v2052_v0 }
 0x1d1   : > { %2001 = vmatmul.mubr.f32.vlgmr.msra.gmra.mrb[0].mxu0 %v1108_v26  ;;  %2013 = vmatmul.mubr.f32.vlgmr.msra.gmra.mrb[0].mxu1 %v1116_v1  ;;  %v1343_v26 = vadd.f32 %v1304_v49, %v1303_v40  ;;  %v1351_v1 = vadd.f32 %v1328_v50, %v1327_v15 }
 0x1d2   : > { %2003 = vmatprep.mubr.f32.mxu0 %v1109_v33  ;;  %2015 = vmatprep.mubr.f32.mxu1 %v1117_v35  ;;  %v1313_v33 = vld [vmem:[#allocation2 + $0xb0] sm:$0xff]  ;;  %v1336_v35 = vld [vmem:[#allocation2 + $0x168] sm:$0xff] }
 0x1d3   : > { %v1346_v12 = vadd.f32 %v1313_v33, %v1312_v61 }
 0x1d5   : > { %2004 = vmatmul.mubr.f32.gmra.mrb[2].mxu0 %v1110_v44  ;;  %2016 = vmatmul.mubr.f32.gmra.mrb[2].mxu1 %v1118_v46  ;;  %v1337_v44 = vld [vmem:[#allocation2 + $0x170] sm:$0xff] }
 0x1d6   : > { %2006 = vmatprep.mubr.f32.mxu0 %v1111_v55  ;;  %2018 = vmatprep.mubr.f32.mxu1 %v1119_v57  ;;  %v1354_v20 = vadd.f32 %v1337_v44, %v1336_v35 }
 0x1d9   : > { %2007 = vmatmul.mubr.f32.gmra.mrb[4].mxu0 %v1112_v2  ;;  %2019 = vmatmul.mubr.f32.gmra.mrb[4].mxu1 %v1120_v4 }
 0x1da   : > { %2009 = vmatprep.mubr.f32.mxu0 %v1113_v5  ;;  %2021 = vmatprep.mubr.f32.mxu1 %v1121_v6 }
 0x1dd   : > { %2010 = vmatmul.mubr.f32.gmra.mrb[6].mxu0 %v1114_v7  ;;  %2022 = vmatmul.mubr.f32.gmra.mrb[6].mxu1 %v1122_v8 }
 0x2a4   : > { %v2002_v32 = vpop.f32.mrb[0].mxu0  ;;  %v2014_v34 = vpop.f32.mrb[0].mxu1 }
 0x2a5   : > { %v1218_v41 = vadd.f32 %v2002_v32, %v2618_v16  ;;  %v1258_v42 = vadd.f32 %v2014_v34, %v2618_v16  ;;  %v1212_v43 = vpop.f32.mrb[1].mxu0  ;;  %v1252_v45 = vpop.f32.mrb[1].mxu1 }
 0x2a6   : > { %v1213_v51 = vadd.f32 %v2618_v16, %v1212_v43  ;;  %v1253_v52 = vadd.f32 %v2618_v16, %v1252_v45 }
 0x2a7   : > { %v1356_v56 = vadd.f32 %v1340_v27, %v1218_v41  ;;  %v1364_v58 = vadd.f32 %v1348_v28, %v1258_v42  ;;  %v1345_v41 = vadd.f32 %v1310_v3, %v1309_v13  ;;  %v1353_v42 = vadd.f32 %v1334_v22, %v1333_v21  ;;  %v1293_v3 = vld [vmem:[#allocation2 + $0x10] sm:$0xff] }
 0x2a8   : > { %v1355_v62 = vadd.f32 %v1339_v36, %v1213_v51  ;;  %v1363_v63 = vadd.f32 %v1347_v37, %v1253_v52  ;;  %v2005_v25 = vpop.f32.mrb[2].mxu0  ;;  %v2017_v0 = vpop.f32.mrb[2].mxu1 }
 0x2a9   : > { %v1838_v46 = vmul.f32 -1.442695, %v1356_v56  ;;  %1484 = vst [vmem:[%s2332_s23 + $0x8] sm:$0xff] %v1356_v56  ;;  %v1846_v55 = vmul.f32 -1.442695, %v1364_v58  ;;  %1492 = vst [vmem:[%s2332_s23 + $0x48] sm:$0xff] %v1364_v58  ;;  %v1228_v57 = vadd.f32 %v2005_v25, %v2618_v16  ;;  %v1268_v2 = vadd.f32 %v2017_v0, %v2618_v16 }
 0x2aa   : > { %v1222_v4 = vpop.f32.mrb[3].mxu0  ;;  %v1262_v5 = vpop.f32.mrb[3].mxu1  ;;  %v1837_v6 = vmul.f32 -1.442695, %v1355_v62  ;;  %1483 = vst [vmem:[%s2332_s23] sm:$0xff] %v1355_v62  ;;  %v1845_v7 = vmul.f32 -1.442695, %v1363_v63 }
 0x2ab   : > { %1491 = vst [vmem:[%s2332_s23 + $0x40] sm:$0xff] %v1363_v63  ;;  %v1223_v8 = vadd.f32 %v2618_v16, %v1222_v4  ;;  %v1263_v9 = vadd.f32 %v2618_v16, %v1262_v5  ;;  %2134 = vpow2.f32 %v1838_v46  ;;  %v1358_v10 = vadd.f32 %v1342_v47, %v1228_v57 }
 0x2ac   : > { %v1366_v11 = vadd.f32 %v1350_v48, %v1268_v2  ;;  %2136 = vpow2.f32 %v1846_v55  ;;  %v2008_v18 = vpop.f32.mrb[4].mxu0  ;;  %v2020_v19 = vpop.f32.mrb[4].mxu1 }
 0x2ad   : > { %v1357_v14 = vadd.f32 %v1341_v53, %v1223_v8  ;;  %v1365_v17 = vadd.f32 %v1349_v54, %v1263_v9  ;;  %2138 = vpow2.f32 %v1837_v6  ;;  %v1840_v23 = vmul.f32 -1.442695, %v1358_v10  ;;  %1486 = vst [vmem:[%s2332_s23 + $0x18] sm:$0xff] %v1358_v10  ;;  %v1232_v28 = vpop.f32.mrb[5].mxu0  ;;  %v1272_v29 = vpop.f32.mrb[5].mxu1 }
 0x2ae   : > { %v1848_v24 = vmul.f32 -1.442695, %v1366_v11  ;;  %1494 = vst [vmem:[%s2332_s23 + $0x58] sm:$0xff] %v1366_v11  ;;  %v1238_v27 = vadd.f32 %v2008_v18, %v2618_v16  ;;  %2140 = vpow2.f32 %v1845_v7  ;;  %v1278_v32 = vadd.f32 %v2020_v19, %v2618_v16 }
 0x2af   : > { %v1839_v30 = vmul.f32 -1.442695, %v1357_v14  ;;  %1485 = vst [vmem:[%s2332_s23 + $0x10] sm:$0xff] %v1357_v14  ;;  %v1847_v31 = vmul.f32 -1.442695, %v1365_v17  ;;  %1493 = vst [vmem:[%s2332_s23 + $0x50] sm:$0xff] %v1365_v17  ;;  %2142 = vpow2.f32 %v1840_v23  ;;  %v1233_v36 = vadd.f32 %v2618_v16, %v1232_v28 }
 0x2b0   : > { %v1360_v34 = vadd.f32 %v1344_v59, %v1238_v27  ;;  %v1273_v37 = vadd.f32 %v2618_v16, %v1272_v29  ;;  %2144 = vpow2.f32 %v1848_v24  ;;  %v1368_v38 = vadd.f32 %v1352_v60, %v1278_v32  ;;  %v2011_v39 = vpop.f32.mrb[6].mxu0  ;;  %v2023_v40 = vpop.f32.mrb[6].mxu1  ;;  %v1320_v17 = vld [vmem:[#allocation2 + $0xe8] sm:$0xff]  ;;  %v1317_v24 = vld [vmem:[#allocation2 + $0xd0] sm:$0xff] }
 0x2b1   : > { %2146 = vpow2.f32 %v1839_v30  ;;  %v1359_v45 = vadd.f32 %v1343_v26, %v1233_v36  ;;  %v1242_v48 = vpop.f32.mrb[7].mxu0  ;;  %v1282_v49 = vpop.f32.mrb[7].mxu1  ;;  %v1248_v50 = vadd.f32 %v2011_v39, %v2618_v16  ;;  %v1288_v51 = vadd.f32 %v2023_v40, %v2618_v16  ;;  %v1302_v30 = vld [vmem:[#allocation2 + $0x58] sm:$0xff]  ;;  %v1299_v40 = vld [vmem:[#allocation2 + $0x40] sm:$0xff] }
 0x2b2   : > { %v1842_v43 = vmul.f32 -1.442695, %v1360_v34  ;;  %1488 = vst [vmem:[%s2332_s23 + $0x28] sm:$0xff] %v1360_v34  ;;  %v1367_v47 = vadd.f32 %v1351_v1, %v1273_v37  ;;  %2148 = vpow2.f32 %v1847_v31  ;;  %v1850_v15 = vmul.f32 -1.442695, %v1368_v38  ;;  %1496 = vst [vmem:[%s2332_s23 + $0x68] sm:$0xff] %v1368_v38 }
 0x2b3   : > { %v1841_v52 = vmul.f32 -1.442695, %v1359_v45  ;;  %1487 = vst [vmem:[%s2332_s23 + $0x20] sm:$0xff] %v1359_v45  ;;  %v1243_v54 = vadd.f32 %v2618_v16, %v1242_v48  ;;  %v1362_v56 = vadd.f32 %v1346_v12, %v1248_v50  ;;  %v1370_v58 = vadd.f32 %v1354_v20, %v1288_v51  ;;  %v1296_v12 = vld [vmem:[#allocation2 + $0x28] sm:$0xff]  ;;  %v1326_v36 = vld [vmem:[#allocation2 + $0x118] sm:$0xff]  ;;  %v1323_v45 = vld [vmem:[#allocation2 + $0x100] sm:$0xff] }
 0x2b4   : > { %2150 = vpow2.f32 %v1842_v43  ;;  %v1849_v53 = vmul.f32 -1.442695, %v1367_v47  ;;  %1495 = vst [vmem:[%s2332_s23 + $0x60] sm:$0xff] %v1367_v47  ;;  %v1283_v59 = vadd.f32 %v2618_v16, %v1282_v49 }
 0x2b5   : > { %2152 = vpow2.f32 %v1850_v15  ;;  %v2135_v60 = vpop.eup %2134  ;;  %v1361_v61 = vadd.f32 %v1345_v41, %v1243_v54  ;;  %1490 = vst [vmem:[%s2332_s23 + $0x38] sm:$0xff] %v1362_v56  ;;  %1498 = vst [vmem:[%s2332_s23 + $0x78] sm:$0xff] %v1370_v58  ;;  %v1844_v14 = vmul.f32 -1.442695, %v1362_v56  ;;  %v1852_v19 = vmul.f32 -1.442695, %v1370_v58 }
 0x2b6   : > { %2154 = vpow2.f32 %v1841_v52  ;;  %v2137_v62 = vpop.eup %2136  ;;  %v1420_v63 = vadd.f32 1.0, %v2135_v60  ;;  %v1369_v26 = vadd.f32 %v1353_v42, %v1283_v59  ;;  %v1308_v15 = vld [vmem:[#allocation2 + $0x88] sm:$0xff]  ;;  %v1305_v59 = vld [vmem:[#allocation2 + $0x70] sm:$0xff] }
 0x2b7   : > { %2156 = vpow2.f32 %v1849_v53  ;;  %v2139_v25 = vpop.eup %2138  ;;  %v1428_v0 = vadd.f32 1.0, %v2137_v62  ;;  %1489 = vst [vmem:[%s2332_s23 + $0x30] sm:$0xff] %v1361_v61  ;;  %v1843_v21 = vmul.f32 -1.442695, %v1361_v61  ;;  %v1332_v53 = vld [vmem:[#allocation2 + $0x148] sm:$0xff] }
 0x2b8   : > { %v2141_v1 = vpop.eup %2140  ;;  %2158 = vrcp.f32 %v1420_v63  ;;  %v1419_v33 = vadd.f32 1.0, %v2139_v25  ;;  %1497 = vst [vmem:[%s2332_s23 + $0x70] sm:$0xff] %v1369_v26  ;;  %v1851_v27 = vmul.f32 -1.442695, %v1369_v26  ;;  %v1329_v63 = vld [vmem:[#allocation2 + $0x130] sm:$0xff] }
 0x2b9   : > { %v2143_v35 = vpop.eup %2142  ;;  %2160 = vrcp.f32 %v1428_v0  ;;  %v1427_v44 = vadd.f32 1.0, %v2141_v1 }
 0x2ba   : > { %v2145_v16 = vpop.eup %2144  ;;  %2162 = vrcp.f32 %v1419_v33  ;;  %v1422_v46 = vadd.f32 1.0, %v2143_v35 }
 0x2bb   : > { %v2147_v55 = vpop.eup %2146  ;;  %2164 = vrcp.f32 %v1427_v44  ;;  %v1430_v57 = vadd.f32 1.0, %v2145_v16 }
 0x2bc   : > { %v2149_v2 = vpop.eup %2148  ;;  %2166 = vrcp.f32 %v1422_v46  ;;  %v1421_v4 = vadd.f32 1.0, %v2147_v55 }
 0x2bd   : > { %2168 = vrcp.f32 %v1430_v57  ;;  %v1429_v6 = vadd.f32 1.0, %v2149_v2 }
 0x2be   : > { %v2151_v5 = vpop.eup %2150  ;;  %2170 = vrcp.f32 %v1421_v4 }
 0x2bf   : > { %v2153_v7 = vpop.eup %2152  ;;  %v1424_v8 = vadd.f32 1.0, %v2151_v5  ;;  %2172 = vrcp.f32 %v1429_v6 }
 0x2c0   : > { %v2155_v9 = vpop.eup %2154  ;;  %v1432_v10 = vadd.f32 1.0, %v2153_v7 }
 0x2c1   : > { %v2157_v11 = vpop.eup %2156  ;;  %2174 = vrcp.f32 %v1424_v8  ;;  %v1423_v13 = vadd.f32 1.0, %v2155_v9 }
 0x2c2   : > { %2176 = vrcp.f32 %v1432_v10  ;;  %v1431_v18 = vadd.f32 1.0, %v2157_v11  ;;  %v2159_v20 = vpop.eup %2158  ;;  %v1314_v10 = vld [vmem:[#allocation2 + $0xb8] sm:$0xff] }
 0x2c3   : > { %2178 = vrcp.f32 %v1423_v13  ;;  %v2161_v22 = vpop.eup %2160  ;;  %v1468_v23 = vmul.f32 %v2159_v20, %v1296_v12  ;;  %v1338_v11 = vld [vmem:[#allocation2 + $0x178] sm:$0xff]  ;;  %v1311_v13 = vld [vmem:[#allocation2 + $0xa0] sm:$0xff] }
 0x2c4   : > { %2180 = vrcp.f32 %v1431_v18  ;;  %v2163_v28 = vpop.eup %2162  ;;  %v1476_v29 = vmul.f32 %v2161_v22, %v1320_v17  ;;  %v1335_v18 = vld [vmem:[#allocation2 + $0x160] sm:$0xff] }
 0x2c5   : > { %2182 = vpow2.f32 %v1844_v14  ;;  %v2165_v31 = vpop.eup %2164  ;;  %v1873_v32 = vpack.c.bf16 %v2159_v20, %v1468_v23  ;;  %v1467_v34 = vmul.f32 %v2163_v28, %v1293_v3 }
 0x2c6   : > { %2184 = vpow2.f32 %v1852_v19  ;;  %v2167_v37 = vpop.eup %2166  ;;  %v1881_v38 = vpack.c.bf16 %v2161_v22, %v1476_v29  ;;  %v1475_v39 = vmul.f32 %v2165_v31, %v1317_v24 }
 0x2c7   : > { %2186 = vpow2.f32 %v1843_v21  ;;  %v2169_v41 = vpop.eup %2168  ;;  %1596 = vst [vmem:[%s2337_s11 + $0x8] sm:$0xff] %v1873_v32  ;;  %v1872_v42 = vpack.c.bf16 %v2163_v28, %v1467_v34  ;;  %v1470_v43 = vmul.f32 %v2167_v37, %v1302_v30 }
 0x2c8   : > { %2188 = vpow2.f32 %v1851_v27  ;;  %v2171_v47 = vpop.eup %2170  ;;  %1604 = vst [vmem:[%s2337_s11 + $0x48] sm:$0xff] %v1881_v38  ;;  %v1880_v48 = vpack.c.bf16 %v2165_v31, %v1475_v39  ;;  %v1478_v49 = vmul.f32 %v2169_v41, %v1326_v36 }
 0x2c9   : > { %v2173_v50 = vpop.eup %2172  ;;  %1595 = vst [vmem:[%s2337_s11] sm:$0xff] %v1872_v42  ;;  %v1875_v51 = vpack.c.bf16 %v2167_v37, %v1470_v43  ;;  %v1469_v52 = vmul.f32 %v2171_v47, %v1299_v40 }
 0x2ca   : > { %1603 = vst [vmem:[%s2337_s11 + $0x40] sm:$0xff] %v1880_v48  ;;  %v1883_v56 = vpack.c.bf16 %v2169_v41, %v1478_v49  ;;  %v1477_v58 = vmul.f32 %v2173_v50, %v1323_v45 }
 0x2cb   : > { %v2175_v54 = vpop.eup %2174  ;;  %1598 = vst [vmem:[%s2337_s11 + $0x18] sm:$0xff] %v1875_v51  ;;  %v1874_v61 = vpack.c.bf16 %v2171_v47, %v1469_v52 }
 0x2cc   : > { %v2177_v60 = vpop.eup %2176  ;;  %v1472_v62 = vmul.f32 %v2175_v54, %v1308_v15  ;;  %1606 = vst [vmem:[%s2337_s11 + $0x58] sm:$0xff] %v1883_v56  ;;  %v1882_v0 = vpack.c.bf16 %v2173_v50, %v1477_v58 }
 0x2cd   : > { %v2179_v25 = vpop.eup %2178  ;;  %v1480_v26 = vmul.f32 %v2177_v60, %v1332_v53  ;;  %1597 = vst [vmem:[%s2337_s11 + $0x10] sm:$0xff] %v1874_v61 }
 0x2ce   : > { %v2181_v1 = vpop.eup %2180  ;;  %v1877_v33 = vpack.c.bf16 %v2175_v54, %v1472_v62  ;;  %v1471_v35 = vmul.f32 %v2179_v25, %v1305_v59  ;;  %1605 = vst [vmem:[%s2337_s11 + $0x50] sm:$0xff] %v1882_v0 }
 0x2cf   : > { %v2183_v44 = vpop.eup %2182  ;;  %v1885_v16 = vpack.c.bf16 %v2177_v60, %v1480_v26  ;;  %v1479_v46 = vmul.f32 %v2181_v1, %v1329_v63 }
 0x2d0   : > { %v2185_v55 = vpop.eup %2184  ;;  %1600 = vst [vmem:[%s2337_s11 + $0x28] sm:$0xff] %v1877_v33  ;;  %v1876_v57 = vpack.c.bf16 %v2179_v25, %v1471_v35  ;;  %v1426_v2 = vadd.f32 1.0, %v2183_v44 }
 0x2d1   : > { %v2187_v4 = vpop.eup %2186  ;;  %1608 = vst [vmem:[%s2337_s11 + $0x68] sm:$0xff] %v1885_v16  ;;  %v1884_v5 = vpack.c.bf16 %v2181_v1, %v1479_v46  ;;  %v1434_v6 = vadd.f32 1.0, %v2185_v55 }
 0x2d2   : > { %v2189_v7 = vpop.eup %2188  ;;  %1599 = vst [vmem:[%s2337_s11 + $0x20] sm:$0xff] %v1876_v57  ;;  %2190 = vrcp.f32 %v1426_v2  ;;  %v1425_v8 = vadd.f32 1.0, %v2187_v4 }
 0x2d3   : > { %1607 = vst [vmem:[%s2337_s11 + $0x60] sm:$0xff] %v1884_v5  ;;  %2192 = vrcp.f32 %v1434_v6  ;;  %v1433_v9 = vadd.f32 1.0, %v2189_v7 }
 0x2d4   : > { %2194 = vrcp.f32 %v1425_v8 }
 0x2d5   : > { %2196 = vrcp.f32 %v1433_v9 }
 0x2dc   : > { %v2191_v12 = vpop.eup %2190 }
 0x2dd   : > { %v2193_v14 = vpop.eup %2192  ;;  %v1474_v17 = vmul.f32 %v2191_v12, %v1314_v10 }
 0x2de   : > { %v2195_v19 = vpop.eup %2194  ;;  %v1482_v20 = vmul.f32 %v2193_v14, %v1338_v11 }
 0x2df   : > { %v2197_v3 = vpop.eup %2196  ;;  %v1879_v21 = vpack.c.bf16 %v2191_v12, %v1474_v17  ;;  %v1473_v22 = vmul.f32 %v2195_v19, %v1311_v13 }
 0x2e0   : > { %v1887_v23 = vpack.c.bf16 %v2193_v14, %v1482_v20  ;;  %v1481_v24 = vmul.f32 %v2197_v3, %v1335_v18 }
 0x2e1   : > { %1602 = vst [vmem:[%s2337_s11 + $0x38] sm:$0xff] %v1879_v21  ;;  %v1878_v27 = vpack.c.bf16 %v2195_v19, %v1473_v22 }
 0x2e2   : > { %1610 = vst [vmem:[%s2337_s11 + $0x78] sm:$0xff] %v1887_v23  ;;  %v1886_v28 = vpack.c.bf16 %v2197_v3, %v1481_v24 }
 0x2e3   : > { %1601 = vst [vmem:[%s2337_s11 + $0x30] sm:$0xff] %v1878_v27 }
 0x2e4   : > { %1609 = vst [vmem:[%s2337_s11 + $0x70] sm:$0xff] %v1886_v28 }
 0x2e5 PF: > { %s18_s28 = sadd.s32 1, %s2236_s28   ;;  %s2691_s24 = smov %s2228_s26 }
 0x2e6   : > { %p15_p9 = scmp.ge.s32.totalorder %s18_s28, 14   ;;  %s2692_s25 = smov %s2232_s27 }
 0x2e7   : > { %s2693_s26 = smov %s2696_s29  ;;  %s2694_s27 = smov %s2700_s30 }
 0x2e8   :  { %17 = sbr.rel (!%p15_p9) target bundleno = 3 (0x3), region = 103 }

// kernel: alignn_conv.18
= control target key start
LH: loop header
LB: loop body
LE: loop exit
PB: predicated region body
PF: predicated region fallthrough
CT: control target
= control target key end

     0   :  { %s728_s18 = smov 0   ;;  %s955_s0 = inlined_call_operand.vmem [shape: f32[384,128], index: 0, kind: input, shape index: {}]   ;;  %s956_s1 = inlined_call_operand.vmem [shape: f32[384,128], index: 1, kind: input, shape index: {}]   ;;  %s957_s2 = inlined_call_operand.vmem [shape: f32[2,128], index: 2, kind: input, shape index: {}]   ;;  %s958_s3 = inlined_call_operand.vmem [shape: f32[1,128], index: 3, kind: input, shape index: {}]   ;;  %s959_s4 = inlined_call_operand.vmem [shape: f32[1,128], index: 4, kind: input, shape index: {}]   ;;  %s960_s5 = inlined_call_operand.vmem [shape: f32[384,128], index: 5, kind: output, shape index: {}]  }
   0x1 LB: > { %s584_s19 = sadd.s32 4294967295, %s696_s18   ;;  %p588_p0 = scmp.ge.s32.totalorder %s696_s18, 1  ;;  %s696_s18 = sphi %s728_s18, %s15_s18  }
   0x2   : > { %p199_p1 = scmp.lt.s32.totalorder %s696_s18, 4 }
   0x4   : > { %p200_p2 = pnand %p588_p0, %p199_p1 }
   0x5   : > { %s589_s20 = sshll.u32 (!%p200_p2), %s584_s19, 4  ;;  %v251_v0 = vld [vmem:[%s957_s2 + $0x1] sm:$0x1] (!%p200_p2)  ;;  %v290_v2 = vlaneseq (!%p200_p2)  ;;  %v750_v4 = vld [vmem:[%s957_s2] ss:$0 sm:$0xff] (!%p200_p2) }
   0x6   : > { %203 = sbr.rel (%p200_p2) target bundleno = 86 (0x56), region = 40  ;;  %p233_p3 = scmp.lt.s32.totalorder (!%p200_p2), %s589_s20, 47  ;;  %v288_v1 = vadd.f32 (!%p200_p2), 1e-05, %v251_v0  ;;  %v777_v28 = vld [vmem:[%s958_s3] ss:$0 sm:$0xff] (!%p200_p2) }
   0x7   : > { %v291_v3 = vshrl.u32 (!%p200_p2), %v290_v2, 7  ;;  %v790_v37 = vld [vmem:[%s959_s4] ss:$0 sm:$0xff] (!%p200_p2) }
   0x8   : > { %624 = vrsqrt.f32 (!%p200_p2), %v288_v1 }
   0x9   : > { %v292_v9 = vsub.s32 (!%p200_p2), 0, %v291_v3 }
   0xd   : > { %s962_s20 = smov (!%p233_p3, %s589_s20), 47 }
   0xe   : > { %s739_s23 = sshll.u32 %s962_s20, 3 }
   0xf   : > { %s745_s26 = scalar_lea.vmem %s955_s0, %s739_s23  ;;  %s890_s10 = scalar_lea.vmem %s956_s1, %s739_s23 }
  0x10   : > { %v252_v5 = vld [vmem:[%s745_s26] sm:$0xff]  ;;  %v253_v6 = vld [vmem:[%s745_s26 + $0x8] sm:$0xff]  ;;  %v254_v7 = vld [vmem:[%s745_s26 + $0x10] sm:$0xff]  ;;  %s905_s13 = scalar_lea.vmem %s960_s5, %s739_s23 }
  0x11   : > { %v255_v8 = vld [vmem:[%s745_s26 + $0x18] sm:$0xff]  ;;  %v256_v10 = vld [vmem:[%s745_s26 + $0x20] sm:$0xff]  ;;  %v257_v11 = vld [vmem:[%s745_s26 + $0x28] sm:$0xff]  ;;  %v272_v14 = vsub.f32 %v252_v5, %v750_v4  ;;  %v273_v15 = vsub.f32 %v253_v6, %v750_v4  ;;  %v274_v16 = vsub.f32 %v254_v7, %v750_v4 }
  0x12   : > { %v258_v12 = vld [vmem:[%s745_s26 + $0x30] sm:$0xff]  ;;  %v259_v13 = vld [vmem:[%s745_s26 + $0x38] sm:$0xff]  ;;  %v275_v17 = vsub.f32 %v255_v8, %v750_v4  ;;  %v260_v18 = vld [vmem:[%s745_s26 + $0x40] sm:$0xff]  ;;  %v625_v19 = vpop.eup %624  ;;  %v276_v20 = vsub.f32 %v256_v10, %v750_v4  ;;  %v277_v21 = vsub.f32 %v257_v11, %v750_v4 }
  0x13   : > { %v278_v22 = vsub.f32 %v258_v12, %v750_v4  ;;  %v279_v23 = vsub.f32 %v259_v13, %v750_v4  ;;  %v261_v24 = vld [vmem:[%s745_s26 + $0x48] sm:$0xff]  ;;  %v262_v25 = vld [vmem:[%s745_s26 + $0x50] sm:$0xff]  ;;  %v771_v26 = vrot.slane %v625_v19, %v292_v9  ;;  %v263_v27 = vld [vmem:[%s745_s26 + $0x58] sm:$0xff]  ;;  %v280_v29 = vsub.f32 %v260_v18, %v750_v4 }
  0x14   : > { %v281_v30 = vsub.f32 %v261_v24, %v750_v4  ;;  %v282_v31 = vsub.f32 %v262_v25, %v750_v4  ;;  %v283_v32 = vsub.f32 %v263_v27, %v750_v4  ;;  %v264_v1 = vld [vmem:[%s745_s26 + $0x60] sm:$0xff]  ;;  %v266_v18 = vld [vmem:[%s745_s26 + $0x70] sm:$0xff] }
  0x15   : > { %v294_v33 = vmul.f32 %v771_v26, %v272_v14  ;;  %v295_v34 = vmul.f32 %v771_v26, %v273_v15  ;;  %v296_v35 = vmul.f32 %v771_v26, %v274_v16  ;;  %v297_v36 = vmul.f32 %v771_v26, %v275_v17  ;;  %v265_v15 = vld [vmem:[%s745_s26 + $0x68] sm:$0xff] }
  0x16   : > { %v298_v38 = vmul.f32 %v771_v26, %v276_v20  ;;  %v299_v39 = vmul.f32 %v771_v26, %v277_v21  ;;  %v300_v40 = vmul.f32 %v771_v26, %v278_v22  ;;  %v301_v41 = vmul.f32 %v771_v26, %v279_v23  ;;  %v267_v22 = vld [vmem:[%s745_s26 + $0x78] sm:$0xff] }
  0x17   : > { %v317_v42 = vmul.f32 %v777_v28, %v294_v33  ;;  %v318_v43 = vmul.f32 %v777_v28, %v295_v34  ;;  %v319_v44 = vmul.f32 %v777_v28, %v296_v35  ;;  %v320_v45 = vmul.f32 %v777_v28, %v297_v36 }
  0x18   : > { %v321_v46 = vmul.f32 %v777_v28, %v298_v38  ;;  %v322_v47 = vmul.f32 %v777_v28, %v299_v39  ;;  %v323_v48 = vmul.f32 %v777_v28, %v300_v40  ;;  %v324_v49 = vmul.f32 %v777_v28, %v301_v41 }
  0x19   : > { %v805_v50 = vadd.f32 %v790_v37, %v317_v42  ;;  %v808_v51 = vadd.f32 %v790_v37, %v318_v43  ;;  %v811_v52 = vadd.f32 %v790_v37, %v319_v44  ;;  %v814_v53 = vadd.f32 %v790_v37, %v320_v45 }
  0x1a   : > { %v817_v54 = vadd.f32 %v790_v37, %v321_v46  ;;  %v820_v55 = vadd.f32 %v790_v37, %v322_v47  ;;  %v823_v56 = vadd.f32 %v790_v37, %v323_v48  ;;  %v826_v57 = vadd.f32 %v790_v37, %v324_v49 }
  0x1b   : > { %v598_v58 = vmul.f32 -1.442695, %v805_v50  ;;  %v599_v59 = vmul.f32 -1.442695, %v808_v51  ;;  %v600_v60 = vmul.f32 -1.442695, %v811_v52  ;;  %v302_v61 = vmul.f32 %v771_v26, %v280_v29 }
  0x1c   : > { %v601_v62 = vmul.f32 -1.442695, %v814_v53  ;;  %v602_v63 = vmul.f32 -1.442695, %v817_v54  ;;  %v303_v0 = vmul.f32 %v771_v26, %v281_v30  ;;  %v603_v2 = vmul.f32 -1.442695, %v820_v55 }
  0x1d   : > { %626 = vpow2.f32 %v598_v58  ;;  %v604_v3 = vmul.f32 -1.442695, %v823_v56  ;;  %v325_v5 = vmul.f32 %v777_v28, %v302_v61  ;;  %v304_v7 = vmul.f32 %v771_v26, %v282_v31 }
  0x1e   : > { %628 = vpow2.f32 %v599_v59  ;;  %v326_v6 = vmul.f32 %v777_v28, %v303_v0  ;;  %v305_v8 = vmul.f32 %v771_v26, %v283_v32  ;;  %v605_v9 = vmul.f32 -1.442695, %v826_v57 }
  0x1f   : > { %630 = vpow2.f32 %v600_v60  ;;  %v844_v10 = vadd.f32 %v790_v37, %v325_v5  ;;  %v284_v11 = vsub.f32 %v264_v1, %v750_v4  ;;  %v327_v13 = vmul.f32 %v777_v28, %v304_v7 }
  0x20   : > { %632 = vpow2.f32 %v601_v62  ;;  %v848_v12 = vadd.f32 %v790_v37, %v326_v6  ;;  %v328_v14 = vmul.f32 %v777_v28, %v305_v8  ;;  %v285_v24 = vsub.f32 %v265_v15, %v750_v4 }
  0x21   : > { %634 = vpow2.f32 %v602_v63  ;;  %v606_v16 = vmul.f32 -1.442695, %v844_v10  ;;  %v306_v17 = vmul.f32 %v771_v26, %v284_v11  ;;  %v858_v20 = vadd.f32 %v790_v37, %v327_v13 }
  0x22   : > { %636 = vpow2.f32 %v603_v2  ;;  %v607_v19 = vmul.f32 -1.442695, %v848_v12  ;;  %v861_v21 = vadd.f32 %v790_v37, %v328_v14  ;;  %v286_v29 = vsub.f32 %v266_v18, %v750_v4  ;;  %v468_v14 = vld [vmem:[%s890_s10] sm:$0xff]  ;;  %v469_v18 = vld [vmem:[%s890_s10 + $0x8] sm:$0xff] }
  0x23   : > { %638 = vpow2.f32 %v604_v3  ;;  %v329_v23 = vmul.f32 %v777_v28, %v306_v17  ;;  %v608_v25 = vmul.f32 -1.442695, %v858_v20  ;;  %v287_v31 = vsub.f32 %v267_v22, %v750_v4 }
  0x24   : > { %640 = vpow2.f32 %v605_v9  ;;  %v609_v27 = vmul.f32 -1.442695, %v861_v21  ;;  %v307_v34 = vmul.f32 %v771_v26, %v285_v24  ;;  %v308_v38 = vmul.f32 %v771_v26, %v286_v29  ;;  %v470_v24 = vld [vmem:[%s890_s10 + $0x10] sm:$0xff]  ;;  %v471_v29 = vld [vmem:[%s890_s10 + $0x18] sm:$0xff] }
  0x25   : > { %642 = vpow2.f32 %v606_v16  ;;  %v870_v30 = vadd.f32 %v790_v37, %v329_v23  ;;  %v309_v41 = vmul.f32 %v771_v26, %v287_v31 }
  0x26   : > { %644 = vpow2.f32 %v607_v19  ;;  %v330_v45 = vmul.f32 %v777_v28, %v307_v34  ;;  %v331_v48 = vmul.f32 %v777_v28, %v308_v38  ;;  %v472_v34 = vld [vmem:[%s890_s10 + $0x20] sm:$0xff]  ;;  %v473_v38 = vld [vmem:[%s890_s10 + $0x28] sm:$0xff] }
  0x27   : > { %v627_v32 = vpop.eup %626  ;;  %646 = vpow2.f32 %v608_v25  ;;  %v610_v33 = vmul.f32 -1.442695, %v870_v30  ;;  %v332_v59 = vmul.f32 %v777_v28, %v309_v41 }
  0x28   : > { %v629_v35 = vpop.eup %628  ;;  %v404_v36 = vadd.f32 1.0, %v627_v32  ;;  %648 = vpow2.f32 %v609_v27  ;;  %v881_v63 = vadd.f32 %v790_v37, %v330_v45  ;;  %v884_v2 = vadd.f32 %v790_v37, %v331_v48 }
  0x29   : > { %v631_v39 = vpop.eup %630  ;;  %v405_v40 = vadd.f32 1.0, %v629_v35  ;;  %650 = vpow2.f32 %v610_v33  ;;  %v893_v5 = vadd.f32 %v790_v37, %v332_v59 }
  0x2a   : > { %v633_v42 = vpop.eup %632  ;;  %652 = vrcp.f32 %v404_v36  ;;  %v406_v4 = vadd.f32 1.0, %v631_v39  ;;  %v611_v11 = vmul.f32 -1.442695, %v881_v63  ;;  %v612_v16 = vmul.f32 -1.442695, %v884_v2 }
  0x2b   : > { %v635_v43 = vpop.eup %634  ;;  %654 = vrcp.f32 %v405_v40  ;;  %v407_v44 = vadd.f32 1.0, %v633_v42  ;;  %v613_v19 = vmul.f32 -1.442695, %v893_v5 }
  0x2c   : > { %v637_v46 = vpop.eup %636  ;;  %656 = vrcp.f32 %v406_v4  ;;  %v408_v47 = vadd.f32 1.0, %v635_v43  ;;  %v475_v43 = vld [vmem:[%s890_s10 + $0x38] sm:$0xff] }
  0x2d   : > { %v639_v49 = vpop.eup %638  ;;  %658 = vrcp.f32 %v407_v44  ;;  %v409_v58 = vadd.f32 1.0, %v637_v46  ;;  %v476_v46 = vld [vmem:[%s890_s10 + $0x40] sm:$0xff] }
  0x2e   : > { %v641_v26 = vpop.eup %640  ;;  %660 = vrcp.f32 %v408_v47  ;;  %v410_v60 = vadd.f32 1.0, %v639_v49  ;;  %v477_v49 = vld [vmem:[%s890_s10 + $0x48] sm:$0xff] }
  0x2f   : > { %v643_v61 = vpop.eup %642  ;;  %662 = vrcp.f32 %v409_v58  ;;  %v411_v62 = vadd.f32 1.0, %v641_v26  ;;  %v478_v26 = vld [vmem:[%s890_s10 + $0x50] sm:$0xff] }
  0x30   : > { %v645_v0 = vpop.eup %644  ;;  %664 = vrcp.f32 %v410_v60  ;;  %v412_v1 = vadd.f32 1.0, %v643_v61 }
  0x31   : > { %v647_v3 = vpop.eup %646  ;;  %666 = vrcp.f32 %v411_v62  ;;  %v413_v28 = vadd.f32 1.0, %v645_v0  ;;  %v479_v62 = vld [vmem:[%s890_s10 + $0x58] sm:$0xff] }
  0x32   : > { %v649_v6 = vpop.eup %648  ;;  %668 = vrcp.f32 %v412_v1  ;;  %v414_v7 = vadd.f32 1.0, %v647_v3  ;;  %v480_v3 = vld [vmem:[%s890_s10 + $0x60] sm:$0xff] }
  0x33   : > { %v651_v8 = vpop.eup %650  ;;  %670 = vrcp.f32 %v413_v28  ;;  %v415_v9 = vadd.f32 1.0, %v649_v6 }
  0x34   : > { %v653_v13 = vpop.eup %652  ;;  %672 = vrcp.f32 %v414_v7  ;;  %v416_v15 = vadd.f32 1.0, %v651_v8 }
  0x35   : > { %v655_v17 = vpop.eup %654  ;;  %v452_v37 = vmul.f32 %v653_v13, %v805_v50  ;;  %674 = vrcp.f32 %v415_v9 }
  0x36   : > { %v657_v22 = vpop.eup %656  ;;  %v453_v23 = vmul.f32 %v655_v17, %v808_v51  ;;  %676 = vrcp.f32 %v416_v15  ;;  %v482_v17 = vld [vmem:[%s890_s10 + $0x70] sm:$0xff] }
  0x37   : > { %v659_v25 = vpop.eup %658  ;;  %v484_v27 = vadd.f32 %v468_v14, %v452_v37  ;;  %v454_v50 = vmul.f32 %v657_v22, %v811_v52  ;;  %678 = vpow2.f32 %v611_v11  ;;  %v481_v14 = vld [vmem:[%s890_s10 + $0x68] sm:$0xff] }
  0x38   : > { %v661_v31 = vpop.eup %660  ;;  %v485_v32 = vadd.f32 %v469_v18, %v453_v23  ;;  %v455_v33 = vmul.f32 %v659_v25, %v814_v53  ;;  %680 = vpow2.f32 %v612_v16  ;;  %v474_v53 = vld [vmem:[%s890_s10 + $0x30] sm:$0xff] }
  0x39   : > { %v663_v51 = vpop.eup %662  ;;  %500 = vst [vmem:[%s905_s13] sm:$0xff] %v484_v27  ;;  %v486_v35 = vadd.f32 %v470_v24, %v454_v50  ;;  %v456_v36 = vmul.f32 %v661_v31, %v817_v54  ;;  %682 = vpow2.f32 %v613_v19  ;;  %v483_v19 = vld [vmem:[%s890_s10 + $0x78] sm:$0xff] }
  0x3a   : > { %v665_v52 = vpop.eup %664  ;;  %501 = vst [vmem:[%s905_s13 + $0x8] sm:$0xff] %v485_v32  ;;  %v487_v39 = vadd.f32 %v471_v29, %v455_v33  ;;  %v457_v40 = vmul.f32 %v663_v51, %v820_v55 }
  0x3b   : > { %v667_v41 = vpop.eup %666  ;;  %502 = vst [vmem:[%s905_s13 + $0x10] sm:$0xff] %v486_v35  ;;  %v488_v42 = vadd.f32 %v472_v34, %v456_v36  ;;  %v458_v4 = vmul.f32 %v665_v52, %v823_v56 }
  0x3c   : > { %v669_v54 = vpop.eup %668  ;;  %503 = vst [vmem:[%s905_s13 + $0x18] sm:$0xff] %v487_v39  ;;  %v489_v44 = vadd.f32 %v473_v38, %v457_v40  ;;  %v459_v45 = vmul.f32 %v667_v41, %v826_v57 }
  0x3d   : > { %v671_v47 = vpop.eup %670  ;;  %504 = vst [vmem:[%s905_s13 + $0x20] sm:$0xff] %v488_v42  ;;  %v490_v55 = vadd.f32 %v474_v53, %v458_v4  ;;  %v460_v48 = vmul.f32 %v669_v54, %v844_v10 }
  0x3e   : > { %v673_v58 = vpop.eup %672  ;;  %505 = vst [vmem:[%s905_s13 + $0x28] sm:$0xff] %v489_v44  ;;  %v491_v56 = vadd.f32 %v475_v43, %v459_v45  ;;  %v461_v59 = vmul.f32 %v671_v47, %v848_v12 }
  0x3f   : > { %v675_v60 = vpop.eup %674  ;;  %506 = vst [vmem:[%s905_s13 + $0x30] sm:$0xff] %v490_v55  ;;  %v492_v57 = vadd.f32 %v476_v46, %v460_v48  ;;  %v462_v61 = vmul.f32 %v673_v58, %v858_v20 }
  0x40   : > { %v677_v0 = vpop.eup %676  ;;  %507 = vst [vmem:[%s905_s13 + $0x38] sm:$0xff] %v491_v56  ;;  %v493_v10 = vadd.f32 %v477_v49, %v461_v59  ;;  %v463_v1 = vmul.f32 %v675_v60, %v861_v21 }
  0x41   : > { %v679_v28 = vpop.eup %678  ;;  %508 = vst [vmem:[%s905_s13 + $0x40] sm:$0xff] %v492_v57  ;;  %v494_v12 = vadd.f32 %v478_v26, %v462_v61  ;;  %v464_v6 = vmul.f32 %v677_v0, %v870_v30 }
  0x42   : > { %v681_v7 = vpop.eup %680  ;;  %509 = vst [vmem:[%s905_s13 + $0x48] sm:$0xff] %v493_v10  ;;  %v495_v8 = vadd.f32 %v479_v62, %v463_v1  ;;  %v417_v20 = vadd.f32 1.0, %v679_v28 }
  0x43   : > { %v683_v9 = vpop.eup %682  ;;  %510 = vst [vmem:[%s905_s13 + $0x50] sm:$0xff] %v494_v12  ;;  %v496_v11 = vadd.f32 %v480_v3, %v464_v6  ;;  %v418_v13 = vadd.f32 1.0, %v681_v7 }
  0x44   : > { %511 = vst [vmem:[%s905_s13 + $0x58] sm:$0xff] %v495_v8  ;;  %684 = vrcp.f32 %v417_v20  ;;  %v419_v21 = vadd.f32 1.0, %v683_v9 }
  0x45   : > { %512 = vst [vmem:[%s905_s13 + $0x60] sm:$0xff] %v496_v11  ;;  %686 = vrcp.f32 %v418_v13 }
  0x46   : > { %688 = vrcp.f32 %v419_v21 }
  0x4e   : > { %v685_v30 = vpop.eup %684 }
  0x4f   : > { %v687_v15 = vpop.eup %686  ;;  %v465_v16 = vmul.f32 %v685_v30, %v881_v63 }
  0x50   : > { %v689_v37 = vpop.eup %688  ;;  %v466_v18 = vmul.f32 %v687_v15, %v884_v2 }
  0x51   : > { %v497_v22 = vadd.f32 %v481_v14, %v465_v16  ;;  %v467_v23 = vmul.f32 %v689_v37, %v893_v5 }
  0x52   : > { %v498_v24 = vadd.f32 %v482_v17, %v466_v18 }
  0x53   : > { %513 = vst [vmem:[%s905_s13 + $0x68] sm:$0xff] %v497_v22  ;;  %v499_v25 = vadd.f32 %v483_v19, %v467_v23 }
  0x54   : > { %514 = vst [vmem:[%s905_s13 + $0x70] sm:$0xff] %v498_v24 }
  0x55   : > { %515 = vst [vmem:[%s905_s13 + $0x78] sm:$0xff] %v499_v25 }
  0x56 PF: > { %s15_s18 = sadd.s32 1, %s696_s18  }
  0x57   : > { %p12_p4 = scmp.ge.s32.totalorder %s15_s18, 5  }
  0x59   :  { %14 = sbr.rel (!%p12_p4) target bundleno = 1 (0x1), region = 73 }

// kernel: alignn_conv.21
= control target key start
LH: loop header
LB: loop body
LE: loop exit
PB: predicated region body
PF: predicated region fallthrough
CT: control target
= control target key end

     0   :  { %s918_s15 = smov 0   ;;  %s1339_s0 = inlined_call_operand.vmem [shape: f32[256,128], index: 0, kind: input, shape index: {}]   ;;  %s1340_s1 = inlined_call_operand.vmem [shape: f32[128,512], index: 1, kind: input, shape index: {}]   ;;  %s1341_s2 = inlined_call_operand.vmem [shape: f32[1,512], index: 2, kind: input, shape index: {}]   ;;  %s1342_s3 = inlined_call_operand.vmem [shape: f32[256,384], index: 3, kind: output, shape index: {0}]   ;;  %s1343_s4 = inlined_call_operand.vmem [shape: f32[256,128], index: 4, kind: output, shape index: {1}]  }
   0x1 LB: > { %s797_s16 = sadd.s32 4294967295, %s890_s15   ;;  %p801_p0 = scmp.ge.s32.totalorder %s890_s15, 1  ;;  %s890_s15 = sphi %s918_s15, %s15_s15  }
   0x2   : > { %p166_p1 = scmp.lt.s32.totalorder %s890_s15, 3 }
   0x4   : > { %p167_p2 = pnand %p801_p0, %p166_p1 }
   0x5   : > { %v234_v0 = vld [vmem:[%s1340_s1 + $0x8] sm:$0xff] (!%p167_p2)  ;;  %v236_v2 = vld [vmem:[%s1340_s1 + $0x18] sm:$0xff] (!%p167_p2)  ;;  %v233_v5 = vld [vmem:[%s1340_s1] sm:$0xff] (!%p167_p2)  ;;  %v892_v7 = vmov (!%p167_p2), 0.0   ;;  %s1062_s7 = sshll.u32 (!%p167_p2), %s797_s16, 4 }
   0x6   : > { %170 = sbr.rel (%p167_p2) target bundleno = 318 (0x13e), region = 32  ;;  %v238_v1 = vld [vmem:[%s1340_s1 + $0x28] sm:$0xff] (!%p167_p2)  ;;  %v240_v4 = vld [vmem:[%s1340_s1 + $0x38] sm:$0xff] (!%p167_p2)  ;;  %v237_v6 = vld [vmem:[%s1340_s1 + $0x20] sm:$0xff] (!%p167_p2)  ;;  %383 = vmatprep.mubr.f32.mxu0 (!%p167_p2), %v892_v7  ;;  %544 = vmatprep.mubr.f32.mxu1 (!%p167_p2), %v892_v7  ;;  %p199_p3 = scmp.lt.s32.totalorder (!%p167_p2), %s1062_s7, 31 }
   0x7   : > { %v810_v3 = vpack.c.bf16 (!%p167_p2), %v238_v1, %v234_v0  ;;  %v842_v8 = vpack.c.bf16 (!%p167_p2), %v240_v4, %v236_v2  ;;  %v812_v9 = vpack.c.bf16 (!%p167_p2), %v237_v6, %v233_v5  ;;  %v235_v10 = vld [vmem:[%s1340_s1 + $0x10] sm:$0xff] (!%p167_p2)  ;;  %v242_v12 = vld [vmem:[%s1340_s1 + $0x48] sm:$0xff] (!%p167_p2)  ;;  %v244_v15 = vld [vmem:[%s1340_s1 + $0x58] sm:$0xff] (!%p167_p2) }
   0x8   : > { %v239_v11 = vld [vmem:[%s1340_s1 + $0x30] sm:$0xff] (!%p167_p2)  ;;  %v246_v14 = vld [vmem:[%s1340_s1 + $0x68] sm:$0xff] (!%p167_p2)  ;;  %v248_v16 = vld [vmem:[%s1340_s1 + $0x78] sm:$0xff] (!%p167_p2) }
   0x9   : > { %811 = vmatprep.subr.bf16.mxu0 (!%p167_p2), %v810_v3  ;;  %v844_v13 = vpack.c.bf16 (!%p167_p2), %v239_v11, %v235_v10  ;;  %843 = vmatprep.subr.bf16.mxu1 (!%p167_p2), %v842_v8  ;;  %v814_v17 = vpack.c.bf16 (!%p167_p2), %v246_v14, %v242_v12  ;;  %v846_v18 = vpack.c.bf16 (!%p167_p2), %v248_v16, %v244_v15  ;;  %v241_v19 = vld [vmem:[%s1340_s1 + $0x40] sm:$0xff] (!%p167_p2)  ;;  %v243_v21 = vld [vmem:[%s1340_s1 + $0x50] sm:$0xff] (!%p167_p2)  ;;  %v250_v24 = vld [vmem:[%s1340_s1 + $0x88] sm:$0xff] (!%p167_p2) }
   0xa   : > { %813 = vmatpush1.bf16.msra.mxu0 (!%p167_p2), %v812_v9  ;;  %v245_v20 = vld [vmem:[%s1340_s1 + $0x60] sm:$0xff] (!%p167_p2)  ;;  %v247_v23 = vld [vmem:[%s1340_s1 + $0x70] sm:$0xff] (!%p167_p2)  ;;  %v254_v25 = vld [vmem:[%s1340_s1 + $0xa8] sm:$0xff] (!%p167_p2) }
   0xb   : > { %845 = vmatpush1.bf16.msra.mxu1 (!%p167_p2), %v844_v13  ;;  %v816_v22 = vpack.c.bf16 (!%p167_p2), %v245_v20, %v241_v19  ;;  %815 = vmatprep.subr.bf16.mxu0 (!%p167_p2), %v814_v17  ;;  %v848_v26 = vpack.c.bf16 (!%p167_p2), %v247_v23, %v243_v21  ;;  %v818_v27 = vpack.c.bf16 (!%p167_p2), %v254_v25, %v250_v24  ;;  %v252_v28 = vld [vmem:[%s1340_s1 + $0x98] sm:$0xff] (!%p167_p2)  ;;  %v249_v30 = vld [vmem:[%s1340_s1 + $0x80] sm:$0xff] (!%p167_p2)  ;;  %v251_v33 = vld [vmem:[%s1340_s1 + $0x90] sm:$0xff] (!%p167_p2) }
   0xc   : > { %847 = vmatprep.subr.bf16.mxu1 (!%p167_p2), %v846_v18  ;;  %v256_v29 = vld [vmem:[%s1340_s1 + $0xb8] sm:$0xff] (!%p167_p2)  ;;  %v253_v32 = vld [vmem:[%s1340_s1 + $0xa0] sm:$0xff] (!%p167_p2)  ;;  %v255_v34 = vld [vmem:[%s1340_s1 + $0xb0] sm:$0xff] (!%p167_p2) }
   0xd   : > { %v850_v31 = vpack.c.bf16 %v256_v29, %v252_v28  ;;  %v820_v35 = vpack.c.bf16 %v253_v32, %v249_v30  ;;  %v258_v36 = vld [vmem:[%s1340_s1 + $0xc8] sm:$0xff]  ;;  %v260_v38 = vld [vmem:[%s1340_s1 + $0xd8] sm:$0xff]  ;;  %v852_v39 = vpack.c.bf16 %v255_v34, %v251_v33  ;;  %v257_v42 = vld [vmem:[%s1340_s1 + $0xc0] sm:$0xff]  ;;  %s1345_s7 = smov (!%p199_p3, %s1062_s7), 31 }
   0xe   : > { %817 = vmatpush1.bf16.msra.mxu0 %v816_v22  ;;  %v262_v37 = vld [vmem:[%s1340_s1 + $0xe8] sm:$0xff]  ;;  %v264_v41 = vld [vmem:[%s1340_s1 + $0xf8] sm:$0xff]  ;;  %v261_v43 = vld [vmem:[%s1340_s1 + $0xe0] sm:$0xff]  ;;  %s803_s25 = sshll.u32 %s1345_s7, 3  ;;  %s874_s5 = smul.u32 24, %s1345_s7 }
   0xf   : > { %849 = vmatpush1.bf16.msra.mxu1 %v848_v26  ;;  %819 = vmatprep.subr.bf16.mxu0 %v818_v27  ;;  %v822_v40 = vpack.c.bf16 %v262_v37, %v258_v36  ;;  %v854_v44 = vpack.c.bf16 %v264_v41, %v260_v38  ;;  %v259_v45 = vld [vmem:[%s1340_s1 + $0xd0] sm:$0xff]  ;;  %v266_v47 = vld [vmem:[%s1340_s1 + $0x108] sm:$0xff]  ;;  %v268_v49 = vld [vmem:[%s1340_s1 + $0x118] sm:$0xff]  ;;  %v824_v51 = vpack.c.bf16 %v261_v43, %v257_v42  ;;  %s1136_s28 = scalar_lea.vmem %s1339_s0, %s803_s25  ;;  %s1209_s12 = scalar_lea.vmem %s1343_s4, %s803_s25 }
  0x10   : > { %851 = vmatprep.subr.bf16.mxu1 %v850_v31  ;;  %v263_v46 = vld [vmem:[%s1340_s1 + $0xf0] sm:$0xff]  ;;  %v270_v48 = vld [vmem:[%s1340_s1 + $0x128] sm:$0xff]  ;;  %v272_v50 = vld [vmem:[%s1340_s1 + $0x138] sm:$0xff]  ;;  %s1199_s9 = scalar_lea.vmem %s1342_s3, %s874_s5 }
  0x11   : > { %v856_v52 = vpack.c.bf16 %v263_v46, %v259_v45  ;;  %v826_v53 = vpack.c.bf16 %v270_v48, %v266_v47  ;;  %v265_v54 = vld [vmem:[%s1340_s1 + $0x100] sm:$0xff]  ;;  %v267_v56 = vld [vmem:[%s1340_s1 + $0x110] sm:$0xff]  ;;  %v858_v57 = vpack.c.bf16 %v272_v50, %v268_v49  ;;  %v274_v59 = vld [vmem:[%s1340_s1 + $0x148] sm:$0xff]  ;;  %v299_v50 = vlaneseq }
  0x12   : > { %821 = vmatpush1.bf16.msra.mxu0 %v820_v35  ;;  %v269_v55 = vld [vmem:[%s1340_s1 + $0x120] sm:$0xff]  ;;  %v271_v58 = vld [vmem:[%s1340_s1 + $0x130] sm:$0xff]  ;;  %v278_v60 = vld [vmem:[%s1340_s1 + $0x168] sm:$0xff] }
  0x13   : > { %853 = vmatpush1.bf16.msra.mxu1 %v852_v39  ;;  %823 = vmatprep.subr.bf16.mxu0 %v822_v40  ;;  %v276_v61 = vld [vmem:[%s1340_s1 + $0x158] sm:$0xff]  ;;  %v828_v63 = vpack.c.bf16 %v269_v55, %v265_v54  ;;  %v860_v0 = vpack.c.bf16 %v271_v58, %v267_v56  ;;  %v830_v1 = vpack.c.bf16 %v278_v60, %v274_v59  ;;  %v273_v2 = vld [vmem:[%s1340_s1 + $0x140] sm:$0xff]  ;;  %v275_v4 = vld [vmem:[%s1340_s1 + $0x150] sm:$0xff] }
  0x14   : > { %855 = vmatprep.subr.bf16.mxu1 %v854_v44  ;;  %v280_v62 = vld [vmem:[%s1340_s1 + $0x178] sm:$0xff]  ;;  %v277_v3 = vld [vmem:[%s1340_s1 + $0x160] sm:$0xff]  ;;  %v279_v6 = vld [vmem:[%s1340_s1 + $0x170] sm:$0xff] }
  0x15   : > { %v862_v5 = vpack.c.bf16 %v280_v62, %v276_v61  ;;  %v282_v8 = vld [vmem:[%s1340_s1 + $0x188] sm:$0xff]  ;;  %v284_v10 = vld [vmem:[%s1340_s1 + $0x198] sm:$0xff]  ;;  %v832_v12 = vpack.c.bf16 %v277_v3, %v273_v2  ;;  %v864_v13 = vpack.c.bf16 %v279_v6, %v275_v4  ;;  %v281_v15 = vld [vmem:[%s1340_s1 + $0x180] sm:$0xff] }
  0x16   : > { %825 = vmatpush1.bf16.msra.mxu0 %v824_v51  ;;  %v286_v9 = vld [vmem:[%s1340_s1 + $0x1a8] sm:$0xff]  ;;  %v288_v11 = vld [vmem:[%s1340_s1 + $0x1b8] sm:$0xff]  ;;  %v285_v16 = vld [vmem:[%s1340_s1 + $0x1a0] sm:$0xff]  ;;  %v300_v51 = vshrl.u32 %v299_v50, 7 }
  0x17   : > { %857 = vmatpush1.bf16.msra.mxu1 %v856_v52  ;;  %827 = vmatprep.subr.bf16.mxu0 %v826_v53  ;;  %v834_v14 = vpack.c.bf16 %v286_v9, %v282_v8  ;;  %v283_v17 = vld [vmem:[%s1340_s1 + $0x190] sm:$0xff]  ;;  %v866_v18 = vpack.c.bf16 %v288_v11, %v284_v10  ;;  %v290_v20 = vld [vmem:[%s1340_s1 + $0x1c8] sm:$0xff]  ;;  %v292_v22 = vld [vmem:[%s1340_s1 + $0x1d8] sm:$0xff]  ;;  %v836_v24 = vpack.c.bf16 %v285_v16, %v281_v15 }
  0x18   : > { %859 = vmatprep.subr.bf16.mxu1 %v858_v57  ;;  %v287_v19 = vld [vmem:[%s1340_s1 + $0x1b0] sm:$0xff]  ;;  %v294_v21 = vld [vmem:[%s1340_s1 + $0x1e8] sm:$0xff]  ;;  %v296_v23 = vld [vmem:[%s1340_s1 + $0x1f8] sm:$0xff]  ;;  %v301_v52 = vsub.s32 0, %v300_v51  ;;  %v309_v54 = vsub.s32 2, %v300_v51  ;;  %v305_v55 = vsub.s32 1, %v300_v51 }
  0x19   : > { %v868_v25 = vpack.c.bf16 %v287_v19, %v283_v17  ;;  %v838_v26 = vpack.c.bf16 %v294_v21, %v290_v20  ;;  %v289_v27 = vld [vmem:[%s1340_s1 + $0x1c0] sm:$0xff]  ;;  %v870_v29 = vpack.c.bf16 %v296_v23, %v292_v22  ;;  %v291_v30 = vld [vmem:[%s1340_s1 + $0x1d0] sm:$0xff]  ;;  %v218_v35 = vld [vmem:[%s1136_s28 + $0x8] sm:$0xff]  ;;  %v313_v56 = vsub.s32 3, %v300_v51 }
  0x1a   : > { %829 = vmatpush1.bf16.msra.mxu0 %v828_v63  ;;  %v293_v28 = vld [vmem:[%s1340_s1 + $0x1e0] sm:$0xff]  ;;  %v295_v31 = vld [vmem:[%s1340_s1 + $0x1f0] sm:$0xff]  ;;  %v220_v37 = vld [vmem:[%s1136_s28 + $0x18] sm:$0xff] }
  0x1b   : > { %861 = vmatpush1.bf16.msra.mxu1 %v860_v0  ;;  %831 = vmatprep.subr.bf16.mxu0 %v830_v1  ;;  %v840_v32 = vpack.c.bf16 %v293_v28, %v289_v27  ;;  %v872_v33 = vpack.c.bf16 %v295_v31, %v291_v30  ;;  %v217_v34 = vld [vmem:[%s1136_s28] sm:$0xff]  ;;  %v219_v36 = vld [vmem:[%s1136_s28 + $0x10] sm:$0xff]  ;;  %v222_v39 = vld [vmem:[%s1136_s28 + $0x28] sm:$0xff] }
  0x1c   : > { %863 = vmatprep.subr.bf16.mxu1 %v862_v5  ;;  %v221_v38 = vld [vmem:[%s1136_s28 + $0x20] sm:$0xff]  ;;  %v223_v40 = vld [vmem:[%s1136_s28 + $0x30] sm:$0xff]  ;;  %v224_v41 = vld [vmem:[%s1136_s28 + $0x38] sm:$0xff] }
  0x1d   : > { %v225_v42 = vld [vmem:[%s1136_s28 + $0x40] sm:$0xff]  ;;  %v226_v43 = vld [vmem:[%s1136_s28 + $0x48] sm:$0xff]  ;;  %v227_v44 = vld [vmem:[%s1136_s28 + $0x50] sm:$0xff] }
  0x1e   : > { %833 = vmatpush1.bf16.msra.mxu0 %v832_v12  ;;  %v228_v45 = vld [vmem:[%s1136_s28 + $0x58] sm:$0xff]  ;;  %v229_v46 = vld [vmem:[%s1136_s28 + $0x60] sm:$0xff]  ;;  %v230_v47 = vld [vmem:[%s1136_s28 + $0x68] sm:$0xff] }
  0x1f   : > { %865 = vmatpush1.bf16.msra.mxu1 %v864_v13  ;;  %835 = vmatprep.subr.bf16.mxu0 %v834_v14  ;;  %v231_v48 = vld [vmem:[%s1136_s28 + $0x70] sm:$0xff]  ;;  %v232_v49 = vld [vmem:[%s1136_s28 + $0x78] sm:$0xff]  ;;  %v297_v53 = vld [vmem:[%s1341_s2] sm:$0xf] }
  0x20   : > { %867 = vmatprep.subr.bf16.mxu1 %v866_v18  ;;  %v1188_v57 = vrot.slane %v297_v53, %v301_v52  ;;  %v1190_v58 = vrot.slane %v297_v53, %v309_v54  ;;  %v1192_v59 = vrot.slane %v297_v53, %v305_v55 }
  0x22   : > { %837 = vmatpush1.bf16.msra.mxu0 %v836_v24 }
  0x23   : > { %869 = vmatpush1.bf16.msra.mxu1 %v868_v25  ;;  %839 = vmatprep.subr.bf16.mxu0 %v838_v26 }
  0x24   : > { %871 = vmatprep.subr.bf16.mxu1 %v870_v29 }
  0x26   : > { %841 = vmatpush1.bf16.msra.mxu0 %v840_v32 }
  0x27   : > { %873 = vmatpush1.bf16.msra.mxu1 %v872_v33 }
  0x29   : > { %384 = vmatmul.mubr.f32.vlgmr.msra.gmra.mrb[0].mxu0 %v217_v34 }
  0x2a   : > { %545 = vmatmul.mubr.f32.vlgmr.msra.gmra.mrb[0].mxu1 %v217_v34  ;;  %389 = vmatprep.mubr.f32.mxu0 %v892_v7 }
  0x2b   : > { %550 = vmatprep.mubr.f32.mxu1 %v892_v7 }
  0x2d   : > { %390 = vmatmul.mubr.f32.gmra.mrb[2].mxu0 %v218_v35 }
  0x2e   : > { %551 = vmatmul.mubr.f32.gmra.mrb[2].mxu1 %v218_v35  ;;  %395 = vmatprep.mubr.f32.mxu0 %v892_v7 }
  0x2f   : > { %556 = vmatprep.mubr.f32.mxu1 %v892_v7 }
  0x31   : > { %396 = vmatmul.mubr.f32.gmra.mrb[4].mxu0 %v219_v36 }
  0x32   : > { %557 = vmatmul.mubr.f32.gmra.mrb[4].mxu1 %v219_v36  ;;  %401 = vmatprep.mubr.f32.mxu0 %v892_v7 }
  0x33   : > { %562 = vmatprep.mubr.f32.mxu1 %v892_v7 }
  0x35   : > { %402 = vmatmul.mubr.f32.gmra.mrb[6].mxu0 %v220_v37 }
  0x36   : > { %563 = vmatmul.mubr.f32.gmra.mrb[6].mxu1 %v220_v37  ;;  %407 = vmatprep.mubr.f32.mxu0 %v892_v7 }
  0x37   : > { %568 = vmatprep.mubr.f32.mxu1 %v892_v7 }
  0x39   : > { %408 = vmatmul.mubr.f32.gmra.mrb[8].mxu0 %v221_v38 }
  0x3a   : > { %569 = vmatmul.mubr.f32.gmra.mrb[8].mxu1 %v221_v38  ;;  %413 = vmatprep.mubr.f32.mxu0 %v892_v7 }
  0x3b   : > { %574 = vmatprep.mubr.f32.mxu1 %v892_v7 }
  0x3d   : > { %414 = vmatmul.mubr.f32.gmra.mrb[10].mxu0 %v222_v39 }
  0x3e   : > { %575 = vmatmul.mubr.f32.gmra.mrb[10].mxu1 %v222_v39  ;;  %419 = vmatprep.mubr.f32.mxu0 %v892_v7 }
  0x3f   : > { %580 = vmatprep.mubr.f32.mxu1 %v892_v7 }
  0x41   : > { %420 = vmatmul.mubr.f32.gmra.mrb[12].mxu0 %v223_v40 }
  0x42   : > { %581 = vmatmul.mubr.f32.gmra.mrb[12].mxu1 %v223_v40  ;;  %425 = vmatprep.mubr.f32.mxu0 %v892_v7 }
  0x43   : > { %586 = vmatprep.mubr.f32.mxu1 %v892_v7 }
  0x45   : > { %426 = vmatmul.mubr.f32.gmra.mrb[14].mxu0 %v224_v41 }
  0x46   : > { %587 = vmatmul.mubr.f32.gmra.mrb[14].mxu1 %v224_v41  ;;  %431 = vmatprep.mubr.f32.mxu0 %v892_v7 }
  0x47   : > { %592 = vmatprep.mubr.f32.mxu1 %v892_v7 }
  0x49   : > { %432 = vmatmul.mubr.f32.gmra.mrb[16].mxu0 %v225_v42 }
  0x4a   : > { %593 = vmatmul.mubr.f32.gmra.mrb[16].mxu1 %v225_v42  ;;  %437 = vmatprep.mubr.f32.mxu0 %v892_v7 }
  0x4b   : > { %598 = vmatprep.mubr.f32.mxu1 %v892_v7 }
  0x4d   : > { %438 = vmatmul.mubr.f32.gmra.mrb[18].mxu0 %v226_v43 }
  0x4e   : > { %599 = vmatmul.mubr.f32.gmra.mrb[18].mxu1 %v226_v43  ;;  %443 = vmatprep.mubr.f32.mxu0 %v892_v7 }
  0x4f   : > { %604 = vmatprep.mubr.f32.mxu1 %v892_v7 }
  0x51   : > { %444 = vmatmul.mubr.f32.gmra.mrb[20].mxu0 %v227_v44 }
  0x52   : > { %605 = vmatmul.mubr.f32.gmra.mrb[20].mxu1 %v227_v44  ;;  %449 = vmatprep.mubr.f32.mxu0 %v892_v7 }
  0x53   : > { %610 = vmatprep.mubr.f32.mxu1 %v892_v7 }
  0x55   : > { %450 = vmatmul.mubr.f32.gmra.mrb[22].mxu0 %v228_v45 }
  0x56   : > { %611 = vmatmul.mubr.f32.gmra.mrb[22].mxu1 %v228_v45  ;;  %455 = vmatprep.mubr.f32.mxu0 %v892_v7 }
  0x57   : > { %616 = vmatprep.mubr.f32.mxu1 %v892_v7 }
  0x59   : > { %456 = vmatmul.mubr.f32.gmra.mrb[24].mxu0 %v229_v46 }
  0x5a   : > { %617 = vmatmul.mubr.f32.gmra.mrb[24].mxu1 %v229_v46  ;;  %461 = vmatprep.mubr.f32.mxu0 %v892_v7 }
  0x5b   : > { %622 = vmatprep.mubr.f32.mxu1 %v892_v7 }
  0x5d   : > { %462 = vmatmul.mubr.f32.gmra.mrb[26].mxu0 %v230_v47 }
  0x5e   : > { %623 = vmatmul.mubr.f32.gmra.mrb[26].mxu1 %v230_v47  ;;  %467 = vmatprep.mubr.f32.mxu0 %v892_v7 }
  0x5f   : > { %628 = vmatprep.mubr.f32.mxu1 %v892_v7 }
  0x61   : > { %468 = vmatmul.mubr.f32.gmra.mrb[28].mxu0 %v231_v48 }
  0x62   : > { %629 = vmatmul.mubr.f32.gmra.mrb[28].mxu1 %v231_v48  ;;  %473 = vmatprep.mubr.f32.mxu0 %v892_v7 }
  0x63   : > { %634 = vmatprep.mubr.f32.mxu1 %v892_v7  ;;  %v1194_v7 = vrot.slane %v297_v53, %v313_v56 }
  0x65   : > { %474 = vmatmul.mubr.f32.gmra.mrb[30].mxu0 %v232_v49 }
  0x66   : > { %635 = vmatmul.mubr.f32.gmra.mrb[30].mxu1 %v232_v49 }
  0xfc   : > { %v385_v60 = vpop.f32.mrb[0].mxu0 }
  0xfd   : > { %v386_v61 = vadd.f32 %v385_v60, %v1188_v57  ;;  %v546_v62 = vpop.f32.mrb[0].mxu1  ;;  %v387_v63 = vpop.f32.mrb[1].mxu0 }
  0xfe   : > { %v547_v0 = vadd.f32 %v546_v62, %v1190_v58  ;;  %v388_v1 = vadd.f32 %v387_v63, %v1192_v59  ;;  %v548_v2 = vpop.f32.mrb[1].mxu1 }
  0xff   : > { %641 = vst [vmem:[%s1199_s9] sm:$0xff] %v386_v61  ;;  %v549_v3 = vadd.f32 %v548_v2, %v1194_v7 }
 0x100   : > { %643 = vst [vmem:[%s1199_s9 + $0x10] sm:$0xff] %v547_v0  ;;  %642 = vst [vmem:[%s1199_s9 + $0x8] sm:$0xff] %v388_v1  ;;  %v391_v4 = vpop.f32.mrb[2].mxu0 }
 0x101   : > { %689 = vst [vmem:[%s1209_s12] sm:$0xff] %v549_v3  ;;  %v392_v5 = vadd.f32 %v391_v4, %v1188_v57  ;;  %v552_v6 = vpop.f32.mrb[2].mxu1  ;;  %v393_v8 = vpop.f32.mrb[3].mxu0 }
 0x102   : > { %v553_v9 = vadd.f32 %v552_v6, %v1190_v58  ;;  %v394_v10 = vadd.f32 %v393_v8, %v1192_v59  ;;  %v554_v11 = vpop.f32.mrb[3].mxu1 }
 0x103   : > { %644 = vst [vmem:[%s1199_s9 + $0x18] sm:$0xff] %v392_v5  ;;  %v555_v12 = vadd.f32 %v554_v11, %v1194_v7 }
 0x104   : > { %646 = vst [vmem:[%s1199_s9 + $0x28] sm:$0xff] %v553_v9  ;;  %645 = vst [vmem:[%s1199_s9 + $0x20] sm:$0xff] %v394_v10  ;;  %v397_v13 = vpop.f32.mrb[4].mxu0 }
 0x105   : > { %690 = vst [vmem:[%s1209_s12 + $0x8] sm:$0xff] %v555_v12  ;;  %v398_v14 = vadd.f32 %v397_v13, %v1188_v57  ;;  %v558_v15 = vpop.f32.mrb[4].mxu1  ;;  %v399_v16 = vpop.f32.mrb[5].mxu0 }
 0x106   : > { %v559_v17 = vadd.f32 %v558_v15, %v1190_v58  ;;  %v400_v18 = vadd.f32 %v399_v16, %v1192_v59  ;;  %v560_v19 = vpop.f32.mrb[5].mxu1 }
 0x107   : > { %647 = vst [vmem:[%s1199_s9 + $0x30] sm:$0xff] %v398_v14  ;;  %v561_v20 = vadd.f32 %v560_v19, %v1194_v7 }
 0x108   : > { %649 = vst [vmem:[%s1199_s9 + $0x40] sm:$0xff] %v559_v17  ;;  %648 = vst [vmem:[%s1199_s9 + $0x38] sm:$0xff] %v400_v18  ;;  %v403_v21 = vpop.f32.mrb[6].mxu0 }
 0x109   : > { %691 = vst [vmem:[%s1209_s12 + $0x10] sm:$0xff] %v561_v20  ;;  %v404_v22 = vadd.f32 %v403_v21, %v1188_v57  ;;  %v564_v23 = vpop.f32.mrb[6].mxu1  ;;  %v405_v24 = vpop.f32.mrb[7].mxu0 }
 0x10a   : > { %v565_v25 = vadd.f32 %v564_v23, %v1190_v58  ;;  %v406_v26 = vadd.f32 %v405_v24, %v1192_v59  ;;  %v566_v27 = vpop.f32.mrb[7].mxu1 }
 0x10b   : > { %650 = vst [vmem:[%s1199_s9 + $0x48] sm:$0xff] %v404_v22  ;;  %v567_v28 = vadd.f32 %v566_v27, %v1194_v7 }
 0x10c   : > { %652 = vst [vmem:[%s1199_s9 + $0x58] sm:$0xff] %v565_v25  ;;  %651 = vst [vmem:[%s1199_s9 + $0x50] sm:$0xff] %v406_v26  ;;  %v409_v29 = vpop.f32.mrb[8].mxu0 }
 0x10d   : > { %692 = vst [vmem:[%s1209_s12 + $0x18] sm:$0xff] %v567_v28  ;;  %v410_v30 = vadd.f32 %v409_v29, %v1188_v57  ;;  %v570_v31 = vpop.f32.mrb[8].mxu1  ;;  %v411_v32 = vpop.f32.mrb[9].mxu0 }
 0x10e   : > { %v571_v33 = vadd.f32 %v570_v31, %v1190_v58  ;;  %v412_v34 = vadd.f32 %v411_v32, %v1192_v59  ;;  %v572_v35 = vpop.f32.mrb[9].mxu1 }
 0x10f   : > { %653 = vst [vmem:[%s1199_s9 + $0x60] sm:$0xff] %v410_v30  ;;  %v573_v36 = vadd.f32 %v572_v35, %v1194_v7 }
 0x110   : > { %655 = vst [vmem:[%s1199_s9 + $0x70] sm:$0xff] %v571_v33  ;;  %654 = vst [vmem:[%s1199_s9 + $0x68] sm:$0xff] %v412_v34  ;;  %v415_v37 = vpop.f32.mrb[10].mxu0 }
 0x111   : > { %693 = vst [vmem:[%s1209_s12 + $0x20] sm:$0xff] %v573_v36  ;;  %v416_v38 = vadd.f32 %v415_v37, %v1188_v57  ;;  %v576_v39 = vpop.f32.mrb[10].mxu1  ;;  %v417_v40 = vpop.f32.mrb[11].mxu0 }
 0x112   : > { %v577_v41 = vadd.f32 %v576_v39, %v1190_v58  ;;  %v418_v42 = vadd.f32 %v417_v40, %v1192_v59  ;;  %v578_v43 = vpop.f32.mrb[11].mxu1 }
 0x113   : > { %656 = vst [vmem:[%s1199_s9 + $0x78] sm:$0xff] %v416_v38  ;;  %v579_v44 = vadd.f32 %v578_v43, %v1194_v7 }
 0x114   : > { %658 = vst [vmem:[%s1199_s9 + $0x88] sm:$0xff] %v577_v41  ;;  %657 = vst [vmem:[%s1199_s9 + $0x80] sm:$0xff] %v418_v42  ;;  %v421_v45 = vpop.f32.mrb[12].mxu0 }
 0x115   : > { %694 = vst [vmem:[%s1209_s12 + $0x28] sm:$0xff] %v579_v44  ;;  %v422_v46 = vadd.f32 %v421_v45, %v1188_v57  ;;  %v582_v47 = vpop.f32.mrb[12].mxu1  ;;  %v423_v48 = vpop.f32.mrb[13].mxu0 }
 0x116   : > { %v583_v49 = vadd.f32 %v582_v47, %v1190_v58  ;;  %v424_v50 = vadd.f32 %v423_v48, %v1192_v59  ;;  %v584_v51 = vpop.f32.mrb[13].mxu1 }
 0x117   : > { %659 = vst [vmem:[%s1199_s9 + $0x90] sm:$0xff] %v422_v46  ;;  %v585_v52 = vadd.f32 %v584_v51, %v1194_v7 }
 0x118   : > { %661 = vst [vmem:[%s1199_s9 + $0xa0] sm:$0xff] %v583_v49  ;;  %660 = vst [vmem:[%s1199_s9 + $0x98] sm:$0xff] %v424_v50  ;;  %v427_v53 = vpop.f32.mrb[14].mxu0 }
 0x119   : > { %695 = vst [vmem:[%s1209_s12 + $0x30] sm:$0xff] %v585_v52  ;;  %v428_v54 = vadd.f32 %v427_v53, %v1188_v57  ;;  %v588_v55 = vpop.f32.mrb[14].mxu1  ;;  %v429_v56 = vpop.f32.mrb[15].mxu0 }
 0x11a   : > { %v589_v60 = vadd.f32 %v588_v55, %v1190_v58  ;;  %v430_v61 = vadd.f32 %v429_v56, %v1192_v59  ;;  %v590_v62 = vpop.f32.mrb[15].mxu1 }
 0x11b   : > { %662 = vst [vmem:[%s1199_s9 + $0xa8] sm:$0xff] %v428_v54  ;;  %v591_v63 = vadd.f32 %v590_v62, %v1194_v7 }
 0x11c   : > { %664 = vst [vmem:[%s1199_s9 + $0xb8] sm:$0xff] %v589_v60  ;;  %663 = vst [vmem:[%s1199_s9 + $0xb0] sm:$0xff] %v430_v61  ;;  %v433_v0 = vpop.f32.mrb[16].mxu0 }
 0x11d   : > { %696 = vst [vmem:[%s1209_s12 + $0x38] sm:$0xff] %v591_v63  ;;  %v434_v1 = vadd.f32 %v433_v0, %v1188_v57  ;;  %v594_v2 = vpop.f32.mrb[16].mxu1  ;;  %v435_v3 = vpop.f32.mrb[17].mxu0 }
 0x11e   : > { %v595_v4 = vadd.f32 %v594_v2, %v1190_v58  ;;  %v436_v5 = vadd.f32 %v435_v3, %v1192_v59  ;;  %v596_v6 = vpop.f32.mrb[17].mxu1 }
 0x11f   : > { %665 = vst [vmem:[%s1199_s9 + $0xc0] sm:$0xff] %v434_v1  ;;  %v597_v8 = vadd.f32 %v596_v6, %v1194_v7 }
 0x120   : > { %667 = vst [vmem:[%s1199_s9 + $0xd0] sm:$0xff] %v595_v4  ;;  %666 = vst [vmem:[%s1199_s9 + $0xc8] sm:$0xff] %v436_v5  ;;  %v439_v9 = vpop.f32.mrb[18].mxu0 }
 0x121   : > { %697 = vst [vmem:[%s1209_s12 + $0x40] sm:$0xff] %v597_v8  ;;  %v440_v10 = vadd.f32 %v439_v9, %v1188_v57  ;;  %v600_v11 = vpop.f32.mrb[18].mxu1  ;;  %v441_v12 = vpop.f32.mrb[19].mxu0 }
 0x122   : > { %v601_v13 = vadd.f32 %v600_v11, %v1190_v58  ;;  %v442_v14 = vadd.f32 %v441_v12, %v1192_v59  ;;  %v602_v15 = vpop.f32.mrb[19].mxu1 }
 0x123   : > { %668 = vst [vmem:[%s1199_s9 + $0xd8] sm:$0xff] %v440_v10  ;;  %v603_v16 = vadd.f32 %v602_v15, %v1194_v7 }
 0x124   : > { %670 = vst [vmem:[%s1199_s9 + $0xe8] sm:$0xff] %v601_v13  ;;  %669 = vst [vmem:[%s1199_s9 + $0xe0] sm:$0xff] %v442_v14  ;;  %v445_v17 = vpop.f32.mrb[20].mxu0 }
 0x125   : > { %698 = vst [vmem:[%s1209_s12 + $0x48] sm:$0xff] %v603_v16  ;;  %v446_v18 = vadd.f32 %v445_v17, %v1188_v57  ;;  %v606_v19 = vpop.f32.mrb[20].mxu1  ;;  %v447_v20 = vpop.f32.mrb[21].mxu0 }
 0x126   : > { %v607_v21 = vadd.f32 %v606_v19, %v1190_v58  ;;  %v448_v22 = vadd.f32 %v447_v20, %v1192_v59  ;;  %v608_v23 = vpop.f32.mrb[21].mxu1 }
 0x127   : > { %671 = vst [vmem:[%s1199_s9 + $0xf0] sm:$0xff] %v446_v18  ;;  %v609_v24 = vadd.f32 %v608_v23, %v1194_v7 }
 0x128   : > { %673 = vst [vmem:[%s1199_s9 + $0x100] sm:$0xff] %v607_v21  ;;  %672 = vst [vmem:[%s1199_s9 + $0xf8] sm:$0xff] %v448_v22  ;;  %v451_v25 = vpop.f32.mrb[22].mxu0 }
 0x129   : > { %699 = vst [vmem:[%s1209_s12 + $0x50] sm:$0xff] %v609_v24  ;;  %v452_v26 = vadd.f32 %v451_v25, %v1188_v57  ;;  %v612_v27 = vpop.f32.mrb[22].mxu1  ;;  %v453_v28 = vpop.f32.mrb[23].mxu0 }
 0x12a   : > { %v613_v29 = vadd.f32 %v612_v27, %v1190_v58  ;;  %v454_v30 = vadd.f32 %v453_v28, %v1192_v59  ;;  %v614_v31 = vpop.f32.mrb[23].mxu1 }
 0x12b   : > { %674 = vst [vmem:[%s1199_s9 + $0x108] sm:$0xff] %v452_v26  ;;  %v615_v32 = vadd.f32 %v614_v31, %v1194_v7 }
 0x12c   : > { %676 = vst [vmem:[%s1199_s9 + $0x118] sm:$0xff] %v613_v29  ;;  %675 = vst [vmem:[%s1199_s9 + $0x110] sm:$0xff] %v454_v30  ;;  %v457_v33 = vpop.f32.mrb[24].mxu0 }
 0x12d   : > { %700 = vst [vmem:[%s1209_s12 + $0x58] sm:$0xff] %v615_v32  ;;  %v458_v34 = vadd.f32 %v457_v33, %v1188_v57  ;;  %v618_v35 = vpop.f32.mrb[24].mxu1  ;;  %v459_v36 = vpop.f32.mrb[25].mxu0 }
 0x12e   : > { %v619_v37 = vadd.f32 %v618_v35, %v1190_v58  ;;  %v460_v38 = vadd.f32 %v459_v36, %v1192_v59  ;;  %v620_v39 = vpop.f32.mrb[25].mxu1 }
 0x12f   : > { %677 = vst [vmem:[%s1199_s9 + $0x120] sm:$0xff] %v458_v34  ;;  %v621_v40 = vadd.f32 %v620_v39, %v1194_v7 }
 0x130   : > { %679 = vst [vmem:[%s1199_s9 + $0x130] sm:$0xff] %v619_v37  ;;  %678 = vst [vmem:[%s1199_s9 + $0x128] sm:$0xff] %v460_v38  ;;  %v463_v41 = vpop.f32.mrb[26].mxu0 }
 0x131   : > { %701 = vst [vmem:[%s1209_s12 + $0x60] sm:$0xff] %v621_v40  ;;  %v464_v42 = vadd.f32 %v463_v41, %v1188_v57  ;;  %v624_v43 = vpop.f32.mrb[26].mxu1  ;;  %v465_v44 = vpop.f32.mrb[27].mxu0 }
 0x132   : > { %v625_v45 = vadd.f32 %v624_v43, %v1190_v58  ;;  %v466_v46 = vadd.f32 %v465_v44, %v1192_v59  ;;  %v626_v47 = vpop.f32.mrb[27].mxu1 }
 0x133   : > { %680 = vst [vmem:[%s1199_s9 + $0x138] sm:$0xff] %v464_v42  ;;  %v627_v48 = vadd.f32 %v626_v47, %v1194_v7 }
 0x134   : > { %682 = vst [vmem:[%s1199_s9 + $0x148] sm:$0xff] %v625_v45  ;;  %681 = vst [vmem:[%s1199_s9 + $0x140] sm:$0xff] %v466_v46  ;;  %v469_v49 = vpop.f32.mrb[28].mxu0 }
 0x135   : > { %702 = vst [vmem:[%s1209_s12 + $0x68] sm:$0xff] %v627_v48  ;;  %v470_v50 = vadd.f32 %v469_v49, %v1188_v57  ;;  %v630_v51 = vpop.f32.mrb[28].mxu1  ;;  %v471_v52 = vpop.f32.mrb[29].mxu0 }
 0x136   : > { %v631_v53 = vadd.f32 %v630_v51, %v1190_v58  ;;  %v472_v54 = vadd.f32 %v471_v52, %v1192_v59  ;;  %v632_v55 = vpop.f32.mrb[29].mxu1 }
 0x137   : > { %683 = vst [vmem:[%s1199_s9 + $0x150] sm:$0xff] %v470_v50  ;;  %v633_v56 = vadd.f32 %v632_v55, %v1194_v7 }
 0x138   : > { %685 = vst [vmem:[%s1199_s9 + $0x160] sm:$0xff] %v631_v53  ;;  %684 = vst [vmem:[%s1199_s9 + $0x158] sm:$0xff] %v472_v54  ;;  %v475_v60 = vpop.f32.mrb[30].mxu0 }
 0x139   : > { %703 = vst [vmem:[%s1209_s12 + $0x70] sm:$0xff] %v633_v56  ;;  %v476_v61 = vadd.f32 %v475_v60, %v1188_v57  ;;  %v636_v62 = vpop.f32.mrb[30].mxu1  ;;  %v477_v63 = vpop.f32.mrb[31].mxu0 }
 0x13a   : > { %v637_v0 = vadd.f32 %v636_v62, %v1190_v58  ;;  %v478_v1 = vadd.f32 %v477_v63, %v1192_v59  ;;  %v638_v2 = vpop.f32.mrb[31].mxu1 }
 0x13b   : > { %686 = vst [vmem:[%s1199_s9 + $0x168] sm:$0xff] %v476_v61  ;;  %v639_v3 = vadd.f32 %v638_v2, %v1194_v7 }
 0x13c   : > { %688 = vst [vmem:[%s1199_s9 + $0x178] sm:$0xff] %v637_v0  ;;  %687 = vst [vmem:[%s1199_s9 + $0x170] sm:$0xff] %v478_v1 }
 0x13d   : > { %704 = vst [vmem:[%s1209_s12 + $0x78] sm:$0xff] %v639_v3 }
 0x13e PF: > { %s15_s15 = sadd.s32 1, %s890_s15  }
 0x13f   : > { %p12_p4 = scmp.ge.s32.totalorder %s15_s15, 4  }
 0x141   :  { %14 = sbr.rel (!%p12_p4) target bundleno = 1 (0x1), region = 74 }

// kernel: alignn_conv.24
= control target key start
LH: loop header
LB: loop body
LE: loop exit
PB: predicated region body
PF: predicated region fallthrough
CT: control target
= control target key end

     0   :  { %s335_s6 = smov 0   ;;  %s426_s0 = inlined_call_operand.vmem [shape: f32[256,128], index: 0, kind: input, shape index: {}]   ;;  %s427_s1 = inlined_call_operand.vmem [shape: f32[2,128], index: 1, kind: output, shape index: {}]  }
   0x1 LB: > { %s341_s7 = sadd.s32 4294967295, %s322_s6   ;;  %p299_p0 = scmp.ge.s32.totalorder %s322_s6, 1  ;;  %s322_s6 = sphi %s335_s6, %s11_s6  }
   0x2   : > { %p83_p1 = scmp.lt.s32.totalorder %s322_s6, 3 }
   0x4   : > { %p84_p2 = pnand %p299_p0, %p83_p1 }
   0x5   : > { %s300_s8 = sshll.u32 (!%p84_p2), %s341_s7, 4  ;;  %v120_v0 = vlaneseq (!%p84_p2)  ;;  %s302_s9 = sshll.u32 (!%p84_p2), %s341_s7, 7 }
   0x6   : > { %87 = sbr.rel (%p84_p2) target bundleno = 84 (0x54), region = 24  ;;  %p99_p3 = scmp.lt.s32.totalorder (!%p84_p2), %s300_s8, 31  ;;  %v350_v3 = vstv (!%p84_p2), %s302_s9 }
   0x7   : > { %v346_v1 = vshrl.u32 (!%p84_p2), %v120_v0, 7  ;;  %p303_p4 = scmp.ne.s32.totalorder (!%p84_p2), %s341_s7, 0 }
   0x9   : > { %v122_v2 = vadd.s32 (!%p84_p2), 8, %v346_v1  ;;  %v123_v4 = vadd.s32 (!%p84_p2), 16, %v346_v1  ;;  %v124_v5 = vadd.s32 (!%p84_p2), 24, %v346_v1  ;;  %v139_v6 = vadd.s32 (!%p84_p2), %v350_v3, %v346_v1 }
   0xa   : > { %v125_v8 = vadd.s32 (!%p84_p2), 32, %v346_v1  ;;  %v126_v12 = vadd.s32 (!%p84_p2), 40, %v346_v1  ;;  %v127_v15 = vadd.s32 (!%p84_p2), 48, %v346_v1  ;;  %v128_v20 = vadd.s32 (!%p84_p2), 56, %v346_v1 }
   0xb   : > { %v140_v7 = vadd.s32 (!%p84_p2), %v350_v3, %v122_v2  ;;  %v141_v9 = vadd.s32 (!%p84_p2), %v350_v3, %v123_v4  ;;  %v142_v13 = vadd.s32 (!%p84_p2), %v350_v3, %v124_v5  ;;  %vm155_vm0 = vcmp.lt.s32.totalorder (!%p84_p2), %v139_v6, 136 }
   0xc   : > { %v143_v16 = vadd.s32 (!%p84_p2), %v350_v3, %v125_v8  ;;  %v144_v21 = vadd.s32 (!%p84_p2), %v350_v3, %v126_v12  ;;  %v129_v22 = vadd.s32 (!%p84_p2), 64, %v346_v1  ;;  %v145_v26 = vadd.s32 (!%p84_p2), %v350_v3, %v127_v15 }
   0xd   : > { %s429_s8 = smov (!%p99_p3, %s300_s8), 31  ;;  %vm156_vm1 = vcmp.lt.s32.totalorder %v140_v7, 136  ;;  %vm157_vm2 = vcmp.lt.s32.totalorder %v141_v9, 136  ;;  %vm158_vm3 = vcmp.lt.s32.totalorder %v142_v13, 136  ;;  %v130_v32 = vadd.s32 72, %v346_v1 }
   0xe   : > { %s301_s10 = sshll.u32 %s429_s8, 3  ;;  %vm159_vm4 = vcmp.lt.s32.totalorder %v143_v16, 136  ;;  %v146_v33 = vadd.s32 %v350_v3, %v128_v20  ;;  %vm160_vm5 = vcmp.lt.s32.totalorder %v144_v21, 136  ;;  %v131_v35 = vadd.s32 80, %v346_v1 }
   0xf   : > { %s360_s13 = scalar_lea.vmem %s426_s0, %s301_s10  ;;  %v147_v39 = vadd.s32 %v350_v3, %v129_v22  ;;  %vm161_vm6 = vcmp.lt.s32.totalorder %v145_v26, 136  ;;  %v132_v42 = vadd.s32 88, %v346_v1  ;;  %v148_v46 = vadd.s32 %v350_v3, %v130_v32 }
  0x10   : > { %v104_v10 = vld [vmem:[%s360_s13] sm:$0xff]  ;;  %v105_v11 = vld [vmem:[%s360_s13 + $0x8] sm:$0xff]  ;;  %v106_v14 = vld [vmem:[%s360_s13 + $0x10] sm:$0xff]  ;;  %vm162_vm7 = vcmp.lt.s32.totalorder %v146_v33, 136  ;;  %v133_v49 = vadd.s32 96, %v346_v1  ;;  %v149_v53 = vadd.s32 %v350_v3, %v131_v35  ;;  %v134_v56 = vadd.s32 104, %v346_v1 }
  0x11   : > { %v171_v17 = vsel %vm155_vm0, %v104_v10, 0.0  ;;  %v172_v18 = vsel %vm156_vm1, %v105_v11, 0.0  ;;  %v107_v19 = vld [vmem:[%s360_s13 + $0x18] sm:$0xff]  ;;  %v173_v23 = vsel %vm157_vm2, %v106_v14, 0.0  ;;  %v108_v25 = vld [vmem:[%s360_s13 + $0x20] sm:$0xff]  ;;  %v109_v31 = vld [vmem:[%s360_s13 + $0x28] sm:$0xff]  ;;  %v150_v60 = vadd.s32 %v350_v3, %v132_v42 }
  0x12   : > { %v187_v24 = vadd.f32 %v172_v18, %v171_v17  ;;  %v208_v27 = vmul.f32 %v171_v17, %v171_v17  ;;  %v209_v28 = vmul.f32 %v172_v18, %v172_v18  ;;  %v174_v29 = vsel %vm158_vm3, %v107_v19, 0.0  ;;  %v110_v38 = vld [vmem:[%s360_s13 + $0x30] sm:$0xff]  ;;  %v111_v45 = vld [vmem:[%s360_s13 + $0x38] sm:$0xff]  ;;  %v112_v52 = vld [vmem:[%s360_s13 + $0x40] sm:$0xff] }
  0x13   : > { %v210_v34 = vmul.f32 %v173_v23, %v173_v23  ;;  %v175_v36 = vsel %vm159_vm4, %v108_v25, 0.0  ;;  %v211_v40 = vmul.f32 %v174_v29, %v174_v29  ;;  %v176_v43 = vsel %vm160_vm5, %v109_v31, 0.0  ;;  %v113_v59 = vld [vmem:[%s360_s13 + $0x48] sm:$0xff]  ;;  %v114_v4 = vld [vmem:[%s360_s13 + $0x50] sm:$0xff]  ;;  %v115_v11 = vld [vmem:[%s360_s13 + $0x58] sm:$0xff] }
  0x14   : > { %v188_v30 = vadd.f32 %v187_v24, %v173_v23  ;;  %v224_v41 = vadd.f32 %v209_v28, %v208_v27  ;;  %v212_v47 = vmul.f32 %v175_v36, %v175_v36  ;;  %v177_v50 = vsel %vm161_vm6, %v110_v38, 0.0  ;;  %v116_v17 = vld [vmem:[%s360_s13 + $0x60] sm:$0xff]  ;;  %v117_v22 = vld [vmem:[%s360_s13 + $0x68] sm:$0xff]  ;;  %v118_v28 = vld [vmem:[%s360_s13 + $0x70] sm:$0xff] }
  0x15   : > { %vm163_vm8 = vcmp.lt.s32.totalorder %v147_v39, 136  ;;  %v213_v54 = vmul.f32 %v176_v43, %v176_v43  ;;  %v178_v57 = vsel %vm162_vm7, %v111_v45, 0.0  ;;  %vm164_vm9 = vcmp.lt.s32.totalorder %v148_v46, 136  ;;  %v119_v33 = vld [vmem:[%s360_s13 + $0x78] sm:$0xff] }
  0x16   : > { %v189_v37 = vadd.f32 %v188_v30, %v174_v29  ;;  %v225_v48 = vadd.f32 %v224_v41, %v210_v34  ;;  %v214_v61 = vmul.f32 %v177_v50, %v177_v50  ;;  %v135_v63 = vadd.s32 112, %v346_v1 }
  0x17   : > { %v179_v0 = vsel %vm163_vm8, %v112_v52, 0.0  ;;  %v151_v5 = vadd.s32 %v350_v3, %v133_v49  ;;  %vm165_vm10 = vcmp.lt.s32.totalorder %v149_v53, 136  ;;  %v215_v6 = vmul.f32 %v178_v57, %v178_v57 }
  0x18   : > { %v190_v44 = vadd.f32 %v189_v37, %v175_v36  ;;  %v226_v55 = vadd.f32 %v225_v48, %v211_v40  ;;  %v136_v8 = vadd.s32 120, %v346_v1  ;;  %v180_v9 = vsel %vm164_vm9, %v113_v59, 0.0 }
  0x19   : > { %v152_v12 = vadd.s32 %v350_v3, %v134_v56  ;;  %vm166_vm11 = vcmp.lt.s32.totalorder %v150_v60, 136  ;;  %v216_v13 = vmul.f32 %v179_v0, %v179_v0  ;;  %v181_v15 = vsel %vm165_vm10, %v114_v4, 0.0 }
  0x1a   : > { %v191_v51 = vadd.f32 %v190_v44, %v176_v43  ;;  %v227_v62 = vadd.f32 %v226_v55, %v212_v47  ;;  %v153_v18 = vadd.s32 %v350_v3, %v135_v63  ;;  %vm167_vm12 = vcmp.lt.s32.totalorder %v151_v5, 136 }
  0x1b   : > { %v217_v19 = vmul.f32 %v180_v9, %v180_v9  ;;  %v182_v1 = vsel %vm166_vm11, %v115_v11, 0.0  ;;  %v154_v23 = vadd.s32 %v350_v3, %v136_v8  ;;  %vm168_vm13 = vcmp.lt.s32.totalorder %v152_v12, 136 }
  0x1c   : > { %v192_v58 = vadd.f32 %v191_v51, %v177_v50  ;;  %v228_v7 = vadd.f32 %v227_v62, %v213_v54  ;;  %v218_v24 = vmul.f32 %v181_v15, %v181_v15  ;;  %v183_v26 = vsel %vm167_vm12, %v116_v17, 0.0 }
  0x1d   : > { %vm169_vm14 = vcmp.lt.s32.totalorder %v153_v18, 136  ;;  %v219_v29 = vmul.f32 %v182_v1, %v182_v1  ;;  %v184_v31 = vsel %vm168_vm13, %v117_v22, 0.0  ;;  %vm170_vm15 = vcmp.lt.s32.totalorder %v154_v23, 136 }
  0x1e   : > { %v193_v2 = vadd.f32 %v192_v58, %v178_v57  ;;  %v229_v14 = vadd.f32 %v228_v7, %v214_v61  ;;  %v220_v34 = vmul.f32 %v183_v26, %v183_v26  ;;  %v185_v36 = vsel %vm169_vm14, %v118_v28, 0.0 }
  0x1f   : > { %v221_v38 = vmul.f32 %v184_v31, %v184_v31  ;;  %v186_v3 = vsel %vm170_vm15, %v119_v33, 0.0  ;;  %v222_v41 = vmul.f32 %v185_v36, %v185_v36  ;;  %vm245_vm0 = vcmask 1040384  }
  0x20   : > { %v194_v10 = vadd.f32 %v193_v2, %v179_v0  ;;  %v230_v20 = vadd.f32 %v229_v14, %v215_v6  ;;  %v223_v44 = vmul.f32 %v186_v3, %v186_v3  ;;  %v324_v61 = vmov (!%p303_p4), 0.0  }
  0x21   : > { %251 = vst [vmem:[%s427_s1] sm:$0x3] (!%p303_p4), %v324_v61 }
  0x22   : > { %v195_v16 = vadd.f32 %v194_v10, %v180_v9  ;;  %v231_v25 = vadd.f32 %v230_v20, %v216_v13 }
  0x24   : > { %v196_v21 = vadd.f32 %v195_v16, %v181_v15  ;;  %v232_v30 = vadd.f32 %v231_v25, %v217_v19 }
  0x26   : > { %v197_v27 = vadd.f32 %v196_v21, %v182_v1  ;;  %v233_v35 = vadd.f32 %v232_v30, %v218_v24 }
  0x28   : > { %v198_v32 = vadd.f32 %v197_v27, %v183_v26  ;;  %v234_v39 = vadd.f32 %v233_v35, %v219_v29 }
  0x2a   : > { %v199_v37 = vadd.f32 %v198_v32, %v184_v31  ;;  %v235_v42 = vadd.f32 %v234_v39, %v220_v34 }
  0x2c   : > { %v200_v40 = vadd.f32 %v199_v37, %v185_v36  ;;  %v236_v45 = vadd.f32 %v235_v42, %v221_v38 }
  0x2e   : > { %v201_v43 = vadd.f32 %v200_v40, %v186_v3  ;;  %v237_v47 = vadd.f32 %v236_v45, %v222_v41 }
  0x30   : > { %v202_v46 = vrot.slane %v201_v43, 4  ;;  %v238_v49 = vadd.f32 %v237_v47, %v223_v44 }
  0x32   : > { %v203_v48 = vadd.f32 %v202_v46, %v201_v43  ;;  %v239_v51 = vrot.slane %v238_v49, 4 }
  0x34   : > { %v204_v50 = vrot.slane %v203_v48, 2  ;;  %v240_v53 = vadd.f32 %v239_v51, %v238_v49 }
  0x36   : > { %v205_v52 = vadd.f32 %v204_v50, %v203_v48  ;;  %v241_v55 = vrot.slane %v240_v53, 2 }
  0x38   : > { %v206_v54 = vrot.slane %v205_v52, 1  ;;  %v242_v56 = vadd.f32 %v241_v55, %v240_v53  ;;  %250 = sbr.rel (%p303_p4) target bundleno = 63 (0x3f), region = 28 }
  0x3a   : > { %v207_v57 = vadd.f32 %v206_v54, %v205_v52  ;;  %v243_v58 = vrot.slane %v242_v56, 1 }
  0x3c   : > { %v244_v59 = vadd.f32 %v243_v58, %v242_v56 }
  0x3e   : > { %v246_v60 = vsel %vm245_vm0, %v207_v57, %v244_v59 }
  0x3f PF: > { %v252_v62 = vld [vmem:[%s427_s1] sm:$0x3]  ;;  %p304_p5 = scmp.ne.s32.totalorder %s341_s7, 1 }
  0x40   : > { %v253_v63 = vadd.f32 %v252_v62, %v246_v60 }
  0x41   : > { %258 = sbr.rel (%p304_p5) target bundleno = 84 (0x54), region = 32 }
  0x42   : > { %254 = vst [vmem:[%s427_s1] sm:$0x3] %v253_v63 }
  0x49   : > { %v259_v0 = vld [vmem:[%s427_s1] sm:$0x3] }
  0x4a   : > { %v260_v2 = vmul.f32 0.007352941, %v259_v0 }
  0x4c   : > { %v261_v4 = vmul.f32 %v260_v2, %v260_v2 }
  0x4e   : > { %v263_v5 = vrot.slane %v261_v4, 7 }
  0x50   : > { %v265_v6 = vsub.f32 %v260_v2, %v263_v5 }
  0x52   : > { %v266_v7 = vsel %vm245_vm0, %v260_v2, %v265_v6 }
  0x53   : > { %267 = vst [vmem:[%s427_s1] sm:$0x3] %v266_v7 }
  0x54 PF: > { %s11_s6 = sadd.s32 1, %s322_s6  }
  0x55   : > { %p8_p6 = scmp.ge.s32.totalorder %s11_s6, 4  }
  0x57   :  { %10 = sbr.rel (!%p8_p6) target bundleno = 1 (0x1), region = 58 }

// kernel: alignn_conv.23
= control target key start
LH: loop header
LB: loop body
LE: loop exit
PB: predicated region body
PF: predicated region fallthrough
CT: control target
= control target key end

     0   :  { %s1129_s12 = smov 0   ;;  %s1131_s13 = smov 0   ;;  %s1321_s0 = inlined_call_operand.vmem [shape: s32[1,384], index: 0, kind: input, shape index: {}]   ;;  %s1322_s1 = inlined_call_operand.vmem [shape: bf16[384,256], index: 1, kind: input, shape index: {}]   ;;  %s1323_s2 = inlined_call_operand.vmem [shape: f32[256,128], index: 2, kind: input, shape index: {}]   ;;  %s1324_s3 = inlined_call_operand.vmem [shape: f32[256,128], index: 3, kind: output, shape index: {}]  }
   0x1   :  { %s1133_s14 = smov 0   ;;  %s1135_s15 = smov 0  }
   0x2   :  { %s1137_s16 = smov 0  }
   0x3 LB: > { %s22_s17 = sadd.s32 1, %s1096_s14  ;;  %s25_s18 = sadd.s32 1, %s1100_s15  ;;  %s1104_s16 = sphi %s1137_s16, %s13_s16   ;;  %s1100_s15 = sphi %s1135_s15, %s1328_s15   ;;  %s1096_s14 = sphi %s1133_s14, %s1327_s14   ;;  %s1092_s13 = sphi %s1131_s13, %s1326_s13   ;;  %s1088_s12 = sphi %s1129_s12, %s1325_s12  }
   0x4   : > { %p23_p0 = scmp.ge.s32.totalorder %s22_s17, 3  ;;  %p888_p1 = scmp.ge.s32.totalorder %s1104_s16, 1 }
   0x5   : > { %p170_p2 = scmp.lt.s32.totalorder %s1104_s16, 7 }
   0x6   : > { %s1330_s17 = smov (%p23_p0, %s22_s17), 0  ;;  %s1332_s18 = smov (!%p23_p0, %s25_s18), %s1100_s15 }
   0x7   : > { %p171_p3 = pnand %p888_p1, %p170_p2  ;;  %p27_p4 = scmp.ge.s32.totalorder %s1332_s18, 2 }
   0x8   : > { %p203_p5 = scmp.lt.s32.totalorder (!%p171_p3), %s1088_s12, 2  ;;  %s889_s19 = sshll.u32 (!%p171_p3), %s1088_s12, 4 }
   0x9   : > { %s1334_s18 = smov (%p27_p4, %s1332_s18), 0  ;;  %174 = sbr.rel (%p171_p3) target bundleno = 344 (0x158), region = 32 }
   0xa   : > { %p207_p6 = scmp.lt.s32.totalorder (!%p171_p3), %s889_s19, 47  ;;  %s892_s20 = sshll.u32 (!%p171_p3), %s1092_s13, 4 }
   0xb   : > { %p214_p7 = scmp.lt.s32.totalorder (!%p171_p3), %s892_s20, 31  ;;  %p896_p8 = scmp.ne.s32.totalorder (!%p171_p3), %s1088_s12, 0 }
  0x10   : > { %s1167_s21 = scalar_select %p203_p5, %s1088_s12, 2 }
  0x11   : > { %s1336_s19 = smov (!%p207_p6, %s889_s19), 47  ;;  %s1338_s20 = smov (!%p214_p7, %s892_s20), 31 }
  0x12   : > { %s205_s24 = scalar_lea.vmem %s1321_s0, %s1167_s21  ;;  %s950_s25 = sshll.u32 %s1336_s19, 3  ;;  %v1106_v0 = vmov (!%p896_p8), 0.0  }
  0x13   : > { %s1176_s28 = scalar_lea.vmem %s1322_s1, %s950_s25  ;;  %s893_s29 = sshll.u32 %s1338_s20, 3  ;;  %230 = vst [vmem:[#allocation2] sm:$0xff] (!%p896_p8), %v1106_v0  ;;  %231 = vst [vmem:[#allocation2 + $0x8] sm:$0xff] (!%p896_p8), %v1106_v0 }
  0x14   : > { %s1181_s5 = scalar_lea.vmem %s1323_s2, %s893_s29  ;;  %s1186_s8 = scalar_lea.vmem %s1324_s3, %s893_s29  ;;  %232 = vst [vmem:[#allocation2 + $0x10] sm:$0xff] (!%p896_p8), %v1106_v0  ;;  %233 = vst [vmem:[#allocation2 + $0x18] sm:$0xff] (!%p896_p8), %v1106_v0 }
  0x15   : > { %229 = sbr.rel (%p896_p8) target bundleno = 35 (0x23), region = 36  ;;  %234 = vst [vmem:[#allocation2 + $0x20] sm:$0xff] (!%p896_p8), %v1106_v0  ;;  %235 = vst [vmem:[#allocation2 + $0x28] sm:$0xff] (!%p896_p8), %v1106_v0 }
  0x16   : > { %236 = vst [vmem:[#allocation2 + $0x30] sm:$0xff] (!%p896_p8), %v1106_v0  ;;  %237 = vst [vmem:[#allocation2 + $0x38] sm:$0xff] (!%p896_p8), %v1106_v0 }
  0x17   : > { %238 = vst [vmem:[#allocation2 + $0x40] sm:$0xff] (!%p896_p8), %v1106_v0  ;;  %239 = vst [vmem:[#allocation2 + $0x48] sm:$0xff] (!%p896_p8), %v1106_v0 }
  0x18   : > { %240 = vst [vmem:[#allocation2 + $0x50] sm:$0xff] (!%p896_p8), %v1106_v0  ;;  %241 = vst [vmem:[#allocation2 + $0x58] sm:$0xff] (!%p896_p8), %v1106_v0 }
  0x19   : > { %242 = vst [vmem:[#allocation2 + $0x60] sm:$0xff] (!%p896_p8), %v1106_v0  ;;  %243 = vst [vmem:[#allocation2 + $0x68] sm:$0xff] (!%p896_p8), %v1106_v0 }
  0x1a   : > { %244 = vst [vmem:[#allocation2 + $0x70] sm:$0xff] (!%p896_p8), %v1106_v0  ;;  %245 = vst [vmem:[#allocation2 + $0x78] sm:$0xff] (!%p896_p8), %v1106_v0 }
  0x1b   : > { %246 = vst [vmem:[#allocation2 + $0x80] sm:$0xff] (!%p896_p8), %v1106_v0  ;;  %247 = vst [vmem:[#allocation2 + $0x88] sm:$0xff] (!%p896_p8), %v1106_v0 }
  0x1c   : > { %248 = vst [vmem:[#allocation2 + $0x90] sm:$0xff] %v1106_v0  ;;  %249 = vst [vmem:[#allocation2 + $0x98] sm:$0xff] %v1106_v0 }
  0x1d   : > { %250 = vst [vmem:[#allocation2 + $0xa0] sm:$0xff] %v1106_v0  ;;  %251 = vst [vmem:[#allocation2 + $0xa8] sm:$0xff] %v1106_v0 }
  0x1e   : > { %252 = vst [vmem:[#allocation2 + $0xb0] sm:$0xff] %v1106_v0  ;;  %253 = vst [vmem:[#allocation2 + $0xb8] sm:$0xff] %v1106_v0 }
  0x1f   : > { %254 = vst [vmem:[#allocation2 + $0xc0] sm:$0xff] %v1106_v0  ;;  %255 = vst [vmem:[#allocation2 + $0xc8] sm:$0xff] %v1106_v0 }
  0x20   : > { %256 = vst [vmem:[#allocation2 + $0xd0] sm:$0xff] %v1106_v0  ;;  %257 = vst [vmem:[#allocation2 + $0xd8] sm:$0xff] %v1106_v0 }
  0x21   : > { %258 = vst [vmem:[#allocation2 + $0xe0] sm:$0xff] %v1106_v0  ;;  %259 = vst [vmem:[#allocation2 + $0xe8] sm:$0xff] %v1106_v0 }
  0x22   : > { %260 = vst [vmem:[#allocation2 + $0xf0] sm:$0xff] %v1106_v0  ;;  %261 = vst [vmem:[#allocation2 + $0xf8] sm:$0xff] %v1106_v0 }
  0x23 PF: > { %v1010_v1 = vld [vmem:[%s1176_s28 + $0x4] ss:$8 sps:$4 sm:$0xff]   ;;  %v1012_v2 = vld [vmem:[%s1176_s28] ss:$8 sps:$4 sm:$0xff]   ;;  %v1107_v3 = vmov 0   ;;  %v262_v10 = vlaneseq  ;;  %s897_s9 = sshll.u32 %s1092_s13, 7 }
  0x24   : > { %518 = vmatprep.mubr.bf16.mxu0 %v1107_v3  ;;  %558 = vmatprep.mubr.bf16.mxu1 %v1107_v3  ;;  %v1013_v4 = vld [vmem:[%s1176_s28 + $0x14] ss:$8 sps:$4 sm:$0xff]   ;;  %v1015_v5 = vld [vmem:[%s1176_s28 + $0x10] ss:$8 sps:$4 sm:$0xff]   ;;  %v1016_v6 = vld [vmem:[%s1176_s28 + $0x24] ss:$8 sps:$4 sm:$0xff]   ;;  %v1208_v18 = vstv %s897_s9 }
  0x25   : > { %486 = vmatprep.subr.bf16.mxu0 %v1010_v1  ;;  %951 = vmatprep.subr.bf16.mxu1 %v1010_v1  ;;  %v1018_v7 = vld [vmem:[%s1176_s28 + $0x20] ss:$8 sps:$4 sm:$0xff]   ;;  %v1019_v8 = vld [vmem:[%s1176_s28 + $0x34] ss:$8 sps:$4 sm:$0xff]   ;;  %v1021_v9 = vld [vmem:[%s1176_s28 + $0x30] ss:$8 sps:$4 sm:$0xff]  }
  0x26   : > { %487 = vmatpush1.bf16.msra.mxu0 %v1012_v2  ;;  %959 = vmatpush1.bf16.msra.mxu1 %v1012_v2  ;;  %v1022_v11 = vld [vmem:[%s1176_s28 + $0x44] ss:$8 sps:$4 sm:$0xff]   ;;  %v1024_v12 = vld [vmem:[%s1176_s28 + $0x40] ss:$8 sps:$4 sm:$0xff]   ;;  %v1201_v13 = vshrl.u32 %v262_v10, 7  ;;  %v360_v60 = vld [vmem:[#allocation2 + $0x10] sm:$0xff] }
  0x27   : > { %488 = vmatprep.subr.bf16.mxu0 %v1013_v4  ;;  %952 = vmatprep.subr.bf16.mxu1 %v1013_v4  ;;  %v1025_v14 = vld [vmem:[%s1176_s28 + $0x54] ss:$8 sps:$4 sm:$0xff]   ;;  %v1027_v15 = vld [vmem:[%s1176_s28 + $0x50] ss:$8 sps:$4 sm:$0xff]   ;;  %v1028_v17 = vld [vmem:[%s1176_s28 + $0x64] ss:$8 sps:$4 sm:$0xff]  }
  0x28   : > { %v264_v16 = vadd.s32 8, %v1201_v13  ;;  %v271_v19 = vadd.s32 64, %v1201_v13  ;;  %v272_v20 = vadd.s32 72, %v1201_v13  ;;  %v1030_v21 = vld [vmem:[%s1176_s28 + $0x60] ss:$8 sps:$4 sm:$0xff]   ;;  %v281_v22 = vadd.s32 %v1208_v18, %v1201_v13  ;;  %v361_v2 = vld [vmem:[#allocation2 + $0x18] sm:$0xff] }
  0x29   : > { %v1031_v24 = vld [vmem:[%s1176_s28 + $0x74] ss:$8 sps:$4 sm:$0xff]   ;;  %v1222_v25 = vld [vmem:[%s205_s24] ss:$0 sm:$0xff]  ;;  %v1033_v28 = vld [vmem:[%s1176_s28 + $0x70] ss:$8 sps:$4 sm:$0xff]  }
  0x2a   : > { %489 = vmatpush1.bf16.msra.mxu0 %v1015_v5  ;;  %960 = vmatpush1.bf16.msra.mxu1 %v1015_v5  ;;  %v282_v23 = vadd.s32 %v1208_v18, %v264_v16  ;;  %v289_v26 = vadd.s32 %v1208_v18, %v271_v19  ;;  %v290_v27 = vadd.s32 %v1208_v18, %v272_v20  ;;  %v265_v29 = vadd.s32 16, %v1201_v13  ;;  %v358_v54 = vld [vmem:[#allocation2] sm:$0xff]  ;;  %v359_v56 = vld [vmem:[#allocation2 + $0x8] sm:$0xff]  ;;  %v376_v61 = vld [vmem:[#allocation2 + $0x90] sm:$0xff]  ;;  %p947_p9 = scmp.ne.s32.totalorder %s1088_s12, 2 }
  0x2b   : > { %490 = vmatprep.subr.bf16.mxu0 %v1016_v6  ;;  %953 = vmatprep.subr.bf16.mxu1 %v1016_v6  ;;  %vm302_vm0 = vcmp.eq.s32.totalorder %v281_v22, %v1222_v25  ;;  %v266_v30 = vadd.s32 24, %v1201_v13  ;;  %v273_v31 = vadd.s32 80, %v1201_v13  ;;  %v274_v32 = vadd.s32 88, %v1201_v13  ;;  %v374_v55 = vld [vmem:[#allocation2 + $0x80] sm:$0xff]  ;;  %v375_v57 = vld [vmem:[#allocation2 + $0x88] sm:$0xff]  ;;  %v364_v20 = vld [vmem:[#allocation2 + $0x30] sm:$0xff] }
  0x2c   : > { %vm303_vm1 = vcmp.eq.s32.totalorder %v282_v23, %v1222_v25  ;;  %vm310_vm2 = vcmp.eq.s32.totalorder %v289_v26, %v1222_v25  ;;  %vm311_vm3 = vcmp.eq.s32.totalorder %v290_v27, %v1222_v25  ;;  %v283_v33 = vadd.s32 %v1208_v18, %v265_v29  ;;  %v363_v16 = vld [vmem:[#allocation2 + $0x28] sm:$0xff]  ;;  %v365_v26 = vld [vmem:[#allocation2 + $0x38] sm:$0xff] }
  0x2d   : > { %vm931_vm4 = vmpackc.low %vm303_vm1, %vm302_vm0  ;;  %v284_v34 = vadd.s32 %v1208_v18, %v266_v30  ;;  %v291_v35 = vadd.s32 %v1208_v18, %v273_v31  ;;  %v292_v36 = vadd.s32 %v1208_v18, %v274_v32  ;;  %v1108_v37 = vmov 1.0|1.0   ;;  %v381_v27 = vld [vmem:[#allocation2 + $0xb8] sm:$0xff] }
  0x2e   : > { %491 = vmatpush1.bf16.msra.mxu0 %v1018_v7  ;;  %961 = vmatpush1.bf16.msra.mxu1 %v1018_v7  ;;  %vm939_vm5 = vmpackc.low %vm311_vm3, %vm310_vm2  ;;  %vm304_vm6 = vcmp.eq.s32.totalorder %v283_v33, %v1222_v25  ;;  %v267_v38 = vadd.s32 32, %v1201_v13  ;;  %v268_v39 = vadd.s32 40, %v1201_v13  ;;  %v275_v40 = vadd.s32 96, %v1201_v13 }
  0x2f   : > { %492 = vmatprep.subr.bf16.mxu0 %v1019_v8  ;;  %954 = vmatprep.subr.bf16.mxu1 %v1019_v8  ;;  %vm305_vm7 = vcmp.eq.s32.totalorder %v284_v34, %v1222_v25  ;;  %vm312_vm8 = vcmp.eq.s32.totalorder %v291_v35, %v1222_v25  ;;  %vm313_vm9 = vcmp.eq.s32.totalorder %v292_v36, %v1222_v25  ;;  %v276_v41 = vadd.s32 104, %v1201_v13 }
  0x30   : > { %vm933_vm10 = vmpackc.low %vm305_vm7, %vm304_vm6  ;;  %v285_v42 = vadd.s32 %v1208_v18, %v267_v38  ;;  %v286_v43 = vadd.s32 %v1208_v18, %v268_v39  ;;  %v293_v44 = vadd.s32 %v1208_v18, %v275_v40  ;;  %v269_v46 = vadd.s32 48, %v1201_v13  ;;  %v366_v38 = vld [vmem:[#allocation2 + $0x40] sm:$0xff]  ;;  %v367_v40 = vld [vmem:[#allocation2 + $0x48] sm:$0xff] }
  0x31   : > { %vm941_vm11 = vmpackc.low %vm313_vm9, %vm312_vm8  ;;  %v294_v45 = vadd.s32 %v1208_v18, %v276_v41  ;;  %v270_v47 = vadd.s32 56, %v1201_v13  ;;  %v277_v48 = vadd.s32 112, %v1201_v13  ;;  %v278_v49 = vadd.s32 120, %v1201_v13  ;;  %v382_v39 = vld [vmem:[#allocation2 + $0xc0] sm:$0xff]  ;;  %v383_v41 = vld [vmem:[#allocation2 + $0xc8] sm:$0xff] }
  0x32   : > { %493 = vmatpush1.bf16.msra.mxu0 %v1021_v9  ;;  %962 = vmatpush1.bf16.msra.mxu1 %v1021_v9  ;;  %vm306_vm12 = vcmp.eq.s32.totalorder %v285_v42, %v1222_v25  ;;  %vm307_vm13 = vcmp.eq.s32.totalorder %v286_v43, %v1222_v25  ;;  %vm314_vm14 = vcmp.eq.s32.totalorder %v293_v44, %v1222_v25  ;;  %v368_v44 = vld [vmem:[#allocation2 + $0x50] sm:$0xff] }
  0x33   : > { %494 = vmatprep.subr.bf16.mxu0 %v1022_v11  ;;  %955 = vmatprep.subr.bf16.mxu1 %v1022_v11  ;;  %vm315_vm15 = vcmp.eq.s32.totalorder %v294_v45, %v1222_v25  ;;  %vm935_vm0 = vmpackc.low %vm307_vm13, %vm306_vm12  ;;  %v287_v50 = vadd.s32 %v1208_v18, %v269_v46  ;;  %v288_v51 = vadd.s32 %v1208_v18, %v270_v47  ;;  %v384_v45 = vld [vmem:[#allocation2 + $0xd0] sm:$0xff] }
  0x34   : > { %vm943_vm1 = vmpackc.low %vm315_vm15, %vm314_vm14  ;;  %v295_v52 = vadd.s32 %v1208_v18, %v277_v48  ;;  %v296_v53 = vadd.s32 %v1208_v18, %v278_v49 }
  0x35   : > { %vm308_vm2 = vcmp.eq.s32.totalorder %v287_v50, %v1222_v25  ;;  %vm309_vm3 = vcmp.eq.s32.totalorder %v288_v51, %v1222_v25  ;;  %v369_v50 = vld [vmem:[#allocation2 + $0x58] sm:$0xff] }
  0x36   : > { %495 = vmatpush1.bf16.msra.mxu0 %v1024_v12  ;;  %963 = vmatpush1.bf16.msra.mxu1 %v1024_v12  ;;  %vm937_vm6 = vmpackc.low %vm309_vm3, %vm308_vm2  ;;  %v385_v51 = vld [vmem:[#allocation2 + $0xd8] sm:$0xff] }
  0x37   : > { %496 = vmatprep.subr.bf16.mxu0 %v1025_v14  ;;  %956 = vmatprep.subr.bf16.mxu1 %v1025_v14  ;;  %v362_v14 = vld [vmem:[#allocation2 + $0x20] sm:$0xff] }
  0x3a   : > { %497 = vmatpush1.bf16.msra.mxu0 %v1027_v15  ;;  %964 = vmatpush1.bf16.msra.mxu1 %v1027_v15  ;;  %v378_v15 = vld [vmem:[#allocation2 + $0xa0] sm:$0xff] }
  0x3b   : > { %498 = vmatprep.subr.bf16.mxu0 %v1028_v17  ;;  %957 = vmatprep.subr.bf16.mxu1 %v1028_v17  ;;  %v379_v17 = vld [vmem:[#allocation2 + $0xa8] sm:$0xff] }
  0x3e   : > { %499 = vmatpush1.bf16.msra.mxu0 %v1030_v21  ;;  %965 = vmatpush1.bf16.msra.mxu1 %v1030_v21  ;;  %v380_v21 = vld [vmem:[#allocation2 + $0xb0] sm:$0xff] }
  0x3f   : > { %500 = vmatprep.subr.bf16.mxu0 %v1031_v24  ;;  %958 = vmatprep.subr.bf16.mxu1 %v1031_v24 }
  0x42   : > { %501 = vmatpush1.bf16.msra.mxu0 %v1033_v28  ;;  %966 = vmatpush1.bf16.msra.mxu1 %v1033_v28 }
  0x45   : > { %932 = vmatmul.mubr.msk.bf16.vlgmr.msra.gmra.mrb[0].mxu0 %vm931_vm4, %v1108_v37  ;;  %940 = vmatmul.mubr.msk.bf16.vlgmr.msra.gmra.mrb[0].mxu1 %vm939_vm5, %v1108_v37  ;;  %vm316_vm4 = vcmp.eq.s32.totalorder %v295_v52, %v1222_v25  ;;  %vm317_vm5 = vcmp.eq.s32.totalorder %v296_v53, %v1222_v25 }
  0x46   : > { %528 = vmatprep.mubr.bf16.mxu0 %v1107_v3  ;;  %568 = vmatprep.mubr.bf16.mxu1 %v1107_v3  ;;  %vm945_vm7 = vmpackc.low %vm317_vm5, %vm316_vm4 }
  0x4d   : > { %934 = vmatmul.mubr.msk.bf16.gmra.mrb[4].mxu0 %vm933_vm10, %v1108_v37  ;;  %942 = vmatmul.mubr.msk.bf16.gmra.mrb[4].mxu1 %vm941_vm11, %v1108_v37 }
  0x4e   : > { %538 = vmatprep.mubr.bf16.mxu0 %v1107_v3  ;;  %578 = vmatprep.mubr.bf16.mxu1 %v1107_v3 }
  0x55   : > { %936 = vmatmul.mubr.msk.bf16.gmra.mrb[8].mxu0 %vm935_vm0, %v1108_v37  ;;  %944 = vmatmul.mubr.msk.bf16.gmra.mrb[8].mxu1 %vm943_vm1, %v1108_v37 }
  0x56   : > { %548 = vmatprep.mubr.bf16.mxu0 %v1107_v3  ;;  %588 = vmatprep.mubr.bf16.mxu1 %v1107_v3  ;;  %v377_v3 = vld [vmem:[#allocation2 + $0x98] sm:$0xff] }
  0x5d   : > { %938 = vmatmul.mubr.msk.bf16.gmra.mrb[12].mxu0 %vm937_vm6, %v1108_v37  ;;  %946 = vmatmul.mubr.msk.bf16.gmra.mrb[12].mxu1 %vm945_vm7, %v1108_v37 }
 0x118   : > { %v520_v58 = vpop.f32.mrb[0].mxu0  ;;  %v560_v59 = vpop.f32.mrb[0].mxu1 }
 0x119   : > { %v599_v62 = vadd.f32 %v520_v58, %v358_v54  ;;  %v615_v63 = vadd.f32 %v560_v59, %v374_v55  ;;  %v522_v0 = vpop.f32.mrb[1].mxu0  ;;  %v562_v1 = vpop.f32.mrb[1].mxu1 }
 0x11a   : > { %v600_v4 = vadd.f32 %v522_v0, %v359_v56  ;;  %v616_v5 = vadd.f32 %v562_v1, %v375_v57  ;;  %v524_v6 = vpop.f32.mrb[2].mxu0  ;;  %v564_v7 = vpop.f32.mrb[2].mxu1  ;;  %v371_v0 = vld [vmem:[#allocation2 + $0x68] sm:$0xff] }
 0x11b   : > { %631 = vst [vmem:[#allocation2] sm:$0xff] %v599_v62  ;;  %647 = vst [vmem:[#allocation2 + $0x80] sm:$0xff] %v615_v63  ;;  %v601_v8 = vadd.f32 %v524_v6, %v360_v60  ;;  %v617_v9 = vadd.f32 %v564_v7, %v376_v61  ;;  %v526_v10 = vpop.f32.mrb[3].mxu0  ;;  %v566_v11 = vpop.f32.mrb[3].mxu1  ;;  %v370_v62 = vld [vmem:[#allocation2 + $0x60] sm:$0xff]  ;;  %v387_v1 = vld [vmem:[#allocation2 + $0xe8] sm:$0xff] }
 0x11c   : > { %632 = vst [vmem:[#allocation2 + $0x8] sm:$0xff] %v600_v4  ;;  %648 = vst [vmem:[#allocation2 + $0x88] sm:$0xff] %v616_v5  ;;  %v602_v12 = vadd.f32 %v526_v10, %v361_v2  ;;  %v618_v13 = vadd.f32 %v566_v11, %v377_v3  ;;  %v386_v63 = vld [vmem:[#allocation2 + $0xe0] sm:$0xff]  ;;  %v372_v4 = vld [vmem:[#allocation2 + $0x70] sm:$0xff] }
 0x11d   : > { %633 = vst [vmem:[#allocation2 + $0x10] sm:$0xff] %v601_v8  ;;  %649 = vst [vmem:[#allocation2 + $0x90] sm:$0xff] %v617_v9  ;;  %v388_v5 = vld [vmem:[#allocation2 + $0xf0] sm:$0xff]  ;;  %v373_v10 = vld [vmem:[#allocation2 + $0x78] sm:$0xff] }
 0x11e   : > { %634 = vst [vmem:[#allocation2 + $0x18] sm:$0xff] %v602_v12  ;;  %650 = vst [vmem:[#allocation2 + $0x98] sm:$0xff] %v618_v13  ;;  %v389_v11 = vld [vmem:[#allocation2 + $0xf8] sm:$0xff] }
 0x120   : > { %v530_v18 = vpop.f32.mrb[4].mxu0  ;;  %v570_v19 = vpop.f32.mrb[4].mxu1 }
 0x121   : > { %v603_v22 = vadd.f32 %v530_v18, %v362_v14  ;;  %v619_v23 = vadd.f32 %v570_v19, %v378_v15  ;;  %v532_v24 = vpop.f32.mrb[5].mxu0  ;;  %v572_v25 = vpop.f32.mrb[5].mxu1 }
 0x122   : > { %v604_v28 = vadd.f32 %v532_v24, %v363_v16  ;;  %v620_v29 = vadd.f32 %v572_v25, %v379_v17  ;;  %v534_v30 = vpop.f32.mrb[6].mxu0  ;;  %v574_v31 = vpop.f32.mrb[6].mxu1 }
 0x123   : > { %635 = vst [vmem:[#allocation2 + $0x20] sm:$0xff] %v603_v22  ;;  %651 = vst [vmem:[#allocation2 + $0xa0] sm:$0xff] %v619_v23  ;;  %v605_v32 = vadd.f32 %v534_v30, %v364_v20  ;;  %v621_v33 = vadd.f32 %v574_v31, %v380_v21  ;;  %v536_v34 = vpop.f32.mrb[7].mxu0  ;;  %v576_v35 = vpop.f32.mrb[7].mxu1  ;;  %v668_v22 = vld [vmem:[#allocation2 + $0x8] sm:$0xff] (!%p947_p9) }
 0x124   : > { %636 = vst [vmem:[#allocation2 + $0x28] sm:$0xff] %v604_v28  ;;  %652 = vst [vmem:[#allocation2 + $0xa8] sm:$0xff] %v620_v29  ;;  %v606_v36 = vadd.f32 %v536_v34, %v365_v26  ;;  %v622_v37 = vadd.f32 %v576_v35, %v381_v27  ;;  %v699_v23 = vadd.f32 (!%p947_p9), 1e-06, %v668_v22  ;;  %v683_v22 = vld [vmem:[#allocation2 + $0x80] sm:$0xff] (!%p947_p9) }
 0x125   : > { %637 = vst [vmem:[#allocation2 + $0x30] sm:$0xff] %v605_v32  ;;  %653 = vst [vmem:[#allocation2 + $0xb0] sm:$0xff] %v621_v33  ;;  %v670_v24 = vld [vmem:[#allocation2 + $0x18] sm:$0xff] (!%p947_p9) }
 0x126   : > { %638 = vst [vmem:[#allocation2 + $0x38] sm:$0xff] %v606_v36  ;;  %654 = vst [vmem:[#allocation2 + $0xb8] sm:$0xff] %v622_v37  ;;  %v700_v25 = vadd.f32 (!%p947_p9), 1e-06, %v670_v24  ;;  %1034 = vrcp.f32 (!%p947_p9), %v699_v23 }
 0x128   : > { %v540_v42 = vpop.f32.mrb[8].mxu0  ;;  %v580_v43 = vpop.f32.mrb[8].mxu1  ;;  %1036 = vrcp.f32 (!%p947_p9), %v700_v25 }
 0x129   : > { %v607_v46 = vadd.f32 %v540_v42, %v366_v38  ;;  %v623_v47 = vadd.f32 %v580_v43, %v382_v39  ;;  %v542_v48 = vpop.f32.mrb[9].mxu0  ;;  %v582_v49 = vpop.f32.mrb[9].mxu1  ;;  %v684_v38 = vld [vmem:[#allocation2 + $0x88] sm:$0xff] (!%p947_p9)  ;;  %v667_v43 = vld [vmem:[#allocation2] sm:$0xff] (!%p947_p9) }
 0x12a   : > { %v608_v52 = vadd.f32 %v542_v48, %v367_v40  ;;  %v624_v53 = vadd.f32 %v582_v49, %v383_v41  ;;  %v544_v54 = vpop.f32.mrb[10].mxu0  ;;  %v584_v55 = vpop.f32.mrb[10].mxu1  ;;  %v707_v39 = vadd.f32 (!%p947_p9), 1e-06, %v684_v38  ;;  %v686_v40 = vld [vmem:[#allocation2 + $0x98] sm:$0xff] (!%p947_p9) }
 0x12b   : > { %639 = vst [vmem:[#allocation2 + $0x40] sm:$0xff] %v607_v46  ;;  %655 = vst [vmem:[#allocation2 + $0xc0] sm:$0xff] %v623_v47  ;;  %v609_v56 = vadd.f32 %v544_v54, %v368_v44  ;;  %v625_v57 = vadd.f32 %v584_v55, %v384_v45  ;;  %v546_v58 = vpop.f32.mrb[11].mxu0  ;;  %v586_v59 = vpop.f32.mrb[11].mxu1  ;;  %v672_v26 = vld [vmem:[#allocation2 + $0x28] sm:$0xff] (!%p947_p9)  ;;  %v669_v46 = vld [vmem:[#allocation2 + $0x10] sm:$0xff] (!%p947_p9) }
 0x12c   : > { %640 = vst [vmem:[#allocation2 + $0x48] sm:$0xff] %v608_v52  ;;  %656 = vst [vmem:[#allocation2 + $0xc8] sm:$0xff] %v624_v53  ;;  %v610_v60 = vadd.f32 %v546_v58, %v369_v50  ;;  %v626_v61 = vadd.f32 %v586_v59, %v385_v51  ;;  %v701_v27 = vadd.f32 (!%p947_p9), 1e-06, %v672_v26  ;;  %v708_v41 = vadd.f32 (!%p947_p9), 1e-06, %v686_v40 }
 0x12d   : > { %641 = vst [vmem:[#allocation2 + $0x50] sm:$0xff] %v609_v56  ;;  %657 = vst [vmem:[#allocation2 + $0xd0] sm:$0xff] %v625_v57  ;;  %v674_v28 = vld [vmem:[#allocation2 + $0x38] sm:$0xff] (!%p947_p9)  ;;  %v688_v42 = vld [vmem:[#allocation2 + $0xa8] sm:$0xff] (!%p947_p9) }
 0x12e   : > { %642 = vst [vmem:[#allocation2 + $0x58] sm:$0xff] %v610_v60  ;;  %658 = vst [vmem:[#allocation2 + $0xd8] sm:$0xff] %v626_v61  ;;  %v702_v29 = vadd.f32 (!%p947_p9), 1e-06, %v674_v28  ;;  %1038 = vrcp.f32 (!%p947_p9), %v701_v27  ;;  %v709_v44 = vadd.f32 (!%p947_p9), 1e-06, %v688_v42 }
 0x12f   : > { %v690_v45 = vld [vmem:[#allocation2 + $0xb8] sm:$0xff] (!%p947_p9)  ;;  %v747_v50 = vld [vmem:[%s1181_s5] sm:$0xff] (!%p947_p9)  ;;  %v748_v56 = vld [vmem:[%s1181_s5 + $0x8] sm:$0xff] (!%p947_p9) }
 0x130   : > { %v550_v2 = vpop.f32.mrb[12].mxu0  ;;  %v590_v3 = vpop.f32.mrb[12].mxu1  ;;  %666 = sbr.rel (%p947_p9) target bundleno = 344 (0x158), region = 40  ;;  %1040 = vrcp.f32 (!%p947_p9), %v702_v29  ;;  %v710_v47 = vadd.f32 (!%p947_p9), 1e-06, %v690_v45  ;;  %v671_v51 = vld [vmem:[#allocation2 + $0x20] sm:$0xff] (!%p947_p9) }
 0x131   : > { %v611_v6 = vadd.f32 %v550_v2, %v370_v62  ;;  %v627_v7 = vadd.f32 %v590_v3, %v386_v63  ;;  %v552_v8 = vpop.f32.mrb[13].mxu0  ;;  %v592_v9 = vpop.f32.mrb[13].mxu1  ;;  %v673_v57 = vld [vmem:[#allocation2 + $0x30] sm:$0xff] (!%p947_p9)  ;;  %v754_v26 = vld [vmem:[%s1181_s5 + $0x38] sm:$0xff] (!%p947_p9) }
 0x132   : > { %v612_v12 = vadd.f32 %v552_v8, %v371_v0  ;;  %v628_v13 = vadd.f32 %v592_v9, %v387_v1  ;;  %v554_v14 = vpop.f32.mrb[14].mxu0  ;;  %v594_v15 = vpop.f32.mrb[14].mxu1  ;;  %v749_v62 = vld [vmem:[%s1181_s5 + $0x10] sm:$0xff] (!%p947_p9)  ;;  %v675_v63 = vld [vmem:[#allocation2 + $0x40] sm:$0xff] (!%p947_p9) }
 0x133   : > { %643 = vst [vmem:[#allocation2 + $0x60] sm:$0xff] %v611_v6  ;;  %659 = vst [vmem:[#allocation2 + $0xe0] sm:$0xff] %v627_v7  ;;  %v613_v16 = vadd.f32 %v554_v14, %v372_v4  ;;  %v629_v17 = vadd.f32 %v594_v15, %v388_v5  ;;  %v556_v18 = vpop.f32.mrb[15].mxu0  ;;  %v596_v19 = vpop.f32.mrb[15].mxu1  ;;  %v676_v30 = vld [vmem:[#allocation2 + $0x48] sm:$0xff] (!%p947_p9)  ;;  %v750_v5 = vld [vmem:[%s1181_s5 + $0x18] sm:$0xff] (!%p947_p9) }
 0x134   : > { %644 = vst [vmem:[#allocation2 + $0x68] sm:$0xff] %v612_v12  ;;  %660 = vst [vmem:[#allocation2 + $0xe8] sm:$0xff] %v628_v13  ;;  %v614_v20 = vadd.f32 %v556_v18, %v373_v10  ;;  %v630_v21 = vadd.f32 %v596_v19, %v389_v11  ;;  %v703_v31 = vadd.f32 (!%p947_p9), 1e-06, %v676_v30  ;;  %v692_v48 = vld [vmem:[#allocation2 + $0xc8] sm:$0xff] (!%p947_p9)  ;;  %v1035_v49 = vpop.eup (!%p947_p9), %1034  ;;  %v677_v6 = vld [vmem:[#allocation2 + $0x50] sm:$0xff] (!%p947_p9) }
 0x135   : > { %645 = vst [vmem:[#allocation2 + $0x70] sm:$0xff] %v613_v16  ;;  %661 = vst [vmem:[#allocation2 + $0xf0] sm:$0xff] %v629_v17  ;;  %v678_v32 = vld [vmem:[#allocation2 + $0x58] sm:$0xff] (!%p947_p9)  ;;  %v711_v52 = vadd.f32 (!%p947_p9), 1e-06, %v692_v48  ;;  %v1037_v54 = vpop.eup (!%p947_p9), %1036  ;;  %v731_v55 = vmul.f32 (!%p947_p9), %v1035_v49, %v667_v43  ;;  %v751_v11 = vld [vmem:[%s1181_s5 + $0x20] sm:$0xff] (!%p947_p9) }
 0x136   : > { %646 = vst [vmem:[#allocation2 + $0x78] sm:$0xff] %v614_v20  ;;  %662 = vst [vmem:[#allocation2 + $0xf8] sm:$0xff] %v630_v21  ;;  %v704_v33 = vadd.f32 (!%p947_p9), 1e-06, %v678_v32  ;;  %1042 = vrcp.f32 (!%p947_p9), %v703_v31  ;;  %v694_v53 = vld [vmem:[#allocation2 + $0xd8] sm:$0xff] (!%p947_p9)  ;;  %v732_v61 = vmul.f32 (!%p947_p9), %v1037_v54, %v669_v46  ;;  %v752_v16 = vld [vmem:[%s1181_s5 + $0x28] sm:$0xff] (!%p947_p9) }
 0x137   : > { %v712_v58 = vadd.f32 1e-06, %v694_v53  ;;  %v763_v3 = vadd.f32 %v747_v50, %v731_v55  ;;  %v753_v21 = vld [vmem:[%s1181_s5 + $0x30] sm:$0xff]  ;;  %v755_v31 = vld [vmem:[%s1181_s5 + $0x40] sm:$0xff]  ;;  %v758_v46 = vld [vmem:[%s1181_s5 + $0x58] sm:$0xff] }
 0x138   : > { %1044 = vrcp.f32 %v704_v33  ;;  %v1039_v60 = vpop.eup %1038  ;;  %v764_v9 = vadd.f32 %v748_v56, %v732_v61  ;;  %v685_v27 = vld [vmem:[#allocation2 + $0x90] sm:$0xff]  ;;  %v687_v32 = vld [vmem:[#allocation2 + $0xa0] sm:$0xff]  ;;  %v760_v56 = vld [vmem:[%s1181_s5 + $0x68] sm:$0xff] }
 0x139   : > { %v733_v4 = vmul.f32 %v1039_v60, %v671_v51  ;;  %779 = vst [vmem:[%s1186_s8] sm:$0xff] %v763_v3  ;;  %v691_v42 = vld [vmem:[#allocation2 + $0xc0] sm:$0xff]  ;;  %v761_v61 = vld [vmem:[%s1181_s5 + $0x70] sm:$0xff] }
 0x13a   : > { %v1041_v2 = vpop.eup %1040  ;;  %v679_v12 = vld [vmem:[#allocation2 + $0x60] sm:$0xff]  ;;  %780 = vst [vmem:[%s1186_s8 + $0x8] sm:$0xff] %v764_v9 }
 0x13b   : > { %v680_v34 = vld [vmem:[#allocation2 + $0x68] sm:$0xff]  ;;  %v734_v10 = vmul.f32 %v1041_v2, %v673_v57  ;;  %v765_v14 = vadd.f32 %v749_v62, %v733_v4  ;;  %v759_v51 = vld [vmem:[%s1181_s5 + $0x60] sm:$0xff] }
 0x13c   : > { %v705_v35 = vadd.f32 1e-06, %v680_v34  ;;  %v696_v59 = vld [vmem:[#allocation2 + $0xe8] sm:$0xff]  ;;  %v681_v17 = vld [vmem:[#allocation2 + $0x70] sm:$0xff] }
 0x13d   : > { %v682_v36 = vld [vmem:[#allocation2 + $0x78] sm:$0xff]  ;;  %v713_v0 = vadd.f32 1e-06, %v696_v59  ;;  %v766_v19 = vadd.f32 %v750_v5, %v734_v10  ;;  %781 = vst [vmem:[%s1186_s8 + $0x10] sm:$0xff] %v765_v14  ;;  %v697_v57 = vld [vmem:[#allocation2 + $0xf0] sm:$0xff] }
 0x13e   : > { %v706_v37 = vadd.f32 1e-06, %v682_v36  ;;  %1046 = vrcp.f32 %v705_v35  ;;  %v698_v1 = vld [vmem:[#allocation2 + $0xf8] sm:$0xff]  ;;  %v756_v36 = vld [vmem:[%s1181_s5 + $0x48] sm:$0xff] }
 0x13f   : > { %v714_v7 = vadd.f32 1e-06, %v698_v1  ;;  %782 = vst [vmem:[%s1186_s8 + $0x18] sm:$0xff] %v766_v19  ;;  %v762_v1 = vld [vmem:[%s1181_s5 + $0x78] sm:$0xff] }
 0x140   : > { %1048 = vrcp.f32 %v706_v37  ;;  %v1043_v8 = vpop.eup %1042  ;;  %v689_v37 = vld [vmem:[#allocation2 + $0xb0] sm:$0xff] }
 0x141   : > { %1050 = vrcp.f32 %v707_v39  ;;  %v735_v15 = vmul.f32 %v1043_v8, %v675_v63 }
 0x142   : > { %1052 = vrcp.f32 %v708_v41  ;;  %v1045_v13 = vpop.eup %1044  ;;  %v757_v41 = vld [vmem:[%s1181_s5 + $0x50] sm:$0xff] }
 0x143   : > { %1054 = vrcp.f32 %v709_v44  ;;  %v736_v20 = vmul.f32 %v1045_v13, %v677_v6  ;;  %v767_v24 = vadd.f32 %v751_v11, %v735_v15 }
 0x144   : > { %1056 = vrcp.f32 %v710_v47  ;;  %v693_v47 = vld [vmem:[#allocation2 + $0xd0] sm:$0xff] }
 0x145   : > { %1058 = vrcp.f32 %v711_v52  ;;  %v768_v29 = vadd.f32 %v752_v16, %v736_v20  ;;  %783 = vst [vmem:[%s1186_s8 + $0x20] sm:$0xff] %v767_v24  ;;  %v695_v52 = vld [vmem:[#allocation2 + $0xe0] sm:$0xff] }
 0x146   : > { %1060 = vrcp.f32 %v712_v58 }
 0x147   : > { %1062 = vrcp.f32 %v713_v0  ;;  %784 = vst [vmem:[%s1186_s8 + $0x28] sm:$0xff] %v768_v29 }
 0x148   : > { %1064 = vrcp.f32 %v714_v7  ;;  %v1047_v18 = vpop.eup %1046 }
 0x149   : > { %v737_v25 = vmul.f32 %v1047_v18, %v679_v12 }
 0x14a   : > { %v1049_v23 = vpop.eup %1048 }
 0x14b   : > { %v1051_v28 = vpop.eup %1050  ;;  %v738_v30 = vmul.f32 %v1049_v23, %v681_v17  ;;  %v769_v34 = vadd.f32 %v753_v21, %v737_v25 }
 0x14c   : > { %v1053_v33 = vpop.eup %1052  ;;  %v739_v35 = vmul.f32 %v1051_v28, %v683_v22 }
 0x14d   : > { %v1055_v38 = vpop.eup %1054  ;;  %v770_v39 = vadd.f32 %v754_v26, %v738_v30  ;;  %v740_v40 = vmul.f32 %v1053_v33, %v685_v27  ;;  %785 = vst [vmem:[%s1186_s8 + $0x30] sm:$0xff] %v769_v34 }
 0x14e   : > { %v1057_v43 = vpop.eup %1056  ;;  %v771_v44 = vadd.f32 %v755_v31, %v739_v35  ;;  %v741_v45 = vmul.f32 %v1055_v38, %v687_v32 }
 0x14f   : > { %v1059_v48 = vpop.eup %1058  ;;  %786 = vst [vmem:[%s1186_s8 + $0x38] sm:$0xff] %v770_v39  ;;  %v772_v49 = vadd.f32 %v756_v36, %v740_v40  ;;  %v742_v50 = vmul.f32 %v1057_v43, %v689_v37 }
 0x150   : > { %v1061_v53 = vpop.eup %1060  ;;  %787 = vst [vmem:[%s1186_s8 + $0x40] sm:$0xff] %v771_v44  ;;  %v773_v54 = vadd.f32 %v757_v41, %v741_v45  ;;  %v743_v55 = vmul.f32 %v1059_v48, %v691_v42 }
 0x151   : > { %v1063_v58 = vpop.eup %1062  ;;  %788 = vst [vmem:[%s1186_s8 + $0x48] sm:$0xff] %v772_v49  ;;  %v774_v59 = vadd.f32 %v758_v46, %v742_v50  ;;  %v744_v60 = vmul.f32 %v1061_v53, %v693_v47 }
 0x152   : > { %v1065_v62 = vpop.eup %1064  ;;  %789 = vst [vmem:[%s1186_s8 + $0x50] sm:$0xff] %v773_v54  ;;  %v775_v63 = vadd.f32 %v759_v51, %v743_v55  ;;  %v745_v0 = vmul.f32 %v1063_v58, %v695_v52 }
 0x153   : > { %790 = vst [vmem:[%s1186_s8 + $0x58] sm:$0xff] %v774_v59  ;;  %v776_v2 = vadd.f32 %v760_v56, %v744_v60  ;;  %v746_v3 = vmul.f32 %v1065_v62, %v697_v57 }
 0x154   : > { %791 = vst [vmem:[%s1186_s8 + $0x60] sm:$0xff] %v775_v63  ;;  %v777_v4 = vadd.f32 %v761_v61, %v745_v0 }
 0x155   : > { %792 = vst [vmem:[%s1186_s8 + $0x68] sm:$0xff] %v776_v2  ;;  %v778_v5 = vadd.f32 %v762_v1, %v746_v3 }
 0x156   : > { %793 = vst [vmem:[%s1186_s8 + $0x70] sm:$0xff] %v777_v4 }
 0x157   : > { %794 = vst [vmem:[%s1186_s8 + $0x78] sm:$0xff] %v778_v5 }
 0x158 PF: > { %s13_s16 = sadd.s32 1, %s1104_s16   ;;  %s1325_s12 = smov %s1096_s14 }
 0x159   : > { %p10_p10 = scmp.ge.s32.totalorder %s13_s16, 8   ;;  %s1326_s13 = smov %s1100_s15 }
 0x15a   : > { %s1327_s14 = smov %s1330_s17  ;;  %s1328_s15 = smov %s1334_s18 }
 0x15b   :  { %12 = sbr.rel (!%p10_p10) target bundleno = 3 (0x3), region = 76 }

// kernel: alignn_conv.22
= control target key start
LH: loop header
LB: loop body
LE: loop exit
PB: predicated region body
PF: predicated region fallthrough
CT: control target
= control target key end

     0   :  { %s2281_s24 = smov 0   ;;  %s2283_s25 = smov 0   ;;  %s2683_s0 = inlined_call_operand.vmem [shape: s32[384,1], index: 0, kind: input, shape index: {}]   ;;  %s2684_s1 = inlined_call_operand.vmem [shape: s32[384,1], index: 1, kind: input, shape index: {}]   ;;  %s2685_s2 = inlined_call_operand.vmem [shape: f32[256,384], index: 2, kind: input, shape index: {}]   ;;  %s2686_s3 = inlined_call_operand.vmem [shape: f32[384,128], index: 3, kind: input, shape index: {}]   ;;  %s2687_s4 = inlined_call_operand.vmem [shape: f32[128,128], index: 4, kind: input, shape index: {}]   ;;  %s2688_s5 = inlined_call_operand.vmem [shape: f32[1,128], index: 5, kind: input, shape index: {}]   ;;  %s2689_s6 = inlined_call_operand.vmem [shape: f32[384,128], index: 6, kind: output, shape index: {0}]   ;;  %s2690_s7 = inlined_call_operand.vmem [shape: bf16[384,256], index: 7, kind: output, shape index: {1}]  }
   0x1   :  { %s2285_s26 = smov 0   ;;  %s2287_s27 = smov 0  }
   0x2   :  { %s2289_s28 = smov 0  }
   0x3 LB: > { %s27_s29 = sadd.s32 1, %s2228_s26  ;;  %s30_s30 = sadd.s32 1, %s2232_s27  ;;  %s2236_s28 = sphi %s2289_s28, %s18_s28   ;;  %s2232_s27 = sphi %s2287_s27, %s2694_s27   ;;  %s2228_s26 = sphi %s2285_s26, %s2693_s26   ;;  %s2224_s25 = sphi %s2283_s25, %s2692_s25   ;;  %s2220_s24 = sphi %s2281_s24, %s2691_s24  }
   0x4   : > { %p28_p0 = scmp.ge.s32.totalorder %s27_s29, 2  ;;  %p1755_p1 = scmp.ge.s32.totalorder %s2236_s28, 1 }
   0x5   : > { %p287_p2 = scmp.lt.s32.totalorder %s2236_s28, 7 }
   0x6   : > { %s2696_s29 = smov (%p28_p0, %s27_s29), 0  ;;  %s2698_s30 = smov (!%p28_p0, %s30_s30), %s2232_s27 }
   0x7   : > { %p288_p3 = pnand %p1755_p1, %p287_p2  ;;  %p32_p4 = scmp.ge.s32.totalorder %s2698_s30, 3 }
   0x8   : > { %s1756_s8 = sshll.u32 (!%p288_p3), %s2224_s25, 4  ;;  %s1760_s9 = sshll.u32 (!%p288_p3), %s2220_s24, 4 }
   0x9   : > { %s2700_s30 = smov (%p32_p4, %s2698_s30), 0  ;;  %291 = sbr.rel (%p288_p3) target bundleno = 741 (0x2e5), region = 44 }
   0xa   : > { %p342_p5 = scmp.lt.s32.totalorder (!%p288_p3), %s1756_s8, 47  ;;  %p354_p6 = scmp.lt.s32.totalorder (!%p288_p3), %s1760_s9, 31 }
   0xb   : > { %p1769_p7 = scmp.ne.s32.totalorder (!%p288_p3), %s2220_s24, 0 }
  0x10   : > { %s2702_s8 = smov (!%p342_p5, %s1756_s8), 47  ;;  %s2704_s9 = smov (!%p354_p6, %s1760_s9), 31 }
  0x11   : > { %s1757_s10 = sshll.u32 %s2702_s8, 3  ;;  %s2088_s17 = smul.u32 24, %s2704_s9  ;;  %v2238_v0 = vmov (!%p1769_p7), 0.0  }
  0x12   : > { %s2317_s13 = scalar_lea.vmem %s2683_s0, %s1757_s10  ;;  %s2322_s16 = scalar_lea.vmem %s2684_s1, %s1757_s10  ;;  %384 = vst [vmem:[#allocation2] sm:$0xff] (!%p1769_p7), %v2238_v0  ;;  %385 = vst [vmem:[#allocation2 + $0x8] sm:$0xff] (!%p1769_p7), %v2238_v0 }
  0x13   : > { %s2327_s20 = scalar_lea.vmem %s2686_s3, %s1757_s10  ;;  %s2332_s23 = scalar_lea.vmem %s2689_s6, %s1757_s10  ;;  %386 = vst [vmem:[#allocation2 + $0x10] sm:$0xff] (!%p1769_p7), %v2238_v0  ;;  %387 = vst [vmem:[#allocation2 + $0x18] sm:$0xff] (!%p1769_p7), %v2238_v0 }
  0x14   : > { %s2337_s11 = scalar_lea.vmem %s2690_s7, %s1757_s10  ;;  %s2342_s15 = scalar_lea.vmem %s2685_s2, %s2088_s17  ;;  %388 = vst [vmem:[#allocation2 + $0x20] sm:$0xff] (!%p1769_p7), %v2238_v0  ;;  %389 = vst [vmem:[#allocation2 + $0x28] sm:$0xff] (!%p1769_p7), %v2238_v0 }
  0x15   : > { %383 = sbr.rel (%p1769_p7) target bundleno = 42 (0x2a), region = 48  ;;  %390 = vst [vmem:[#allocation2 + $0x30] sm:$0xff] (!%p1769_p7), %v2238_v0  ;;  %391 = vst [vmem:[#allocation2 + $0x38] sm:$0xff] (!%p1769_p7), %v2238_v0 }
  0x16   : > { %392 = vst [vmem:[#allocation2 + $0x40] sm:$0xff] (!%p1769_p7), %v2238_v0  ;;  %393 = vst [vmem:[#allocation2 + $0x48] sm:$0xff] (!%p1769_p7), %v2238_v0 }
  0x17   : > { %394 = vst [vmem:[#allocation2 + $0x50] sm:$0xff] (!%p1769_p7), %v2238_v0  ;;  %395 = vst [vmem:[#allocation2 + $0x58] sm:$0xff] (!%p1769_p7), %v2238_v0 }
  0x18   : > { %396 = vst [vmem:[#allocation2 + $0x60] sm:$0xff] (!%p1769_p7), %v2238_v0  ;;  %397 = vst [vmem:[#allocation2 + $0x68] sm:$0xff] (!%p1769_p7), %v2238_v0 }
  0x19   : > { %398 = vst [vmem:[#allocation2 + $0x70] sm:$0xff] (!%p1769_p7), %v2238_v0  ;;  %399 = vst [vmem:[#allocation2 + $0x78] sm:$0xff] (!%p1769_p7), %v2238_v0 }
  0x1a   : > { %400 = vst [vmem:[#allocation2 + $0x80] sm:$0xff] (!%p1769_p7), %v2238_v0  ;;  %401 = vst [vmem:[#allocation2 + $0x88] sm:$0xff] (!%p1769_p7), %v2238_v0 }
  0x1b   : > { %402 = vst [vmem:[#allocation2 + $0x90] sm:$0xff] (!%p1769_p7), %v2238_v0  ;;  %403 = vst [vmem:[#allocation2 + $0x98] sm:$0xff] (!%p1769_p7), %v2238_v0 }
  0x1c   : > { %404 = vst [vmem:[#allocation2 + $0xa0] sm:$0xff] %v2238_v0  ;;  %405 = vst [vmem:[#allocation2 + $0xa8] sm:$0xff] %v2238_v0 }
  0x1d   : > { %406 = vst [vmem:[#allocation2 + $0xb0] sm:$0xff] %v2238_v0  ;;  %407 = vst [vmem:[#allocation2 + $0xb8] sm:$0xff] %v2238_v0 }
  0x1e   : > { %408 = vst [vmem:[#allocation2 + $0xc0] sm:$0xff] %v2238_v0  ;;  %409 = vst [vmem:[#allocation2 + $0xc8] sm:$0xff] %v2238_v0 }
  0x1f   : > { %410 = vst [vmem:[#allocation2 + $0xd0] sm:$0xff] %v2238_v0  ;;  %411 = vst [vmem:[#allocation2 + $0xd8] sm:$0xff] %v2238_v0 }
  0x20   : > { %412 = vst [vmem:[#allocation2 + $0xe0] sm:$0xff] %v2238_v0  ;;  %413 = vst [vmem:[#allocation2 + $0xe8] sm:$0xff] %v2238_v0 }
  0x21   : > { %414 = vst [vmem:[#allocation2 + $0xf0] sm:$0xff] %v2238_v0  ;;  %415 = vst [vmem:[#allocation2 + $0xf8] sm:$0xff] %v2238_v0 }
  0x22   : > { %416 = vst [vmem:[#allocation2 + $0x100] sm:$0xff] %v2238_v0  ;;  %417 = vst [vmem:[#allocation2 + $0x108] sm:$0xff] %v2238_v0 }
  0x23   : > { %418 = vst [vmem:[#allocation2 + $0x110] sm:$0xff] %v2238_v0  ;;  %419 = vst [vmem:[#allocation2 + $0x118] sm:$0xff] %v2238_v0 }
  0x24   : > { %420 = vst [vmem:[#allocation2 + $0x120] sm:$0xff] %v2238_v0  ;;  %421 = vst [vmem:[#allocation2 + $0x128] sm:$0xff] %v2238_v0 }
  0x25   : > { %422 = vst [vmem:[#allocation2 + $0x130] sm:$0xff] %v2238_v0  ;;  %423 = vst [vmem:[#allocation2 + $0x138] sm:$0xff] %v2238_v0 }
  0x26   : > { %424 = vst [vmem:[#allocation2 + $0x140] sm:$0xff] %v2238_v0  ;;  %425 = vst [vmem:[#allocation2 + $0x148] sm:$0xff] %v2238_v0 }
  0x27   : > { %426 = vst [vmem:[#allocation2 + $0x150] sm:$0xff] %v2238_v0  ;;  %427 = vst [vmem:[#allocation2 + $0x158] sm:$0xff] %v2238_v0 }
  0x28   : > { %428 = vst [vmem:[#allocation2 + $0x160] sm:$0xff] %v2238_v0  ;;  %429 = vst [vmem:[#allocation2 + $0x168] sm:$0xff] %v2238_v0 }
  0x29   : > { %430 = vst [vmem:[#allocation2 + $0x170] sm:$0xff] %v2238_v0  ;;  %431 = vst [vmem:[#allocation2 + $0x178] sm:$0xff] %v2238_v0 }
  0x2a PF: > { %v439_v1 = vld [vmem:[%s2317_s13 + $0x10] sm:$0xff]  ;;  %v437_v2 = vld [vmem:[%s2317_s13] sm:$0xff]  ;;  %v2239_v3 = vmov 0   ;;  %v440_v4 = vld [vmem:[%s2317_s13 + $0x18] sm:$0xff]  ;;  %s1770_s9 = sshll.u32 %s2220_s24, 7  ;;  %p1835_p8 = scmp.ne.s32.totalorder %s2220_s24, 1 }
  0x2b   : > { %2133 = vset.pattern.permute.xlu1 %v2239_v3  ;;  %2132 = vset.pattern.permute.xlu0 %v2239_v3  ;;  %v438_v5 = vld [vmem:[%s2317_s13 + $0x8] sm:$0xff]  ;;  %v561_v7 = vld [vmem:[%s2322_s16 + $0x20] sm:$0xff]  ;;  %v680_v11 = vld [vmem:[%s2342_s15 + $0x18] sm:$0xff] }
  0x2c   : > { %460 = vperm.xlu1 %2133, %v439_v1   ;;  %454 = vperm.xlu0 %2132, %v437_v2   ;;  %v562_v6 = vld [vmem:[%s2322_s16 + $0x28] sm:$0xff]  ;;  %v441_v9 = vld [vmem:[%s2317_s13 + $0x20] sm:$0xff]  ;;  %v679_v12 = vld [vmem:[%s2342_s15 + $0x10] sm:$0xff] }
  0x2d   : > { %978 = vmatprep.mubr.bf16.mxu1 %v2239_v3  ;;  %v442_v8 = vld [vmem:[%s2317_s13 + $0x28] sm:$0xff]  ;;  %v677_v10 = vld [vmem:[%s2342_s15] sm:$0xff]  ;;  %v683_v16 = vld [vmem:[%s2342_s15 + $0x30] sm:$0xff] }
  0x2e   : > { %v682_v13 = vld [vmem:[%s2342_s15 + $0x28] sm:$0xff]  ;;  %v725_v14 = vpack.c.bf16 %v680_v11, %v677_v10  ;;  %v444_v19 = vld [vmem:[%s2317_s13 + $0x38] sm:$0xff]  ;;  %v443_v20 = vld [vmem:[%s2317_s13 + $0x30] sm:$0xff] }
  0x2f   : > { %v2360_v15 = vpack.c.bf16 %v682_v13, %v679_v12  ;;  %v686_v17 = vld [vmem:[%s2342_s15 + $0x48] sm:$0xff]  ;;  %v681_v22 = vld [vmem:[%s2342_s15 + $0x20] sm:$0xff]  ;;  %v688_v24 = vld [vmem:[%s2342_s15 + $0x58] sm:$0xff] }
  0x30   : > { %463 = vperm.xlu1 %2133, %v440_v4   ;;  %457 = vperm.xlu0 %2132, %v438_v5   ;;  %v678_v18 = vld [vmem:[%s2342_s15 + $0x8] sm:$0xff]  ;;  %v728_v21 = vpack.c.bf16 %v686_v17, %v683_v16  ;;  %v685_v23 = vld [vmem:[%s2342_s15 + $0x40] sm:$0xff]  ;;  %v692_v28 = vld [vmem:[%s2342_s15 + $0x78] sm:$0xff] }
  0x31   : > { %v2370_v25 = vpack.c.bf16 %v681_v22, %v678_v18  ;;  %v2372_v26 = vpack.c.bf16 %v688_v24, %v685_v23  ;;  %v689_v27 = vld [vmem:[%s2342_s15 + $0x60] sm:$0xff]  ;;  %v684_v29 = vld [vmem:[%s2342_s15 + $0x38] sm:$0xff]  ;;  %1936 = vmatprep.subr.bf16.mxu0 %v725_v14  ;;  %2056 = vmatprep.subr.bf16.mxu1 %v2360_v15  ;;  %v687_v30 = vld [vmem:[%s2342_s15 + $0x50] sm:$0xff] }
  0x32   : > { %v691_v31 = vld [vmem:[%s2342_s15 + $0x70] sm:$0xff]  ;;  %v694_v32 = vld [vmem:[%s2342_s15 + $0x88] sm:$0xff]  ;;  %1937 = vmatpush3.bf16.msra.mxu0 %v725_v14  ;;  %v2382_v33 = vpack.c.bf16 %v687_v30, %v684_v29  ;;  %v731_v34 = vpack.c.bf16 %v692_v28, %v689_v27  ;;  %v693_v38 = vld [vmem:[%s2342_s15 + $0x80] sm:$0xff] }
  0x33   : > { %2064 = vmatpush1.bf16.msra.mxu1 %v2370_v25  ;;  %1938 = vmatprep.subr.bf16.mxu0 %v728_v21  ;;  %v2385_v35 = vpack.c.bf16 %v694_v32, %v691_v31  ;;  %v695_v36 = vld [vmem:[%s2342_s15 + $0x90] sm:$0xff]  ;;  %v690_v37 = vld [vmem:[%s2342_s15 + $0x68] sm:$0xff]  ;;  %v697_v40 = vld [vmem:[%s2342_s15 + $0xa0] sm:$0xff] }
  0x34   : > { %589 = vperm.xlu1 %2133, %v562_v6   ;;  %586 = vperm.xlu0 %2132, %v561_v7   ;;  %v698_v39 = vld [vmem:[%s2342_s15 + $0xa8] sm:$0xff]  ;;  %v700_v41 = vld [vmem:[%s2342_s15 + $0xb8] sm:$0xff]  ;;  %v563_v43 = vld [vmem:[%s2322_s16 + $0x30] sm:$0xff]  ;;  %v2396_v44 = vpack.c.bf16 %v693_v38, %v690_v37 }
  0x35   : > { %2057 = vmatprep.subr.bf16.mxu1 %v2372_v26  ;;  %v564_v42 = vld [vmem:[%s2322_s16 + $0x38] sm:$0xff]  ;;  %v734_v45 = vpack.c.bf16 %v698_v39, %v695_v36  ;;  %v2399_v46 = vpack.c.bf16 %v700_v41, %v697_v40  ;;  %v701_v47 = vld [vmem:[%s2342_s15 + $0xc0] sm:$0xff]  ;;  %v699_v49 = vld [vmem:[%s2342_s15 + $0xb0] sm:$0xff] }
  0x36   : > { %1939 = vmatpush3.bf16.msra.mxu0 %v728_v21  ;;  %v696_v48 = vld [vmem:[%s2342_s15 + $0x98] sm:$0xff]  ;;  %v703_v51 = vld [vmem:[%s2342_s15 + $0xd0] sm:$0xff]  ;;  %v706_v52 = vld [vmem:[%s2342_s15 + $0xe8] sm:$0xff] }
  0x37   : > { %2065 = vmatpush1.bf16.msra.mxu1 %v2382_v33  ;;  %1940 = vmatprep.subr.bf16.mxu0 %v731_v34  ;;  %v704_v50 = vld [vmem:[%s2342_s15 + $0xd8] sm:$0xff]  ;;  %v446_v53 = vld [vmem:[%s2317_s13 + $0x48] sm:$0xff]  ;;  %v445_v54 = vld [vmem:[%s2317_s13 + $0x40] sm:$0xff]  ;;  %v2410_v55 = vpack.c.bf16 %v699_v49, %v696_v48  ;;  %v2413_v57 = vpack.c.bf16 %v706_v52, %v703_v51  ;;  %v435_v51 = vstv %s1770_s9 }
  0x38   : > { %469 = vperm.xlu1 %2133, %v442_v8   ;;  %466 = vperm.xlu0 %2132, %v441_v9   ;;  %v737_v56 = vpack.c.bf16 %v704_v50, %v701_v47  ;;  %v707_v58 = vld [vmem:[%s2342_s15 + $0xf0] sm:$0xff]  ;;  %v702_v59 = vld [vmem:[%s2342_s15 + $0xc8] sm:$0xff]  ;;  %v705_v60 = vld [vmem:[%s2342_s15 + $0xe0] sm:$0xff] }
  0x39   : > { %2058 = vmatprep.subr.bf16.mxu1 %v2385_v35  ;;  %v710_v61 = vld [vmem:[%s2342_s15 + $0x108] sm:$0xff]  ;;  %v709_v62 = vld [vmem:[%s2342_s15 + $0x100] sm:$0xff]  ;;  %v712_v63 = vld [vmem:[%s2342_s15 + $0x118] sm:$0xff]  ;;  %v2424_v2 = vpack.c.bf16 %v705_v60, %v702_v59  ;;  %v2240_v59 = vmov 1.0|1.0  }
  0x3a   : > { %1941 = vmatpush3.bf16.msra.mxu0 %v731_v34  ;;  %v448_v0 = vld [vmem:[%s2317_s13 + $0x58] sm:$0xff]  ;;  %v447_v1 = vld [vmem:[%s2317_s13 + $0x50] sm:$0xff]  ;;  %v740_v4 = vpack.c.bf16 %v710_v61, %v707_v58  ;;  %v2427_v5 = vpack.c.bf16 %v712_v63, %v709_v62  ;;  %v713_v6 = vld [vmem:[%s2342_s15 + $0x120] sm:$0xff] }
  0x3b   : > { %2066 = vmatpush1.bf16.msra.mxu1 %v2396_v44  ;;  %1942 = vmatprep.subr.bf16.mxu0 %v734_v45  ;;  %v708_v7 = vld [vmem:[%s2342_s15 + $0xf8] sm:$0xff]  ;;  %v711_v8 = vld [vmem:[%s2342_s15 + $0x110] sm:$0xff]  ;;  %v718_v11 = vld [vmem:[%s2342_s15 + $0x148] sm:$0xff] }
  0x3c   : > { %475 = vperm.xlu1 %2133, %v444_v19   ;;  %472 = vperm.xlu0 %2132, %v443_v20   ;;  %v716_v9 = vld [vmem:[%s2342_s15 + $0x138] sm:$0xff]  ;;  %v715_v10 = vld [vmem:[%s2342_s15 + $0x130] sm:$0xff]  ;;  %v566_v12 = vld [vmem:[%s2322_s16 + $0x48] sm:$0xff]  ;;  %v2438_v14 = vpack.c.bf16 %v711_v8, %v708_v7 }
  0x3d   : > { %2059 = vmatprep.subr.bf16.mxu1 %v2399_v46  ;;  %v565_v13 = vld [vmem:[%s2322_s16 + $0x40] sm:$0xff]  ;;  %v743_v16 = vpack.c.bf16 %v716_v9, %v713_v6  ;;  %v2441_v17 = vpack.c.bf16 %v718_v11, %v715_v10  ;;  %v719_v18 = vld [vmem:[%s2342_s15 + $0x150] sm:$0xff]  ;;  %v714_v19 = vld [vmem:[%s2342_s15 + $0x128] sm:$0xff] }
  0x3e   : > { %1943 = vmatpush3.bf16.msra.mxu0 %v734_v45  ;;  %v717_v20 = vld [vmem:[%s2342_s15 + $0x140] sm:$0xff]  ;;  %v722_v21 = vld [vmem:[%s2342_s15 + $0x168] sm:$0xff]  ;;  %v724_v23 = vld [vmem:[%s2342_s15 + $0x178] sm:$0xff] }
  0x3f   : > { %2067 = vmatpush1.bf16.msra.mxu1 %v2410_v55  ;;  %1944 = vmatprep.subr.bf16.mxu0 %v737_v56  ;;  %v721_v22 = vld [vmem:[%s2342_s15 + $0x160] sm:$0xff]  ;;  %v450_v24 = vld [vmem:[%s2317_s13 + $0x68] sm:$0xff]  ;;  %v2452_v28 = vpack.c.bf16 %v717_v20, %v714_v19  ;;  %v746_v29 = vpack.c.bf16 %v722_v21, %v719_v18  ;;  %v720_v31 = vld [vmem:[%s2342_s15 + $0x158] sm:$0xff] }
  0x40   : > { %595 = vperm.xlu1 %2133, %v564_v42   ;;  %592 = vperm.xlu0 %2132, %v563_v43   ;;  %v449_v27 = vld [vmem:[%s2317_s13 + $0x60] sm:$0xff]  ;;  %v2455_v30 = vpack.c.bf16 %v724_v23, %v721_v22  ;;  %v723_v32 = vld [vmem:[%s2342_s15 + $0x170] sm:$0xff]  ;;  %v452_v34 = vld [vmem:[%s2317_s13 + $0x78] sm:$0xff] }
  0x41   : > { %2060 = vmatprep.subr.bf16.mxu1 %v2413_v57  ;;  %v451_v36 = vld [vmem:[%s2317_s13 + $0x70] sm:$0xff]  ;;  %v2462_v37 = vpack.c.bf16 %v723_v32, %v720_v31  ;;  %v568_v38 = vld [vmem:[%s2322_s16 + $0x58] sm:$0xff]  ;;  %v558_v40 = vld [vmem:[%s2322_s16 + $0x8] sm:$0xff] }
  0x42   : > { %1945 = vmatpush3.bf16.msra.mxu0 %v737_v56  ;;  %v567_v39 = vld [vmem:[%s2322_s16 + $0x50] sm:$0xff]  ;;  %v557_v41 = vld [vmem:[%s2322_s16] sm:$0xff]  ;;  %v570_v42 = vld [vmem:[%s2322_s16 + $0x68] sm:$0xff] }
  0x43   : > { %2068 = vmatpush1.bf16.msra.mxu1 %v2424_v2  ;;  %1946 = vmatprep.subr.bf16.mxu0 %v740_v4  ;;  %v569_v43 = vld [vmem:[%s2322_s16 + $0x60] sm:$0xff]  ;;  %v560_v45 = vld [vmem:[%s2322_s16 + $0x18] sm:$0xff]  ;;  %v559_v47 = vld [vmem:[%s2322_s16 + $0x10] sm:$0xff] }
  0x44   : > { %481 = vperm.xlu1 %2133, %v446_v53   ;;  %478 = vperm.xlu0 %2132, %v445_v54   ;;  %v572_v48 = vld [vmem:[%s2322_s16 + $0x78] sm:$0xff]  ;;  %v571_v49 = vld [vmem:[%s2322_s16 + $0x70] sm:$0xff]  ;;  %v749_v19 = vld [vmem:[#allocation2] sm:$0xff] }
  0x45   : > { %2061 = vmatprep.subr.bf16.mxu1 %v2427_v5  ;;  %v751_v18 = vld [vmem:[#allocation2 + $0x30] sm:$0xff]  ;;  %v902_v21 = vld [vmem:[#allocation2 + $0x68] sm:$0xff]  ;;  %v904_v31 = vld [vmem:[#allocation2 + $0x80] sm:$0xff] }
  0x46   : > { %1947 = vmatpush3.bf16.msra.mxu0 %v740_v4 }
  0x47   : > { %2069 = vmatpush1.bf16.msra.mxu1 %v2438_v14  ;;  %1948 = vmatprep.subr.bf16.mxu0 %v743_v16 }
  0x48   : > { %487 = vperm.xlu1 %2133, %v448_v0   ;;  %484 = vperm.xlu0 %2132, %v447_v1  }
  0x49   : > { %2062 = vmatprep.subr.bf16.mxu1 %v2441_v17 }
  0x4a   : > { %1949 = vmatpush3.bf16.msra.mxu0 %v743_v16 }
  0x4b   : > { %2070 = vmatpush1.bf16.msra.mxu1 %v2452_v28  ;;  %1950 = vmatprep.subr.bf16.mxu0 %v746_v29 }
  0x4c   : > { %601 = vperm.xlu1 %2133, %v566_v12   ;;  %598 = vperm.xlu0 %2132, %v565_v13  }
  0x4d   : > { %2063 = vmatprep.subr.bf16.mxu1 %v2455_v30 }
  0x4e   : > { %1951 = vmatpush3.bf16.msra.mxu0 %v746_v29 }
  0x4f   : > { %2071 = vmatpush1.bf16.msra.mxu1 %v2462_v37  ;;  %926 = vmatprep.subr.bf16.mxu0 %v2360_v15  ;;  %v432_v15 = vlaneseq }
  0x50   : > { %493 = vperm.xlu1 %2133, %v450_v24   ;;  %490 = vperm.xlu0 %2132, %v449_v27   ;;  %v750_v24 = vld [vmem:[#allocation2 + $0x18] sm:$0xff]  ;;  %v903_v27 = vld [vmem:[#allocation2 + $0x70] sm:$0xff] }
  0x51   : > { %v433_v50 = vand.u32 127, %v432_v15  ;;  %v756_v15 = vld [vmem:[#allocation2 + $0xa8] sm:$0xff] }
  0x53   : > { %v2478_v54 = vadd.s32 %v435_v51, %v433_v50 }
  0x54   : > { %499 = vperm.xlu1 %2133, %v452_v34   ;;  %496 = vperm.xlu0 %2132, %v451_v36  }
  0x58   : > { %607 = vperm.xlu1 %2133, %v568_v38   ;;  %604 = vperm.xlu0 %2132, %v567_v39   ;;  %v905_v38 = vld [vmem:[#allocation2 + $0x88] sm:$0xff] }
  0x5c   : > { %577 = vperm.xlu1 %2133, %v558_v40   ;;  %574 = vperm.xlu0 %2132, %v557_v41  }
  0x60   : > { %613 = vperm.xlu1 %2133, %v570_v42   ;;  %610 = vperm.xlu0 %2132, %v569_v43  }
  0x64   : > { %583 = vperm.xlu1 %2133, %v560_v45   ;;  %580 = vperm.xlu0 %2132, %v559_v47   ;;  %v755_v47 = vld [vmem:[#allocation2 + $0x90] sm:$0xff] }
  0x68   : > { %619 = vperm.xlu1 %2133, %v572_v48   ;;  %616 = vperm.xlu0 %2132, %v571_v49   ;;  %v753_v48 = vld [vmem:[#allocation2 + $0x60] sm:$0xff] }
  0xab   : > { %v461_v52 = vpop.permute.xlu1 %460  ;;  %v455_v53 = vpop.permute.xlu0 %454 }
  0xac   : > { %vm503_vm0 = vcmp.eq.s32.totalorder %v461_v52, %v2478_v54  ;;  %vm501_vm3 = vcmp.eq.s32.totalorder %v455_v53, %v2478_v54  ;;  %v754_v52 = vld [vmem:[#allocation2 + $0x78] sm:$0xff] }
  0xaf   : > { %v464_v56 = vpop.permute.xlu1 %463  ;;  %v458_v58 = vpop.permute.xlu0 %457 }
  0xb0   : > { %vm504_vm1 = vcmp.eq.s32.totalorder %v464_v56, %v2478_v54  ;;  %vm502_vm2 = vcmp.eq.s32.totalorder %v458_v58, %v2478_v54  ;;  %v906_v56 = vld [vmem:[#allocation2 + $0x98] sm:$0xff] }
  0xb1   : > { %vm1805_vm4 = vmpackc.low %vm504_vm1, %vm503_vm0 }
  0xb2   : > { %vm1803_vm5 = vmpackc.low %vm502_vm2, %vm501_vm3 }
  0xb3   : > { %1952 = vmatprep.mubr.msk.bf16.mxu0 %vm1803_vm5, %v2240_v59  ;;  %v590_v60 = vpop.permute.xlu1 %589  ;;  %v587_v61 = vpop.permute.xlu0 %586 }
  0xb4   : > { %vm626_vm6 = vcmp.eq.s32.totalorder %v590_v60, %v2478_v54  ;;  %vm625_vm7 = vcmp.eq.s32.totalorder %v587_v61, %v2478_v54  ;;  %1953 = vmatmul.mubr.msk.bf16.vlgmr.msra.gmra.mrb[0].mxu0 %vm1805_vm4, %v2240_v59  ;;  %v907_v60 = vld [vmem:[#allocation2 + $0xa0] sm:$0xff] }
  0xb5   : > { %vm1823_vm8 = vmpackc.low %vm626_vm6, %vm625_vm7  ;;  %927 = vmatpush1.bf16.msra.mxu0 %v2370_v25 }
  0xb6   : > { %1824 = vmatmul.mubr.msk.bf16.vlgmr.msra.gmra.mrb[0].mxu1 %vm1823_vm8, %v2240_v59  ;;  %928 = vmatprep.subr.bf16.mxu0 %v2372_v26 }
  0xb7   : > { %v470_v62 = vpop.permute.xlu1 %469  ;;  %v467_v63 = vpop.permute.xlu0 %466  ;;  %988 = vmatprep.mubr.bf16.mxu1 %v2239_v3 }
  0xb8   : > { %vm506_vm9 = vcmp.eq.s32.totalorder %v470_v62, %v2478_v54  ;;  %vm505_vm10 = vcmp.eq.s32.totalorder %v467_v63, %v2478_v54  ;;  %v908_v63 = vld [vmem:[#allocation2 + $0xb0] sm:$0xff] }
  0xb9   : > { %vm1807_vm11 = vmpackc.low %vm506_vm9, %vm505_vm10  ;;  %929 = vmatpush1.bf16.msra.mxu0 %v2382_v33 }
  0xba   : > { %1956 = vmatprep.mubr.msk.bf16.mxu0 %vm1807_vm11, %v2240_v59  ;;  %930 = vmatprep.subr.bf16.mxu0 %v2385_v35 }
  0xbb   : > { %v476_v25 = vpop.permute.xlu1 %475  ;;  %v473_v0 = vpop.permute.xlu0 %472 }
  0xbc   : > { %vm508_vm12 = vcmp.eq.s32.totalorder %v476_v25, %v2478_v54  ;;  %vm507_vm13 = vcmp.eq.s32.totalorder %v473_v0, %v2478_v54 }
  0xbd   : > { %vm1809_vm14 = vmpackc.low %vm508_vm12, %vm507_vm13  ;;  %931 = vmatpush1.bf16.msra.mxu0 %v2396_v44 }
  0xbe   : > { %1957 = vmatmul.mubr.msk.bf16.gmra.mrb[4].mxu0 %vm1809_vm14, %v2240_v59  ;;  %932 = vmatprep.subr.bf16.mxu0 %v2399_v46 }
  0xbf   : > { %v596_v26 = vpop.permute.xlu1 %595  ;;  %v593_v1 = vpop.permute.xlu0 %592 }
  0xc0   : > { %vm628_vm15 = vcmp.eq.s32.totalorder %v596_v26, %v2478_v54  ;;  %vm627_vm0 = vcmp.eq.s32.totalorder %v593_v1, %v2478_v54  ;;  %v909_v26 = vld [vmem:[#allocation2 + $0xb8] sm:$0xff] }
  0xc1   : > { %vm1825_vm1 = vmpackc.low %vm628_vm15, %vm627_vm0  ;;  %933 = vmatpush1.bf16.msra.mxu0 %v2410_v55 }
  0xc2   : > { %1826 = vmatmul.mubr.msk.bf16.gmra.mrb[4].mxu1 %vm1825_vm1, %v2240_v59  ;;  %934 = vmatprep.subr.bf16.mxu0 %v2413_v57 }
  0xc3   : > { %v482_v33 = vpop.permute.xlu1 %481  ;;  %v479_v35 = vpop.permute.xlu0 %478  ;;  %998 = vmatprep.mubr.bf16.mxu1 %v2239_v3 }
  0xc4   : > { %vm510_vm2 = vcmp.eq.s32.totalorder %v482_v33, %v2478_v54  ;;  %vm509_vm3 = vcmp.eq.s32.totalorder %v479_v35, %v2478_v54 }
  0xc5   : > { %vm1811_vm4 = vmpackc.low %vm510_vm2, %vm509_vm3  ;;  %935 = vmatpush1.bf16.msra.mxu0 %v2424_v2 }
  0xc6   : > { %1960 = vmatprep.mubr.msk.bf16.mxu0 %vm1811_vm4, %v2240_v59  ;;  %936 = vmatprep.subr.bf16.mxu0 %v2427_v5 }
  0xc7   : > { %v488_v44 = vpop.permute.xlu1 %487  ;;  %v485_v46 = vpop.permute.xlu0 %484 }
  0xc8   : > { %vm512_vm5 = vcmp.eq.s32.totalorder %v488_v44, %v2478_v54  ;;  %vm511_vm6 = vcmp.eq.s32.totalorder %v485_v46, %v2478_v54 }
  0xc9   : > { %vm1813_vm7 = vmpackc.low %vm512_vm5, %vm511_vm6  ;;  %937 = vmatpush1.bf16.msra.mxu0 %v2438_v14 }
  0xca   : > { %1961 = vmatmul.mubr.msk.bf16.gmra.mrb[8].mxu0 %vm1813_vm7, %v2240_v59  ;;  %938 = vmatprep.subr.bf16.mxu0 %v2441_v17 }
  0xcb   : > { %v602_v55 = vpop.permute.xlu1 %601  ;;  %v599_v57 = vpop.permute.xlu0 %598 }
  0xcc   : > { %vm630_vm8 = vcmp.eq.s32.totalorder %v602_v55, %v2478_v54  ;;  %vm629_vm9 = vcmp.eq.s32.totalorder %v599_v57, %v2478_v54  ;;  %v759_v55 = vld [vmem:[#allocation2 + $0xf0] sm:$0xff]  ;;  %v757_v57 = vld [vmem:[#allocation2 + $0xc0] sm:$0xff] }
  0xcd   : > { %vm1827_vm10 = vmpackc.low %vm630_vm8, %vm629_vm9  ;;  %939 = vmatpush1.bf16.msra.mxu0 %v2452_v28 }
  0xce   : > { %1828 = vmatmul.mubr.msk.bf16.gmra.mrb[8].mxu1 %vm1827_vm10, %v2240_v59  ;;  %940 = vmatprep.subr.bf16.mxu0 %v2455_v30 }
  0xcf   : > { %v494_v2 = vpop.permute.xlu1 %493  ;;  %v491_v4 = vpop.permute.xlu0 %490  ;;  %1008 = vmatprep.mubr.bf16.mxu1 %v2239_v3 }
  0xd0   : > { %vm514_vm11 = vcmp.eq.s32.totalorder %v494_v2, %v2478_v54  ;;  %vm513_vm12 = vcmp.eq.s32.totalorder %v491_v4, %v2478_v54  ;;  %v760_v4 = vld [vmem:[#allocation2 + $0x108] sm:$0xff] }
  0xd1   : > { %vm1815_vm13 = vmpackc.low %vm514_vm11, %vm513_vm12  ;;  %941 = vmatpush1.bf16.msra.mxu0 %v2462_v37 }
  0xd2   : > { %1964 = vmatprep.mubr.msk.bf16.mxu0 %vm1815_vm13, %v2240_v59 }
  0xd3   : > { %v500_v5 = vpop.permute.xlu1 %499  ;;  %v497_v6 = vpop.permute.xlu0 %496 }
  0xd4   : > { %vm516_vm14 = vcmp.eq.s32.totalorder %v500_v5, %v2478_v54  ;;  %vm515_vm15 = vcmp.eq.s32.totalorder %v497_v6, %v2478_v54 }
  0xd5   : > { %vm1817_vm0 = vmpackc.low %vm516_vm14, %vm515_vm15 }
  0xd6   : > { %1965 = vmatmul.mubr.msk.bf16.gmra.mrb[12].mxu0 %vm1817_vm0, %v2240_v59 }
  0xd7   : > { %v608_v7 = vpop.permute.xlu1 %607  ;;  %v605_v8 = vpop.permute.xlu0 %604  ;;  %958 = vmatprep.mubr.bf16.mxu0 %v2239_v3 }
  0xd8   : > { %vm632_vm1 = vcmp.eq.s32.totalorder %v608_v7, %v2478_v54  ;;  %vm631_vm2 = vcmp.eq.s32.totalorder %v605_v8, %v2478_v54  ;;  %v758_v7 = vld [vmem:[#allocation2 + $0xd8] sm:$0xff] }
  0xd9   : > { %vm1829_vm3 = vmpackc.low %vm632_vm1, %vm631_vm2 }
  0xda   : > { %1830 = vmatmul.mubr.msk.bf16.gmra.mrb[12].mxu1 %vm1829_vm3, %v2240_v59 }
  0xdb   : > { %v578_v9 = vpop.permute.xlu1 %577  ;;  %v575_v10 = vpop.permute.xlu0 %574  ;;  %1018 = vmatprep.mubr.bf16.mxu1 %v2239_v3 }
  0xdc   : > { %vm622_vm4 = vcmp.eq.s32.totalorder %v578_v9, %v2478_v54  ;;  %vm621_vm5 = vcmp.eq.s32.totalorder %v575_v10, %v2478_v54  ;;  %v910_v10 = vld [vmem:[#allocation2 + $0xc8] sm:$0xff] }
  0xdd   : > { %vm1819_vm6 = vmpackc.low %vm622_vm4, %vm621_vm5 }
  0xde   : > { %1820 = vmatmul.mubr.msk.bf16.vlgmr.msra.gmra.mrb[16].mxu0 %vm1819_vm6, %v2240_v59 }
  0xdf   : > { %v614_v11 = vpop.permute.xlu1 %613  ;;  %v611_v12 = vpop.permute.xlu0 %610  ;;  %968 = vmatprep.mubr.bf16.mxu0 %v2239_v3 }
  0xe0   : > { %vm634_vm7 = vcmp.eq.s32.totalorder %v614_v11, %v2478_v54  ;;  %vm633_vm8 = vcmp.eq.s32.totalorder %v611_v12, %v2478_v54 }
  0xe1   : > { %vm1831_vm9 = vmpackc.low %vm634_vm7, %vm633_vm8 }
  0xe2   : > { %1832 = vmatmul.mubr.msk.bf16.gmra.mrb[16].mxu1 %vm1831_vm9, %v2240_v59 }
  0xe3   : > { %v584_v13 = vpop.permute.xlu1 %583  ;;  %v581_v14 = vpop.permute.xlu0 %580  ;;  %1028 = vmatprep.mubr.bf16.mxu1 %v2239_v3  ;;  %v752_v3 = vld [vmem:[#allocation2 + $0x48] sm:$0xff] }
  0xe4   : > { %vm624_vm10 = vcmp.eq.s32.totalorder %v584_v13, %v2478_v54  ;;  %vm623_vm11 = vcmp.eq.s32.totalorder %v581_v14, %v2478_v54  ;;  %v911_v13 = vld [vmem:[#allocation2 + $0xd0] sm:$0xff] }
  0xe5   : > { %vm1821_vm12 = vmpackc.low %vm624_vm10, %vm623_vm11 }
  0xe6   : > { %1822 = vmatmul.mubr.msk.bf16.gmra.mrb[20].mxu0 %vm1821_vm12, %v2240_v59 }
  0xe7   : > { %v620_v16 = vpop.permute.xlu1 %619  ;;  %v617_v17 = vpop.permute.xlu0 %616 }
  0xe8   : > { %vm636_vm13 = vcmp.eq.s32.totalorder %v620_v16, %v2478_v54  ;;  %vm635_vm14 = vcmp.eq.s32.totalorder %v617_v17, %v2478_v54  ;;  %v912_v17 = vld [vmem:[#allocation2 + $0xe0] sm:$0xff] }
  0xe9   : > { %vm1833_vm15 = vmpackc.low %vm636_vm13, %vm635_vm14 }
  0xea   : > { %1834 = vmatmul.mubr.msk.bf16.gmra.mrb[20].mxu1 %vm1833_vm15, %v2240_v59 }
 0x187   : > { %v1954_v20 = vpop.f32.mrb[0].mxu0 }
 0x188   : > { %v864_v22 = vadd.f32 %v1954_v20, %v751_v18  ;;  %v799_v23 = vpop.f32.mrb[1].mxu0  ;;  %v913_v20 = vld [vmem:[#allocation2 + $0xe8] sm:$0xff] }
 0x189   : > { %v862_v28 = vadd.f32 %v799_v23, %v749_v19  ;;  %v1955_v29 = vpop.f32.mrb[2].mxu0  ;;  %v980_v30 = vpop.f32.mrb[0].mxu1 }
 0x18a   : > { %880 = vst [vmem:[#allocation2 + $0x30] sm:$0xff] %v864_v22  ;;  %v865_v32 = vadd.f32 %v1955_v29, %v752_v3  ;;  %v802_v34 = vpop.f32.mrb[3].mxu0  ;;  %v1047_v36 = vadd.f32 %v980_v30, %v902_v21  ;;  %v982_v37 = vpop.f32.mrb[1].mxu1  ;;  %v764_v30 = vld [vmem:[#allocation2 + $0x168] sm:$0xff] }
 0x18b   : > { %878 = vst [vmem:[#allocation2] sm:$0xff] %v862_v28  ;;  %v863_v39 = vadd.f32 %v802_v34, %v750_v24  ;;  %v1048_v40 = vadd.f32 %v982_v37, %v903_v27  ;;  %v984_v41 = vpop.f32.mrb[2].mxu1  ;;  %v763_v27 = vld [vmem:[#allocation2 + $0x150] sm:$0xff]  ;;  %v761_v28 = vld [vmem:[#allocation2 + $0x120] sm:$0xff]  ;;  %v762_v34 = vld [vmem:[#allocation2 + $0x138] sm:$0xff] }
 0x18c   : > { %881 = vst [vmem:[#allocation2 + $0x48] sm:$0xff] %v865_v32  ;;  %1079 = vst [vmem:[#allocation2 + $0x68] sm:$0xff] %v1047_v36  ;;  %v1049_v42 = vadd.f32 %v984_v41, %v904_v31  ;;  %v986_v43 = vpop.f32.mrb[3].mxu1  ;;  %v915_v41 = vld [vmem:[#allocation2 + $0x100] sm:$0xff] }
 0x18d   : > { %879 = vst [vmem:[#allocation2 + $0x18] sm:$0xff] %v863_v39  ;;  %1080 = vst [vmem:[#allocation2 + $0x70] sm:$0xff] %v1048_v40  ;;  %v1050_v45 = vadd.f32 %v986_v43, %v905_v38  ;;  %v914_v38 = vld [vmem:[#allocation2 + $0xf8] sm:$0xff] }
 0x18e   : > { %1081 = vst [vmem:[#allocation2 + $0x80] sm:$0xff] %v1049_v42 }
 0x18f   : > { %1082 = vst [vmem:[#allocation2 + $0x88] sm:$0xff] %v1050_v45  ;;  %v916_v45 = vld [vmem:[#allocation2 + $0x110] sm:$0xff] }
 0x191   : > { %v1958_v49 = vpop.f32.mrb[4].mxu0 }
 0x192   : > { %v868_v50 = vadd.f32 %v1958_v49, %v755_v47  ;;  %v815_v51 = vpop.f32.mrb[5].mxu0  ;;  %v917_v49 = vld [vmem:[#allocation2 + $0x118] sm:$0xff] }
 0x193   : > { %v866_v53 = vadd.f32 %v815_v51, %v753_v48  ;;  %v1959_v54 = vpop.f32.mrb[6].mxu0  ;;  %v894_v51 = vld [vmem:[#allocation2 + $0x8] sm:$0xff] }
 0x194   : > { %884 = vst [vmem:[#allocation2 + $0x90] sm:$0xff] %v868_v50  ;;  %v869_v58 = vadd.f32 %v1959_v54, %v756_v15  ;;  %v818_v59 = vpop.f32.mrb[7].mxu0  ;;  %v895_v54 = vld [vmem:[#allocation2 + $0x10] sm:$0xff] }
 0x195   : > { %882 = vst [vmem:[#allocation2 + $0x60] sm:$0xff] %v866_v53  ;;  %v867_v61 = vadd.f32 %v818_v59, %v754_v52  ;;  %v990_v62 = vpop.f32.mrb[4].mxu1  ;;  %v896_v59 = vld [vmem:[#allocation2 + $0x20] sm:$0xff] }
 0x196   : > { %885 = vst [vmem:[#allocation2 + $0xa8] sm:$0xff] %v869_v58  ;;  %v1051_v25 = vadd.f32 %v990_v62, %v906_v56  ;;  %v992_v0 = vpop.f32.mrb[5].mxu1  ;;  %v897_v62 = vld [vmem:[#allocation2 + $0x28] sm:$0xff] }
 0x197   : > { %883 = vst [vmem:[#allocation2 + $0x78] sm:$0xff] %v867_v61  ;;  %v1052_v1 = vadd.f32 %v992_v0, %v907_v60  ;;  %v994_v33 = vpop.f32.mrb[6].mxu1  ;;  %v918_v0 = vld [vmem:[#allocation2 + $0x128] sm:$0xff] }
 0x198   : > { %1083 = vst [vmem:[#allocation2 + $0x98] sm:$0xff] %v1051_v25  ;;  %v1053_v35 = vadd.f32 %v994_v33, %v908_v63  ;;  %v996_v44 = vpop.f32.mrb[7].mxu1  ;;  %v919_v33 = vld [vmem:[#allocation2 + $0x130] sm:$0xff] }
 0x199   : > { %1084 = vst [vmem:[#allocation2 + $0xa0] sm:$0xff] %v1052_v1  ;;  %v1054_v46 = vadd.f32 %v996_v44, %v909_v26 }
 0x19a   : > { %1085 = vst [vmem:[#allocation2 + $0xb0] sm:$0xff] %v1053_v35 }
 0x19b   : > { %1086 = vst [vmem:[#allocation2 + $0xb8] sm:$0xff] %v1054_v46  ;;  %v920_v46 = vld [vmem:[#allocation2 + $0x140] sm:$0xff] }
 0x19d   : > { %v1962_v2 = vpop.f32.mrb[8].mxu0 }
 0x19e   : > { %v872_v5 = vadd.f32 %v1962_v2, %v759_v55  ;;  %v831_v6 = vpop.f32.mrb[9].mxu0  ;;  %v921_v2 = vld [vmem:[#allocation2 + $0x148] sm:$0xff] }
 0x19f   : > { %v870_v8 = vadd.f32 %v831_v6, %v757_v57  ;;  %v1963_v9 = vpop.f32.mrb[10].mxu0  ;;  %v898_v6 = vld [vmem:[#allocation2 + $0x38] sm:$0xff] }
 0x1a0   : > { %888 = vst [vmem:[#allocation2 + $0xf0] sm:$0xff] %v872_v5  ;;  %v873_v11 = vadd.f32 %v1963_v9, %v760_v4  ;;  %v834_v12 = vpop.f32.mrb[11].mxu0  ;;  %v899_v9 = vld [vmem:[#allocation2 + $0x40] sm:$0xff] }
 0x1a1   : > { %886 = vst [vmem:[#allocation2 + $0xc0] sm:$0xff] %v870_v8  ;;  %v871_v14 = vadd.f32 %v834_v12, %v758_v7  ;;  %v1000_v16 = vpop.f32.mrb[8].mxu1  ;;  %v900_v12 = vld [vmem:[#allocation2 + $0x50] sm:$0xff] }
 0x1a2   : > { %889 = vst [vmem:[#allocation2 + $0x108] sm:$0xff] %v873_v11  ;;  %v1055_v18 = vadd.f32 %v1000_v16, %v910_v10  ;;  %v1002_v19 = vpop.f32.mrb[9].mxu1  ;;  %v901_v16 = vld [vmem:[#allocation2 + $0x58] sm:$0xff] }
 0x1a3   : > { %887 = vst [vmem:[#allocation2 + $0xd8] sm:$0xff] %v871_v14  ;;  %v1056_v3 = vadd.f32 %v1002_v19, %v911_v13  ;;  %v1004_v21 = vpop.f32.mrb[10].mxu1  ;;  %v922_v19 = vld [vmem:[#allocation2 + $0x158] sm:$0xff] }
 0x1a4   : > { %1087 = vst [vmem:[#allocation2 + $0xc8] sm:$0xff] %v1055_v18  ;;  %v1057_v22 = vadd.f32 %v1004_v21, %v912_v17  ;;  %v1006_v23 = vpop.f32.mrb[11].mxu1  ;;  %v923_v21 = vld [vmem:[#allocation2 + $0x160] sm:$0xff] }
 0x1a5   : > { %1088 = vst [vmem:[#allocation2 + $0xd0] sm:$0xff] %v1056_v3  ;;  %v1058_v24 = vadd.f32 %v1006_v23, %v913_v20 }
 0x1a6   : > { %1089 = vst [vmem:[#allocation2 + $0xe0] sm:$0xff] %v1057_v22 }
 0x1a7   : > { %1090 = vst [vmem:[#allocation2 + $0xe8] sm:$0xff] %v1058_v24  ;;  %v924_v24 = vld [vmem:[#allocation2 + $0x170] sm:$0xff] }
 0x1a9   : > { %v1966_v29 = vpop.f32.mrb[12].mxu0 }
 0x1aa   : > { %v876_v31 = vadd.f32 %v1966_v29, %v763_v27  ;;  %v847_v32 = vpop.f32.mrb[13].mxu0  ;;  %v925_v29 = vld [vmem:[#allocation2 + $0x178] sm:$0xff] }
 0x1ab   : > { %v874_v36 = vadd.f32 %v847_v32, %v761_v28  ;;  %v1967_v37 = vpop.f32.mrb[14].mxu0 }
 0x1ac   : > { %892 = vst [vmem:[#allocation2 + $0x150] sm:$0xff] %v876_v31  ;;  %v877_v39 = vadd.f32 %v1967_v37, %v764_v30  ;;  %v850_v40 = vpop.f32.mrb[15].mxu0  ;;  %v1123_v37 = vld [vmem:[%s2687_s4] sm:$0xff] (!%p1835_p8) }
 0x1ad   : > { %890 = vst [vmem:[#allocation2 + $0x120] sm:$0xff] %v874_v36  ;;  %v875_v42 = vadd.f32 %v850_v40, %v762_v34  ;;  %v1010_v43 = vpop.f32.mrb[12].mxu1 }
 0x1ae   : > { %893 = vst [vmem:[#allocation2 + $0x168] sm:$0xff] %v877_v39  ;;  %v1059_v47 = vadd.f32 %v1010_v43, %v914_v38  ;;  %v1012_v48 = vpop.f32.mrb[13].mxu1  ;;  %v1124_v38 = vld [vmem:[%s2687_s4 + $0x8] sm:$0xff] (!%p1835_p8)  ;;  %v1125_v39 = vld [vmem:[%s2687_s4 + $0x10] sm:$0xff] (!%p1835_p8)  ;;  %v1127_v43 = vld [vmem:[%s2687_s4 + $0x20] sm:$0xff] (!%p1835_p8) }
 0x1af   : > { %891 = vst [vmem:[#allocation2 + $0x138] sm:$0xff] %v875_v42  ;;  %v1060_v15 = vadd.f32 %v1012_v48, %v915_v41  ;;  %v1014_v50 = vpop.f32.mrb[14].mxu1  ;;  %v2024_v40 = vpack.c.bf16 (!%p1835_p8), %v1124_v38, %v1123_v37  ;;  %v1126_v41 = vld [vmem:[%s2687_s4 + $0x18] sm:$0xff] (!%p1835_p8)  ;;  %v1107_v48 = vld [vmem:[%s2327_s20] sm:$0xff] (!%p1835_p8) }
 0x1b0   : > { %1091 = vst [vmem:[#allocation2 + $0xf8] sm:$0xff] %v1059_v47  ;;  %v1061_v52 = vadd.f32 %v1014_v50, %v916_v45  ;;  %v1016_v53 = vpop.f32.mrb[15].mxu1  ;;  %v2028_v42 = vpack.c.bf16 (!%p1835_p8), %v1126_v41, %v1125_v39  ;;  %v1128_v45 = vld [vmem:[%s2687_s4 + $0x28] sm:$0xff] (!%p1835_p8)  ;;  %v1130_v50 = vld [vmem:[%s2687_s4 + $0x38] sm:$0xff] (!%p1835_p8)  ;;  %2000 = vmatprep.mubr.f32.mxu0 (!%p1835_p8), %v1107_v48 }
 0x1b1   : > { %1092 = vst [vmem:[#allocation2 + $0x100] sm:$0xff] %v1060_v15  ;;  %v1062_v56 = vadd.f32 %v1016_v53, %v917_v49  ;;  %v960_v58 = vpop.f32.mrb[16].mxu0  ;;  %2025 = vmatprep.subr.bf16.mxu0 (!%p1835_p8), %v2024_v40  ;;  %2072 = vmatprep.subr.bf16.mxu1 (!%p1835_p8), %v2024_v40  ;;  %v2032_v47 = vpack.c.bf16 (!%p1835_p8), %v1128_v45, %v1127_v43  ;;  %v1115_v49 = vld [vmem:[%s2327_s20 + $0x40] sm:$0xff] (!%p1835_p8)  ;;  %v1129_v15 = vld [vmem:[%s2687_s4 + $0x30] sm:$0xff] (!%p1835_p8)  ;;  %v1132_v53 = vld [vmem:[%s2687_s4 + $0x48] sm:$0xff] (!%p1835_p8) }
 0x1b2   : > { %1093 = vst [vmem:[#allocation2 + $0x110] sm:$0xff] %v1061_v52  ;;  %v1039_v60 = vadd.f32 %v960_v58, %v894_v51  ;;  %v962_v61 = vpop.f32.mrb[17].mxu0  ;;  %2027 = vmatpush3.bf16.msra.mxu0 (!%p1835_p8), %v2024_v40  ;;  %2080 = vmatpush3.bf16.msra.mxu1 (!%p1835_p8), %v2024_v40  ;;  %v2036_v51 = vpack.c.bf16 (!%p1835_p8), %v1130_v50, %v1129_v15  ;;  %v1131_v52 = vld [vmem:[%s2687_s4 + $0x40] sm:$0xff] (!%p1835_p8)  ;;  %v1134_v58 = vld [vmem:[%s2687_s4 + $0x58] sm:$0xff] (!%p1835_p8) }
 0x1b3   : > { %1094 = vst [vmem:[#allocation2 + $0x118] sm:$0xff] %v1062_v56  ;;  %v1040_v63 = vadd.f32 %v962_v61, %v895_v54  ;;  %v964_v25 = vpop.f32.mrb[18].mxu0  ;;  %2029 = vmatprep.subr.bf16.mxu0 (!%p1835_p8), %v2028_v42  ;;  %2073 = vmatprep.subr.bf16.mxu1 (!%p1835_p8), %v2028_v42  ;;  %v2040_v54 = vpack.c.bf16 (!%p1835_p8), %v1132_v53, %v1131_v52  ;;  %v1133_v56 = vld [vmem:[%s2687_s4 + $0x50] sm:$0xff] (!%p1835_p8)  ;;  %v1136_v61 = vld [vmem:[%s2687_s4 + $0x68] sm:$0xff] (!%p1835_p8)  ;;  %v1303_v40 = vld [vmem:[#allocation2 + $0x60] sm:$0xff] (!%p1835_p8) }
 0x1b4   : > { %1071 = vst [vmem:[#allocation2 + $0x8] sm:$0xff] %v1039_v60  ;;  %v1041_v26 = vadd.f32 %v964_v25, %v896_v59  ;;  %v966_v1 = vpop.f32.mrb[19].mxu0  ;;  %2012 = vmatprep.mubr.f32.mxu1 (!%p1835_p8), %v1115_v49  ;;  %v2044_v59 = vpack.c.bf16 (!%p1835_p8), %v1134_v58, %v1133_v56  ;;  %v1135_v60 = vld [vmem:[%s2687_s4 + $0x60] sm:$0xff] (!%p1835_p8)  ;;  %v1138_v25 = vld [vmem:[%s2687_s4 + $0x78] sm:$0xff] (!%p1835_p8)  ;;  %v1304_v49 = vld [vmem:[#allocation2 + $0x68] sm:$0xff] (!%p1835_p8) }
 0x1b5   : > { %1072 = vst [vmem:[#allocation2 + $0x10] sm:$0xff] %v1040_v63  ;;  %v1042_v35 = vadd.f32 %v966_v1, %v897_v62  ;;  %v1020_v44 = vpop.f32.mrb[16].mxu1  ;;  %v2048_v62 = vpack.c.bf16 (!%p1835_p8), %v1136_v61, %v1135_v60  ;;  %v1137_v63 = vld [vmem:[%s2687_s4 + $0x70] sm:$0xff] (!%p1835_p8)  ;;  %v1116_v1 = vld [vmem:[%s2327_s20 + $0x48] sm:$0xff] (!%p1835_p8)  ;;  %v1327_v15 = vld [vmem:[#allocation2 + $0x120] sm:$0xff] (!%p1835_p8) }
 0x1b6   : > { %1073 = vst [vmem:[#allocation2 + $0x20] sm:$0xff] %v1041_v26  ;;  %v1063_v55 = vadd.f32 %v1020_v44, %v918_v0  ;;  %v1022_v57 = vpop.f32.mrb[17].mxu1  ;;  %2031 = vmatpush3.bf16.msra.mxu0 (!%p1835_p8), %v2028_v42  ;;  %2081 = vmatpush3.bf16.msra.mxu1 (!%p1835_p8), %v2028_v42  ;;  %v2052_v0 = vpack.c.bf16 (!%p1835_p8), %v1138_v25, %v1137_v63  ;;  %v1108_v26 = vld [vmem:[%s2327_s20 + $0x8] sm:$0xff] (!%p1835_p8)  ;;  %v1110_v44 = vld [vmem:[%s2327_s20 + $0x18] sm:$0xff] (!%p1835_p8) }
 0x1b7   : > { %1074 = vst [vmem:[#allocation2 + $0x28] sm:$0xff] %v1042_v35  ;;  %v1064_v4 = vadd.f32 %v1022_v57, %v919_v33  ;;  %v1024_v5 = vpop.f32.mrb[18].mxu1  ;;  %2033 = vmatprep.subr.bf16.mxu0 (!%p1835_p8), %v2032_v47  ;;  %2074 = vmatprep.subr.bf16.mxu1 (!%p1835_p8), %v2032_v47  ;;  %v1109_v33 = vld [vmem:[%s2327_s20 + $0x10] sm:$0xff] (!%p1835_p8)  ;;  %v1119_v57 = vld [vmem:[%s2327_s20 + $0x60] sm:$0xff] (!%p1835_p8)  ;;  %v1330_v38 = vld [vmem:[#allocation2 + $0x138] sm:$0xff] (!%p1835_p8) }
 0x1b8   : > { %1095 = vst [vmem:[#allocation2 + $0x128] sm:$0xff] %v1063_v55  ;;  %v1065_v7 = vadd.f32 %v1024_v5, %v920_v46  ;;  %v1026_v8 = vpop.f32.mrb[19].mxu1  ;;  %v1117_v35 = vld [vmem:[%s2327_s20 + $0x50] sm:$0xff] (!%p1835_p8)  ;;  %v1118_v46 = vld [vmem:[%s2327_s20 + $0x58] sm:$0xff] (!%p1835_p8)  ;;  %v1111_v55 = vld [vmem:[%s2327_s20 + $0x20] sm:$0xff] (!%p1835_p8) }
 0x1b9   : > { %1096 = vst [vmem:[#allocation2 + $0x130] sm:$0xff] %v1064_v4  ;;  %v1066_v10 = vadd.f32 %v1026_v8, %v921_v2  ;;  %v970_v11 = vpop.f32.mrb[20].mxu0  ;;  %v1112_v2 = vld [vmem:[%s2327_s20 + $0x28] sm:$0xff] (!%p1835_p8)  ;;  %v1113_v5 = vld [vmem:[%s2327_s20 + $0x30] sm:$0xff] (!%p1835_p8)  ;;  %v1122_v8 = vld [vmem:[%s2327_s20 + $0x78] sm:$0xff] (!%p1835_p8) }
 0x1ba   : > { %1097 = vst [vmem:[#allocation2 + $0x140] sm:$0xff] %v1065_v7  ;;  %v1043_v13 = vadd.f32 %v970_v11, %v898_v6  ;;  %v972_v14 = vpop.f32.mrb[21].mxu0  ;;  %2035 = vmatpush3.bf16.msra.mxu0 (!%p1835_p8), %v2032_v47  ;;  %2082 = vmatpush3.bf16.msra.mxu1 (!%p1835_p8), %v2032_v47  ;;  %v1120_v4 = vld [vmem:[%s2327_s20 + $0x68] sm:$0xff] (!%p1835_p8)  ;;  %v1121_v6 = vld [vmem:[%s2327_s20 + $0x70] sm:$0xff] (!%p1835_p8)  ;;  %v1114_v7 = vld [vmem:[%s2327_s20 + $0x38] sm:$0xff] (!%p1835_p8) }
 0x1bb   : > { %1098 = vst [vmem:[#allocation2 + $0x148] sm:$0xff] %v1066_v10  ;;  %v1044_v17 = vadd.f32 %v972_v14, %v899_v9  ;;  %v974_v18 = vpop.f32.mrb[22].mxu0  ;;  %2037 = vmatprep.subr.bf16.mxu0 (!%p1835_p8), %v2036_v51  ;;  %2075 = vmatprep.subr.bf16.mxu1 (!%p1835_p8), %v2036_v51  ;;  %v1294_v9 = vld [vmem:[#allocation2 + $0x18] sm:$0xff] (!%p1835_p8)  ;;  %v1292_v14 = vld [vmem:[#allocation2 + $0x8] sm:$0xff] (!%p1835_p8) }
 0x1bc   : > { %1075 = vst [vmem:[#allocation2 + $0x38] sm:$0xff] %v1043_v13  ;;  %v1045_v20 = vadd.f32 %v974_v18, %v900_v12  ;;  %v976_v3 = vpop.f32.mrb[23].mxu0  ;;  %v1318_v11 = vld [vmem:[#allocation2 + $0xd8] sm:$0xff] (!%p1835_p8)  ;;  %v1319_v12 = vld [vmem:[#allocation2 + $0xe0] sm:$0xff] (!%p1835_p8)  ;;  %v1316_v18 = vld [vmem:[#allocation2 + $0xc8] sm:$0xff] (!%p1835_p8) }
 0x1bd   : > { %1076 = vst [vmem:[#allocation2 + $0x40] sm:$0xff] %v1044_v17  ;;  %v1046_v22 = vadd.f32 %v976_v3, %v901_v16  ;;  %v1030_v23 = vpop.f32.mrb[20].mxu1  ;;  %1106 = sbr.rel (%p1835_p8) target bundleno = 741 (0x2e5), region = 52  ;;  %v1295_v10 = vld [vmem:[#allocation2 + $0x20] sm:$0xff] (!%p1835_p8)  ;;  %v1324_v3 = vld [vmem:[#allocation2 + $0x108] sm:$0xff] (!%p1835_p8) }
 0x1be   : > { %1077 = vst [vmem:[#allocation2 + $0x50] sm:$0xff] %v1045_v20  ;;  %v1067_v27 = vadd.f32 %v1030_v23, %v922_v19  ;;  %v1032_v28 = vpop.f32.mrb[21].mxu1  ;;  %2039 = vmatpush3.bf16.msra.mxu0 (!%p1835_p8), %v2036_v51  ;;  %2083 = vmatpush3.bf16.msra.mxu1 (!%p1835_p8), %v2036_v51  ;;  %v1291_v13 = vld [vmem:[#allocation2] sm:$0xff] (!%p1835_p8)  ;;  %v1300_v19 = vld [vmem:[#allocation2 + $0x48] sm:$0xff] (!%p1835_p8) }
 0x1bf   : > { %1078 = vst [vmem:[#allocation2 + $0x58] sm:$0xff] %v1046_v22  ;;  %v1068_v30 = vadd.f32 %v1032_v28, %v923_v21  ;;  %v1034_v31 = vpop.f32.mrb[22].mxu1  ;;  %2041 = vmatprep.subr.bf16.mxu0 (!%p1835_p8), %v2040_v54  ;;  %2076 = vmatprep.subr.bf16.mxu1 (!%p1835_p8), %v2040_v54  ;;  %v2618_v16 = vld [vmem:[%s2688_s5] ss:$0 sm:$0xff] (!%p1835_p8)  ;;  %v1325_v21 = vld [vmem:[#allocation2 + $0x110] sm:$0xff] (!%p1835_p8)  ;;  %v1348_v28 = vadd.f32 (!%p1835_p8), %v1319_v12, %v1318_v11  ;;  %v1328_v50 = vld [vmem:[#allocation2 + $0x128] sm:$0xff] (!%p1835_p8) }
 0x1c0   : > { %1099 = vst [vmem:[#allocation2 + $0x158] sm:$0xff] %v1067_v27  ;;  %v1069_v32 = vadd.f32 %v1034_v31, %v924_v24  ;;  %v1036_v34 = vpop.f32.mrb[23].mxu1  ;;  %v1315_v17 = vld [vmem:[#allocation2 + $0xc0] sm:$0xff] (!%p1835_p8)  ;;  %v1297_v22 = vld [vmem:[#allocation2 + $0x30] sm:$0xff] (!%p1835_p8)  ;;  %v1340_v27 = vadd.f32 (!%p1835_p8), %v1295_v10, %v1294_v9  ;;  %v1350_v48 = vadd.f32 (!%p1835_p8), %v1325_v21, %v1324_v3  ;;  %v1312_v61 = vld [vmem:[#allocation2 + $0xa8] sm:$0xff] (!%p1835_p8) }
 0x1c1   : > { %1100 = vst [vmem:[#allocation2 + $0x160] sm:$0xff] %v1068_v30  ;;  %v1070_v36 = vadd.f32 %v1036_v34, %v925_v29  ;;  %v1321_v24 = vld [vmem:[#allocation2 + $0xf0] sm:$0xff] (!%p1835_p8)  ;;  %v1322_v29 = vld [vmem:[#allocation2 + $0xf8] sm:$0xff] (!%p1835_p8)  ;;  %v1307_v31 = vld [vmem:[#allocation2 + $0x80] sm:$0xff] (!%p1835_p8)  ;;  %v1347_v37 = vadd.f32 (!%p1835_p8), %v1316_v18, %v1315_v17 }
 0x1c2   : > { %1101 = vst [vmem:[#allocation2 + $0x170] sm:$0xff] %v1069_v32  ;;  %2043 = vmatpush3.bf16.msra.mxu0 (!%p1835_p8), %v2040_v54  ;;  %2084 = vmatpush3.bf16.msra.mxu1 (!%p1835_p8), %v2040_v54  ;;  %v1306_v30 = vld [vmem:[#allocation2 + $0x78] sm:$0xff] (!%p1835_p8)  ;;  %v1331_v39 = vld [vmem:[#allocation2 + $0x140] sm:$0xff] (!%p1835_p8)  ;;  %v1349_v54 = vadd.f32 (!%p1835_p8), %v1322_v29, %v1321_v24  ;;  %v1333_v21 = vld [vmem:[#allocation2 + $0x150] sm:$0xff] (!%p1835_p8) }
 0x1c3   : > { %1102 = vst [vmem:[#allocation2 + $0x178] sm:$0xff] %v1070_v36  ;;  %2045 = vmatprep.subr.bf16.mxu0 (!%p1835_p8), %v2044_v59  ;;  %2077 = vmatprep.subr.bf16.mxu1 (!%p1835_p8), %v2044_v59  ;;  %v1298_v23 = vld [vmem:[#allocation2 + $0x38] sm:$0xff] (!%p1835_p8)  ;;  %v1339_v36 = vadd.f32 (!%p1835_p8), %v1292_v14, %v1291_v13  ;;  %v1352_v60 = vadd.f32 (!%p1835_p8), %v1331_v39, %v1330_v38  ;;  %v1309_v13 = vld [vmem:[#allocation2 + $0x90] sm:$0xff] (!%p1835_p8) }
 0x1c4   : > { %v1341_v53 = vadd.f32 %v1298_v23, %v1297_v22  ;;  %v1310_v3 = vld [vmem:[#allocation2 + $0x98] sm:$0xff] }
 0x1c5   : > { %v1301_v20 = vld [vmem:[#allocation2 + $0x50] sm:$0xff] }
 0x1c6   : > { %2047 = vmatpush3.bf16.msra.mxu0 %v2044_v59  ;;  %2085 = vmatpush3.bf16.msra.mxu1 %v2044_v59  ;;  %v1342_v47 = vadd.f32 %v1301_v20, %v1300_v19  ;;  %v1344_v59 = vadd.f32 %v1307_v31, %v1306_v30 }
 0x1c7   : > { %2049 = vmatprep.subr.bf16.mxu0 %v2048_v62  ;;  %2078 = vmatprep.subr.bf16.mxu1 %v2048_v62  ;;  %v1334_v22 = vld [vmem:[#allocation2 + $0x158] sm:$0xff] }
 0x1ca   : > { %2051 = vmatpush3.bf16.msra.mxu0 %v2048_v62  ;;  %2086 = vmatpush3.bf16.msra.mxu1 %v2048_v62 }
 0x1cb   : > { %2053 = vmatprep.subr.bf16.mxu0 %v2052_v0  ;;  %2079 = vmatprep.subr.bf16.mxu1 %v2052_v0 }
 0x1ce   : > { %2055 = vmatpush3.bf16.msra.mxu0 %v2052_v0  ;;  %2087 = vmatpush3.bf16.msra.mxu1 %v2052_v0 }
 0x1d1   : > { %2001 = vmatmul.mubr.f32.vlgmr.msra.gmra.mrb[0].mxu0 %v1108_v26  ;;  %2013 = vmatmul.mubr.f32.vlgmr.msra.gmra.mrb[0].mxu1 %v1116_v1  ;;  %v1343_v26 = vadd.f32 %v1304_v49, %v1303_v40  ;;  %v1351_v1 = vadd.f32 %v1328_v50, %v1327_v15 }
 0x1d2   : > { %2003 = vmatprep.mubr.f32.mxu0 %v1109_v33  ;;  %2015 = vmatprep.mubr.f32.mxu1 %v1117_v35  ;;  %v1313_v33 = vld [vmem:[#allocation2 + $0xb0] sm:$0xff]  ;;  %v1336_v35 = vld [vmem:[#allocation2 + $0x168] sm:$0xff] }
 0x1d3   : > { %v1346_v12 = vadd.f32 %v1313_v33, %v1312_v61 }
 0x1d5   : > { %2004 = vmatmul.mubr.f32.gmra.mrb[2].mxu0 %v1110_v44  ;;  %2016 = vmatmul.mubr.f32.gmra.mrb[2].mxu1 %v1118_v46  ;;  %v1337_v44 = vld [vmem:[#allocation2 + $0x170] sm:$0xff] }
 0x1d6   : > { %2006 = vmatprep.mubr.f32.mxu0 %v1111_v55  ;;  %2018 = vmatprep.mubr.f32.mxu1 %v1119_v57  ;;  %v1354_v20 = vadd.f32 %v1337_v44, %v1336_v35 }
 0x1d9   : > { %2007 = vmatmul.mubr.f32.gmra.mrb[4].mxu0 %v1112_v2  ;;  %2019 = vmatmul.mubr.f32.gmra.mrb[4].mxu1 %v1120_v4 }
 0x1da   : > { %2009 = vmatprep.mubr.f32.mxu0 %v1113_v5  ;;  %2021 = vmatprep.mubr.f32.mxu1 %v1121_v6 }
 0x1dd   : > { %2010 = vmatmul.mubr.f32.gmra.mrb[6].mxu0 %v1114_v7  ;;  %2022 = vmatmul.mubr.f32.gmra.mrb[6].mxu1 %v1122_v8 }
 0x2a4   : > { %v2002_v32 = vpop.f32.mrb[0].mxu0  ;;  %v2014_v34 = vpop.f32.mrb[0].mxu1 }
 0x2a5   : > { %v1218_v41 = vadd.f32 %v2002_v32, %v2618_v16  ;;  %v1258_v42 = vadd.f32 %v2014_v34, %v2618_v16  ;;  %v1212_v43 = vpop.f32.mrb[1].mxu0  ;;  %v1252_v45 = vpop.f32.mrb[1].mxu1 }
 0x2a6   : > { %v1213_v51 = vadd.f32 %v2618_v16, %v1212_v43  ;;  %v1253_v52 = vadd.f32 %v2618_v16, %v1252_v45 }
 0x2a7   : > { %v1356_v56 = vadd.f32 %v1340_v27, %v1218_v41  ;;  %v1364_v58 = vadd.f32 %v1348_v28, %v1258_v42  ;;  %v1345_v41 = vadd.f32 %v1310_v3, %v1309_v13  ;;  %v1353_v42 = vadd.f32 %v1334_v22, %v1333_v21  ;;  %v1293_v3 = vld [vmem:[#allocation2 + $0x10] sm:$0xff] }
 0x2a8   : > { %v1355_v62 = vadd.f32 %v1339_v36, %v1213_v51  ;;  %v1363_v63 = vadd.f32 %v1347_v37, %v1253_v52  ;;  %v2005_v25 = vpop.f32.mrb[2].mxu0  ;;  %v2017_v0 = vpop.f32.mrb[2].mxu1 }
 0x2a9   : > { %v1838_v46 = vmul.f32 -1.442695, %v1356_v56  ;;  %1484 = vst [vmem:[%s2332_s23 + $0x8] sm:$0xff] %v1356_v56  ;;  %v1846_v55 = vmul.f32 -1.442695, %v1364_v58  ;;  %1492 = vst [vmem:[%s2332_s23 + $0x48] sm:$0xff] %v1364_v58  ;;  %v1228_v57 = vadd.f32 %v2005_v25, %v2618_v16  ;;  %v1268_v2 = vadd.f32 %v2017_v0, %v2618_v16 }
 0x2aa   : > { %v1222_v4 = vpop.f32.mrb[3].mxu0  ;;  %v1262_v5 = vpop.f32.mrb[3].mxu1  ;;  %v1837_v6 = vmul.f32 -1.442695, %v1355_v62  ;;  %1483 = vst [vmem:[%s2332_s23] sm:$0xff] %v1355_v62  ;;  %v1845_v7 = vmul.f32 -1.442695, %v1363_v63 }
 0x2ab   : > { %1491 = vst [vmem:[%s2332_s23 + $0x40] sm:$0xff] %v1363_v63  ;;  %v1223_v8 = vadd.f32 %v2618_v16, %v1222_v4  ;;  %v1263_v9 = vadd.f32 %v2618_v16, %v1262_v5  ;;  %2134 = vpow2.f32 %v1838_v46  ;;  %v1358_v10 = vadd.f32 %v1342_v47, %v1228_v57 }
 0x2ac   : > { %v1366_v11 = vadd.f32 %v1350_v48, %v1268_v2  ;;  %2136 = vpow2.f32 %v1846_v55  ;;  %v2008_v18 = vpop.f32.mrb[4].mxu0  ;;  %v2020_v19 = vpop.f32.mrb[4].mxu1 }
 0x2ad   : > { %v1357_v14 = vadd.f32 %v1341_v53, %v1223_v8  ;;  %v1365_v17 = vadd.f32 %v1349_v54, %v1263_v9  ;;  %2138 = vpow2.f32 %v1837_v6  ;;  %v1840_v23 = vmul.f32 -1.442695, %v1358_v10  ;;  %1486 = vst [vmem:[%s2332_s23 + $0x18] sm:$0xff] %v1358_v10  ;;  %v1232_v28 = vpop.f32.mrb[5].mxu0  ;;  %v1272_v29 = vpop.f32.mrb[5].mxu1 }
 0x2ae   : > { %v1848_v24 = vmul.f32 -1.442695, %v1366_v11  ;;  %1494 = vst [vmem:[%s2332_s23 + $0x58] sm:$0xff] %v1366_v11  ;;  %v1238_v27 = vadd.f32 %v2008_v18, %v2618_v16  ;;  %2140 = vpow2.f32 %v1845_v7  ;;  %v1278_v32 = vadd.f32 %v2020_v19, %v2618_v16 }
 0x2af   : > { %v1839_v30 = vmul.f32 -1.442695, %v1357_v14  ;;  %1485 = vst [vmem:[%s2332_s23 + $0x10] sm:$0xff] %v1357_v14  ;;  %v1847_v31 = vmul.f32 -1.442695, %v1365_v17  ;;  %1493 = vst [vmem:[%s2332_s23 + $0x50] sm:$0xff] %v1365_v17  ;;  %2142 = vpow2.f32 %v1840_v23  ;;  %v1233_v36 = vadd.f32 %v2618_v16, %v1232_v28 }
 0x2b0   : > { %v1360_v34 = vadd.f32 %v1344_v59, %v1238_v27  ;;  %v1273_v37 = vadd.f32 %v2618_v16, %v1272_v29  ;;  %2144 = vpow2.f32 %v1848_v24  ;;  %v1368_v38 = vadd.f32 %v1352_v60, %v1278_v32  ;;  %v2011_v39 = vpop.f32.mrb[6].mxu0  ;;  %v2023_v40 = vpop.f32.mrb[6].mxu1  ;;  %v1320_v17 = vld [vmem:[#allocation2 + $0xe8] sm:$0xff]  ;;  %v1317_v24 = vld [vmem:[#allocation2 + $0xd0] sm:$0xff] }
 0x2b1   : > { %2146 = vpow2.f32 %v1839_v30  ;;  %v1359_v45 = vadd.f32 %v1343_v26, %v1233_v36  ;;  %v1242_v48 = vpop.f32.mrb[7].mxu0  ;;  %v1282_v49 = vpop.f32.mrb[7].mxu1  ;;  %v1248_v50 = vadd.f32 %v2011_v39, %v2618_v16  ;;  %v1288_v51 = vadd.f32 %v2023_v40, %v2618_v16  ;;  %v1302_v30 = vld [vmem:[#allocation2 + $0x58] sm:$0xff]  ;;  %v1299_v40 = vld [vmem:[#allocation2 + $0x40] sm:$0xff] }
 0x2b2   : > { %v1842_v43 = vmul.f32 -1.442695, %v1360_v34  ;;  %1488 = vst [vmem:[%s2332_s23 + $0x28] sm:$0xff] %v1360_v34  ;;  %v1367_v47 = vadd.f32 %v1351_v1, %v1273_v37  ;;  %2148 = vpow2.f32 %v1847_v31  ;;  %v1850_v15 = vmul.f32 -1.442695, %v1368_v38  ;;  %1496 = vst [vmem:[%s2332_s23 + $0x68] sm:$0xff] %v1368_v38 }
 0x2b3   : > { %v1841_v52 = vmul.f32 -1.442695, %v1359_v45  ;;  %1487 = vst [vmem:[%s2332_s23 + $0x20] sm:$0xff] %v1359_v45  ;;  %v1243_v54 = vadd.f32 %v2618_v16, %v1242_v48  ;;  %v1362_v56 = vadd.f32 %v1346_v12, %v1248_v50  ;;  %v1370_v58 = vadd.f32 %v1354_v20, %v1288_v51  ;;  %v1296_v12 = vld [vmem:[#allocation2 + $0x28] sm:$0xff]  ;;  %v1326_v36 = vld [vmem:[#allocation2 + $0x118] sm:$0xff]  ;;  %v1323_v45 = vld [vmem:[#allocation2 + $0x100] sm:$0xff] }
 0x2b4   : > { %2150 = vpow2.f32 %v1842_v43  ;;  %v1849_v53 = vmul.f32 -1.442695, %v1367_v47  ;;  %1495 = vst [vmem:[%s2332_s23 + $0x60] sm:$0xff] %v1367_v47  ;;  %v1283_v59 = vadd.f32 %v2618_v16, %v1282_v49 }
 0x2b5   : > { %2152 = vpow2.f32 %v1850_v15  ;;  %v2135_v60 = vpop.eup %2134  ;;  %v1361_v61 = vadd.f32 %v1345_v41, %v1243_v54  ;;  %1490 = vst [vmem:[%s2332_s23 + $0x38] sm:$0xff] %v1362_v56  ;;  %1498 = vst [vmem:[%s2332_s23 + $0x78] sm:$0xff] %v1370_v58  ;;  %v1844_v14 = vmul.f32 -1.442695, %v1362_v56  ;;  %v1852_v19 = vmul.f32 -1.442695, %v1370_v58 }
 0x2b6   : > { %2154 = vpow2.f32 %v1841_v52  ;;  %v2137_v62 = vpop.eup %2136  ;;  %v1420_v63 = vadd.f32 1.0, %v2135_v60  ;;  %v1369_v26 = vadd.f32 %v1353_v42, %v1283_v59  ;;  %v1308_v15 = vld [vmem:[#allocation2 + $0x88] sm:$0xff]  ;;  %v1305_v59 = vld [vmem:[#allocation2 + $0x70] sm:$0xff] }
 0x2b7   : > { %2156 = vpow2.f32 %v1849_v53  ;;  %v2139_v25 = vpop.eup %2138  ;;  %v1428_v0 = vadd.f32 1.0, %v2137_v62  ;;  %1489 = vst [vmem:[%s2332_s23 + $0x30] sm:$0xff] %v1361_v61  ;;  %v1843_v21 = vmul.f32 -1.442695, %v1361_v61  ;;  %v1332_v53 = vld [vmem:[#allocation2 + $0x148] sm:$0xff] }
 0x2b8   : > { %v2141_v1 = vpop.eup %2140  ;;  %2158 = vrcp.f32 %v1420_v63  ;;  %v1419_v33 = vadd.f32 1.0, %v2139_v25  ;;  %1497 = vst [vmem:[%s2332_s23 + $0x70] sm:$0xff] %v1369_v26  ;;  %v1851_v27 = vmul.f32 -1.442695, %v1369_v26  ;;  %v1329_v63 = vld [vmem:[#allocation2 + $0x130] sm:$0xff] }
 0x2b9   : > { %v2143_v35 = vpop.eup %2142  ;;  %2160 = vrcp.f32 %v1428_v0  ;;  %v1427_v44 = vadd.f32 1.0, %v2141_v1 }
 0x2ba   : > { %v2145_v16 = vpop.eup %2144  ;;  %2162 = vrcp.f32 %v1419_v33  ;;  %v1422_v46 = vadd.f32 1.0, %v2143_v35 }
 0x2bb   : > { %v2147_v55 = vpop.eup %2146  ;;  %2164 = vrcp.f32 %v1427_v44  ;;  %v1430_v57 = vadd.f32 1.0, %v2145_v16 }
 0x2bc   : > { %v2149_v2 = vpop.eup %2148  ;;  %2166 = vrcp.f32 %v1422_v46  ;;  %v1421_v4 = vadd.f32 1.0, %v2147_v55 }
 0x2bd   : > { %2168 = vrcp.f32 %v1430_v57  ;;  %v1429_v6 = vadd.f32 1.0, %v2149_v2 }
 0x2be   : > { %v2151_v5 = vpop.eup %2150  ;;  %2170 = vrcp.f32 %v1421_v4 }
 0x2bf   : > { %v2153_v7 = vpop.eup %2152  ;;  %v1424_v8 = vadd.f32 1.0, %v2151_v5  ;;  %2172 = vrcp.f32 %v1429_v6 }
 0x2c0   : > { %v2155_v9 = vpop.eup %2154  ;;  %v1432_v10 = vadd.f32 1.0, %v2153_v7 }
 0x2c1   : > { %v2157_v11 = vpop.eup %2156  ;;  %2174 = vrcp.f32 %v1424_v8  ;;  %v1423_v13 = vadd.f32 1.0, %v2155_v9 }
 0x2c2   : > { %2176 = vrcp.f32 %v1432_v10  ;;  %v1431_v18 = vadd.f32 1.0, %v2157_v11  ;;  %v2159_v20 = vpop.eup %2158  ;;  %v1314_v10 = vld [vmem:[#allocation2 + $0xb8] sm:$0xff] }
 0x2c3   : > { %2178 = vrcp.f32 %v1423_v13  ;;  %v2161_v22 = vpop.eup %2160  ;;  %v1468_v23 = vmul.f32 %v2159_v20, %v1296_v12  ;;  %v1338_v11 = vld [vmem:[#allocation2 + $0x178] sm:$0xff]  ;;  %v1311_v13 = vld [vmem:[#allocation2 + $0xa0] sm:$0xff] }
 0x2c4   : > { %2180 = vrcp.f32 %v1431_v18  ;;  %v2163_v28 = vpop.eup %2162  ;;  %v1476_v29 = vmul.f32 %v2161_v22, %v1320_v17  ;;  %v1335_v18 = vld [vmem:[#allocation2 + $0x160] sm:$0xff] }
 0x2c5   : > { %2182 = vpow2.f32 %v1844_v14  ;;  %v2165_v31 = vpop.eup %2164  ;;  %v1873_v32 = vpack.c.bf16 %v2159_v20, %v1468_v23  ;;  %v1467_v34 = vmul.f32 %v2163_v28, %v1293_v3 }
 0x2c6   : > { %2184 = vpow2.f32 %v1852_v19  ;;  %v2167_v37 = vpop.eup %2166  ;;  %v1881_v38 = vpack.c.bf16 %v2161_v22, %v1476_v29  ;;  %v1475_v39 = vmul.f32 %v2165_v31, %v1317_v24 }
 0x2c7   : > { %2186 = vpow2.f32 %v1843_v21  ;;  %v2169_v41 = vpop.eup %2168  ;;  %1596 = vst [vmem:[%s2337_s11 + $0x8] sm:$0xff] %v1873_v32  ;;  %v1872_v42 = vpack.c.bf16 %v2163_v28, %v1467_v34  ;;  %v1470_v43 = vmul.f32 %v2167_v37, %v1302_v30 }
 0x2c8   : > { %2188 = vpow2.f32 %v1851_v27  ;;  %v2171_v47 = vpop.eup %2170  ;;  %1604 = vst [vmem:[%s2337_s11 + $0x48] sm:$0xff] %v1881_v38  ;;  %v1880_v48 = vpack.c.bf16 %v2165_v31, %v1475_v39  ;;  %v1478_v49 = vmul.f32 %v2169_v41, %v1326_v36 }
 0x2c9   : > { %v2173_v50 = vpop.eup %2172  ;;  %1595 = vst [vmem:[%s2337_s11] sm:$0xff] %v1872_v42  ;;  %v1875_v51 = vpack.c.bf16 %v2167_v37, %v1470_v43  ;;  %v1469_v52 = vmul.f32 %v2171_v47, %v1299_v40 }
 0x2ca   : > { %1603 = vst [vmem:[%s2337_s11 + $0x40] sm:$0xff] %v1880_v48  ;;  %v1883_v56 = vpack.c.bf16 %v2169_v41, %v1478_v49  ;;  %v1477_v58 = vmul.f32 %v2173_v50, %v1323_v45 }
 0x2cb   : > { %v2175_v54 = vpop.eup %2174  ;;  %1598 = vst [vmem:[%s2337_s11 + $0x18] sm:$0xff] %v1875_v51  ;;  %v1874_v61 = vpack.c.bf16 %v2171_v47, %v1469_v52 }
 0x2cc   : > { %v2177_v60 = vpop.eup %2176  ;;  %v1472_v62 = vmul.f32 %v2175_v54, %v1308_v15  ;;  %1606 = vst [vmem:[%s2337_s11 + $0x58] sm:$0xff] %v1883_v56  ;;  %v1882_v0 = vpack.c.bf16 %v2173_v50, %v1477_v58 }
 0x2cd   : > { %v2179_v25 = vpop.eup %2178  ;;  %v1480_v26 = vmul.f32 %v2177_v60, %v1332_v53  ;;  %1597 = vst [vmem:[%s2337_s11 + $0x10] sm:$0xff] %v1874_v61 }
 0x2ce   : > { %v2181_v1 = vpop.eup %2180  ;;  %v1877_v33 = vpack.c.bf16 %v2175_v54, %v1472_v62  ;;  %v1471_v35 = vmul.f32 %v2179_v25, %v1305_v59  ;;  %1605 = vst [vmem:[%s2337_s11 + $0x50] sm:$0xff] %v1882_v0 }
 0x2cf   : > { %v2183_v44 = vpop.eup %2182  ;;  %v1885_v16 = vpack.c.bf16 %v2177_v60, %v1480_v26  ;;  %v1479_v46 = vmul.f32 %v2181_v1, %v1329_v63 }
 0x2d0   : > { %v2185_v55 = vpop.eup %2184  ;;  %1600 = vst [vmem:[%s2337_s11 + $0x28] sm:$0xff] %v1877_v33  ;;  %v1876_v57 = vpack.c.bf16 %v2179_v25, %v1471_v35  ;;  %v1426_v2 = vadd.f32 1.0, %v2183_v44 }
 0x2d1   : > { %v2187_v4 = vpop.eup %2186  ;;  %1608 = vst [vmem:[%s2337_s11 + $0x68] sm:$0xff] %v1885_v16  ;;  %v1884_v5 = vpack.c.bf16 %v2181_v1, %v1479_v46  ;;  %v1434_v6 = vadd.f32 1.0, %v2185_v55 }
 0x2d2   : > { %v2189_v7 = vpop.eup %2188  ;;  %1599 = vst [vmem:[%s2337_s11 + $0x20] sm:$0xff] %v1876_v57  ;;  %2190 = vrcp.f32 %v1426_v2  ;;  %v1425_v8 = vadd.f32 1.0, %v2187_v4 }
 0x2d3   : > { %1607 = vst [vmem:[%s2337_s11 + $0x60] sm:$0xff] %v1884_v5  ;;  %2192 = vrcp.f32 %v1434_v6  ;;  %v1433_v9 = vadd.f32 1.0, %v2189_v7 }
 0x2d4   : > { %2194 = vrcp.f32 %v1425_v8 }
 0x2d5   : > { %2196 = vrcp.f32 %v1433_v9 }
 0x2dc   : > { %v2191_v12 = vpop.eup %2190 }
 0x2dd   : > { %v2193_v14 = vpop.eup %2192  ;;  %v1474_v17 = vmul.f32 %v2191_v12, %v1314_v10 }
 0x2de   : > { %v2195_v19 = vpop.eup %2194  ;;  %v1482_v20 = vmul.f32 %v2193_v14, %v1338_v11 }
 0x2df   : > { %v2197_v3 = vpop.eup %2196  ;;  %v1879_v21 = vpack.c.bf16 %v2191_v12, %v1474_v17  ;;  %v1473_v22 = vmul.f32 %v2195_v19, %v1311_v13 }
 0x2e0   : > { %v1887_v23 = vpack.c.bf16 %v2193_v14, %v1482_v20  ;;  %v1481_v24 = vmul.f32 %v2197_v3, %v1335_v18 }
 0x2e1   : > { %1602 = vst [vmem:[%s2337_s11 + $0x38] sm:$0xff] %v1879_v21  ;;  %v1878_v27 = vpack.c.bf16 %v2195_v19, %v1473_v22 }
 0x2e2   : > { %1610 = vst [vmem:[%s2337_s11 + $0x78] sm:$0xff] %v1887_v23  ;;  %v1886_v28 = vpack.c.bf16 %v2197_v3, %v1481_v24 }
 0x2e3   : > { %1601 = vst [vmem:[%s2337_s11 + $0x30] sm:$0xff] %v1878_v27 }
 0x2e4   : > { %1609 = vst [vmem:[%s2337_s11 + $0x70] sm:$0xff] %v1886_v28 }
 0x2e5 PF: > { %s18_s28 = sadd.s32 1, %s2236_s28   ;;  %s2691_s24 = smov %s2228_s26 }
 0x2e6   : > { %p15_p9 = scmp.ge.s32.totalorder %s18_s28, 8   ;;  %s2692_s25 = smov %s2232_s27 }
 0x2e7   : > { %s2693_s26 = smov %s2696_s29  ;;  %s2694_s27 = smov %s2700_s30 }
 0x2e8   :  { %17 = sbr.rel (!%p15_p9) target bundleno = 3 (0x3), region = 103 }

// kernel: alignn_conv.25
= control target key start
LH: loop header
LB: loop body
LE: loop exit
PB: predicated region body
PF: predicated region fallthrough
CT: control target
= control target key end

     0   :  { %s728_s18 = smov 0   ;;  %s955_s0 = inlined_call_operand.vmem [shape: f32[256,128], index: 0, kind: input, shape index: {}]   ;;  %s956_s1 = inlined_call_operand.vmem [shape: f32[256,128], index: 1, kind: input, shape index: {}]   ;;  %s957_s2 = inlined_call_operand.vmem [shape: f32[2,128], index: 2, kind: input, shape index: {}]   ;;  %s958_s3 = inlined_call_operand.vmem [shape: f32[1,128], index: 3, kind: input, shape index: {}]   ;;  %s959_s4 = inlined_call_operand.vmem [shape: f32[1,128], index: 4, kind: input, shape index: {}]   ;;  %s960_s5 = inlined_call_operand.vmem [shape: f32[256,128], index: 5, kind: output, shape index: {}]  }
   0x1 LB: > { %s584_s19 = sadd.s32 4294967295, %s696_s18   ;;  %p588_p0 = scmp.ge.s32.totalorder %s696_s18, 1  ;;  %s696_s18 = sphi %s728_s18, %s15_s18  }
   0x2   : > { %p199_p1 = scmp.lt.s32.totalorder %s696_s18, 3 }
   0x4   : > { %p200_p2 = pnand %p588_p0, %p199_p1 }
   0x5   : > { %s589_s20 = sshll.u32 (!%p200_p2), %s584_s19, 4  ;;  %v251_v0 = vld [vmem:[%s957_s2 + $0x1] sm:$0x1] (!%p200_p2)  ;;  %v290_v2 = vlaneseq (!%p200_p2)  ;;  %v750_v4 = vld [vmem:[%s957_s2] ss:$0 sm:$0xff] (!%p200_p2) }
   0x6   : > { %203 = sbr.rel (%p200_p2) target bundleno = 86 (0x56), region = 40  ;;  %p233_p3 = scmp.lt.s32.totalorder (!%p200_p2), %s589_s20, 31  ;;  %v288_v1 = vadd.f32 (!%p200_p2), 1e-05, %v251_v0  ;;  %v777_v28 = vld [vmem:[%s958_s3] ss:$0 sm:$0xff] (!%p200_p2) }
   0x7   : > { %v291_v3 = vshrl.u32 (!%p200_p2), %v290_v2, 7  ;;  %v790_v37 = vld [vmem:[%s959_s4] ss:$0 sm:$0xff] (!%p200_p2) }
   0x8   : > { %624 = vrsqrt.f32 (!%p200_p2), %v288_v1 }
   0x9   : > { %v292_v9 = vsub.s32 (!%p200_p2), 0, %v291_v3 }
   0xd   : > { %s962_s20 = smov (!%p233_p3, %s589_s20), 31 }
   0xe   : > { %s739_s23 = sshll.u32 %s962_s20, 3 }
   0xf   : > { %s745_s26 = scalar_lea.vmem %s955_s0, %s739_s23  ;;  %s890_s10 = scalar_lea.vmem %s956_s1, %s739_s23 }
  0x10   : > { %v252_v5 = vld [vmem:[%s745_s26] sm:$0xff]  ;;  %v253_v6 = vld [vmem:[%s745_s26 + $0x8] sm:$0xff]  ;;  %v254_v7 = vld [vmem:[%s745_s26 + $0x10] sm:$0xff]  ;;  %s905_s13 = scalar_lea.vmem %s960_s5, %s739_s23 }
  0x11   : > { %v255_v8 = vld [vmem:[%s745_s26 + $0x18] sm:$0xff]  ;;  %v256_v10 = vld [vmem:[%s745_s26 + $0x20] sm:$0xff]  ;;  %v257_v11 = vld [vmem:[%s745_s26 + $0x28] sm:$0xff]  ;;  %v272_v14 = vsub.f32 %v252_v5, %v750_v4  ;;  %v273_v15 = vsub.f32 %v253_v6, %v750_v4  ;;  %v274_v16 = vsub.f32 %v254_v7, %v750_v4 }
  0x12   : > { %v258_v12 = vld [vmem:[%s745_s26 + $0x30] sm:$0xff]  ;;  %v259_v13 = vld [vmem:[%s745_s26 + $0x38] sm:$0xff]  ;;  %v275_v17 = vsub.f32 %v255_v8, %v750_v4  ;;  %v260_v18 = vld [vmem:[%s745_s26 + $0x40] sm:$0xff]  ;;  %v625_v19 = vpop.eup %624  ;;  %v276_v20 = vsub.f32 %v256_v10, %v750_v4  ;;  %v277_v21 = vsub.f32 %v257_v11, %v750_v4 }
  0x13   : > { %v278_v22 = vsub.f32 %v258_v12, %v750_v4  ;;  %v279_v23 = vsub.f32 %v259_v13, %v750_v4  ;;  %v261_v24 = vld [vmem:[%s745_s26 + $0x48] sm:$0xff]  ;;  %v262_v25 = vld [vmem:[%s745_s26 + $0x50] sm:$0xff]  ;;  %v771_v26 = vrot.slane %v625_v19, %v292_v9  ;;  %v263_v27 = vld [vmem:[%s745_s26 + $0x58] sm:$0xff]  ;;  %v280_v29 = vsub.f32 %v260_v18, %v750_v4 }
  0x14   : > { %v281_v30 = vsub.f32 %v261_v24, %v750_v4  ;;  %v282_v31 = vsub.f32 %v262_v25, %v750_v4  ;;  %v283_v32 = vsub.f32 %v263_v27, %v750_v4  ;;  %v264_v1 = vld [vmem:[%s745_s26 + $0x60] sm:$0xff]  ;;  %v266_v18 = vld [vmem:[%s745_s26 + $0x70] sm:$0xff] }
  0x15   : > { %v294_v33 = vmul.f32 %v771_v26, %v272_v14  ;;  %v295_v34 = vmul.f32 %v771_v26, %v273_v15  ;;  %v296_v35 = vmul.f32 %v771_v26, %v274_v16  ;;  %v297_v36 = vmul.f32 %v771_v26, %v275_v17  ;;  %v265_v15 = vld [vmem:[%s745_s26 + $0x68] sm:$0xff] }
  0x16   : > { %v298_v38 = vmul.f32 %v771_v26, %v276_v20  ;;  %v299_v39 = vmul.f32 %v771_v26, %v277_v21  ;;  %v300_v40 = vmul.f32 %v771_v26, %v278_v22  ;;  %v301_v41 = vmul.f32 %v771_v26, %v279_v23  ;;  %v267_v22 = vld [vmem:[%s745_s26 + $0x78] sm:$0xff] }
  0x17   : > { %v317_v42 = vmul.f32 %v777_v28, %v294_v33  ;;  %v318_v43 = vmul.f32 %v777_v28, %v295_v34  ;;  %v319_v44 = vmul.f32 %v777_v28, %v296_v35  ;;  %v320_v45 = vmul.f32 %v777_v28, %v297_v36 }
  0x18   : > { %v321_v46 = vmul.f32 %v777_v28, %v298_v38  ;;  %v322_v47 = vmul.f32 %v777_v28, %v299_v39  ;;  %v323_v48 = vmul.f32 %v777_v28, %v300_v40  ;;  %v324_v49 = vmul.f32 %v777_v28, %v301_v41 }
  0x19   : > { %v805_v50 = vadd.f32 %v790_v37, %v317_v42  ;;  %v808_v51 = vadd.f32 %v790_v37, %v318_v43  ;;  %v811_v52 = vadd.f32 %v790_v37, %v319_v44  ;;  %v814_v53 = vadd.f32 %v790_v37, %v320_v45 }
  0x1a   : > { %v817_v54 = vadd.f32 %v790_v37, %v321_v46  ;;  %v820_v55 = vadd.f32 %v790_v37, %v322_v47  ;;  %v823_v56 = vadd.f32 %v790_v37, %v323_v48  ;;  %v826_v57 = vadd.f32 %v790_v37, %v324_v49 }
  0x1b   : > { %v598_v58 = vmul.f32 -1.442695, %v805_v50  ;;  %v599_v59 = vmul.f32 -1.442695, %v808_v51  ;;  %v600_v60 = vmul.f32 -1.442695, %v811_v52  ;;  %v302_v61 = vmul.f32 %v771_v26, %v280_v29 }
  0x1c   : > { %v601_v62 = vmul.f32 -1.442695, %v814_v53  ;;  %v602_v63 = vmul.f32 -1.442695, %v817_v54  ;;  %v303_v0 = vmul.f32 %v771_v26, %v281_v30  ;;  %v603_v2 = vmul.f32 -1.442695, %v820_v55 }
  0x1d   : > { %626 = vpow2.f32 %v598_v58  ;;  %v604_v3 = vmul.f32 -1.442695, %v823_v56  ;;  %v325_v5 = vmul.f32 %v777_v28, %v302_v61  ;;  %v304_v7 = vmul.f32 %v771_v26, %v282_v31 }
  0x1e   : > { %628 = vpow2.f32 %v599_v59  ;;  %v326_v6 = vmul.f32 %v777_v28, %v303_v0  ;;  %v305_v8 = vmul.f32 %v771_v26, %v283_v32  ;;  %v605_v9 = vmul.f32 -1.442695, %v826_v57 }
  0x1f   : > { %630 = vpow2.f32 %v600_v60  ;;  %v844_v10 = vadd.f32 %v790_v37, %v325_v5  ;;  %v284_v11 = vsub.f32 %v264_v1, %v750_v4  ;;  %v327_v13 = vmul.f32 %v777_v28, %v304_v7 }
  0x20   : > { %632 = vpow2.f32 %v601_v62  ;;  %v848_v12 = vadd.f32 %v790_v37, %v326_v6  ;;  %v328_v14 = vmul.f32 %v777_v28, %v305_v8  ;;  %v285_v24 = vsub.f32 %v265_v15, %v750_v4 }
  0x21   : > { %634 = vpow2.f32 %v602_v63  ;;  %v606_v16 = vmul.f32 -1.442695, %v844_v10  ;;  %v306_v17 = vmul.f32 %v771_v26, %v284_v11  ;;  %v858_v20 = vadd.f32 %v790_v37, %v327_v13 }
  0x22   : > { %636 = vpow2.f32 %v603_v2  ;;  %v607_v19 = vmul.f32 -1.442695, %v848_v12  ;;  %v861_v21 = vadd.f32 %v790_v37, %v328_v14  ;;  %v286_v29 = vsub.f32 %v266_v18, %v750_v4  ;;  %v468_v14 = vld [vmem:[%s890_s10] sm:$0xff]  ;;  %v469_v18 = vld [vmem:[%s890_s10 + $0x8] sm:$0xff] }
  0x23   : > { %638 = vpow2.f32 %v604_v3  ;;  %v329_v23 = vmul.f32 %v777_v28, %v306_v17  ;;  %v608_v25 = vmul.f32 -1.442695, %v858_v20  ;;  %v287_v31 = vsub.f32 %v267_v22, %v750_v4 }
  0x24   : > { %640 = vpow2.f32 %v605_v9  ;;  %v609_v27 = vmul.f32 -1.442695, %v861_v21  ;;  %v307_v34 = vmul.f32 %v771_v26, %v285_v24  ;;  %v308_v38 = vmul.f32 %v771_v26, %v286_v29  ;;  %v470_v24 = vld [vmem:[%s890_s10 + $0x10] sm:$0xff]  ;;  %v471_v29 = vld [vmem:[%s890_s10 + $0x18] sm:$0xff] }
  0x25   : > { %642 = vpow2.f32 %v606_v16  ;;  %v870_v30 = vadd.f32 %v790_v37, %v329_v23  ;;  %v309_v41 = vmul.f32 %v771_v26, %v287_v31 }
  0x26   : > { %644 = vpow2.f32 %v607_v19  ;;  %v330_v45 = vmul.f32 %v777_v28, %v307_v34  ;;  %v331_v48 = vmul.f32 %v777_v28, %v308_v38  ;;  %v472_v34 = vld [vmem:[%s890_s10 + $0x20] sm:$0xff]  ;;  %v473_v38 = vld [vmem:[%s890_s10 + $0x28] sm:$0xff] }
  0x27   : > { %v627_v32 = vpop.eup %626  ;;  %646 = vpow2.f32 %v608_v25  ;;  %v610_v33 = vmul.f32 -1.442695, %v870_v30  ;;  %v332_v59 = vmul.f32 %v777_v28, %v309_v41 }
  0x28   : > { %v629_v35 = vpop.eup %628  ;;  %v404_v36 = vadd.f32 1.0, %v627_v32  ;;  %648 = vpow2.f32 %v609_v27  ;;  %v881_v63 = vadd.f32 %v790_v37, %v330_v45  ;;  %v884_v2 = vadd.f32 %v790_v37, %v331_v48 }
  0x29   : > { %v631_v39 = vpop.eup %630  ;;  %v405_v40 = vadd.f32 1.0, %v629_v35  ;;  %650 = vpow2.f32 %v610_v33  ;;  %v893_v5 = vadd.f32 %v790_v37, %v332_v59 }
  0x2a   : > { %v633_v42 = vpop.eup %632  ;;  %652 = vrcp.f32 %v404_v36  ;;  %v406_v4 = vadd.f32 1.0, %v631_v39  ;;  %v611_v11 = vmul.f32 -1.442695, %v881_v63  ;;  %v612_v16 = vmul.f32 -1.442695, %v884_v2 }
  0x2b   : > { %v635_v43 = vpop.eup %634  ;;  %654 = vrcp.f32 %v405_v40  ;;  %v407_v44 = vadd.f32 1.0, %v633_v42  ;;  %v613_v19 = vmul.f32 -1.442695, %v893_v5 }
  0x2c   : > { %v637_v46 = vpop.eup %636  ;;  %656 = vrcp.f32 %v406_v4  ;;  %v408_v47 = vadd.f32 1.0, %v635_v43  ;;  %v475_v43 = vld [vmem:[%s890_s10 + $0x38] sm:$0xff] }
  0x2d   : > { %v639_v49 = vpop.eup %638  ;;  %658 = vrcp.f32 %v407_v44  ;;  %v409_v58 = vadd.f32 1.0, %v637_v46  ;;  %v476_v46 = vld [vmem:[%s890_s10 + $0x40] sm:$0xff] }
  0x2e   : > { %v641_v26 = vpop.eup %640  ;;  %660 = vrcp.f32 %v408_v47  ;;  %v410_v60 = vadd.f32 1.0, %v639_v49  ;;  %v477_v49 = vld [vmem:[%s890_s10 + $0x48] sm:$0xff] }
  0x2f   : > { %v643_v61 = vpop.eup %642  ;;  %662 = vrcp.f32 %v409_v58  ;;  %v411_v62 = vadd.f32 1.0, %v641_v26  ;;  %v478_v26 = vld [vmem:[%s890_s10 + $0x50] sm:$0xff] }
  0x30   : > { %v645_v0 = vpop.eup %644  ;;  %664 = vrcp.f32 %v410_v60  ;;  %v412_v1 = vadd.f32 1.0, %v643_v61 }
  0x31   : > { %v647_v3 = vpop.eup %646  ;;  %666 = vrcp.f32 %v411_v62  ;;  %v413_v28 = vadd.f32 1.0, %v645_v0  ;;  %v479_v62 = vld [vmem:[%s890_s10 + $0x58] sm:$0xff] }
  0x32   : > { %v649_v6 = vpop.eup %648  ;;  %668 = vrcp.f32 %v412_v1  ;;  %v414_v7 = vadd.f32 1.0, %v647_v3  ;;  %v480_v3 = vld [vmem:[%s890_s10 + $0x60] sm:$0xff] }
  0x33   : > { %v651_v8 = vpop.eup %650  ;;  %670 = vrcp.f32 %v413_v28  ;;  %v415_v9 = vadd.f32 1.0, %v649_v6 }
  0x34   : > { %v653_v13 = vpop.eup %652  ;;  %672 = vrcp.f32 %v414_v7  ;;  %v416_v15 = vadd.f32 1.0, %v651_v8 }
  0x35   : > { %v655_v17 = vpop.eup %654  ;;  %v452_v37 = vmul.f32 %v653_v13, %v805_v50  ;;  %674 = vrcp.f32 %v415_v9 }
  0x36   : > { %v657_v22 = vpop.eup %656  ;;  %v453_v23 = vmul.f32 %v655_v17, %v808_v51  ;;  %676 = vrcp.f32 %v416_v15  ;;  %v482_v17 = vld [vmem:[%s890_s10 + $0x70] sm:$0xff] }
  0x37   : > { %v659_v25 = vpop.eup %658  ;;  %v484_v27 = vadd.f32 %v468_v14, %v452_v37  ;;  %v454_v50 = vmul.f32 %v657_v22, %v811_v52  ;;  %678 = vpow2.f32 %v611_v11  ;;  %v481_v14 = vld [vmem:[%s890_s10 + $0x68] sm:$0xff] }
  0x38   : > { %v661_v31 = vpop.eup %660  ;;  %v485_v32 = vadd.f32 %v469_v18, %v453_v23  ;;  %v455_v33 = vmul.f32 %v659_v25, %v814_v53  ;;  %680 = vpow2.f32 %v612_v16  ;;  %v474_v53 = vld [vmem:[%s890_s10 + $0x30] sm:$0xff] }
  0x39   : > { %v663_v51 = vpop.eup %662  ;;  %500 = vst [vmem:[%s905_s13] sm:$0xff] %v484_v27  ;;  %v486_v35 = vadd.f32 %v470_v24, %v454_v50  ;;  %v456_v36 = vmul.f32 %v661_v31, %v817_v54  ;;  %682 = vpow2.f32 %v613_v19  ;;  %v483_v19 = vld [vmem:[%s890_s10 + $0x78] sm:$0xff] }
  0x3a   : > { %v665_v52 = vpop.eup %664  ;;  %501 = vst [vmem:[%s905_s13 + $0x8] sm:$0xff] %v485_v32  ;;  %v487_v39 = vadd.f32 %v471_v29, %v455_v33  ;;  %v457_v40 = vmul.f32 %v663_v51, %v820_v55 }
  0x3b   : > { %v667_v41 = vpop.eup %666  ;;  %502 = vst [vmem:[%s905_s13 + $0x10] sm:$0xff] %v486_v35  ;;  %v488_v42 = vadd.f32 %v472_v34, %v456_v36  ;;  %v458_v4 = vmul.f32 %v665_v52, %v823_v56 }
  0x3c   : > { %v669_v54 = vpop.eup %668  ;;  %503 = vst [vmem:[%s905_s13 + $0x18] sm:$0xff] %v487_v39  ;;  %v489_v44 = vadd.f32 %v473_v38, %v457_v40  ;;  %v459_v45 = vmul.f32 %v667_v41, %v826_v57 }
  0x3d   : > { %v671_v47 = vpop.eup %670  ;;  %504 = vst [vmem:[%s905_s13 + $0x20] sm:$0xff] %v488_v42  ;;  %v490_v55 = vadd.f32 %v474_v53, %v458_v4  ;;  %v460_v48 = vmul.f32 %v669_v54, %v844_v10 }
  0x3e   : > { %v673_v58 = vpop.eup %672  ;;  %505 = vst [vmem:[%s905_s13 + $0x28] sm:$0xff] %v489_v44  ;;  %v491_v56 = vadd.f32 %v475_v43, %v459_v45  ;;  %v461_v59 = vmul.f32 %v671_v47, %v848_v12 }
  0x3f   : > { %v675_v60 = vpop.eup %674  ;;  %506 = vst [vmem:[%s905_s13 + $0x30] sm:$0xff] %v490_v55  ;;  %v492_v57 = vadd.f32 %v476_v46, %v460_v48  ;;  %v462_v61 = vmul.f32 %v673_v58, %v858_v20 }
  0x40   : > { %v677_v0 = vpop.eup %676  ;;  %507 = vst [vmem:[%s905_s13 + $0x38] sm:$0xff] %v491_v56  ;;  %v493_v10 = vadd.f32 %v477_v49, %v461_v59  ;;  %v463_v1 = vmul.f32 %v675_v60, %v861_v21 }
  0x41   : > { %v679_v28 = vpop.eup %678  ;;  %508 = vst [vmem:[%s905_s13 + $0x40] sm:$0xff] %v492_v57  ;;  %v494_v12 = vadd.f32 %v478_v26, %v462_v61  ;;  %v464_v6 = vmul.f32 %v677_v0, %v870_v30 }
  0x42   : > { %v681_v7 = vpop.eup %680  ;;  %509 = vst [vmem:[%s905_s13 + $0x48] sm:$0xff] %v493_v10  ;;  %v495_v8 = vadd.f32 %v479_v62, %v463_v1  ;;  %v417_v20 = vadd.f32 1.0, %v679_v28 }
  0x43   : > { %v683_v9 = vpop.eup %682  ;;  %510 = vst [vmem:[%s905_s13 + $0x50] sm:$0xff] %v494_v12  ;;  %v496_v11 = vadd.f32 %v480_v3, %v464_v6  ;;  %v418_v13 = vadd.f32 1.0, %v681_v7 }
  0x44   : > { %511 = vst [vmem:[%s905_s13 + $0x58] sm:$0xff] %v495_v8  ;;  %684 = vrcp.f32 %v417_v20  ;;  %v419_v21 = vadd.f32 1.0, %v683_v9 }
  0x45   : > { %512 = vst [vmem:[%s905_s13 + $0x60] sm:$0xff] %v496_v11  ;;  %686 = vrcp.f32 %v418_v13 }
  0x46   : > { %688 = vrcp.f32 %v419_v21 }
  0x4e   : > { %v685_v30 = vpop.eup %684 }
  0x4f   : > { %v687_v15 = vpop.eup %686  ;;  %v465_v16 = vmul.f32 %v685_v30, %v881_v63 }
  0x50   : > { %v689_v37 = vpop.eup %688  ;;  %v466_v18 = vmul.f32 %v687_v15, %v884_v2 }
  0x51   : > { %v497_v22 = vadd.f32 %v481_v14, %v465_v16  ;;  %v467_v23 = vmul.f32 %v689_v37, %v893_v5 }
  0x52   : > { %v498_v24 = vadd.f32 %v482_v17, %v466_v18 }
  0x53   : > { %513 = vst [vmem:[%s905_s13 + $0x68] sm:$0xff] %v497_v22  ;;  %v499_v25 = vadd.f32 %v483_v19, %v467_v23 }
  0x54   : > { %514 = vst [vmem:[%s905_s13 + $0x70] sm:$0xff] %v498_v24 }
  0x55   : > { %515 = vst [vmem:[%s905_s13 + $0x78] sm:$0xff] %v499_v25 }
  0x56 PF: > { %s15_s18 = sadd.s32 1, %s696_s18  }
  0x57   : > { %p12_p4 = scmp.ge.s32.totalorder %s15_s18, 4  }
  0x59   :  { %14 = sbr.rel (!%p12_p4) target bundleno = 1 (0x1), region = 73 }

// kernel: alignn_conv.19
= control target key start
LH: loop header
LB: loop body
LE: loop exit
PB: predicated region body
PF: predicated region fallthrough
CT: control target
= control target key end

     0   :  { %s335_s6 = smov 0   ;;  %s426_s0 = inlined_call_operand.vmem [shape: f32[512,128], index: 0, kind: input, shape index: {}]   ;;  %s427_s1 = inlined_call_operand.vmem [shape: f32[2,128], index: 1, kind: output, shape index: {}]  }
   0x1 LB: > { %s341_s7 = sadd.s32 4294967295, %s322_s6   ;;  %p299_p0 = scmp.ge.s32.totalorder %s322_s6, 1  ;;  %s322_s6 = sphi %s335_s6, %s11_s6  }
   0x2   : > { %p83_p1 = scmp.lt.s32.totalorder %s322_s6, 5 }
   0x4   : > { %p84_p2 = pnand %p299_p0, %p83_p1 }
   0x5   : > { %s300_s8 = sshll.u32 (!%p84_p2), %s341_s7, 4  ;;  %v120_v0 = vlaneseq (!%p84_p2)  ;;  %s302_s9 = sshll.u32 (!%p84_p2), %s341_s7, 7 }
   0x6   : > { %87 = sbr.rel (%p84_p2) target bundleno = 84 (0x54), region = 24  ;;  %p99_p3 = scmp.lt.s32.totalorder (!%p84_p2), %s300_s8, 63  ;;  %v350_v3 = vstv (!%p84_p2), %s302_s9 }
   0x7   : > { %v346_v1 = vshrl.u32 (!%p84_p2), %v120_v0, 7  ;;  %p303_p4 = scmp.ne.s32.totalorder (!%p84_p2), %s341_s7, 0 }
   0x9   : > { %v122_v2 = vadd.s32 (!%p84_p2), 8, %v346_v1  ;;  %v123_v4 = vadd.s32 (!%p84_p2), 16, %v346_v1  ;;  %v124_v5 = vadd.s32 (!%p84_p2), 24, %v346_v1  ;;  %v139_v6 = vadd.s32 (!%p84_p2), %v350_v3, %v346_v1 }
   0xa   : > { %v125_v8 = vadd.s32 (!%p84_p2), 32, %v346_v1  ;;  %v126_v12 = vadd.s32 (!%p84_p2), 40, %v346_v1  ;;  %v127_v15 = vadd.s32 (!%p84_p2), 48, %v346_v1  ;;  %v128_v20 = vadd.s32 (!%p84_p2), 56, %v346_v1 }
   0xb   : > { %v140_v7 = vadd.s32 (!%p84_p2), %v350_v3, %v122_v2  ;;  %v141_v9 = vadd.s32 (!%p84_p2), %v350_v3, %v123_v4  ;;  %v142_v13 = vadd.s32 (!%p84_p2), %v350_v3, %v124_v5  ;;  %vm155_vm0 = vcmp.lt.s32.totalorder (!%p84_p2), %v139_v6, 400 }
   0xc   : > { %v143_v16 = vadd.s32 (!%p84_p2), %v350_v3, %v125_v8  ;;  %v144_v21 = vadd.s32 (!%p84_p2), %v350_v3, %v126_v12  ;;  %v129_v22 = vadd.s32 (!%p84_p2), 64, %v346_v1  ;;  %v145_v26 = vadd.s32 (!%p84_p2), %v350_v3, %v127_v15 }
   0xd   : > { %s429_s8 = smov (!%p99_p3, %s300_s8), 63  ;;  %vm156_vm1 = vcmp.lt.s32.totalorder %v140_v7, 400  ;;  %vm157_vm2 = vcmp.lt.s32.totalorder %v141_v9, 400  ;;  %vm158_vm3 = vcmp.lt.s32.totalorder %v142_v13, 400  ;;  %v130_v32 = vadd.s32 72, %v346_v1 }
   0xe   : > { %s301_s10 = sshll.u32 %s429_s8, 3  ;;  %vm159_vm4 = vcmp.lt.s32.totalorder %v143_v16, 400  ;;  %v146_v33 = vadd.s32 %v350_v3, %v128_v20  ;;  %vm160_vm5 = vcmp.lt.s32.totalorder %v144_v21, 400  ;;  %v131_v35 = vadd.s32 80, %v346_v1 }
   0xf   : > { %s360_s13 = scalar_lea.vmem %s426_s0, %s301_s10  ;;  %v147_v39 = vadd.s32 %v350_v3, %v129_v22  ;;  %vm161_vm6 = vcmp.lt.s32.totalorder %v145_v26, 400  ;;  %v132_v42 = vadd.s32 88, %v346_v1  ;;  %v148_v46 = vadd.s32 %v350_v3, %v130_v32 }
  0x10   : > { %v104_v10 = vld [vmem:[%s360_s13] sm:$0xff]  ;;  %v105_v11 = vld [vmem:[%s360_s13 + $0x8] sm:$0xff]  ;;  %v106_v14 = vld [vmem:[%s360_s13 + $0x10] sm:$0xff]  ;;  %vm162_vm7 = vcmp.lt.s32.totalorder %v146_v33, 400  ;;  %v133_v49 = vadd.s32 96, %v346_v1  ;;  %v149_v53 = vadd.s32 %v350_v3, %v131_v35  ;;  %v134_v56 = vadd.s32 104, %v346_v1 }
  0x11   : > { %v171_v17 = vsel %vm155_vm0, %v104_v10, 0.0  ;;  %v172_v18 = vsel %vm156_vm1, %v105_v11, 0.0  ;;  %v107_v19 = vld [vmem:[%s360_s13 + $0x18] sm:$0xff]  ;;  %v173_v23 = vsel %vm157_vm2, %v106_v14, 0.0  ;;  %v108_v25 = vld [vmem:[%s360_s13 + $0x20] sm:$0xff]  ;;  %v109_v31 = vld [vmem:[%s360_s13 + $0x28] sm:$0xff]  ;;  %v150_v60 = vadd.s32 %v350_v3, %v132_v42 }
  0x12   : > { %v187_v24 = vadd.f32 %v172_v18, %v171_v17  ;;  %v208_v27 = vmul.f32 %v171_v17, %v171_v17  ;;  %v209_v28 = vmul.f32 %v172_v18, %v172_v18  ;;  %v174_v29 = vsel %vm158_vm3, %v107_v19, 0.0  ;;  %v110_v38 = vld [vmem:[%s360_s13 + $0x30] sm:$0xff]  ;;  %v111_v45 = vld [vmem:[%s360_s13 + $0x38] sm:$0xff]  ;;  %v112_v52 = vld [vmem:[%s360_s13 + $0x40] sm:$0xff] }
  0x13   : > { %v210_v34 = vmul.f32 %v173_v23, %v173_v23  ;;  %v175_v36 = vsel %vm159_vm4, %v108_v25, 0.0  ;;  %v211_v40 = vmul.f32 %v174_v29, %v174_v29  ;;  %v176_v43 = vsel %vm160_vm5, %v109_v31, 0.0  ;;  %v113_v59 = vld [vmem:[%s360_s13 + $0x48] sm:$0xff]  ;;  %v114_v4 = vld [vmem:[%s360_s13 + $0x50] sm:$0xff]  ;;  %v115_v11 = vld [vmem:[%s360_s13 + $0x58] sm:$0xff] }
  0x14   : > { %v188_v30 = vadd.f32 %v187_v24, %v173_v23  ;;  %v224_v41 = vadd.f32 %v209_v28, %v208_v27  ;;  %v212_v47 = vmul.f32 %v175_v36, %v175_v36  ;;  %v177_v50 = vsel %vm161_vm6, %v110_v38, 0.0  ;;  %v116_v17 = vld [vmem:[%s360_s13 + $0x60] sm:$0xff]  ;;  %v117_v22 = vld [vmem:[%s360_s13 + $0x68] sm:$0xff]  ;;  %v118_v28 = vld [vmem:[%s360_s13 + $0x70] sm:$0xff] }
  0x15   : > { %vm163_vm8 = vcmp.lt.s32.totalorder %v147_v39, 400  ;;  %v213_v54 = vmul.f32 %v176_v43, %v176_v43  ;;  %v178_v57 = vsel %vm162_vm7, %v111_v45, 0.0  ;;  %vm164_vm9 = vcmp.lt.s32.totalorder %v148_v46, 400  ;;  %v119_v33 = vld [vmem:[%s360_s13 + $0x78] sm:$0xff] }
  0x16   : > { %v189_v37 = vadd.f32 %v188_v30, %v174_v29  ;;  %v225_v48 = vadd.f32 %v224_v41, %v210_v34  ;;  %v214_v61 = vmul.f32 %v177_v50, %v177_v50  ;;  %v135_v63 = vadd.s32 112, %v346_v1 }
  0x17   : > { %v179_v0 = vsel %vm163_vm8, %v112_v52, 0.0  ;;  %v151_v5 = vadd.s32 %v350_v3, %v133_v49  ;;  %vm165_vm10 = vcmp.lt.s32.totalorder %v149_v53, 400  ;;  %v215_v6 = vmul.f32 %v178_v57, %v178_v57 }
  0x18   : > { %v190_v44 = vadd.f32 %v189_v37, %v175_v36  ;;  %v226_v55 = vadd.f32 %v225_v48, %v211_v40  ;;  %v136_v8 = vadd.s32 120, %v346_v1  ;;  %v180_v9 = vsel %vm164_vm9, %v113_v59, 0.0 }
  0x19   : > { %v152_v12 = vadd.s32 %v350_v3, %v134_v56  ;;  %vm166_vm11 = vcmp.lt.s32.totalorder %v150_v60, 400  ;;  %v216_v13 = vmul.f32 %v179_v0, %v179_v0  ;;  %v181_v15 = vsel %vm165_vm10, %v114_v4, 0.0 }
  0x1a   : > { %v191_v51 = vadd.f32 %v190_v44, %v176_v43  ;;  %v227_v62 = vadd.f32 %v226_v55, %v212_v47  ;;  %v153_v18 = vadd.s32 %v350_v3, %v135_v63  ;;  %vm167_vm12 = vcmp.lt.s32.totalorder %v151_v5, 400 }
  0x1b   : > { %v217_v19 = vmul.f32 %v180_v9, %v180_v9  ;;  %v182_v1 = vsel %vm166_vm11, %v115_v11, 0.0  ;;  %v154_v23 = vadd.s32 %v350_v3, %v136_v8  ;;  %vm168_vm13 = vcmp.lt.s32.totalorder %v152_v12, 400 }
  0x1c   : > { %v192_v58 = vadd.f32 %v191_v51, %v177_v50  ;;  %v228_v7 = vadd.f32 %v227_v62, %v213_v54  ;;  %v218_v24 = vmul.f32 %v181_v15, %v181_v15  ;;  %v183_v26 = vsel %vm167_vm12, %v116_v17, 0.0 }
  0x1d   : > { %vm169_vm14 = vcmp.lt.s32.totalorder %v153_v18, 400  ;;  %v219_v29 = vmul.f32 %v182_v1, %v182_v1  ;;  %v184_v31 = vsel %vm168_vm13, %v117_v22, 0.0  ;;  %vm170_vm15 = vcmp.lt.s32.totalorder %v154_v23, 400 }
  0x1e   : > { %v193_v2 = vadd.f32 %v192_v58, %v178_v57  ;;  %v229_v14 = vadd.f32 %v228_v7, %v214_v61  ;;  %v220_v34 = vmul.f32 %v183_v26, %v183_v26  ;;  %v185_v36 = vsel %vm169_vm14, %v118_v28, 0.0 }
  0x1f   : > { %v221_v38 = vmul.f32 %v184_v31, %v184_v31  ;;  %v186_v3 = vsel %vm170_vm15, %v119_v33, 0.0  ;;  %v222_v41 = vmul.f32 %v185_v36, %v185_v36  ;;  %vm245_vm0 = vcmask 1040384  }
  0x20   : > { %v194_v10 = vadd.f32 %v193_v2, %v179_v0  ;;  %v230_v20 = vadd.f32 %v229_v14, %v215_v6  ;;  %v223_v44 = vmul.f32 %v186_v3, %v186_v3  ;;  %v324_v61 = vmov (!%p303_p4), 0.0  }
  0x21   : > { %251 = vst [vmem:[%s427_s1] sm:$0x3] (!%p303_p4), %v324_v61 }
  0x22   : > { %v195_v16 = vadd.f32 %v194_v10, %v180_v9  ;;  %v231_v25 = vadd.f32 %v230_v20, %v216_v13 }
  0x24   : > { %v196_v21 = vadd.f32 %v195_v16, %v181_v15  ;;  %v232_v30 = vadd.f32 %v231_v25, %v217_v19 }
  0x26   : > { %v197_v27 = vadd.f32 %v196_v21, %v182_v1  ;;  %v233_v35 = vadd.f32 %v232_v30, %v218_v24 }
  0x28   : > { %v198_v32 = vadd.f32 %v197_v27, %v183_v26  ;;  %v234_v39 = vadd.f32 %v233_v35, %v219_v29 }
  0x2a   : > { %v199_v37 = vadd.f32 %v198_v32, %v184_v31  ;;  %v235_v42 = vadd.f32 %v234_v39, %v220_v34 }
  0x2c   : > { %v200_v40 = vadd.f32 %v199_v37, %v185_v36  ;;  %v236_v45 = vadd.f32 %v235_v42, %v221_v38 }
  0x2e   : > { %v201_v43 = vadd.f32 %v200_v40, %v186_v3  ;;  %v237_v47 = vadd.f32 %v236_v45, %v222_v41 }
  0x30   : > { %v202_v46 = vrot.slane %v201_v43, 4  ;;  %v238_v49 = vadd.f32 %v237_v47, %v223_v44 }
  0x32   : > { %v203_v48 = vadd.f32 %v202_v46, %v201_v43  ;;  %v239_v51 = vrot.slane %v238_v49, 4 }
  0x34   : > { %v204_v50 = vrot.slane %v203_v48, 2  ;;  %v240_v53 = vadd.f32 %v239_v51, %v238_v49 }
  0x36   : > { %v205_v52 = vadd.f32 %v204_v50, %v203_v48  ;;  %v241_v55 = vrot.slane %v240_v53, 2 }
  0x38   : > { %v206_v54 = vrot.slane %v205_v52, 1  ;;  %v242_v56 = vadd.f32 %v241_v55, %v240_v53  ;;  %250 = sbr.rel (%p303_p4) target bundleno = 63 (0x3f), region = 28 }
  0x3a   : > { %v207_v57 = vadd.f32 %v206_v54, %v205_v52  ;;  %v243_v58 = vrot.slane %v242_v56, 1 }
  0x3c   : > { %v244_v59 = vadd.f32 %v243_v58, %v242_v56 }
  0x3e   : > { %v246_v60 = vsel %vm245_vm0, %v207_v57, %v244_v59 }
  0x3f PF: > { %v252_v62 = vld [vmem:[%s427_s1] sm:$0x3]  ;;  %p304_p5 = scmp.ne.s32.totalorder %s341_s7, 3 }
  0x40   : > { %v253_v63 = vadd.f32 %v252_v62, %v246_v60 }
  0x41   : > { %258 = sbr.rel (%p304_p5) target bundleno = 84 (0x54), region = 32 }
  0x42   : > { %254 = vst [vmem:[%s427_s1] sm:$0x3] %v253_v63 }
  0x49   : > { %v259_v0 = vld [vmem:[%s427_s1] sm:$0x3] }
  0x4a   : > { %v260_v2 = vmul.f32 0.0025, %v259_v0 }
  0x4c   : > { %v261_v4 = vmul.f32 %v260_v2, %v260_v2 }
  0x4e   : > { %v263_v5 = vrot.slane %v261_v4, 7 }
  0x50   : > { %v265_v6 = vsub.f32 %v260_v2, %v263_v5 }
  0x52   : > { %v266_v7 = vsel %vm245_vm0, %v260_v2, %v265_v6 }
  0x53   : > { %267 = vst [vmem:[%s427_s1] sm:$0x3] %v266_v7 }
  0x54 PF: > { %s11_s6 = sadd.s32 1, %s322_s6  }
  0x55   : > { %p8_p6 = scmp.ge.s32.totalorder %s11_s6, 6  }
  0x57   :  { %10 = sbr.rel (!%p8_p6) target bundleno = 1 (0x1), region = 58 }

// kernel: alignn_conv.20
= control target key start
LH: loop header
LB: loop body
LE: loop exit
PB: predicated region body
PF: predicated region fallthrough
CT: control target
= control target key end

     0   :  { %s728_s18 = smov 0   ;;  %s955_s0 = inlined_call_operand.vmem [shape: f32[512,128], index: 0, kind: input, shape index: {}]   ;;  %s956_s1 = inlined_call_operand.vmem [shape: f32[512,128], index: 1, kind: input, shape index: {}]   ;;  %s957_s2 = inlined_call_operand.vmem [shape: f32[2,128], index: 2, kind: input, shape index: {}]   ;;  %s958_s3 = inlined_call_operand.vmem [shape: f32[1,128], index: 3, kind: input, shape index: {}]   ;;  %s959_s4 = inlined_call_operand.vmem [shape: f32[1,128], index: 4, kind: input, shape index: {}]   ;;  %s960_s5 = inlined_call_operand.vmem [shape: f32[512,128], index: 5, kind: output, shape index: {}]  }
   0x1 LB: > { %s584_s19 = sadd.s32 4294967295, %s696_s18   ;;  %p588_p0 = scmp.ge.s32.totalorder %s696_s18, 1  ;;  %s696_s18 = sphi %s728_s18, %s15_s18  }
   0x2   : > { %p199_p1 = scmp.lt.s32.totalorder %s696_s18, 5 }
   0x4   : > { %p200_p2 = pnand %p588_p0, %p199_p1 }
   0x5   : > { %s589_s20 = sshll.u32 (!%p200_p2), %s584_s19, 4  ;;  %v251_v0 = vld [vmem:[%s957_s2 + $0x1] sm:$0x1] (!%p200_p2)  ;;  %v290_v2 = vlaneseq (!%p200_p2)  ;;  %v750_v4 = vld [vmem:[%s957_s2] ss:$0 sm:$0xff] (!%p200_p2) }
   0x6   : > { %203 = sbr.rel (%p200_p2) target bundleno = 86 (0x56), region = 40  ;;  %p233_p3 = scmp.lt.s32.totalorder (!%p200_p2), %s589_s20, 63  ;;  %v288_v1 = vadd.f32 (!%p200_p2), 1e-05, %v251_v0  ;;  %v777_v28 = vld [vmem:[%s958_s3] ss:$0 sm:$0xff] (!%p200_p2) }
   0x7   : > { %v291_v3 = vshrl.u32 (!%p200_p2), %v290_v2, 7  ;;  %v790_v37 = vld [vmem:[%s959_s4] ss:$0 sm:$0xff] (!%p200_p2) }
   0x8   : > { %624 = vrsqrt.f32 (!%p200_p2), %v288_v1 }
   0x9   : > { %v292_v9 = vsub.s32 (!%p200_p2), 0, %v291_v3 }
   0xd   : > { %s962_s20 = smov (!%p233_p3, %s589_s20), 63 }
   0xe   : > { %s739_s23 = sshll.u32 %s962_s20, 3 }
   0xf   : > { %s745_s26 = scalar_lea.vmem %s955_s0, %s739_s23  ;;  %s890_s10 = scalar_lea.vmem %s956_s1, %s739_s23 }
  0x10   : > { %v252_v5 = vld [vmem:[%s745_s26] sm:$0xff]  ;;  %v253_v6 = vld [vmem:[%s745_s26 + $0x8] sm:$0xff]  ;;  %v254_v7 = vld [vmem:[%s745_s26 + $0x10] sm:$0xff]  ;;  %s905_s13 = scalar_lea.vmem %s960_s5, %s739_s23 }
  0x11   : > { %v255_v8 = vld [vmem:[%s745_s26 + $0x18] sm:$0xff]  ;;  %v256_v10 = vld [vmem:[%s745_s26 + $0x20] sm:$0xff]  ;;  %v257_v11 = vld [vmem:[%s745_s26 + $0x28] sm:$0xff]  ;;  %v272_v14 = vsub.f32 %v252_v5, %v750_v4  ;;  %v273_v15 = vsub.f32 %v253_v6, %v750_v4  ;;  %v274_v16 = vsub.f32 %v254_v7, %v750_v4 }
  0x12   : > { %v258_v12 = vld [vmem:[%s745_s26 + $0x30] sm:$0xff]  ;;  %v259_v13 = vld [vmem:[%s745_s26 + $0x38] sm:$0xff]  ;;  %v275_v17 = vsub.f32 %v255_v8, %v750_v4  ;;  %v260_v18 = vld [vmem:[%s745_s26 + $0x40] sm:$0xff]  ;;  %v625_v19 = vpop.eup %624  ;;  %v276_v20 = vsub.f32 %v256_v10, %v750_v4  ;;  %v277_v21 = vsub.f32 %v257_v11, %v750_v4 }
  0x13   : > { %v278_v22 = vsub.f32 %v258_v12, %v750_v4  ;;  %v279_v23 = vsub.f32 %v259_v13, %v750_v4  ;;  %v261_v24 = vld [vmem:[%s745_s26 + $0x48] sm:$0xff]  ;;  %v262_v25 = vld [vmem:[%s745_s26 + $0x50] sm:$0xff]  ;;  %v771_v26 = vrot.slane %v625_v19, %v292_v9  ;;  %v263_v27 = vld [vmem:[%s745_s26 + $0x58] sm:$0xff]  ;;  %v280_v29 = vsub.f32 %v260_v18, %v750_v4 }
  0x14   : > { %v281_v30 = vsub.f32 %v261_v24, %v750_v4  ;;  %v282_v31 = vsub.f32 %v262_v25, %v750_v4  ;;  %v283_v32 = vsub.f32 %v263_v27, %v750_v4  ;;  %v264_v1 = vld [vmem:[%s745_s26 + $0x60] sm:$0xff]  ;;  %v266_v18 = vld [vmem:[%s745_s26 + $0x70] sm:$0xff] }
  0x15   : > { %v294_v33 = vmul.f32 %v771_v26, %v272_v14  ;;  %v295_v34 = vmul.f32 %v771_v26, %v273_v15  ;;  %v296_v35 = vmul.f32 %v771_v26, %v274_v16  ;;  %v297_v36 = vmul.f32 %v771_v26, %v275_v17  ;;  %v265_v15 = vld [vmem:[%s745_s26 + $0x68] sm:$0xff] }
  0x16   : > { %v298_v38 = vmul.f32 %v771_v26, %v276_v20  ;;  %v299_v39 = vmul.f32 %v771_v26, %v277_v21  ;;  %v300_v40 = vmul.f32 %v771_v26, %v278_v22  ;;  %v301_v41 = vmul.f32 %v771_v26, %v279_v23  ;;  %v267_v22 = vld [vmem:[%s745_s26 + $0x78] sm:$0xff] }
  0x17   : > { %v317_v42 = vmul.f32 %v777_v28, %v294_v33  ;;  %v318_v43 = vmul.f32 %v777_v28, %v295_v34  ;;  %v319_v44 = vmul.f32 %v777_v28, %v296_v35  ;;  %v320_v45 = vmul.f32 %v777_v28, %v297_v36 }
  0x18   : > { %v321_v46 = vmul.f32 %v777_v28, %v298_v38  ;;  %v322_v47 = vmul.f32 %v777_v28, %v299_v39  ;;  %v323_v48 = vmul.f32 %v777_v28, %v300_v40  ;;  %v324_v49 = vmul.f32 %v777_v28, %v301_v41 }
  0x19   : > { %v805_v50 = vadd.f32 %v790_v37, %v317_v42  ;;  %v808_v51 = vadd.f32 %v790_v37, %v318_v43  ;;  %v811_v52 = vadd.f32 %v790_v37, %v319_v44  ;;  %v814_v53 = vadd.f32 %v790_v37, %v320_v45 }
  0x1a   : > { %v817_v54 = vadd.f32 %v790_v37, %v321_v46  ;;  %v820_v55 = vadd.f32 %v790_v37, %v322_v47  ;;  %v823_v56 = vadd.f32 %v790_v37, %v323_v48  ;;  %v826_v57 = vadd.f32 %v790_v37, %v324_v49 }
  0x1b   : > { %v598_v58 = vmul.f32 -1.442695, %v805_v50  ;;  %v599_v59 = vmul.f32 -1.442695, %v808_v51  ;;  %v600_v60 = vmul.f32 -1.442695, %v811_v52  ;;  %v302_v61 = vmul.f32 %v771_v26, %v280_v29 }
  0x1c   : > { %v601_v62 = vmul.f32 -1.442695, %v814_v53  ;;  %v602_v63 = vmul.f32 -1.442695, %v817_v54  ;;  %v303_v0 = vmul.f32 %v771_v26, %v281_v30  ;;  %v603_v2 = vmul.f32 -1.442695, %v820_v55 }
  0x1d   : > { %626 = vpow2.f32 %v598_v58  ;;  %v604_v3 = vmul.f32 -1.442695, %v823_v56  ;;  %v325_v5 = vmul.f32 %v777_v28, %v302_v61  ;;  %v304_v7 = vmul.f32 %v771_v26, %v282_v31 }
  0x1e   : > { %628 = vpow2.f32 %v599_v59  ;;  %v326_v6 = vmul.f32 %v777_v28, %v303_v0  ;;  %v305_v8 = vmul.f32 %v771_v26, %v283_v32  ;;  %v605_v9 = vmul.f32 -1.442695, %v826_v57 }
  0x1f   : > { %630 = vpow2.f32 %v600_v60  ;;  %v844_v10 = vadd.f32 %v790_v37, %v325_v5  ;;  %v284_v11 = vsub.f32 %v264_v1, %v750_v4  ;;  %v327_v13 = vmul.f32 %v777_v28, %v304_v7 }
  0x20   : > { %632 = vpow2.f32 %v601_v62  ;;  %v848_v12 = vadd.f32 %v790_v37, %v326_v6  ;;  %v328_v14 = vmul.f32 %v777_v28, %v305_v8  ;;  %v285_v24 = vsub.f32 %v265_v15, %v750_v4 }
  0x21   : > { %634 = vpow2.f32 %v602_v63  ;;  %v606_v16 = vmul.f32 -1.442695, %v844_v10  ;;  %v306_v17 = vmul.f32 %v771_v26, %v284_v11  ;;  %v858_v20 = vadd.f32 %v790_v37, %v327_v13 }
  0x22   : > { %636 = vpow2.f32 %v603_v2  ;;  %v607_v19 = vmul.f32 -1.442695, %v848_v12  ;;  %v861_v21 = vadd.f32 %v790_v37, %v328_v14  ;;  %v286_v29 = vsub.f32 %v266_v18, %v750_v4  ;;  %v468_v14 = vld [vmem:[%s890_s10] sm:$0xff]  ;;  %v469_v18 = vld [vmem:[%s890_s10 + $0x8] sm:$0xff] }
  0x23   : > { %638 = vpow2.f32 %v604_v3  ;;  %v329_v23 = vmul.f32 %v777_v28, %v306_v17  ;;  %v608_v25 = vmul.f32 -1.442695, %v858_v20  ;;  %v287_v31 = vsub.f32 %v267_v22, %v750_v4 }
  0x24   : > { %640 = vpow2.f32 %v605_v9  ;;  %v609_v27 = vmul.f32 -1.442695, %v861_v21  ;;  %v307_v34 = vmul.f32 %v771_v26, %v285_v24  ;;  %v308_v38 = vmul.f32 %v771_v26, %v286_v29  ;;  %v470_v24 = vld [vmem:[%s890_s10 + $0x10] sm:$0xff]  ;;  %v471_v29 = vld [vmem:[%s890_s10 + $0x18] sm:$0xff] }
  0x25   : > { %642 = vpow2.f32 %v606_v16  ;;  %v870_v30 = vadd.f32 %v790_v37, %v329_v23  ;;  %v309_v41 = vmul.f32 %v771_v26, %v287_v31 }
  0x26   : > { %644 = vpow2.f32 %v607_v19  ;;  %v330_v45 = vmul.f32 %v777_v28, %v307_v34  ;;  %v331_v48 = vmul.f32 %v777_v28, %v308_v38  ;;  %v472_v34 = vld [vmem:[%s890_s10 + $0x20] sm:$0xff]  ;;  %v473_v38 = vld [vmem:[%s890_s10 + $0x28] sm:$0xff] }
  0x27   : > { %v627_v32 = vpop.eup %626  ;;  %646 = vpow2.f32 %v608_v25  ;;  %v610_v33 = vmul.f32 -1.442695, %v870_v30  ;;  %v332_v59 = vmul.f32 %v777_v28, %v309_v41 }
  0x28   : > { %v629_v35 = vpop.eup %628  ;;  %v404_v36 = vadd.f32 1.0, %v627_v32  ;;  %648 = vpow2.f32 %v609_v27  ;;  %v881_v63 = vadd.f32 %v790_v37, %v330_v45  ;;  %v884_v2 = vadd.f32 %v790_v37, %v331_v48 }
  0x29   : > { %v631_v39 = vpop.eup %630  ;;  %v405_v40 = vadd.f32 1.0, %v629_v35  ;;  %650 = vpow2.f32 %v610_v33  ;;  %v893_v5 = vadd.f32 %v790_v37, %v332_v59 }
  0x2a   : > { %v633_v42 = vpop.eup %632  ;;  %652 = vrcp.f32 %v404_v36  ;;  %v406_v4 = vadd.f32 1.0, %v631_v39  ;;  %v611_v11 = vmul.f32 -1.442695, %v881_v63  ;;  %v612_v16 = vmul.f32 -1.442695, %v884_v2 }
  0x2b   : > { %v635_v43 = vpop.eup %634  ;;  %654 = vrcp.f32 %v405_v40  ;;  %v407_v44 = vadd.f32 1.0, %v633_v42  ;;  %v613_v19 = vmul.f32 -1.442695, %v893_v5 }
  0x2c   : > { %v637_v46 = vpop.eup %636  ;;  %656 = vrcp.f32 %v406_v4  ;;  %v408_v47 = vadd.f32 1.0, %v635_v43  ;;  %v475_v43 = vld [vmem:[%s890_s10 + $0x38] sm:$0xff] }
  0x2d   : > { %v639_v49 = vpop.eup %638  ;;  %658 = vrcp.f32 %v407_v44  ;;  %v409_v58 = vadd.f32 1.0, %v637_v46  ;;  %v476_v46 = vld [vmem:[%s890_s10 + $0x40] sm:$0xff] }
  0x2e   : > { %v641_v26 = vpop.eup %640  ;;  %660 = vrcp.f32 %v408_v47  ;;  %v410_v60 = vadd.f32 1.0, %v639_v49  ;;  %v477_v49 = vld [vmem:[%s890_s10 + $0x48] sm:$0xff] }
  0x2f   : > { %v643_v61 = vpop.eup %642  ;;  %662 = vrcp.f32 %v409_v58  ;;  %v411_v62 = vadd.f32 1.0, %v641_v26  ;;  %v478_v26 = vld [vmem:[%s890_s10 + $0x50] sm:$0xff] }
  0x30   : > { %v645_v0 = vpop.eup %644  ;;  %664 = vrcp.f32 %v410_v60  ;;  %v412_v1 = vadd.f32 1.0, %v643_v61 }
  0x31   : > { %v647_v3 = vpop.eup %646  ;;  %666 = vrcp.f32 %v411_v62  ;;  %v413_v28 = vadd.f32 1.0, %v645_v0  ;;  %v479_v62 = vld [vmem:[%s890_s10 + $0x58] sm:$0xff] }
  0x32   : > { %v649_v6 = vpop.eup %648  ;;  %668 = vrcp.f32 %v412_v1  ;;  %v414_v7 = vadd.f32 1.0, %v647_v3  ;;  %v480_v3 = vld [vmem:[%s890_s10 + $0x60] sm:$0xff] }
  0x33   : > { %v651_v8 = vpop.eup %650  ;;  %670 = vrcp.f32 %v413_v28  ;;  %v415_v9 = vadd.f32 1.0, %v649_v6 }
  0x34   : > { %v653_v13 = vpop.eup %652  ;;  %672 = vrcp.f32 %v414_v7  ;;  %v416_v15 = vadd.f32 1.0, %v651_v8 }
  0x35   : > { %v655_v17 = vpop.eup %654  ;;  %v452_v37 = vmul.f32 %v653_v13, %v805_v50  ;;  %674 = vrcp.f32 %v415_v9 }
  0x36   : > { %v657_v22 = vpop.eup %656  ;;  %v453_v23 = vmul.f32 %v655_v17, %v808_v51  ;;  %676 = vrcp.f32 %v416_v15  ;;  %v482_v17 = vld [vmem:[%s890_s10 + $0x70] sm:$0xff] }
  0x37   : > { %v659_v25 = vpop.eup %658  ;;  %v484_v27 = vadd.f32 %v468_v14, %v452_v37  ;;  %v454_v50 = vmul.f32 %v657_v22, %v811_v52  ;;  %678 = vpow2.f32 %v611_v11  ;;  %v481_v14 = vld [vmem:[%s890_s10 + $0x68] sm:$0xff] }
  0x38   : > { %v661_v31 = vpop.eup %660  ;;  %v485_v32 = vadd.f32 %v469_v18, %v453_v23  ;;  %v455_v33 = vmul.f32 %v659_v25, %v814_v53  ;;  %680 = vpow2.f32 %v612_v16  ;;  %v474_v53 = vld [vmem:[%s890_s10 + $0x30] sm:$0xff] }
  0x39   : > { %v663_v51 = vpop.eup %662  ;;  %500 = vst [vmem:[%s905_s13] sm:$0xff] %v484_v27  ;;  %v486_v35 = vadd.f32 %v470_v24, %v454_v50  ;;  %v456_v36 = vmul.f32 %v661_v31, %v817_v54  ;;  %682 = vpow2.f32 %v613_v19  ;;  %v483_v19 = vld [vmem:[%s890_s10 + $0x78] sm:$0xff] }
  0x3a   : > { %v665_v52 = vpop.eup %664  ;;  %501 = vst [vmem:[%s905_s13 + $0x8] sm:$0xff] %v485_v32  ;;  %v487_v39 = vadd.f32 %v471_v29, %v455_v33  ;;  %v457_v40 = vmul.f32 %v663_v51, %v820_v55 }
  0x3b   : > { %v667_v41 = vpop.eup %666  ;;  %502 = vst [vmem:[%s905_s13 + $0x10] sm:$0xff] %v486_v35  ;;  %v488_v42 = vadd.f32 %v472_v34, %v456_v36  ;;  %v458_v4 = vmul.f32 %v665_v52, %v823_v56 }
  0x3c   : > { %v669_v54 = vpop.eup %668  ;;  %503 = vst [vmem:[%s905_s13 + $0x18] sm:$0xff] %v487_v39  ;;  %v489_v44 = vadd.f32 %v473_v38, %v457_v40  ;;  %v459_v45 = vmul.f32 %v667_v41, %v826_v57 }
  0x3d   : > { %v671_v47 = vpop.eup %670  ;;  %504 = vst [vmem:[%s905_s13 + $0x20] sm:$0xff] %v488_v42  ;;  %v490_v55 = vadd.f32 %v474_v53, %v458_v4  ;;  %v460_v48 = vmul.f32 %v669_v54, %v844_v10 }
  0x3e   : > { %v673_v58 = vpop.eup %672  ;;  %505 = vst [vmem:[%s905_s13 + $0x28] sm:$0xff] %v489_v44  ;;  %v491_v56 = vadd.f32 %v475_v43, %v459_v45  ;;  %v461_v59 = vmul.f32 %v671_v47, %v848_v12 }
  0x3f   : > { %v675_v60 = vpop.eup %674  ;;  %506 = vst [vmem:[%s905_s13 + $0x30] sm:$0xff] %v490_v55  ;;  %v492_v57 = vadd.f32 %v476_v46, %v460_v48  ;;  %v462_v61 = vmul.f32 %v673_v58, %v858_v20 }
  0x40   : > { %v677_v0 = vpop.eup %676  ;;  %507 = vst [vmem:[%s905_s13 + $0x38] sm:$0xff] %v491_v56  ;;  %v493_v10 = vadd.f32 %v477_v49, %v461_v59  ;;  %v463_v1 = vmul.f32 %v675_v60, %v861_v21 }
  0x41   : > { %v679_v28 = vpop.eup %678  ;;  %508 = vst [vmem:[%s905_s13 + $0x40] sm:$0xff] %v492_v57  ;;  %v494_v12 = vadd.f32 %v478_v26, %v462_v61  ;;  %v464_v6 = vmul.f32 %v677_v0, %v870_v30 }
  0x42   : > { %v681_v7 = vpop.eup %680  ;;  %509 = vst [vmem:[%s905_s13 + $0x48] sm:$0xff] %v493_v10  ;;  %v495_v8 = vadd.f32 %v479_v62, %v463_v1  ;;  %v417_v20 = vadd.f32 1.0, %v679_v28 }
  0x43   : > { %v683_v9 = vpop.eup %682  ;;  %510 = vst [vmem:[%s905_s13 + $0x50] sm:$0xff] %v494_v12  ;;  %v496_v11 = vadd.f32 %v480_v3, %v464_v6  ;;  %v418_v13 = vadd.f32 1.0, %v681_v7 }
  0x44   : > { %511 = vst [vmem:[%s905_s13 + $0x58] sm:$0xff] %v495_v8  ;;  %684 = vrcp.f32 %v417_v20  ;;  %v419_v21 = vadd.f32 1.0, %v683_v9 }
  0x45   : > { %512 = vst [vmem:[%s905_s13 + $0x60] sm:$0xff] %v496_v11  ;;  %686 = vrcp.f32 %v418_v13 }
  0x46   : > { %688 = vrcp.f32 %v419_v21 }
  0x4e   : > { %v685_v30 = vpop.eup %684 }
  0x4f   : > { %v687_v15 = vpop.eup %686  ;;  %v465_v16 = vmul.f32 %v685_v30, %v881_v63 }
  0x50   : > { %v689_v37 = vpop.eup %688  ;;  %v466_v18 = vmul.f32 %v687_v15, %v884_v2 }
  0x51   : > { %v497_v22 = vadd.f32 %v481_v14, %v465_v16  ;;  %v467_v23 = vmul.f32 %v689_v37, %v893_v5 }
  0x52   : > { %v498_v24 = vadd.f32 %v482_v17, %v466_v18 }
  0x53   : > { %513 = vst [vmem:[%s905_s13 + $0x68] sm:$0xff] %v497_v22  ;;  %v499_v25 = vadd.f32 %v483_v19, %v467_v23 }
  0x54   : > { %514 = vst [vmem:[%s905_s13 + $0x70] sm:$0xff] %v498_v24 }
  0x55   : > { %515 = vst [vmem:[%s905_s13 + $0x78] sm:$0xff] %v499_v25 }
  0x56 PF: > { %s15_s18 = sadd.s32 1, %s696_s18  }
  0x57   : > { %p12_p4 = scmp.ge.s32.totalorder %s15_s18, 6  }
  0x59   :  { %14 = sbr.rel (!%p12_p4) target bundleno = 1 (0x1), region = 73 }

</bundles_post_ra>
